<compile_context>
chip_gen: v7x
topology: tpu7x:2x2x1
jax: 0.10.0
libtpu: 0.0.40
codegen_flags: <defaults>
</compile_context>

<pallas_src>
import jax
import jax.numpy as jnp
from jax.experimental import pallas as pl
from jax.experimental.pallas import tpu as pltpu


def _round8(n: int) -> int:
    return ((n + 7) // 8) * 8


def _cdiv(a: int, b: int) -> int:
    return -(-a // b)


# ---------------------------------------------------------------------------
# Kernels
# ---------------------------------------------------------------------------
def _conv_pool_kernel(p_ref, w_ref, b_ref, o_ref):
    """One grid step of conv + bias + ReLU + 2x2 max-pool.

    p_ref : (1, 4*TM, K) bf16  im2col patches; the 4 pool-window positions of
            TM pooled outputs laid out position-major in blocks of TM rows, so
            one tall matmul covers all of them.
    w_ref : (K, Cout)   bf16   flattened conv weight, feature order (kh,kw,cin)
    b_ref : (1, Cout)   f32
    o_ref : (TM, Cout)  bf16   pooled output rows.
    """
    tm = o_ref.shape[0]
    y = jnp.dot(p_ref[0], w_ref[...], preferred_element_type=jnp.float32)
    # 2x2 max-pool == max over the 4 position blocks (bias/ReLU commute with it).
    y = jnp.maximum(jnp.maximum(y[0 * tm:1 * tm], y[1 * tm:2 * tm]),
                    jnp.maximum(y[2 * tm:3 * tm], y[3 * tm:4 * tm]))
    y = jnp.maximum(y + b_ref[...], 0.0)
    o_ref[...] = y.astype(o_ref.dtype)


def _make_tail_kernel(mp: int, g: int):
    """conv4 + ReLU + pool + flatten + fc1 + ReLU + fc2 + ReLU + fc3, fused.

    mp = 3*3 pooled spatial positions, g = sublane-padded batch (>= N, mult of 8).
    Pooled conv4 rows are ordered m-major / image-minor (row = m*g + n), so all
    in-kernel slices are 8-row aligned.
    """

    def kernel(p_ref, w4_ref, b4_ref, w1_ref, b1_ref, w2_ref, b2_ref,
               w3_ref, b3_ref, o_ref):
        r = mp * g
        # conv4 (+ bias + ReLU + 2x2 pool), same scheme as _conv_pool_kernel.
        y = jnp.dot(p_ref[...], w4_ref[...], preferred_element_type=jnp.float32)
        y = jnp.maximum(jnp.maximum(y[0 * r:1 * r], y[1 * r:2 * r]),
                        jnp.maximum(y[2 * r:3 * r], y[3 * r:4 * r]))
        y = jnp.maximum(y + b4_ref[...], 0.0)               # (mp*g, 128)
        # flatten(C,H,W) + fc1: fc1 weights were pre-permuted in glue to the
        # kernel's (m, c) feature layout -> fc1 is an accumulation of mp
        # aligned (g,128)x(128,128) matmuls, no in-kernel transpose.
        h = jnp.zeros((g, w1_ref.shape[2]), jnp.float32)
        for m in range(mp):
            h = h + jnp.dot(y[m * g:(m + 1) * g], w1_ref[m],
                            preferred_element_type=jnp.float32)
        h = jnp.maximum(h + b1_ref[...], 0.0)
        h = jnp.maximum(
            jnp.dot(h, w2_ref[...], preferred_element_type=jnp.float32) + b2_ref[...],
            0.0)
        o_ref[...] = (jnp.dot(h, w3_ref[...], preferred_element_type=jnp.float32)
                      + b3_ref[...])

    return kernel


# ---------------------------------------------------------------------------
# Glue (cheap XLA-side layout work: im2col, padding, weight repacking)
# ---------------------------------------------------------------------------
def _build_patches(x_nhwc, kh, kw):
    """Per-pool-position im2col.

    Returns (patches, Hp, Wp) with patches of shape (4, N, Hp*Wp, KH*KW*Cin);
    feature order (kh, kw, cin) matches the flattened PyTorch weights, and the
    leading axis enumerates the 2x2 pool-window positions (di, dj).
    """
    n, h, w, cin = x_nhwc.shape
    ho, wo = h - kh + 1, w - kw + 1
    hp, wp = ho // 2, wo // 2          # floor pooling (== nn.MaxPool2d default)
    k = kh * kw * cin
    taps = [x_nhwc[:, dh:dh + ho, dw:dw + wo, :]
            for dh in range(kh) for dw in range(kw)]
    pats = jnp.concatenate(taps, axis=-1)                       # (N, Ho, Wo, K)
    pos = []
    for di in range(2):
        for dj in range(2):
            sub = pats[:, di:di + 2 * hp:2, dj:dj + 2 * wp:2, :]
            pos.append(sub.reshape(n, hp * wp, k))
    return jnp.stack(pos, axis=0), hp, wp                       # (4, N, Mp, K)


def conv_relu_pool(x_nhwc, w_torch, b, *, row_target=512):
    """pool(relu(conv2d_valid(x))) for one layer; batch folded into matmul rows."""
    n = x_nhwc.shape[0]
    cout, cin, kh, kw = w_torch.shape
    k = kh * kw * cin
    p4, hp, wp = _build_patches(x_nhwc, kh, kw)                 # (4, N, Mp, K)
    mp = hp * wp

    r_real = n * mp                              # pooled output rows (all images)
    chunks = max(2, _cdiv(r_real, row_target))   # >=2 keeps both v7x TCs busy
    tm = _round8(_cdiv(r_real, chunks))
    r_pad = chunks * tm

    p = p4.reshape(4, r_real, k)
    p = jnp.pad(p, ((0, 0), (0, r_pad - r_real), (0, 0)))
    # Interleave so each grid chunk holds its own 4 position blocks contiguously:
    # (4, chunks, TM, K) -> (chunks, 4*TM, K)  => one tall matmul per grid step.
    p = p.reshape(4, chunks, tm, k).transpose(1, 0, 2, 3).reshape(chunks, 4 * tm, k)
    p = p.astype(jnp.bfloat16)

    w_mat = jnp.transpose(w_torch, (2, 3, 1, 0)).reshape(k, cout).astype(jnp.bfloat16)
    b_mat = b.reshape(1, cout).astype(jnp.float32)

    flops = 2 * 4 * r_pad * k * cout
    bytes_accessed = p.size * 2 + w_mat.size * 2 + b_mat.size * 4 + r_pad * cout * 2

    out = pl.pallas_call(
        _conv_pool_kernel,
        out_shape=jax.ShapeDtypeStruct((r_pad, cout), jnp.bfloat16),
        grid=(chunks,),
        in_specs=[
            pl.BlockSpec((1, 4 * tm, k), lambda c: (c, 0, 0)),
            pl.BlockSpec((k, cout), lambda c: (0, 0)),
            pl.BlockSpec((1, cout), lambda c: (0, 0)),
        ],
        out_specs=pl.BlockSpec((tm, cout), lambda c: (c, 0)),
        compiler_params=pltpu.CompilerParams(
            dimension_semantics=("parallel",),
            vmem_limit_bytes=32 * 1024 * 1024),
        cost_estimate=pl.CostEstimate(flops=flops, transcendentals=0,
                                      bytes_accessed=bytes_accessed),
    )(p, w_mat, b_mat)

    return out[:r_real].reshape(n, hp, wp, cout)


def conv4_mlp(x_nhwc, conv4, fc1, fc2, fc3):
    """conv4 -> ReLU -> pool -> flatten(C,H,W) -> fc1 -> ReLU -> fc2 -> ReLU -> fc3,
    fused into a single pallas_call (all weights are VMEM-resident)."""
    n = x_nhwc.shape[0]
    w4, b4 = conv4
    cout, cin, kh, kw = w4.shape                     # (128, 128, 4, 4)
    k = kh * kw * cin
    p4, hp, wp = _build_patches(x_nhwc, kh, kw)      # (4, N, Mp, K), Mp = 9
    mp = hp * wp

    g = _round8(n)                                   # batch padded to full sublane group
    p4 = jnp.pad(p4, ((0, 0), (0, g - n), (0, 0), (0, 0)))       # (4, G, Mp, K)
    # Rows: position-major blocks, then (m-major, image-minor) => aligned slices.
    p = p4.transpose(0, 2, 1, 3).reshape(4 * mp * g, k).astype(jnp.bfloat16)

    w4m = jnp.transpose(w4, (2, 3, 1, 0)).reshape(k, cout).astype(jnp.bfloat16)
    b4m = b4.reshape(1, cout).astype(jnp.float32)

    (w1, b1), (w2, b2), (w3, b3) = fc1, fc2, fc3
    hd = 128                                          # lane-padded width of the fc stack
    d1, d2, d3 = w1.shape[0], w2.shape[0], w3.shape[0]   # 100, 50, 2
    # PyTorch flattens (C,H,W); regroup fc1 weights to the kernel's (m, c) layout
    # and zero-pad every fc dimension to 128 lanes (exact: padded weights/biases
    # are zero, so padded activations stay zero).
    w1g = jnp.transpose(w1.reshape(d1, cout, mp), (2, 1, 0))     # (Mp, Cout, 100)
    w1g = jnp.pad(w1g, ((0, 0), (0, 0), (0, hd - d1))).astype(jnp.float32)
    b1p = jnp.pad(b1, (0, hd - d1)).reshape(1, hd).astype(jnp.float32)
    w2p = jnp.pad(w2.T, ((0, hd - d1), (0, hd - d2))).astype(jnp.float32)
    b2p = jnp.pad(b2, (0, hd - d2)).reshape(1, hd).astype(jnp.float32)
    w3p = jnp.pad(w3.T, ((0, hd - d2), (0, hd - d3))).astype(jnp.float32)
    b3p = jnp.pad(b3, (0, hd - d3)).reshape(1, hd).astype(jnp.float32)

    r = mp * g
    flops = 2 * (4 * r * k * cout + r * cout * hd + 2 * g * hd * hd)
    bytes_accessed = (p.size * 2 + w4m.size * 2 + w1g.size * 4
                      + 2 * hd * hd * 4 + 4 * hd * 4 + g * hd * 4)

    out = pl.pallas_call(
        _make_tail_kernel(mp, g),
        out_shape=jax.ShapeDtypeStruct((g, hd), jnp.float32),
        grid=(1,),
        in_specs=[
            pl.BlockSpec((4 * r, k), lambda i: (0, 0)),
            pl.BlockSpec((k, cout), lambda i: (0, 0)),
            pl.BlockSpec((1, cout), lambda i: (0, 0)),
            pl.BlockSpec((mp, cout, hd), lambda i: (0, 0, 0)),
            pl.BlockSpec((1, hd), lambda i: (0, 0)),
            pl.BlockSpec((hd, hd), lambda i: (0, 0)),
            pl.BlockSpec((1, hd), lambda i: (0, 0)),
            pl.BlockSpec((hd, hd), lambda i: (0, 0)),
            pl.BlockSpec((1, hd), lambda i: (0, 0)),
        ],
        out_specs=pl.BlockSpec((g, hd), lambda i: (0, 0)),
        compiler_params=pltpu.CompilerParams(
            dimension_semantics=("arbitrary",),
            vmem_limit_bytes=32 * 1024 * 1024),
        cost_estimate=pl.CostEstimate(flops=flops, transcendentals=0,
                                      bytes_accessed=bytes_accessed),
    )(p, w4m, b4m, w1g, b1p, w2p, b2p, w3p, b3p)

    return out[:n, :d3]


# ---------------------------------------------------------------------------
# Parameters (deterministic, PyTorch-style uniform(-1/sqrt(fan_in), +)) + forward
# ---------------------------------------------------------------------------
def init_params(key):
    ks = jax.random.split(key, 14)

    def conv(kw_key, kb_key, cout, cin, ksz):
        bound = 1.0 / jnp.sqrt(cin * ksz * ksz)
        w = jax.random.uniform(kw_key, (cout, cin, ksz, ksz), jnp.float32, -bound, bound)
        b = jax.random.uniform(kb_key, (cout,), jnp.float32, -bound, bound)
        return w, b

    def lin(kw_key, kb_key, out_f, in_f):
        bound = 1.0 / jnp.sqrt(in_f)
        w = jax.random.uniform(kw_key, (out_f, in_f), jnp.float32, -bound, bound)
        b = jax.random.uniform(kb_key, (out_f,), jnp.float32, -bound, bound)
        return w, b

    return {
        "conv1": conv(ks[0], ks[1], 32, 3, 4),
        "conv2": conv(ks[2], ks[3], 64, 32, 4),
        "conv3": conv(ks[4], ks[5], 128, 64, 4),
        "conv4": conv(ks[6], ks[7], 128, 128, 4),
        "fc1": lin(ks[8], ks[9], 100, 128 * 3 * 3),
        "fc2": lin(ks[10], ks[11], 50, 100),
        "fc3": lin(ks[12], ks[13], 2, 50),
    }


def net_forward(x_nchw, params):
    # NCHW (PyTorch) -> NHWC, bf16 activations (f32 accumulation inside kernels).
    x = jnp.transpose(x_nchw, (0, 2, 3, 1)).astype(jnp.bfloat16)
    x = conv_relu_pool(x, *params["conv1"])   # (N, 46, 46,  32)
    x = conv_relu_pool(x, *params["conv2"])   # (N, 21, 21,  64)
    x = conv_relu_pool(x, *params["conv3"])   # (N,  9,  9, 128)
    # conv4 + flatten + fc1/fc2/fc3 fused into a single pallas_call.
    return conv4_mlp(x, params["conv4"], params["fc1"], params["fc2"], params["fc3"])


if __name__ == "__main__":
    key = jax.random.PRNGKey(0)
    pkey, xkey = jax.random.split(key)
    params = init_params(pkey)
    # Spatial size must reach 3x3 after 4x(conv k=4 + pool 2); 96 is the smallest
    # size consistent with the module's hard-coded 128*3*3 flatten.
    x = jax.random.normal(xkey, (2, 3, 96, 96), dtype=jnp.float32)
    out = jax.jit(net_forward)(x, params)
    out = jax.block_until_ready(out)
    assert out.shape == (2, 2) and out.dtype == jnp.float32
    print("KERNEL_OK")
</pallas_src>

<mosaic_0001>
module attributes {stable_mosaic.version = 11 : i64} {
  func.func @_conv_pool_kernel(%arg0: i32, %arg1: memref<1x1888x48xbf16, #tpu.memory_space<vmem>>, %arg2: memref<48x32xbf16, #tpu.memory_space<vmem>>, %arg3: memref<1x32xf32, #tpu.memory_space<vmem>>, %arg4: memref<472x32xbf16, #tpu.memory_space<vmem>>) attributes {dimension_semantics = [#tpu.dimension_semantics<parallel>], iteration_bounds = array<i64: 9>, scalar_prefetch = 0 : i64, scratch_operands = 0 : i64, tpu.core_type = #tpu.core_type<tc>, window_params = [{transform_indices = @transform_0, window_bounds = array<i64: 1, 1888, 48>}, {pipeline_mode = #tpu.pipeline_mode<synchronous>, transform_indices = @transform_1, window_bounds = array<i64: 48, 32>}, {pipeline_mode = #tpu.pipeline_mode<synchronous>, transform_indices = @transform_2, window_bounds = array<i64: 1, 32>}, {transform_indices = @transform_3, window_bounds = array<i64: 472, 32>}]} {
    %c0 = arith.constant 0 : index
    %c0_0 = arith.constant 0 : index
    %c0_1 = arith.constant 0 : index
    %0 = vector.load %arg1[%c0, %c0_0, %c0_1] : memref<1x1888x48xbf16, #tpu.memory_space<vmem>>, vector<1x1888x48xbf16>
    %1 = vector.shape_cast %0 : vector<1x1888x48xbf16> to vector<1888x48xbf16>
    %c0_2 = arith.constant 0 : index
    %c0_3 = arith.constant 0 : index
    %2 = vector.load %arg2[%c0_2, %c0_3] : memref<48x32xbf16, #tpu.memory_space<vmem>>, vector<48x32xbf16>
    %cst = arith.constant dense<0.000000e+00> : vector<1888x32xf32>
    %3 = tpu.matmul %1, %2, %cst {dimension_numbers = #tpu.dot_dimension_numbers<[1], [0], [0], [1], [0, 0, 1, 1], [], []>} : vector<1888x48xbf16>, vector<48x32xbf16>, vector<1888x32xf32> -> vector<1888x32xf32>
    %4 = vector.extract_strided_slice %3 {offsets = [0, 0], sizes = [472, 32], strides = [1, 1]} : vector<1888x32xf32> to vector<472x32xf32>
    %5 = vector.extract_strided_slice %3 {offsets = [472, 0], sizes = [472, 32], strides = [1, 1]} : vector<1888x32xf32> to vector<472x32xf32>
    %6 = arith.maximumf %4, %5 : vector<472x32xf32>
    %7 = vector.extract_strided_slice %3 {offsets = [944, 0], sizes = [472, 32], strides = [1, 1]} : vector<1888x32xf32> to vector<472x32xf32>
    %8 = vector.extract_strided_slice %3 {offsets = [1416, 0], sizes = [472, 32], strides = [1, 1]} : vector<1888x32xf32> to vector<472x32xf32>
    %9 = arith.maximumf %7, %8 : vector<472x32xf32>
    %10 = arith.maximumf %6, %9 : vector<472x32xf32>
    %c0_4 = arith.constant 0 : index
    %c0_5 = arith.constant 0 : index
    %11 = vector.load %arg3[%c0_4, %c0_5] : memref<1x32xf32, #tpu.memory_space<vmem>>, vector<1x32xf32>
    %12 = vector.broadcast %11 : vector<1x32xf32> to vector<472x32xf32>
    %13 = arith.addf %10, %12 : vector<472x32xf32>
    %cst_6 = arith.constant 0.000000e+00 : f32
    %14 = vector.broadcast %cst_6 : f32 to vector<472x32xf32>
    %15 = arith.maximumf %13, %14 : vector<472x32xf32>
    %16 = arith.truncf %15 : vector<472x32xf32> to vector<472x32xbf16>
    %c0_7 = arith.constant 0 : index
    %c0_8 = arith.constant 0 : index
    %17 = vector.load %arg4[%c0_7, %c0_8] : memref<472x32xbf16, #tpu.memory_space<vmem>>, vector<472x32xbf16>
    tpu.vector_store %arg4[%c0_7, %c0_8], %16 {strides = array<i32>} : memref<472x32xbf16, #tpu.memory_space<vmem>>, vector<472x32xbf16>,
    return
  }
  func.func @transform_0(%arg0: i32) -> (i32, i32, i32) {
    %c0_i32 = arith.constant 0 : i32
    %c0_i32_0 = arith.constant 0 : i32
    %c0_i32_1 = arith.constant 0 : i32
    return %arg0, %c0_i32, %c0_i32_0 : i32, i32, i32
  }
  func.func @transform_1(%arg0: i32) -> (i32, i32) {
    %c0_i32 = arith.constant 0 : i32
    %c0_i32_0 = arith.constant 0 : i32
    %c0_i32_1 = arith.constant 0 : i32
    return %c0_i32, %c0_i32_0 : i32, i32
  }
  func.func @transform_2(%arg0: i32) -> (i32, i32) {
    %c0_i32 = arith.constant 0 : i32
    %c0_i32_0 = arith.constant 0 : i32
    %c0_i32_1 = arith.constant 0 : i32
    return %c0_i32, %c0_i32_0 : i32, i32
  }
  func.func @transform_3(%arg0: i32) -> (i32, i32) {
    %c0_i32 = arith.constant 0 : i32
    %c0_i32_0 = arith.constant 0 : i32
    return %arg0, %c0_i32 : i32, i32
  }
}

module attributes {stable_mosaic.version = 11 : i64} {
  func.func @_conv_pool_kernel(%arg0: i32, %arg1: memref<1x1792x512xbf16, #tpu.memory_space<vmem>>, %arg2: memref<512x64xbf16, #tpu.memory_space<vmem>>, %arg3: memref<1x64xf32, #tpu.memory_space<vmem>>, %arg4: memref<448x64xbf16, #tpu.memory_space<vmem>>) attributes {dimension_semantics = [#tpu.dimension_semantics<parallel>], iteration_bounds = array<i64: 2>, scalar_prefetch = 0 : i64, scratch_operands = 0 : i64, tpu.core_type = #tpu.core_type<tc>, window_params = [{transform_indices = @transform_0, window_bounds = array<i64: 1, 1792, 512>}, {pipeline_mode = #tpu.pipeline_mode<synchronous>, transform_indices = @transform_1, window_bounds = array<i64: 512, 64>}, {pipeline_mode = #tpu.pipeline_mode<synchronous>, transform_indices = @transform_2, window_bounds = array<i64: 1, 64>}, {transform_indices = @transform_3, window_bounds = array<i64: 448, 64>}]} {
    %c0 = arith.constant 0 : index
    %c0_0 = arith.constant 0 : index
    %c0_1 = arith.constant 0 : index
    %0 = vector.load %arg1[%c0, %c0_0, %c0_1] : memref<1x1792x512xbf16, #tpu.memory_space<vmem>>, vector<1x1792x512xbf16>
    %1 = vector.shape_cast %0 : vector<1x1792x512xbf16> to vector<1792x512xbf16>
    %c0_2 = arith.constant 0 : index
    %c0_3 = arith.constant 0 : index
    %2 = vector.load %arg2[%c0_2, %c0_3] : memref<512x64xbf16, #tpu.memory_space<vmem>>, vector<512x64xbf16>
    %cst = arith.constant dense<0.000000e+00> : vector<1792x64xf32>
    %3 = tpu.matmul %1, %2, %cst {dimension_numbers = #tpu.dot_dimension_numbers<[1], [0], [0], [1], [0, 0, 1, 1], [], []>} : vector<1792x512xbf16>, vector<512x64xbf16>, vector<1792x64xf32> -> vector<1792x64xf32>
    %4 = vector.extract_strided_slice %3 {offsets = [0, 0], sizes = [448, 64], strides = [1, 1]} : vector<1792x64xf32> to vector<448x64xf32>
    %5 = vector.extract_strided_slice %3 {offsets = [448, 0], sizes = [448, 64], strides = [1, 1]} : vector<1792x64xf32> to vector<448x64xf32>
    %6 = arith.maximumf %4, %5 : vector<448x64xf32>
    %7 = vector.extract_strided_slice %3 {offsets = [896, 0], sizes = [448, 64], strides = [1, 1]} : vector<1792x64xf32> to vector<448x64xf32>
    %8 = vector.extract_strided_slice %3 {offsets = [1344, 0], sizes = [448, 64], strides = [1, 1]} : vector<1792x64xf32> to vector<448x64xf32>
    %9 = arith.maximumf %7, %8 : vector<448x64xf32>
    %10 = arith.maximumf %6, %9 : vector<448x64xf32>
    %c0_4 = arith.constant 0 : index
    %c0_5 = arith.constant 0 : index
    %11 = vector.load %arg3[%c0_4, %c0_5] : memref<1x64xf32, #tpu.memory_space<vmem>>, vector<1x64xf32>
    %12 = vector.broadcast %11 : vector<1x64xf32> to vector<448x64xf32>
    %13 = arith.addf %10, %12 : vector<448x64xf32>
    %cst_6 = arith.constant 0.000000e+00 : f32
    %14 = vector.broadcast %cst_6 : f32 to vector<448x64xf32>
    %15 = arith.maximumf %13, %14 : vector<448x64xf32>
    %16 = arith.truncf %15 : vector<448x64xf32> to vector<448x64xbf16>
    %c0_7 = arith.constant 0 : index
    %c0_8 = arith.constant 0 : index
    %17 = vector.load %arg4[%c0_7, %c0_8] : memref<448x64xbf16, #tpu.memory_space<vmem>>, vector<448x64xbf16>
    tpu.vector_store %arg4[%c0_7, %c0_8], %16 {strides = array<i32>} : memref<448x64xbf16, #tpu.memory_space<vmem>>, vector<448x64xbf16>,
    return
  }
  func.func @transform_0(%arg0: i32) -> (i32, i32, i32) {
    %c0_i32 = arith.constant 0 : i32
    %c0_i32_0 = arith.constant 0 : i32
    %c0_i32_1 = arith.constant 0 : i32
    return %arg0, %c0_i32, %c0_i32_0 : i32, i32, i32
  }
  func.func @transform_1(%arg0: i32) -> (i32, i32) {
    %c0_i32 = arith.constant 0 : i32
    %c0_i32_0 = arith.constant 0 : i32
    %c0_i32_1 = arith.constant 0 : i32
    return %c0_i32, %c0_i32_0 : i32, i32
  }
  func.func @transform_2(%arg0: i32) -> (i32, i32) {
    %c0_i32 = arith.constant 0 : i32
    %c0_i32_0 = arith.constant 0 : i32
    %c0_i32_1 = arith.constant 0 : i32
    return %c0_i32, %c0_i32_0 : i32, i32
  }
  func.func @transform_3(%arg0: i32) -> (i32, i32) {
    %c0_i32 = arith.constant 0 : i32
    %c0_i32_0 = arith.constant 0 : i32
    return %arg0, %c0_i32 : i32, i32
  }
}

module attributes {stable_mosaic.version = 11 : i64} {
  func.func @_conv_pool_kernel(%arg0: i32, %arg1: memref<1x352x1024xbf16, #tpu.memory_space<vmem>>, %arg2: memref<1024x128xbf16, #tpu.memory_space<vmem>>, %arg3: memref<1x128xf32, #tpu.memory_space<vmem>>, %arg4: memref<88x128xbf16, #tpu.memory_space<vmem>>) attributes {dimension_semantics = [#tpu.dimension_semantics<parallel>], iteration_bounds = array<i64: 2>, scalar_prefetch = 0 : i64, scratch_operands = 0 : i64, tpu.core_type = #tpu.core_type<tc>, window_params = [{transform_indices = @transform_0, window_bounds = array<i64: 1, 352, 1024>}, {pipeline_mode = #tpu.pipeline_mode<synchronous>, transform_indices = @transform_1, window_bounds = array<i64: 1024, 128>}, {pipeline_mode = #tpu.pipeline_mode<synchronous>, transform_indices = @transform_2, window_bounds = array<i64: 1, 128>}, {transform_indices = @transform_3, window_bounds = array<i64: 88, 128>}]} {
    %c0 = arith.constant 0 : index
    %c0_0 = arith.constant 0 : index
    %c0_1 = arith.constant 0 : index
    %0 = vector.load %arg1[%c0, %c0_0, %c0_1] : memref<1x352x1024xbf16, #tpu.memory_space<vmem>>, vector<1x352x1024xbf16>
    %1 = vector.shape_cast %0 : vector<1x352x1024xbf16> to vector<352x1024xbf16>
    %c0_2 = arith.constant 0 : index
    %c0_3 = arith.constant 0 : index
    %2 = vector.load %arg2[%c0_2, %c0_3] : memref<1024x128xbf16, #tpu.memory_space<vmem>>, vector<1024x128xbf16>
    %cst = arith.constant dense<0.000000e+00> : vector<352x128xf32>
    %3 = tpu.matmul %1, %2, %cst {dimension_numbers = #tpu.dot_dimension_numbers<[1], [0], [0], [1], [0, 0, 1, 1], [], []>} : vector<352x1024xbf16>, vector<1024x128xbf16>, vector<352x128xf32> -> vector<352x128xf32>
    %4 = vector.extract_strided_slice %3 {offsets = [0, 0], sizes = [88, 128], strides = [1, 1]} : vector<352x128xf32> to vector<88x128xf32>
    %5 = vector.extract_strided_slice %3 {offsets = [88, 0], sizes = [88, 128], strides = [1, 1]} : vector<352x128xf32> to vector<88x128xf32>
    %6 = arith.maximumf %4, %5 : vector<88x128xf32>
    %7 = vector.extract_strided_slice %3 {offsets = [176, 0], sizes = [88, 128], strides = [1, 1]} : vector<352x128xf32> to vector<88x128xf32>
    %8 = vector.extract_strided_slice %3 {offsets = [264, 0], sizes = [88, 128], strides = [1, 1]} : vector<352x128xf32> to vector<88x128xf32>
    %9 = arith.maximumf %7, %8 : vector<88x128xf32>
    %10 = arith.maximumf %6, %9 : vector<88x128xf32>
    %c0_4 = arith.constant 0 : index
    %c0_5 = arith.constant 0 : index
    %11 = vector.load %arg3[%c0_4, %c0_5] : memref<1x128xf32, #tpu.memory_space<vmem>>, vector<1x128xf32>
    %12 = vector.broadcast %11 : vector<1x128xf32> to vector<88x128xf32>
    %13 = arith.addf %10, %12 : vector<88x128xf32>
    %cst_6 = arith.constant 0.000000e+00 : f32
    %14 = vector.broadcast %cst_6 : f32 to vector<88x128xf32>
    %15 = arith.maximumf %13, %14 : vector<88x128xf32>
    %16 = arith.truncf %15 : vector<88x128xf32> to vector<88x128xbf16>
    %c0_7 = arith.constant 0 : index
    %c0_8 = arith.constant 0 : index
    %17 = vector.load %arg4[%c0_7, %c0_8] : memref<88x128xbf16, #tpu.memory_space<vmem>>, vector<88x128xbf16>
    tpu.vector_store %arg4[%c0_7, %c0_8], %16 {strides = array<i32>} : memref<88x128xbf16, #tpu.memory_space<vmem>>, vector<88x128xbf16>,
    return
  }
  func.func @transform_0(%arg0: i32) -> (i32, i32, i32) {
    %c0_i32 = arith.constant 0 : i32
    %c0_i32_0 = arith.constant 0 : i32
    %c0_i32_1 = arith.constant 0 : i32
    return %arg0, %c0_i32, %c0_i32_0 : i32, i32, i32
  }
  func.func @transform_1(%arg0: i32) -> (i32, i32) {
    %c0_i32 = arith.constant 0 : i32
    %c0_i32_0 = arith.constant 0 : i32
    %c0_i32_1 = arith.constant 0 : i32
    return %c0_i32, %c0_i32_0 : i32, i32
  }
  func.func @transform_2(%arg0: i32) -> (i32, i32) {
    %c0_i32 = arith.constant 0 : i32
    %c0_i32_0 = arith.constant 0 : i32
    %c0_i32_1 = arith.constant 0 : i32
    return %c0_i32, %c0_i32_0 : i32, i32
  }
  func.func @transform_3(%arg0: i32) -> (i32, i32) {
    %c0_i32 = arith.constant 0 : i32
    %c0_i32_0 = arith.constant 0 : i32
    return %arg0, %c0_i32 : i32, i32
  }
}

module attributes {stable_mosaic.version = 11 : i64} {
  func.func @kernel(%arg0: i32, %arg1: memref<288x2048xbf16, #tpu.memory_space<vmem>>, %arg2: memref<2048x128xbf16, #tpu.memory_space<vmem>>, %arg3: memref<1x128xf32, #tpu.memory_space<vmem>>, %arg4: memref<9x128x128xf32, #tpu.memory_space<vmem>>, %arg5: memref<1x128xf32, #tpu.memory_space<vmem>>, %arg6: memref<128x128xf32, #tpu.memory_space<vmem>>, %arg7: memref<1x128xf32, #tpu.memory_space<vmem>>, %arg8: memref<128x128xf32, #tpu.memory_space<vmem>>, %arg9: memref<1x128xf32, #tpu.memory_space<vmem>>, %arg10: memref<8x128xf32, #tpu.memory_space<vmem>>) attributes {dimension_semantics = [#tpu.dimension_semantics<arbitrary>], iteration_bounds = array<i64: 1>, scalar_prefetch = 0 : i64, scratch_operands = 0 : i64, tpu.core_type = #tpu.core_type<tc>, window_params = [{pipeline_mode = #tpu.pipeline_mode<synchronous>, transform_indices = @transform_0, window_bounds = array<i64: 288, 2048>}, {pipeline_mode = #tpu.pipeline_mode<synchronous>, transform_indices = @transform_1, window_bounds = array<i64: 2048, 128>}, {pipeline_mode = #tpu.pipeline_mode<synchronous>, transform_indices = @transform_2, window_bounds = array<i64: 1, 128>}, {pipeline_mode = #tpu.pipeline_mode<synchronous>, transform_indices = @transform_3, window_bounds = array<i64: 9, 128, 128>}, {pipeline_mode = #tpu.pipeline_mode<synchronous>, transform_indices = @transform_4, window_bounds = array<i64: 1, 128>}, {pipeline_mode = #tpu.pipeline_mode<synchronous>, transform_indices = @transform_5, window_bounds = array<i64: 128, 128>}, {pipeline_mode = #tpu.pipeline_mode<synchronous>, transform_indices = @transform_6, window_bounds = array<i64: 1, 128>}, {pipeline_mode = #tpu.pipeline_mode<synchronous>, transform_indices = @transform_7, window_bounds = array<i64: 128, 128>}, {pipeline_mode = #tpu.pipeline_mode<synchronous>, transform_indices = @transform_8, window_bounds = array<i64: 1, 128>}, {pipeline_mode = #tpu.pipeline_mode<synchronous>, transform_indices = @transform_9, window_bounds = array<i64: 8, 128>}]} {
    %c0 = arith.constant 0 : index
    %c0_0 = arith.constant 0 : index
    %0 = vector.load %arg1[%c0, %c0_0] : memref<288x2048xbf16, #tpu.memory_space<vmem>>, vector<288x2048xbf16>
    %c0_1 = arith.constant 0 : index
    %c0_2 = arith.constant 0 : index
    %1 = vector.load %arg2[%c0_1, %c0_2] : memref<2048x128xbf16, #tpu.memory_space<vmem>>, vector<2048x128xbf16>
    %cst = arith.constant dense<0.000000e+00> : vector<288x128xf32>
    %2 = tpu.matmul %0, %1, %cst {dimension_numbers = #tpu.dot_dimension_numbers<[1], [0], [0], [1], [0, 0, 1, 1], [], []>} : vector<288x2048xbf16>, vector<2048x128xbf16>, vector<288x128xf32> -> vector<288x128xf32>
    %3 = vector.extract_strided_slice %2 {offsets = [0, 0], sizes = [72, 128], strides = [1, 1]} : vector<288x128xf32> to vector<72x128xf32>
    %4 = vector.extract_strided_slice %2 {offsets = [72, 0], sizes = [72, 128], strides = [1, 1]} : vector<288x128xf32> to vector<72x128xf32>
    %5 = arith.maximumf %3, %4 : vector<72x128xf32>
    %6 = vector.extract_strided_slice %2 {offsets = [144, 0], sizes = [72, 128], strides = [1, 1]} : vector<288x128xf32> to vector<72x128xf32>
    %7 = vector.extract_strided_slice %2 {offsets = [216, 0], sizes = [72, 128], strides = [1, 1]} : vector<288x128xf32> to vector<72x128xf32>
    %8 = arith.maximumf %6, %7 : vector<72x128xf32>
    %9 = arith.maximumf %5, %8 : vector<72x128xf32>
    %c0_3 = arith.constant 0 : index
    %c0_4 = arith.constant 0 : index
    %10 = vector.load %arg3[%c0_3, %c0_4] : memref<1x128xf32, #tpu.memory_space<vmem>>, vector<1x128xf32>
    %11 = vector.broadcast %10 : vector<1x128xf32> to vector<72x128xf32>
    %12 = arith.addf %9, %11 : vector<72x128xf32>
    %cst_5 = arith.constant 0.000000e+00 : f32
    %13 = vector.broadcast %cst_5 : f32 to vector<72x128xf32>
    %14 = arith.maximumf %12, %13 : vector<72x128xf32>
    %cst_6 = arith.constant 0.000000e+00 : f32
    %15 = vector.broadcast %cst_6 : f32 to vector<8x128xf32>
    %16 = vector.extract_strided_slice %14 {offsets = [0, 0], sizes = [8, 128], strides = [1, 1]} : vector<72x128xf32> to vector<8x128xf32>
    %c0_7 = arith.constant 0 : index
    %c0_8 = arith.constant 0 : index
    %c0_9 = arith.constant 0 : index
    %17 = vector.load %arg4[%c0_7, %c0_8, %c0_9] : memref<9x128x128xf32, #tpu.memory_space<vmem>>, vector<1x128x128xf32>
    %18 = vector.shape_cast %17 : vector<1x128x128xf32> to vector<128x128xf32>
    %cst_10 = arith.constant dense<0.000000e+00> : vector<8x128xf32>
    %19 = tpu.matmul %16, %18, %cst_10 {dimension_numbers = #tpu.dot_dimension_numbers<[1], [0], [0], [1], [0, 0, 1, 1], [], []>} : vector<8x128xf32>, vector<128x128xf32>, vector<8x128xf32> -> vector<8x128xf32>
    %20 = arith.addf %15, %19 : vector<8x128xf32>
    %21 = vector.extract_strided_slice %14 {offsets = [8, 0], sizes = [8, 128], strides = [1, 1]} : vector<72x128xf32> to vector<8x128xf32>
    %c1 = arith.constant 1 : index
    %c0_11 = arith.constant 0 : index
    %c0_12 = arith.constant 0 : index
    %22 = vector.load %arg4[%c1, %c0_11, %c0_12] : memref<9x128x128xf32, #tpu.memory_space<vmem>>, vector<1x128x128xf32>
    %23 = vector.shape_cast %22 : vector<1x128x128xf32> to vector<128x128xf32>
    %cst_13 = arith.constant dense<0.000000e+00> : vector<8x128xf32>
    %24 = tpu.matmul %21, %23, %cst_13 {dimension_numbers = #tpu.dot_dimension_numbers<[1], [0], [0], [1], [0, 0, 1, 1], [], []>} : vector<8x128xf32>, vector<128x128xf32>, vector<8x128xf32> -> vector<8x128xf32>
    %25 = arith.addf %20, %24 : vector<8x128xf32>
    %26 = vector.extract_strided_slice %14 {offsets = [16, 0], sizes = [8, 128], strides = [1, 1]} : vector<72x128xf32> to vector<8x128xf32>
    %c2 = arith.constant 2 : index
    %c0_14 = arith.constant 0 : index
    %c0_15 = arith.constant 0 : index
    %27 = vector.load %arg4[%c2, %c0_14, %c0_15] : memref<9x128x128xf32, #tpu.memory_space<vmem>>, vector<1x128x128xf32>
    %28 = vector.shape_cast %27 : vector<1x128x128xf32> to vector<128x128xf32>
    %cst_16 = arith.constant dense<0.000000e+00> : vector<8x128xf32>
    %29 = tpu.matmul %26, %28, %cst_16 {dimension_numbers = #tpu.dot_dimension_numbers<[1], [0], [0], [1], [0, 0, 1, 1], [], []>} : vector<8x128xf32>, vector<128x128xf32>, vector<8x128xf32> -> vector<8x128xf32>
    %30 = arith.addf %25, %29 : vector<8x128xf32>
    %31 = vector.extract_strided_slice %14 {offsets = [24, 0], sizes = [8, 128], strides = [1, 1]} : vector<72x128xf32> to vector<8x128xf32>
    %c3 = arith.constant 3 : index
    %c0_17 = arith.constant 0 : index
    %c0_18 = arith.constant 0 : index
    %32 = vector.load %arg4[%c3, %c0_17, %c0_18] : memref<9x128x128xf32, #tpu.memory_space<vmem>>, vector<1x128x128xf32>
    %33 = vector.shape_cast %32 : vector<1x128x128xf32> to vector<128x128xf32>
    %cst_19 = arith.constant dense<0.000000e+00> : vector<8x128xf32>
    %34 = tpu.matmul %31, %33, %cst_19 {dimension_numbers = #tpu.dot_dimension_numbers<[1], [0], [0], [1], [0, 0, 1, 1], [], []>} : vector<8x128xf32>, vector<128x128xf32>, vector<8x128xf32> -> vector<8x128xf32>
    %35 = arith.addf %30, %34 : vector<8x128xf32>
    %36 = vector.extract_strided_slice %14 {offsets = [32, 0], sizes = [8, 128], strides = [1, 1]} : vector<72x128xf32> to vector<8x128xf32>
    %c4 = arith.constant 4 : index
    %c0_20 = arith.constant 0 : index
    %c0_21 = arith.constant 0 : index
    %37 = vector.load %arg4[%c4, %c0_20, %c0_21] : memref<9x128x128xf32, #tpu.memory_space<vmem>>, vector<1x128x128xf32>
    %38 = vector.shape_cast %37 : vector<1x128x128xf32> to vector<128x128xf32>
    %cst_22 = arith.constant dense<0.000000e+00> : vector<8x128xf32>
    %39 = tpu.matmul %36, %38, %cst_22 {dimension_numbers = #tpu.dot_dimension_numbers<[1], [0], [0], [1], [0, 0, 1, 1], [], []>} : vector<8x128xf32>, vector<128x128xf32>, vector<8x128xf32> -> vector<8x128xf32>
    %40 = arith.addf %35, %39 : vector<8x128xf32>
    %41 = vector.extract_strided_slice %14 {offsets = [40, 0], sizes = [8, 128], strides = [1, 1]} : vector<72x128xf32> to vector<8x128xf32>
    %c5 = arith.constant 5 : index
    %c0_23 = arith.constant 0 : index
    %c0_24 = arith.constant 0 : index
    %42 = vector.load %arg4[%c5, %c0_23, %c0_24] : memref<9x128x128xf32, #tpu.memory_space<vmem>>, vector<1x128x128xf32>
    %43 = vector.shape_cast %42 : vector<1x128x128xf32> to vector<128x128xf32>
    %cst_25 = arith.constant dense<0.000000e+00> : vector<8x128xf32>
    %44 = tpu.matmul %41, %43, %cst_25 {dimension_numbers = #tpu.dot_dimension_numbers<[1], [0], [0], [1], [0, 0, 1, 1], [], []>} : vector<8x128xf32>, vector<128x128xf32>, vector<8x128xf32> -> vector<8x128xf32>
    %45 = arith.addf %40, %44 : vector<8x128xf32>
    %46 = vector.extract_strided_slice %14 {offsets = [48, 0], sizes = [8, 128], strides = [1, 1]} : vector<72x128xf32> to vector<8x128xf32>
    %c6 = arith.constant 6 : index
    %c0_26 = arith.constant 0 : index
    %c0_27 = arith.constant 0 : index
    %47 = vector.load %arg4[%c6, %c0_26, %c0_27] : memref<9x128x128xf32, #tpu.memory_space<vmem>>, vector<1x128x128xf32>
    %48 = vector.shape_cast %47 : vector<1x128x128xf32> to vector<128x128xf32>
    %cst_28 = arith.constant dense<0.000000e+00> : vector<8x128xf32>
    %49 = tpu.matmul %46, %48, %cst_28 {dimension_numbers = #tpu.dot_dimension_numbers<[1], [0], [0], [1], [0, 0, 1, 1], [], []>} : vector<8x128xf32>, vector<128x128xf32>, vector<8x128xf32> -> vector<8x128xf32>
    %50 = arith.addf %45, %49 : vector<8x128xf32>
    %51 = vector.extract_strided_slice %14 {offsets = [56, 0], sizes = [8, 128], strides = [1, 1]} : vector<72x128xf32> to vector<8x128xf32>
    %c7 = arith.constant 7 : index
    %c0_29 = arith.constant 0 : index
    %c0_30 = arith.constant 0 : index
    %52 = vector.load %arg4[%c7, %c0_29, %c0_30] : memref<9x128x128xf32, #tpu.memory_space<vmem>>, vector<1x128x128xf32>
    %53 = vector.shape_cast %52 : vector<1x128x128xf32> to vector<128x128xf32>
    %cst_31 = arith.constant dense<0.000000e+00> : vector<8x128xf32>
    %54 = tpu.matmul %51, %53, %cst_31 {dimension_numbers = #tpu.dot_dimension_numbers<[1], [0], [0], [1], [0, 0, 1, 1], [], []>} : vector<8x128xf32>, vector<128x128xf32>, vector<8x128xf32> -> vector<8x128xf32>
    %55 = arith.addf %50, %54 : vector<8x128xf32>
    %56 = vector.extract_strided_slice %14 {offsets = [64, 0], sizes = [8, 128], strides = [1, 1]} : vector<72x128xf32> to vector<8x128xf32>
    %c8 = arith.constant 8 : index
    %c0_32 = arith.constant 0 : index
    %c0_33 = arith.constant 0 : index
    %57 = vector.load %arg4[%c8, %c0_32, %c0_33] : memref<9x128x128xf32, #tpu.memory_space<vmem>>, vector<1x128x128xf32>
    %58 = vector.shape_cast %57 : vector<1x128x128xf32> to vector<128x128xf32>
    %cst_34 = arith.constant dense<0.000000e+00> : vector<8x128xf32>
    %59 = tpu.matmul %56, %58, %cst_34 {dimension_numbers = #tpu.dot_dimension_numbers<[1], [0], [0], [1], [0, 0, 1, 1], [], []>} : vector<8x128xf32>, vector<128x128xf32>, vector<8x128xf32> -> vector<8x128xf32>
    %60 = arith.addf %55, %59 : vector<8x128xf32>
    %c0_35 = arith.constant 0 : index
    %c0_36 = arith.constant 0 : index
    %61 = vector.load %arg5[%c0_35, %c0_36] : memref<1x128xf32, #tpu.memory_space<vmem>>, vector<1x128xf32>
    %62 = vector.broadcast %61 : vector<1x128xf32> to vector<8x128xf32>
    %63 = arith.addf %60, %62 : vector<8x128xf32>
    %cst_37 = arith.constant 0.000000e+00 : f32
    %64 = vector.broadcast %cst_37 : f32 to vector<8x128xf32>
    %65 = arith.maximumf %63, %64 : vector<8x128xf32>
    %c0_38 = arith.constant 0 : index
    %c0_39 = arith.constant 0 : index
    %66 = vector.load %arg6[%c0_38, %c0_39] : memref<128x128xf32, #tpu.memory_space<vmem>>, vector<128x128xf32>
    %cst_40 = arith.constant dense<0.000000e+00> : vector<8x128xf32>
    %67 = tpu.matmul %65, %66, %cst_40 {dimension_numbers = #tpu.dot_dimension_numbers<[1], [0], [0], [1], [0, 0, 1, 1], [], []>} : vector<8x128xf32>, vector<128x128xf32>, vector<8x128xf32> -> vector<8x128xf32>
    %c0_41 = arith.constant 0 : index
    %c0_42 = arith.constant 0 : index
    %68 = vector.load %arg7[%c0_41, %c0_42] : memref<1x128xf32, #tpu.memory_space<vmem>>, vector<1x128xf32>
    %69 = vector.broadcast %68 : vector<1x128xf32> to vector<8x128xf32>
    %70 = arith.addf %67, %69 : vector<8x128xf32>
    %cst_43 = arith.constant 0.000000e+00 : f32
    %71 = vector.broadcast %cst_43 : f32 to vector<8x128xf32>
    %72 = arith.maximumf %70, %71 : vector<8x128xf32>
    %c0_44 = arith.constant 0 : index
    %c0_45 = arith.constant 0 : index
    %73 = vector.load %arg8[%c0_44, %c0_45] : memref<128x128xf32, #tpu.memory_space<vmem>>, vector<128x128xf32>
    %cst_46 = arith.constant dense<0.000000e+00> : vector<8x128xf32>
    %74 = tpu.matmul %72, %73, %cst_46 {dimension_numbers = #tpu.dot_dimension_numbers<[1], [0], [0], [1], [0, 0, 1, 1], [], []>} : vector<8x128xf32>, vector<128x128xf32>, vector<8x128xf32> -> vector<8x128xf32>
    %c0_47 = arith.constant 0 : index
    %c0_48 = arith.constant 0 : index
    %75 = vector.load %arg9[%c0_47, %c0_48] : memref<1x128xf32, #tpu.memory_space<vmem>>, vector<1x128xf32>
    %76 = vector.broadcast %75 : vector<1x128xf32> to vector<8x128xf32>
    %77 = arith.addf %74, %76 : vector<8x128xf32>
    %c0_49 = arith.constant 0 : index
    %c0_50 = arith.constant 0 : index
    %78 = vector.load %arg10[%c0_49, %c0_50] : memref<8x128xf32, #tpu.memory_space<vmem>>, vector<8x128xf32>
    tpu.vector_store %arg10[%c0_49, %c0_50], %77 {strides = array<i32>} : memref<8x128xf32, #tpu.memory_space<vmem>>, vector<8x128xf32>,
    return
  }
  func.func @transform_0(%arg0: i32) -> (i32, i32) {
    %c0_i32 = arith.constant 0 : i32
    %c0_i32_0 = arith.constant 0 : i32
    %c0_i32_1 = arith.constant 0 : i32
    return %c0_i32, %c0_i32_0 : i32, i32
  }
  func.func @transform_1(%arg0: i32) -> (i32, i32) {
    %c0_i32 = arith.constant 0 : i32
    %c0_i32_0 = arith.constant 0 : i32
    %c0_i32_1 = arith.constant 0 : i32
    return %c0_i32, %c0_i32_0 : i32, i32
  }
  func.func @transform_2(%arg0: i32) -> (i32, i32) {
    %c0_i32 = arith.constant 0 : i32
    %c0_i32_0 = arith.constant 0 : i32
    %c0_i32_1 = arith.constant 0 : i32
    return %c0_i32, %c0_i32_0 : i32, i32
  }
  func.func @transform_3(%arg0: i32) -> (i32, i32, i32) {
    %c0_i32 = arith.constant 0 : i32
    %c0_i32_0 = arith.constant 0 : i32
    %c0_i32_1 = arith.constant 0 : i32
    %c0_i32_2 = arith.constant 0 : i32
    return %c0_i32, %c0_i32_0, %c0_i32_1 : i32, i32, i32
  }
  func.func @transform_4(%arg0: i32) -> (i32, i32) {
    %c0_i32 = arith.constant 0 : i32
    %c0_i32_0 = arith.constant 0 : i32
    %c0_i32_1 = arith.constant 0 : i32
    return %c0_i32, %c0_i32_0 : i32, i32
  }
  func.func @transform_5(%arg0: i32) -> (i32, i32) {
    %c0_i32 = arith.constant 0 : i32
    %c0_i32_0 = arith.constant 0 : i32
    %c0_i32_1 = arith.constant 0 : i32
    return %c0_i32, %c0_i32_0 : i32, i32
  }
  func.func @transform_6(%arg0: i32) -> (i32, i32) {
    %c0_i32 = arith.constant 0 : i32
    %c0_i32_0 = arith.constant 0 : i32
    %c0_i32_1 = arith.constant 0 : i32
    return %c0_i32, %c0_i32_0 : i32, i32
  }
  func.func @transform_7(%arg0: i32) -> (i32, i32) {
    %c0_i32 = arith.constant 0 : i32
    %c0_i32_0 = arith.constant 0 : i32
    %c0_i32_1 = arith.constant 0 : i32
    return %c0_i32, %c0_i32_0 : i32, i32
  }
  func.func @transform_8(%arg0: i32) -> (i32, i32) {
    %c0_i32 = arith.constant 0 : i32
    %c0_i32_0 = arith.constant 0 : i32
    %c0_i32_1 = arith.constant 0 : i32
    return %c0_i32, %c0_i32_0 : i32, i32
  }
  func.func @transform_9(%arg0: i32) -> (i32, i32) {
    %c0_i32 = arith.constant 0 : i32
    %c0_i32_0 = arith.constant 0 : i32
    %c0_i32_1 = arith.constant 0 : i32
    return %c0_i32, %c0_i32_0 : i32, i32
  }
}

</mosaic_0001>

<bundles_post_ra>
// kernel: net_forward.4
= control target key start
LH: loop header
LB: loop body
LE: loop exit
PB: predicated region body
PF: predicated region fallthrough
CT: control target
= control target key end

     0   :  { %s3904_s12 = smov 0   ;;  %s4723_s0 = inlined_call_operand.vmem [shape: bf16[9,1888,48], index: 0, kind: input, shape index: {}]   ;;  %s4724_s1 = inlined_call_operand.vmem [shape: bf16[48,32], index: 1, kind: input, shape index: {}]   ;;  %s4725_s2 = inlined_call_operand.vmem [shape: f32[1,32], index: 2, kind: input, shape index: {}]   ;;  %s4726_s3 = inlined_call_operand.vmem [shape: bf16[4248,32], index: 3, kind: output, shape index: {}]  }
   0x1 LB: > { %s3910_s13 = sadd.s32 4294967295, %s3882_s12   ;;  %p3014_p0 = scmp.ge.s32.totalorder %s3882_s12, 1  ;;  %s3882_s12 = sphi %s3904_s12, %s13_s12  }
   0x2   : > { %p137_p1 = scmp.lt.s32.totalorder %s3882_s12, 10 }
   0x4   : > { %p138_p2 = pnand %p3014_p0, %p137_p1 }
   0x6   : > { %141 = sbr.rel (%p138_p2) target bundleno = 484 (0x1e4), region = 32 }
   0xd   : > { %v3755_v0 = vld [vmem:[%s4724_s1] sm:$0xff]   ;;  %p161_p3 = scmp.lt.s32.totalorder %s3910_s13, 8  ;;  %v3756_v1 = vld [vmem:[%s4724_s1 + $0x8] sm:$0xff]   ;;  %v3757_v2 = vld [vmem:[%s4724_s1 + $0x10] sm:$0xff]   ;;  %vm1023_vm0 = vcmask 392192   ;;  %s166_s25 = smul.u32 59, %s3910_s13 }
   0xe   : > { %3498 = vmatprep.subr.bf16.mxu0 %v3755_v0  ;;  %3740 = vmatprep.subr.bf16.mxu1 %v3755_v0  ;;  %vm2894_vm1 = vcmask 257024  }
   0xf   : > { %s162_s18 = scalar_select %p161_p3, %s3910_s13, 8  ;;  %3499 = vmatpush3.bf16.msra.mxu0 %v3755_v0  ;;  %3743 = vmatpush3.bf16.msra.mxu1 %v3755_v0 }
  0x10   : > { %3500 = vmatprep.subr.bf16.mxu0 %v3756_v1  ;;  %3741 = vmatprep.subr.bf16.mxu1 %v3756_v1  ;;  %p167_p4 = scmp.lt.s32.totalorder %s166_s25, 530 }
  0x11   : > { %s3746_s21 = smul.u32 944, %s162_s18 }
  0x12   : > { %s4878_s25 = smov (!%p167_p4, %s166_s25), 530 }
  0x13   : > { %s3928_s24 = scalar_lea.vmem %s4723_s0, %s3746_s21  ;;  %3501 = vmatpush3.bf16.msra.mxu0 %v3756_v1  ;;  %3744 = vmatpush3.bf16.msra.mxu1 %v3756_v1  ;;  %s3016_s28 = sshll.u32 %s4878_s25, 2 }
  0x14   : > { %v3758_v3 = vld [vmem:[%s3928_s24] sm:$0xff]   ;;  %3502 = vmatprep.subr.bf16.mxu0 %v3757_v2  ;;  %3742 = vmatprep.subr.bf16.mxu1 %v3757_v2  ;;  %v3760_v5 = vld [vmem:[%s3928_s24 + $0x8] sm:$0xff]   ;;  %v3762_v7 = vld [vmem:[%s3928_s24 + $0x10] sm:$0xff]   ;;  %s4430_s4 = scalar_lea.vmem %s4726_s3, %s3016_s28 }
  0x15   : > { %v3759_v4 = vld [vmem:[%s3928_s24 + $0x1e0] sm:$0xff]   ;;  %3504 = vmatprep.mubr.msk.bf16.mxu0 %vm1023_vm0, %v3758_v3  ;;  %v3761_v6 = vld [vmem:[%s3928_s24 + $0x1e8] sm:$0xff]   ;;  %v3763_v8 = vld [vmem:[%s3928_s24 + $0x1f0] sm:$0xff]  }
  0x16   : > { %3624 = vmatprep.mubr.msk.bf16.mxu1 %vm1023_vm0, %v3759_v4  ;;  %v3764_v9 = vld [vmem:[%s3928_s24 + $0x18] sm:$0xff]   ;;  %v3766_v11 = vld [vmem:[%s3928_s24 + $0x20] sm:$0xff]   ;;  %v3768_v13 = vld [vmem:[%s3928_s24 + $0x28] sm:$0xff]  }
  0x17   : > { %3503 = vmatpush3.bf16.msra.mxu0 %v3757_v2  ;;  %3745 = vmatpush3.bf16.msra.mxu1 %v3757_v2  ;;  %v3765_v10 = vld [vmem:[%s3928_s24 + $0x1f8] sm:$0xff]   ;;  %v3767_v12 = vld [vmem:[%s3928_s24 + $0x200] sm:$0xff]   ;;  %v3769_v14 = vld [vmem:[%s3928_s24 + $0x208] sm:$0xff]  }
  0x18   : > { %v3770_v15 = vld [vmem:[%s3928_s24 + $0x30] sm:$0xff]   ;;  %v3772_v17 = vld [vmem:[%s3928_s24 + $0x38] sm:$0xff]   ;;  %v3774_v19 = vld [vmem:[%s3928_s24 + $0x40] sm:$0xff]  }
  0x19   : > { %v3771_v16 = vld [vmem:[%s3928_s24 + $0x210] sm:$0xff]   ;;  %v3773_v18 = vld [vmem:[%s3928_s24 + $0x218] sm:$0xff]   ;;  %v3775_v20 = vld [vmem:[%s3928_s24 + $0x220] sm:$0xff]  }
  0x1a   : > { %3505 = vmatmul.mubr.msk.bf16.vlgmr.msra.gmra.mrb[0].mxu0 %vm1023_vm0, %v3760_v5  ;;  %3625 = vmatmul.mubr.msk.bf16.vlgmr.msra.gmra.mrb[0].mxu1 %vm1023_vm0, %v3761_v6  ;;  %v3776_v21 = vld [vmem:[%s3928_s24 + $0x48] sm:$0xff]   ;;  %v3778_v23 = vld [vmem:[%s3928_s24 + $0x50] sm:$0xff]   ;;  %v3780_v25 = vld [vmem:[%s3928_s24 + $0x58] sm:$0xff]  }
  0x1b   : > { %3508 = vmatprep.mubr.msk.bf16.mxu0 %vm1023_vm0, %v3762_v7  ;;  %3628 = vmatprep.mubr.msk.bf16.mxu1 %vm1023_vm0, %v3763_v8  ;;  %v3777_v22 = vld [vmem:[%s3928_s24 + $0x228] sm:$0xff]   ;;  %v3779_v24 = vld [vmem:[%s3928_s24 + $0x230] sm:$0xff]   ;;  %v3781_v26 = vld [vmem:[%s3928_s24 + $0x238] sm:$0xff]  }
  0x1c   : > { %v3782_v27 = vld [vmem:[%s3928_s24 + $0x60] sm:$0xff]   ;;  %v3784_v29 = vld [vmem:[%s3928_s24 + $0x68] sm:$0xff]   ;;  %v3786_v31 = vld [vmem:[%s3928_s24 + $0x70] sm:$0xff]  }
  0x1d   : > { %v3783_v28 = vld [vmem:[%s3928_s24 + $0x240] sm:$0xff]   ;;  %v3785_v30 = vld [vmem:[%s3928_s24 + $0x248] sm:$0xff]   ;;  %v3787_v32 = vld [vmem:[%s3928_s24 + $0x250] sm:$0xff]  }
  0x1e   : > { %v3788_v33 = vld [vmem:[%s3928_s24 + $0x78] sm:$0xff]   ;;  %v3790_v35 = vld [vmem:[%s3928_s24 + $0x80] sm:$0xff]   ;;  %v3792_v37 = vld [vmem:[%s3928_s24 + $0x88] sm:$0xff]  }
  0x1f   : > { %v3789_v34 = vld [vmem:[%s3928_s24 + $0x258] sm:$0xff]   ;;  %v3791_v36 = vld [vmem:[%s3928_s24 + $0x260] sm:$0xff]   ;;  %v3793_v38 = vld [vmem:[%s3928_s24 + $0x268] sm:$0xff]  }
  0x20   : > { %v3794_v39 = vld [vmem:[%s3928_s24 + $0x90] sm:$0xff]   ;;  %v3796_v41 = vld [vmem:[%s3928_s24 + $0x98] sm:$0xff]   ;;  %v3798_v43 = vld [vmem:[%s3928_s24 + $0xa0] sm:$0xff]  }
  0x21   : > { %v3795_v40 = vld [vmem:[%s3928_s24 + $0x270] sm:$0xff]   ;;  %v3797_v42 = vld [vmem:[%s3928_s24 + $0x278] sm:$0xff]   ;;  %v3799_v44 = vld [vmem:[%s3928_s24 + $0x280] sm:$0xff]  }
  0x22   : > { %3509 = vmatmul.mubr.msk.bf16.gmra.mrb[4].mxu0 %vm1023_vm0, %v3764_v9  ;;  %3629 = vmatmul.mubr.msk.bf16.gmra.mrb[4].mxu1 %vm1023_vm0, %v3765_v10  ;;  %v3800_v45 = vld [vmem:[%s3928_s24 + $0xa8] sm:$0xff]   ;;  %v3802_v47 = vld [vmem:[%s3928_s24 + $0xb0] sm:$0xff]   ;;  %v3804_v49 = vld [vmem:[%s3928_s24 + $0xb8] sm:$0xff]  }
  0x23   : > { %3512 = vmatprep.mubr.msk.bf16.mxu0 %vm1023_vm0, %v3766_v11  ;;  %3632 = vmatprep.mubr.msk.bf16.mxu1 %vm1023_vm0, %v3767_v12  ;;  %v3801_v46 = vld [vmem:[%s3928_s24 + $0x288] sm:$0xff]   ;;  %v3803_v48 = vld [vmem:[%s3928_s24 + $0x290] sm:$0xff]   ;;  %v3805_v50 = vld [vmem:[%s3928_s24 + $0x298] sm:$0xff]  }
  0x24   : > { %v3806_v51 = vld [vmem:[%s3928_s24 + $0xc0] sm:$0xff]   ;;  %v3808_v53 = vld [vmem:[%s3928_s24 + $0xc8] sm:$0xff]   ;;  %v3810_v55 = vld [vmem:[%s3928_s24 + $0xd0] sm:$0xff]  }
  0x25   : > { %v3807_v52 = vld [vmem:[%s3928_s24 + $0x2a0] sm:$0xff]   ;;  %v3809_v54 = vld [vmem:[%s3928_s24 + $0x2a8] sm:$0xff]   ;;  %v3811_v56 = vld [vmem:[%s3928_s24 + $0x2b0] sm:$0xff]  }
  0x26   : > { %v3812_v57 = vld [vmem:[%s3928_s24 + $0xd8] sm:$0xff]   ;;  %v3814_v59 = vld [vmem:[%s3928_s24 + $0xe0] sm:$0xff]   ;;  %v3816_v61 = vld [vmem:[%s3928_s24 + $0xe8] sm:$0xff]  }
  0x27   : > { %v3813_v58 = vld [vmem:[%s3928_s24 + $0x2b8] sm:$0xff]   ;;  %v3815_v60 = vld [vmem:[%s3928_s24 + $0x2c0] sm:$0xff]   ;;  %v3817_v62 = vld [vmem:[%s3928_s24 + $0x2c8] sm:$0xff]  }
  0x28   : > { %v3818_v63 = vld [vmem:[%s3928_s24 + $0xf0] sm:$0xff]   ;;  %v3820_v1 = vld [vmem:[%s3928_s24 + $0xf8] sm:$0xff]   ;;  %v3822_v3 = vld [vmem:[%s3928_s24 + $0x100] sm:$0xff]  }
  0x29   : > { %v3819_v0 = vld [vmem:[%s3928_s24 + $0x2d0] sm:$0xff]   ;;  %v3821_v2 = vld [vmem:[%s3928_s24 + $0x2d8] sm:$0xff]   ;;  %v3823_v4 = vld [vmem:[%s3928_s24 + $0x2e0] sm:$0xff]  }
  0x2a   : > { %3513 = vmatmul.mubr.msk.bf16.gmra.mrb[8].mxu0 %vm1023_vm0, %v3768_v13  ;;  %3633 = vmatmul.mubr.msk.bf16.gmra.mrb[8].mxu1 %vm1023_vm0, %v3769_v14  ;;  %v3824_v5 = vld [vmem:[%s3928_s24 + $0x108] sm:$0xff]   ;;  %v3826_v7 = vld [vmem:[%s3928_s24 + $0x110] sm:$0xff]   ;;  %v3828_v9 = vld [vmem:[%s3928_s24 + $0x118] sm:$0xff]  }
  0x2b   : > { %3516 = vmatprep.mubr.msk.bf16.mxu0 %vm1023_vm0, %v3770_v15  ;;  %3636 = vmatprep.mubr.msk.bf16.mxu1 %vm1023_vm0, %v3771_v16  ;;  %v3825_v6 = vld [vmem:[%s3928_s24 + $0x2e8] sm:$0xff]   ;;  %v3827_v8 = vld [vmem:[%s3928_s24 + $0x2f0] sm:$0xff]   ;;  %v3829_v10 = vld [vmem:[%s3928_s24 + $0x2f8] sm:$0xff]  }
  0x2c   : > { %v3830_v11 = vld [vmem:[%s3928_s24 + $0x120] sm:$0xff]   ;;  %v3832_v13 = vld [vmem:[%s3928_s24 + $0x128] sm:$0xff]   ;;  %v3834_v15 = vld [vmem:[%s3928_s24 + $0x130] sm:$0xff]  }
  0x2d   : > { %v3831_v12 = vld [vmem:[%s3928_s24 + $0x300] sm:$0xff]   ;;  %v3833_v14 = vld [vmem:[%s3928_s24 + $0x308] sm:$0xff]   ;;  %v3835_v16 = vld [vmem:[%s3928_s24 + $0x310] sm:$0xff]  }
  0x32   : > { %3517 = vmatmul.mubr.msk.bf16.gmra.mrb[12].mxu0 %vm1023_vm0, %v3772_v17  ;;  %3637 = vmatmul.mubr.msk.bf16.gmra.mrb[12].mxu1 %vm1023_vm0, %v3773_v18  ;;  %v3836_v17 = vld [vmem:[%s3928_s24 + $0x138] sm:$0xff]  }
  0x33   : > { %3520 = vmatprep.mubr.msk.bf16.mxu0 %vm1023_vm0, %v3774_v19  ;;  %3640 = vmatprep.mubr.msk.bf16.mxu1 %vm1023_vm0, %v3775_v20  ;;  %v3837_v18 = vld [vmem:[%s3928_s24 + $0x318] sm:$0xff]   ;;  %v3838_v19 = vld [vmem:[%s3928_s24 + $0x140] sm:$0xff]  }
  0x34   : > { %v3839_v20 = vld [vmem:[%s3928_s24 + $0x320] sm:$0xff]  }
  0x3a   : > { %3521 = vmatmul.mubr.msk.bf16.gmra.mrb[16].mxu0 %vm1023_vm0, %v3776_v21  ;;  %3641 = vmatmul.mubr.msk.bf16.gmra.mrb[16].mxu1 %vm1023_vm0, %v3777_v22  ;;  %v3840_v21 = vld [vmem:[%s3928_s24 + $0x148] sm:$0xff]  }
  0x3b   : > { %3524 = vmatprep.mubr.msk.bf16.mxu0 %vm1023_vm0, %v3778_v23  ;;  %3644 = vmatprep.mubr.msk.bf16.mxu1 %vm1023_vm0, %v3779_v24  ;;  %v3841_v22 = vld [vmem:[%s3928_s24 + $0x328] sm:$0xff]   ;;  %v3842_v23 = vld [vmem:[%s3928_s24 + $0x150] sm:$0xff]  }
  0x3c   : > { %v3843_v24 = vld [vmem:[%s3928_s24 + $0x330] sm:$0xff]  }
  0x42   : > { %3525 = vmatmul.mubr.msk.bf16.gmra.mrb[20].mxu0 %vm1023_vm0, %v3780_v25  ;;  %3645 = vmatmul.mubr.msk.bf16.gmra.mrb[20].mxu1 %vm1023_vm0, %v3781_v26  ;;  %v3844_v25 = vld [vmem:[%s3928_s24 + $0x158] sm:$0xff]  }
  0x43   : > { %3528 = vmatprep.mubr.msk.bf16.mxu0 %vm1023_vm0, %v3782_v27  ;;  %3648 = vmatprep.mubr.msk.bf16.mxu1 %vm1023_vm0, %v3783_v28  ;;  %v3845_v26 = vld [vmem:[%s3928_s24 + $0x338] sm:$0xff]   ;;  %v3846_v27 = vld [vmem:[%s3928_s24 + $0x160] sm:$0xff]  }
  0x44   : > { %v3847_v28 = vld [vmem:[%s3928_s24 + $0x340] sm:$0xff]  }
  0x4a   : > { %3529 = vmatmul.mubr.msk.bf16.gmra.mrb[24].mxu0 %vm1023_vm0, %v3784_v29  ;;  %3649 = vmatmul.mubr.msk.bf16.gmra.mrb[24].mxu1 %vm1023_vm0, %v3785_v30  ;;  %v3848_v29 = vld [vmem:[%s3928_s24 + $0x168] sm:$0xff]  }
  0x4b   : > { %3532 = vmatprep.mubr.msk.bf16.mxu0 %vm1023_vm0, %v3786_v31  ;;  %3652 = vmatprep.mubr.msk.bf16.mxu1 %vm1023_vm0, %v3787_v32  ;;  %v3849_v30 = vld [vmem:[%s3928_s24 + $0x348] sm:$0xff]   ;;  %v3850_v31 = vld [vmem:[%s3928_s24 + $0x170] sm:$0xff]  }
  0x4c   : > { %v3851_v32 = vld [vmem:[%s3928_s24 + $0x350] sm:$0xff]  }
  0x52   : > { %3533 = vmatmul.mubr.msk.bf16.gmra.mrb[28].mxu0 %vm1023_vm0, %v3788_v33  ;;  %3653 = vmatmul.mubr.msk.bf16.gmra.mrb[28].mxu1 %vm1023_vm0, %v3789_v34  ;;  %v3852_v33 = vld [vmem:[%s3928_s24 + $0x178] sm:$0xff]  }
  0x53   : > { %3536 = vmatprep.mubr.msk.bf16.mxu0 %vm1023_vm0, %v3790_v35  ;;  %3656 = vmatprep.mubr.msk.bf16.mxu1 %vm1023_vm0, %v3791_v36  ;;  %v3853_v34 = vld [vmem:[%s3928_s24 + $0x358] sm:$0xff]   ;;  %v3854_v35 = vld [vmem:[%s3928_s24 + $0x180] sm:$0xff]  }
  0x54   : > { %v3855_v36 = vld [vmem:[%s3928_s24 + $0x360] sm:$0xff]  }
  0x5a   : > { %3537 = vmatmul.mubr.msk.bf16.gmra.mrb[32].mxu0 %vm1023_vm0, %v3792_v37  ;;  %3657 = vmatmul.mubr.msk.bf16.gmra.mrb[32].mxu1 %vm1023_vm0, %v3793_v38  ;;  %v3856_v37 = vld [vmem:[%s3928_s24 + $0x188] sm:$0xff]  }
  0x5b   : > { %3540 = vmatprep.mubr.msk.bf16.mxu0 %vm1023_vm0, %v3794_v39  ;;  %3660 = vmatprep.mubr.msk.bf16.mxu1 %vm1023_vm0, %v3795_v40  ;;  %v3857_v38 = vld [vmem:[%s3928_s24 + $0x368] sm:$0xff]   ;;  %v3858_v39 = vld [vmem:[%s3928_s24 + $0x190] sm:$0xff]  }
  0x5c   : > { %v3859_v40 = vld [vmem:[%s3928_s24 + $0x370] sm:$0xff]  }
  0x62   : > { %3541 = vmatmul.mubr.msk.bf16.gmra.mrb[36].mxu0 %vm1023_vm0, %v3796_v41  ;;  %3661 = vmatmul.mubr.msk.bf16.gmra.mrb[36].mxu1 %vm1023_vm0, %v3797_v42  ;;  %v3860_v41 = vld [vmem:[%s3928_s24 + $0x198] sm:$0xff]  }
  0x63   : > { %3544 = vmatprep.mubr.msk.bf16.mxu0 %vm1023_vm0, %v3798_v43  ;;  %3664 = vmatprep.mubr.msk.bf16.mxu1 %vm1023_vm0, %v3799_v44  ;;  %v3861_v42 = vld [vmem:[%s3928_s24 + $0x378] sm:$0xff]   ;;  %v3862_v43 = vld [vmem:[%s3928_s24 + $0x1a0] sm:$0xff]  }
  0x64   : > { %v3863_v44 = vld [vmem:[%s3928_s24 + $0x380] sm:$0xff]  }
  0x6a   : > { %3545 = vmatmul.mubr.msk.bf16.gmra.mrb[40].mxu0 %vm1023_vm0, %v3800_v45  ;;  %3665 = vmatmul.mubr.msk.bf16.gmra.mrb[40].mxu1 %vm1023_vm0, %v3801_v46  ;;  %v3864_v45 = vld [vmem:[%s3928_s24 + $0x1a8] sm:$0xff]  }
  0x6b   : > { %3548 = vmatprep.mubr.msk.bf16.mxu0 %vm1023_vm0, %v3802_v47  ;;  %3668 = vmatprep.mubr.msk.bf16.mxu1 %vm1023_vm0, %v3803_v48  ;;  %v3865_v46 = vld [vmem:[%s3928_s24 + $0x388] sm:$0xff]   ;;  %v3866_v47 = vld [vmem:[%s3928_s24 + $0x1b0] sm:$0xff]  }
  0x6c   : > { %v3867_v48 = vld [vmem:[%s3928_s24 + $0x390] sm:$0xff]  }
  0x72   : > { %3549 = vmatmul.mubr.msk.bf16.gmra.mrb[44].mxu0 %vm1023_vm0, %v3804_v49  ;;  %3669 = vmatmul.mubr.msk.bf16.gmra.mrb[44].mxu1 %vm1023_vm0, %v3805_v50 }
  0x73   : > { %3552 = vmatprep.mubr.msk.bf16.mxu0 %vm1023_vm0, %v3806_v51  ;;  %3672 = vmatprep.mubr.msk.bf16.mxu1 %vm1023_vm0, %v3807_v52  ;;  %v3868_v52 = vld [vmem:[%s3928_s24 + $0x1b8] sm:$0xff]  }
  0x7a   : > { %3553 = vmatmul.mubr.msk.bf16.gmra.mrb[48].mxu0 %vm1023_vm0, %v3808_v53  ;;  %3673 = vmatmul.mubr.msk.bf16.gmra.mrb[48].mxu1 %vm1023_vm0, %v3809_v54  ;;  %v3869_v53 = vld [vmem:[%s3928_s24 + $0x398] sm:$0xff]  }
  0x7b   : > { %3556 = vmatprep.mubr.msk.bf16.mxu0 %vm1023_vm0, %v3810_v55  ;;  %3676 = vmatprep.mubr.msk.bf16.mxu1 %vm1023_vm0, %v3811_v56 }
  0x82   : > { %3557 = vmatmul.mubr.msk.bf16.gmra.mrb[52].mxu0 %vm1023_vm0, %v3812_v57  ;;  %3677 = vmatmul.mubr.msk.bf16.gmra.mrb[52].mxu1 %vm1023_vm0, %v3813_v58  ;;  %v3870_v57 = vld [vmem:[%s3928_s24 + $0x1c0] sm:$0xff]  }
  0x83   : > { %3560 = vmatprep.mubr.msk.bf16.mxu0 %vm1023_vm0, %v3814_v59  ;;  %3680 = vmatprep.mubr.msk.bf16.mxu1 %vm1023_vm0, %v3815_v60  ;;  %v3871_v58 = vld [vmem:[%s3928_s24 + $0x3a0] sm:$0xff]  }
  0x8a   : > { %3561 = vmatmul.mubr.msk.bf16.gmra.mrb[56].mxu0 %vm1023_vm0, %v3816_v61  ;;  %3681 = vmatmul.mubr.msk.bf16.gmra.mrb[56].mxu1 %vm1023_vm0, %v3817_v62 }
  0x8b   : > { %3564 = vmatprep.mubr.msk.bf16.mxu0 %vm1023_vm0, %v3818_v63  ;;  %3684 = vmatprep.mubr.msk.bf16.mxu1 %vm1023_vm0, %v3819_v0  ;;  %v3872_v0 = vld [vmem:[%s3928_s24 + $0x1c8] sm:$0xff]  }
  0x92   : > { %3565 = vmatmul.mubr.msk.bf16.gmra.mrb[60].mxu0 %vm1023_vm0, %v3820_v1  ;;  %3685 = vmatmul.mubr.msk.bf16.gmra.mrb[60].mxu1 %vm1023_vm0, %v3821_v2  ;;  %v3873_v1 = vld [vmem:[%s3928_s24 + $0x3a8] sm:$0xff]  }
  0x93   : > { %3568 = vmatprep.mubr.msk.bf16.mxu0 %vm1023_vm0, %v3822_v3  ;;  %3688 = vmatprep.mubr.msk.bf16.mxu1 %vm1023_vm0, %v3823_v4 }
  0x9a   : > { %3569 = vmatmul.mubr.msk.bf16.gmra.mrb[64].mxu0 %vm1023_vm0, %v3824_v5  ;;  %3689 = vmatmul.mubr.msk.bf16.gmra.mrb[64].mxu1 %vm1023_vm0, %v3825_v6  ;;  %v3874_v5 = vld [vmem:[%s3928_s24 + $0x1d0] sm:$0xff]  }
  0x9b   : > { %3572 = vmatprep.mubr.msk.bf16.mxu0 %vm1023_vm0, %v3826_v7  ;;  %3692 = vmatprep.mubr.msk.bf16.mxu1 %vm1023_vm0, %v3827_v8 }
  0xa2   : > { %3573 = vmatmul.mubr.msk.bf16.gmra.mrb[68].mxu0 %vm1023_vm0, %v3828_v9  ;;  %3693 = vmatmul.mubr.msk.bf16.gmra.mrb[68].mxu1 %vm1023_vm0, %v3829_v10 }
  0xa3   : > { %3576 = vmatprep.mubr.msk.bf16.mxu0 %vm1023_vm0, %v3830_v11  ;;  %3696 = vmatprep.mubr.msk.bf16.mxu1 %vm1023_vm0, %v3831_v12  ;;  %v3875_v11 = vld [vmem:[%s3928_s24 + $0x1d8] sm:$0xff]  }
  0xaa   : > { %3577 = vmatmul.mubr.msk.bf16.gmra.mrb[72].mxu0 %vm1023_vm0, %v3832_v13  ;;  %3697 = vmatmul.mubr.msk.bf16.gmra.mrb[72].mxu1 %vm1023_vm0, %v3833_v14 }
  0xab   : > { %3580 = vmatprep.mubr.msk.bf16.mxu0 %vm1023_vm0, %v3834_v15  ;;  %3700 = vmatprep.mubr.msk.bf16.mxu1 %vm1023_vm0, %v3835_v16 }
  0xb2   : > { %3581 = vmatmul.mubr.msk.bf16.gmra.mrb[76].mxu0 %vm1023_vm0, %v3836_v17  ;;  %3701 = vmatmul.mubr.msk.bf16.gmra.mrb[76].mxu1 %vm1023_vm0, %v3837_v18 }
  0xb3   : > { %3584 = vmatprep.mubr.msk.bf16.mxu0 %vm1023_vm0, %v3838_v19  ;;  %3704 = vmatprep.mubr.msk.bf16.mxu1 %vm1023_vm0, %v3839_v20 }
  0xba   : > { %3585 = vmatmul.mubr.msk.bf16.gmra.mrb[80].mxu0 %vm1023_vm0, %v3840_v21  ;;  %3705 = vmatmul.mubr.msk.bf16.gmra.mrb[80].mxu1 %vm1023_vm0, %v3841_v22 }
  0xbb   : > { %3588 = vmatprep.mubr.msk.bf16.mxu0 %vm1023_vm0, %v3842_v23  ;;  %3708 = vmatprep.mubr.msk.bf16.mxu1 %vm1023_vm0, %v3843_v24 }
  0xc2   : > { %3589 = vmatmul.mubr.msk.bf16.gmra.mrb[84].mxu0 %vm1023_vm0, %v3844_v25  ;;  %3709 = vmatmul.mubr.msk.bf16.gmra.mrb[84].mxu1 %vm1023_vm0, %v3845_v26 }
  0xc3   : > { %3592 = vmatprep.mubr.msk.bf16.mxu0 %vm1023_vm0, %v3846_v27  ;;  %3712 = vmatprep.mubr.msk.bf16.mxu1 %vm1023_vm0, %v3847_v28 }
  0xca   : > { %3593 = vmatmul.mubr.msk.bf16.gmra.mrb[88].mxu0 %vm1023_vm0, %v3848_v29  ;;  %3713 = vmatmul.mubr.msk.bf16.gmra.mrb[88].mxu1 %vm1023_vm0, %v3849_v30 }
  0xcb   : > { %3596 = vmatprep.mubr.msk.bf16.mxu0 %vm1023_vm0, %v3850_v31  ;;  %3716 = vmatprep.mubr.msk.bf16.mxu1 %vm1023_vm0, %v3851_v32 }
  0xd2   : > { %3597 = vmatmul.mubr.msk.bf16.gmra.mrb[92].mxu0 %vm1023_vm0, %v3852_v33  ;;  %3717 = vmatmul.mubr.msk.bf16.gmra.mrb[92].mxu1 %vm1023_vm0, %v3853_v34 }
  0xd3   : > { %3600 = vmatprep.mubr.msk.bf16.mxu0 %vm1023_vm0, %v3854_v35  ;;  %3720 = vmatprep.mubr.msk.bf16.mxu1 %vm1023_vm0, %v3855_v36 }
  0xda   : > { %3601 = vmatmul.mubr.msk.bf16.gmra.mrb[96].mxu0 %vm1023_vm0, %v3856_v37  ;;  %3721 = vmatmul.mubr.msk.bf16.gmra.mrb[96].mxu1 %vm1023_vm0, %v3857_v38 }
  0xdb   : > { %3604 = vmatprep.mubr.msk.bf16.mxu0 %vm1023_vm0, %v3858_v39  ;;  %3724 = vmatprep.mubr.msk.bf16.mxu1 %vm1023_vm0, %v3859_v40 }
  0xe2   : > { %3605 = vmatmul.mubr.msk.bf16.gmra.mrb[100].mxu0 %vm1023_vm0, %v3860_v41  ;;  %3725 = vmatmul.mubr.msk.bf16.gmra.mrb[100].mxu1 %vm1023_vm0, %v3861_v42 }
  0xe3   : > { %3608 = vmatprep.mubr.msk.bf16.mxu0 %vm1023_vm0, %v3862_v43  ;;  %3728 = vmatprep.mubr.msk.bf16.mxu1 %vm1023_vm0, %v3863_v44 }
  0xea   : > { %3609 = vmatmul.mubr.msk.bf16.gmra.mrb[104].mxu0 %vm1023_vm0, %v3864_v45  ;;  %3729 = vmatmul.mubr.msk.bf16.gmra.mrb[104].mxu1 %vm1023_vm0, %v3865_v46 }
  0xeb   : > { %3612 = vmatprep.mubr.msk.bf16.mxu0 %vm1023_vm0, %v3866_v47  ;;  %3732 = vmatprep.mubr.msk.bf16.mxu1 %vm1023_vm0, %v3867_v48 }
  0xed   : > { %v4150_v49 = vpop.f32.mrb[0].mxu0  ;;  %v4152_v50 = vpop.f32.mrb[0].mxu1 }
  0xee   : > { %v4154_v51 = vpop.f32.mrb[1].mxu0  ;;  %v4158_v54 = vpop.f32.mrb[1].mxu1 }
  0xef   : > { %4731 = vst [vmem:[#allocation2_spill] sm:$0xff] %v4154_v51  ;;  %v4160_v55 = vpop.f32.mrb[2].mxu0  ;;  %v4162_v56 = vpop.f32.mrb[2].mxu1 }
  0xf0   : > { %v4166_v59 = vpop.f32.mrb[3].mxu0  ;;  %v4168_v60 = vpop.f32.mrb[3].mxu1 }
  0xf1   : > { %4732 = vst [vmem:[#allocation3_spill] sm:$0xff] %v4166_v59 }
  0xf2   : > { %3613 = vmatmul.mubr.msk.bf16.gmra.mrb[108].mxu0 %vm1023_vm0, %v3868_v52  ;;  %3733 = vmatmul.mubr.msk.bf16.gmra.mrb[108].mxu1 %vm1023_vm0, %v3869_v53 }
  0xf3   : > { %3616 = vmatprep.mubr.msk.bf16.mxu0 %vm1023_vm0, %v3870_v57  ;;  %3736 = vmatprep.mubr.msk.bf16.mxu1 %vm1023_vm0, %v3871_v58 }
  0xf5   : > { %v4174_v61 = vpop.f32.mrb[4].mxu0  ;;  %v4176_v62 = vpop.f32.mrb[4].mxu1 }
  0xf6   : > { %v4178_v63 = vpop.f32.mrb[5].mxu0  ;;  %v4182_v2 = vpop.f32.mrb[5].mxu1 }
  0xf7   : > { %v4184_v3 = vpop.f32.mrb[6].mxu0  ;;  %v4186_v4 = vpop.f32.mrb[6].mxu1 }
  0xf8   : > { %v4189_v6 = vpop.f32.mrb[7].mxu0  ;;  %v4191_v7 = vpop.f32.mrb[7].mxu1 }
  0xfa   : > { %3617 = vmatmul.mubr.msk.bf16.gmra.mrb[112].mxu0 %vm1023_vm0, %v3872_v0  ;;  %3737 = vmatmul.mubr.msk.bf16.gmra.mrb[112].mxu1 %vm1023_vm0, %v3873_v1 }
  0xfb   : > { %3620 = vmatprep.mubr.msk.bf16.mxu0 %vm1023_vm0, %v3874_v5 }
  0xfd   : > { %v4196_v8 = vpop.f32.mrb[8].mxu0  ;;  %v4198_v9 = vpop.f32.mrb[8].mxu1 }
  0xfe   : > { %v4200_v10 = vpop.f32.mrb[9].mxu0  ;;  %v4203_v12 = vpop.f32.mrb[9].mxu1 }
  0xff   : > { %v4205_v13 = vpop.f32.mrb[10].mxu0  ;;  %v4207_v14 = vpop.f32.mrb[10].mxu1 }
 0x100   : > { %v4209_v15 = vpop.f32.mrb[11].mxu0  ;;  %v4211_v16 = vpop.f32.mrb[11].mxu1 }
 0x102   : > { %3621 = vmatmul.mubr.msk.bf16.gmra.mrb[116].mxu0 %vm1023_vm0, %v3875_v11 }
 0x105   : > { %v4214_v17 = vpop.f32.mrb[12].mxu0  ;;  %v4216_v18 = vpop.f32.mrb[12].mxu1 }
 0x106   : > { %v4218_v19 = vpop.f32.mrb[13].mxu0  ;;  %v4220_v20 = vpop.f32.mrb[13].mxu1 }
 0x107   : > { %v4222_v21 = vpop.f32.mrb[14].mxu0  ;;  %v4224_v22 = vpop.f32.mrb[14].mxu1 }
 0x108   : > { %v4226_v23 = vpop.f32.mrb[15].mxu0  ;;  %v4228_v24 = vpop.f32.mrb[15].mxu1 }
 0x10d   : > { %v4230_v25 = vpop.f32.mrb[16].mxu0  ;;  %v4232_v26 = vpop.f32.mrb[16].mxu1 }
 0x10e   : > { %v4234_v27 = vpop.f32.mrb[17].mxu0  ;;  %v4236_v28 = vpop.f32.mrb[17].mxu1 }
 0x10f   : > { %v4238_v29 = vpop.f32.mrb[18].mxu0  ;;  %v4240_v30 = vpop.f32.mrb[18].mxu1 }
 0x110   : > { %v4242_v31 = vpop.f32.mrb[19].mxu0  ;;  %v4244_v32 = vpop.f32.mrb[19].mxu1 }
 0x115   : > { %v4246_v33 = vpop.f32.mrb[20].mxu0  ;;  %v4248_v34 = vpop.f32.mrb[20].mxu1 }
 0x116   : > { %v4250_v35 = vpop.f32.mrb[21].mxu0  ;;  %v4252_v36 = vpop.f32.mrb[21].mxu1 }
 0x117   : > { %v4254_v37 = vpop.f32.mrb[22].mxu0  ;;  %v4256_v38 = vpop.f32.mrb[22].mxu1 }
 0x118   : > { %v4258_v39 = vpop.f32.mrb[23].mxu0  ;;  %v4260_v40 = vpop.f32.mrb[23].mxu1 }
 0x11d   : > { %v4262_v41 = vpop.f32.mrb[24].mxu0  ;;  %v4264_v42 = vpop.f32.mrb[24].mxu1 }
 0x11e   : > { %4733 = vst [vmem:[#allocation4_spill] sm:$0xff] %v4262_v41  ;;  %4734 = vst [vmem:[#allocation5_spill] sm:$0xff] %v4264_v42  ;;  %v4266_v43 = vpop.f32.mrb[25].mxu0  ;;  %v4268_v44 = vpop.f32.mrb[25].mxu1 }
 0x11f   : > { %v4270_v45 = vpop.f32.mrb[26].mxu0  ;;  %v4272_v46 = vpop.f32.mrb[26].mxu1 }
 0x120   : > { %4735 = vst [vmem:[#allocation6_spill] sm:$0xff] %v4270_v45  ;;  %4736 = vst [vmem:[#allocation7_spill] sm:$0xff] %v4272_v46  ;;  %v4274_v47 = vpop.f32.mrb[27].mxu0  ;;  %v4276_v48 = vpop.f32.mrb[27].mxu1 }
 0x121   : > { %4737 = vst [vmem:[#allocation8_spill] sm:$0xff] %v4274_v47  ;;  %4738 = vst [vmem:[#allocation9_spill] sm:$0xff] %v4276_v48 }
 0x125   : > { %v4278_v52 = vpop.f32.mrb[28].mxu0  ;;  %v4280_v53 = vpop.f32.mrb[28].mxu1 }
 0x126   : > { %4739 = vst [vmem:[#allocation10_spill] sm:$0xff] %v4278_v52  ;;  %4740 = vst [vmem:[#allocation11_spill] sm:$0xff] %v4280_v53  ;;  %v4282_v57 = vpop.f32.mrb[29].mxu0  ;;  %v4284_v58 = vpop.f32.mrb[29].mxu1 }
 0x127   : > { %4741 = vst [vmem:[#allocation12_spill] sm:$0xff] %v4282_v57  ;;  %4742 = vst [vmem:[#allocation13_spill] sm:$0xff] %v4284_v58  ;;  %v4286_v0 = vpop.f32.mrb[30].mxu0  ;;  %v4288_v1 = vpop.f32.mrb[30].mxu1 }
 0x128   : > { %4743 = vst [vmem:[#allocation14_spill] sm:$0xff] %v4286_v0  ;;  %4744 = vst [vmem:[#allocation15_spill] sm:$0xff] %v4288_v1  ;;  %v4290_v5 = vpop.f32.mrb[31].mxu0  ;;  %v4292_v11 = vpop.f32.mrb[31].mxu1 }
 0x129   : > { %4745 = vst [vmem:[#allocation16_spill] sm:$0xff] %v4290_v5  ;;  %4746 = vst [vmem:[#allocation17_spill] sm:$0xff] %v4292_v11 }
 0x12d   : > { %v4294_v42 = vpop.f32.mrb[32].mxu0  ;;  %v4296_v41 = vpop.f32.mrb[32].mxu1 }
 0x12e   : > { %4747 = vst [vmem:[#allocation18_spill] sm:$0xff] %v4294_v42  ;;  %4748 = vst [vmem:[#allocation19_spill] sm:$0xff] %v4296_v41  ;;  %v4298_v48 = vpop.f32.mrb[33].mxu0  ;;  %v4300_v52 = vpop.f32.mrb[33].mxu1 }
 0x12f   : > { %4749 = vst [vmem:[#allocation20_spill] sm:$0xff] %v4298_v48  ;;  %4750 = vst [vmem:[#allocation21_spill] sm:$0xff] %v4300_v52  ;;  %v4302_v53 = vpop.f32.mrb[34].mxu0  ;;  %v4304_v57 = vpop.f32.mrb[34].mxu1 }
 0x130   : > { %4751 = vst [vmem:[#allocation22_spill] sm:$0xff] %v4302_v53  ;;  %4752 = vst [vmem:[#allocation23_spill] sm:$0xff] %v4304_v57  ;;  %v4306_v58 = vpop.f32.mrb[35].mxu0  ;;  %v4308_v0 = vpop.f32.mrb[35].mxu1 }
 0x131   : > { %4753 = vst [vmem:[#allocation24_spill] sm:$0xff] %v4306_v58  ;;  %4754 = vst [vmem:[#allocation25_spill] sm:$0xff] %v4308_v0 }
 0x135   : > { %v4310_v1 = vpop.f32.mrb[36].mxu0  ;;  %v4312_v5 = vpop.f32.mrb[36].mxu1 }
 0x136   : > { %4755 = vst [vmem:[#allocation26_spill] sm:$0xff] %v4310_v1  ;;  %4756 = vst [vmem:[#allocation27_spill] sm:$0xff] %v4312_v5  ;;  %v4314_v11 = vpop.f32.mrb[37].mxu0  ;;  %v4316_v42 = vpop.f32.mrb[37].mxu1 }
 0x137   : > { %4757 = vst [vmem:[#allocation28_spill] sm:$0xff] %v4314_v11  ;;  %4758 = vst [vmem:[#allocation29_spill] sm:$0xff] %v4316_v42  ;;  %v4318_v41 = vpop.f32.mrb[38].mxu0  ;;  %v4320_v48 = vpop.f32.mrb[38].mxu1 }
 0x138   : > { %4759 = vst [vmem:[#allocation30_spill] sm:$0xff] %v4318_v41  ;;  %4760 = vst [vmem:[#allocation31_spill] sm:$0xff] %v4320_v48  ;;  %v4322_v52 = vpop.f32.mrb[39].mxu0  ;;  %v4324_v53 = vpop.f32.mrb[39].mxu1 }
 0x139   : > { %4761 = vst [vmem:[#allocation32_spill] sm:$0xff] %v4322_v52  ;;  %4762 = vst [vmem:[#allocation33_spill] sm:$0xff] %v4324_v53 }
 0x13d   : > { %v4326_v57 = vpop.f32.mrb[40].mxu0  ;;  %v4328_v58 = vpop.f32.mrb[40].mxu1 }
 0x13e   : > { %4763 = vst [vmem:[#allocation34_spill] sm:$0xff] %v4326_v57  ;;  %4764 = vst [vmem:[#allocation35_spill] sm:$0xff] %v4328_v58  ;;  %v4330_v0 = vpop.f32.mrb[41].mxu0  ;;  %v4332_v1 = vpop.f32.mrb[41].mxu1 }
 0x13f   : > { %4765 = vst [vmem:[#allocation36_spill] sm:$0xff] %v4330_v0  ;;  %4766 = vst [vmem:[#allocation37_spill] sm:$0xff] %v4332_v1  ;;  %v4334_v5 = vpop.f32.mrb[42].mxu0  ;;  %v4336_v11 = vpop.f32.mrb[42].mxu1 }
 0x140   : > { %4767 = vst [vmem:[#allocation38_spill] sm:$0xff] %v4334_v5  ;;  %4768 = vst [vmem:[#allocation39_spill] sm:$0xff] %v4336_v11  ;;  %v4338_v42 = vpop.f32.mrb[43].mxu0  ;;  %v4340_v41 = vpop.f32.mrb[43].mxu1 }
 0x141   : > { %4769 = vst [vmem:[#allocation40_spill] sm:$0xff] %v4338_v42  ;;  %4770 = vst [vmem:[#allocation41_spill] sm:$0xff] %v4340_v41 }
 0x145   : > { %v4342_v48 = vpop.f32.mrb[44].mxu0  ;;  %v4344_v52 = vpop.f32.mrb[44].mxu1 }
 0x146   : > { %4771 = vst [vmem:[#allocation42_spill] sm:$0xff] %v4342_v48  ;;  %4772 = vst [vmem:[#allocation43_spill] sm:$0xff] %v4344_v52  ;;  %v4346_v53 = vpop.f32.mrb[45].mxu0  ;;  %v4348_v57 = vpop.f32.mrb[45].mxu1 }
 0x147   : > { %4773 = vst [vmem:[#allocation44_spill] sm:$0xff] %v4346_v53  ;;  %4774 = vst [vmem:[#allocation45_spill] sm:$0xff] %v4348_v57  ;;  %v4350_v58 = vpop.f32.mrb[46].mxu0  ;;  %v4352_v0 = vpop.f32.mrb[46].mxu1 }
 0x148   : > { %4775 = vst [vmem:[#allocation46_spill] sm:$0xff] %v4350_v58  ;;  %4776 = vst [vmem:[#allocation47_spill] sm:$0xff] %v4352_v0  ;;  %v4354_v1 = vpop.f32.mrb[47].mxu0  ;;  %v4356_v5 = vpop.f32.mrb[47].mxu1 }
 0x149   : > { %4777 = vst [vmem:[#allocation48_spill] sm:$0xff] %v4354_v1  ;;  %4778 = vst [vmem:[#allocation49_spill] sm:$0xff] %v4356_v5 }
 0x14d   : > { %v4358_v11 = vpop.f32.mrb[48].mxu0  ;;  %v4360_v42 = vpop.f32.mrb[48].mxu1 }
 0x14e   : > { %4779 = vst [vmem:[#allocation50_spill] sm:$0xff] %v4358_v11  ;;  %4780 = vst [vmem:[#allocation51_spill] sm:$0xff] %v4360_v42  ;;  %v4362_v41 = vpop.f32.mrb[49].mxu0  ;;  %v4364_v48 = vpop.f32.mrb[49].mxu1 }
 0x14f   : > { %4781 = vst [vmem:[#allocation52_spill] sm:$0xff] %v4362_v41  ;;  %4782 = vst [vmem:[#allocation53_spill] sm:$0xff] %v4364_v48  ;;  %v4366_v52 = vpop.f32.mrb[50].mxu0  ;;  %v4368_v53 = vpop.f32.mrb[50].mxu1 }
 0x150   : > { %4783 = vst [vmem:[#allocation54_spill] sm:$0xff] %v4366_v52  ;;  %4784 = vst [vmem:[#allocation55_spill] sm:$0xff] %v4368_v53  ;;  %v4370_v57 = vpop.f32.mrb[51].mxu0  ;;  %v4372_v0 = vpop.f32.mrb[51].mxu1 }
 0x151   : > { %4785 = vst [vmem:[#allocation56_spill] sm:$0xff] %v4370_v57  ;;  %4786 = vst [vmem:[#allocation57_spill] sm:$0xff] %v4372_v0 }
 0x155   : > { %v4374_v1 = vpop.f32.mrb[52].mxu0  ;;  %v4376_v5 = vpop.f32.mrb[52].mxu1 }
 0x156   : > { %4787 = vst [vmem:[#allocation58_spill] sm:$0xff] %v4374_v1  ;;  %4788 = vst [vmem:[#allocation59_spill] sm:$0xff] %v4376_v5  ;;  %v4378_v11 = vpop.f32.mrb[53].mxu0  ;;  %v4380_v42 = vpop.f32.mrb[53].mxu1 }
 0x157   : > { %4789 = vst [vmem:[#allocation60_spill] sm:$0xff] %v4378_v11  ;;  %4790 = vst [vmem:[#allocation61_spill] sm:$0xff] %v4380_v42  ;;  %v4382_v41 = vpop.f32.mrb[54].mxu0  ;;  %v4384_v48 = vpop.f32.mrb[54].mxu1 }
 0x158   : > { %4791 = vst [vmem:[#allocation62_spill] sm:$0xff] %v4382_v41  ;;  %4792 = vst [vmem:[#allocation63_spill] sm:$0xff] %v4384_v48  ;;  %v4386_v52 = vpop.f32.mrb[55].mxu0  ;;  %v4388_v53 = vpop.f32.mrb[55].mxu1 }
 0x159   : > { %4793 = vst [vmem:[#allocation64_spill] sm:$0xff] %v4386_v52  ;;  %4794 = vst [vmem:[#allocation65_spill] sm:$0xff] %v4388_v53 }
 0x15d   : > { %v4390_v57 = vpop.f32.mrb[56].mxu0  ;;  %v4392_v58 = vpop.f32.mrb[56].mxu1 }
 0x15e   : > { %4795 = vst [vmem:[#allocation66_spill] sm:$0xff] %v4390_v57  ;;  %4796 = vst [vmem:[#allocation67_spill] sm:$0xff] %v4392_v58  ;;  %v4394_v0 = vpop.f32.mrb[57].mxu0  ;;  %v4396_v1 = vpop.f32.mrb[57].mxu1 }
 0x15f   : > { %4797 = vst [vmem:[#allocation68_spill] sm:$0xff] %v4394_v0  ;;  %4798 = vst [vmem:[#allocation69_spill] sm:$0xff] %v4396_v1  ;;  %v4398_v5 = vpop.f32.mrb[58].mxu0  ;;  %v3683_v11 = vpop.f32.mrb[58].mxu1 }
 0x160   : > { %4799 = vst [vmem:[#allocation70_spill] sm:$0xff] %v4398_v5  ;;  %v2416_v48 = vmax.f32 %v4158_v54, %v3683_v11  ;;  %v4404_v52 = vpop.f32.mrb[59].mxu0  ;;  %v4406_v53 = vpop.f32.mrb[59].mxu1  ;;  %v4418_v5 = vld [vmem:[%s4725_s2] ss:$0 sm:$0xff] }
 0x161   : > { %4800 = vst [vmem:[#allocation71_spill] sm:$0xff] %v4404_v52  ;;  %4801 = vst [vmem:[#allocation72_spill] sm:$0xff] %v4406_v53 }
 0x165   : > { %v3566_v57 = vpop.f32.mrb[60].mxu0  ;;  %v3686_v58 = vpop.f32.mrb[60].mxu1 }
 0x166   : > { %v2358_v0 = vmax.f32 %v4160_v55, %v3566_v57  ;;  %v2419_v1 = vmax.f32 %v4162_v56, %v3686_v58  ;;  %v4410_v42 = vpop.f32.mrb[61].mxu0  ;;  %v2132_v47 = vpop.f32.mrb[61].mxu1 }
 0x167   : > { %4802 = vst [vmem:[#allocation73_spill] sm:$0xff] %v4410_v42  ;;  %v2417_v54 = vmax.f32 %v4168_v60, %v2132_v47  ;;  %v3567_v11 = vpop.f32.mrb[62].mxu0  ;;  %v3687_v41 = vpop.f32.mrb[62].mxu1 }
 0x168   : > { %v2359_v55 = vmax.f32 %v4178_v63, %v3567_v11  ;;  %v2420_v56 = vmax.f32 %v4182_v2, %v3687_v41  ;;  %v1655_v57 = vpop.f32.mrb[63].mxu0  ;;  %v2135_v58 = vpop.f32.mrb[63].mxu1 }
 0x169   : > { %v2476_v51 = vmax.f32 %v2358_v0, %v2417_v54  ;;  %v2357_v52 = vmax.f32 %v4150_v49, %v1655_v57  ;;  %v2418_v46 = vmax.f32 %v4152_v50, %v2135_v58 }
 0x16b   : > { %v2542_v60 = vadd.f32 %v4418_v5, %v2476_v51  ;;  %v2475_v47 = vmax.f32 %v2357_v52, %v2416_v48  ;;  %v2477_v42 = vmax.f32 %v2359_v55, %v2418_v46 }
 0x16d   : > { %v2601_v59 = vmax.f32 %v2542_v60, 0.0  ;;  %v2541_v53 = vadd.f32 %v4418_v5, %v2475_v47  ;;  %v2543_v45 = vadd.f32 %v4418_v5, %v2477_v42  ;;  %v3570_v63 = vpop.f32.mrb[64].mxu0  ;;  %v3690_v11 = vpop.f32.mrb[64].mxu1 }
 0x16e   : > { %v2362_v49 = vmax.f32 %v4184_v3, %v3570_v63  ;;  %v2423_v50 = vmax.f32 %v4186_v4, %v3690_v11  ;;  %v1668_v51 = vpop.f32.mrb[65].mxu0  ;;  %v2148_v2 = vpop.f32.mrb[65].mxu1 }
 0x16f   : > { %v3321_v41 = vpack.c.bf16 %v2601_v59, %v2601_v59  ;;  %v2600_v46 = vmax.f32 %v2541_v53, 0.0  ;;  %v2602_v48 = vmax.f32 %v2543_v45, 0.0  ;;  %v2360_v42 = vmax.f32 %v4189_v6, %v1668_v51  ;;  %v3571_v52 = vpop.f32.mrb[66].mxu0  ;;  %v3691_v0 = vpop.f32.mrb[66].mxu1 }
 0x170   : > { %v2421_v54 = vmax.f32 %v4191_v7, %v2148_v2  ;;  %v2363_v55 = vmax.f32 %v4200_v10, %v3571_v52  ;;  %v2424_v57 = vmax.f32 %v4203_v12, %v3691_v0  ;;  %v1671_v3 = vpop.f32.mrb[67].mxu0  ;;  %v2151_v58 = vpop.f32.mrb[67].mxu1 }
 0x171   : > { %2898 = vst.msk [vmem:[%s4430_s4 + $0xc] sm:$0xf] %vm2894_vm1, %v3321_v41  ;;  %v3320_v4 = vpack.c.bf16 %v2600_v46, %v2600_v46  ;;  %v3322_v59 = vpack.c.bf16 %v2602_v48, %v2602_v48  ;;  %v2478_v53 = vmax.f32 %v2360_v42, %v2419_v1  ;;  %v2361_v45 = vmax.f32 %v4174_v61, %v1671_v3 }
 0x172   : > { %v2480_v60 = vmax.f32 %v2362_v49, %v2421_v54  ;;  %v2422_v6 = vmax.f32 %v4176_v62, %v2151_v58 }
 0x173   : > { %2897 = vst.msk [vmem:[%s4430_s4 + $0x8] sm:$0xf] %vm2894_vm1, %v3320_v4  ;;  %2899 = vst.msk [vmem:[%s4430_s4 + $0x10] sm:$0xf] %vm2894_vm1, %v3322_v59  ;;  %v2544_v7 = vadd.f32 %v4418_v5, %v2478_v53  ;;  %v2479_v10 = vmax.f32 %v2361_v45, %v2420_v56 }
 0x174   : > { %v2546_v12 = vadd.f32 %v4418_v5, %v2480_v60  ;;  %v2481_v47 = vmax.f32 %v2363_v55, %v2422_v6 }
 0x175   : > { %v2603_v63 = vmax.f32 %v2544_v7, 0.0  ;;  %v2545_v11 = vadd.f32 %v4418_v5, %v2479_v10  ;;  %v3574_v51 = vpop.f32.mrb[68].mxu0  ;;  %v3694_v1 = vpop.f32.mrb[68].mxu1 }
 0x176   : > { %v2605_v2 = vmax.f32 %v2546_v12, 0.0  ;;  %v2547_v61 = vadd.f32 %v4418_v5, %v2481_v47  ;;  %v2366_v62 = vmax.f32 %v4205_v13, %v3574_v51  ;;  %v2427_v49 = vmax.f32 %v4207_v14, %v3694_v1  ;;  %v1684_v41 = vpop.f32.mrb[69].mxu0  ;;  %v2164_v46 = vpop.f32.mrb[69].mxu1 }
 0x177   : > { %v3323_v48 = vpack.c.bf16 %v2603_v63, %v2603_v63  ;;  %v2604_v56 = vmax.f32 %v2545_v11, 0.0  ;;  %v2364_v42 = vmax.f32 %v4209_v15, %v1684_v41  ;;  %v2425_v52 = vmax.f32 %v4211_v16, %v2164_v46  ;;  %v3575_v0 = vpop.f32.mrb[70].mxu0  ;;  %v3695_v54 = vpop.f32.mrb[70].mxu1 }
 0x178   : > { %v3325_v55 = vpack.c.bf16 %v2605_v2, %v2605_v2  ;;  %v2606_v3 = vmax.f32 %v2547_v61, 0.0  ;;  %v2367_v58 = vmax.f32 %v4218_v19, %v3575_v0  ;;  %v2428_v13 = vmax.f32 %v4220_v20, %v3695_v54  ;;  %v1687_v14 = vpop.f32.mrb[71].mxu0  ;;  %v2167_v4 = vpop.f32.mrb[71].mxu1 }
 0x179   : > { %2900 = vst.msk [vmem:[%s4430_s4 + $0x14] sm:$0xf] %vm2894_vm1, %v3323_v48  ;;  %v3324_v59 = vpack.c.bf16 %v2604_v56, %v2604_v56  ;;  %v2482_v53 = vmax.f32 %v2364_v42, %v2423_v50  ;;  %v2484_v45 = vmax.f32 %v2366_v62, %v2425_v52  ;;  %v2365_v15 = vmax.f32 %v4196_v8, %v1687_v14 }
 0x17a   : > { %2902 = vst.msk [vmem:[%s4430_s4 + $0x1c] sm:$0xf] %vm2894_vm1, %v3325_v55  ;;  %v3326_v16 = vpack.c.bf16 %v2606_v3, %v2606_v3  ;;  %v2426_v60 = vmax.f32 %v4198_v9, %v2167_v4 }
 0x17b   : > { %2901 = vst.msk [vmem:[%s4430_s4 + $0x18] sm:$0xf] %vm2894_vm1, %v3324_v59  ;;  %v2548_v19 = vadd.f32 %v4418_v5, %v2482_v53  ;;  %v2550_v20 = vadd.f32 %v4418_v5, %v2484_v45  ;;  %v2483_v6 = vmax.f32 %v2365_v15, %v2424_v57 }
 0x17c   : > { %2903 = vst.msk [vmem:[%s4430_s4 + $0x20] sm:$0xf] %vm2894_vm1, %v3326_v16  ;;  %v2485_v7 = vmax.f32 %v2367_v58, %v2426_v60 }
 0x17d   : > { %v2607_v10 = vmax.f32 %v2548_v19, 0.0  ;;  %v2609_v50 = vmax.f32 %v2550_v20, 0.0  ;;  %v2549_v12 = vadd.f32 %v4418_v5, %v2483_v6  ;;  %v3578_v8 = vpop.f32.mrb[72].mxu0  ;;  %v3698_v47 = vpop.f32.mrb[72].mxu1 }
 0x17e   : > { %v2551_v63 = vadd.f32 %v4418_v5, %v2485_v7  ;;  %v2370_v9 = vmax.f32 %v4222_v21, %v3578_v8  ;;  %v2431_v11 = vmax.f32 %v4224_v22, %v3698_v47  ;;  %v1700_v51 = vpop.f32.mrb[73].mxu0  ;;  %v2180_v1 = vpop.f32.mrb[73].mxu1 }
 0x17f   : > { %v3327_v57 = vpack.c.bf16 %v2607_v10, %v2607_v10  ;;  %v3329_v2 = vpack.c.bf16 %v2609_v50, %v2609_v50  ;;  %v2608_v61 = vmax.f32 %v2549_v12, 0.0  ;;  %v2368_v62 = vmax.f32 %v4226_v23, %v1700_v51  ;;  %v3579_v41 = vpop.f32.mrb[74].mxu0  ;;  %v3699_v46 = vpop.f32.mrb[74].mxu1 }
 0x180   : > { %v2610_v48 = vmax.f32 %v2551_v63, 0.0  ;;  %v2429_v56 = vmax.f32 %v4228_v24, %v2180_v1  ;;  %v2371_v42 = vmax.f32 %v4234_v27, %v3579_v41  ;;  %v2432_v21 = vmax.f32 %v4236_v28, %v3699_v46  ;;  %v1703_v22 = vpop.f32.mrb[75].mxu0  ;;  %v2183_v52 = vpop.f32.mrb[75].mxu1 }
 0x181   : > { %2904 = vst.msk [vmem:[%s4430_s4 + $0x24] sm:$0xf] %vm2894_vm1, %v3327_v57  ;;  %2906 = vst.msk [vmem:[%s4430_s4 + $0x2c] sm:$0xf] %vm2894_vm1, %v3329_v2  ;;  %v3328_v0 = vpack.c.bf16 %v2608_v61, %v2608_v61  ;;  %v2486_v54 = vmax.f32 %v2368_v62, %v2427_v49  ;;  %v2369_v23 = vmax.f32 %v4214_v17, %v1703_v22 }
 0x182   : > { %v2430_v55 = vmax.f32 %v4216_v18, %v2183_v52  ;;  %v3330_v3 = vpack.c.bf16 %v2610_v48, %v2610_v48  ;;  %v2488_v58 = vmax.f32 %v2370_v9, %v2429_v56 }
 0x183   : > { %2905 = vst.msk [vmem:[%s4430_s4 + $0x28] sm:$0xf] %vm2894_vm1, %v3328_v0  ;;  %v2552_v24 = vadd.f32 %v4418_v5, %v2486_v54  ;;  %v2487_v27 = vmax.f32 %v2369_v23, %v2428_v13 }
 0x184   : > { %v2489_v28 = vmax.f32 %v2371_v42, %v2430_v55  ;;  %2907 = vst.msk [vmem:[%s4430_s4 + $0x30] sm:$0xf] %vm2894_vm1, %v3330_v3  ;;  %v2554_v14 = vadd.f32 %v4418_v5, %v2488_v58 }
 0x185   : > { %v2611_v4 = vmax.f32 %v2552_v24, 0.0  ;;  %v2553_v59 = vadd.f32 %v4418_v5, %v2487_v27  ;;  %v3582_v17 = vpop.f32.mrb[76].mxu0  ;;  %v3702_v53 = vpop.f32.mrb[76].mxu1 }
 0x186   : > { %v2555_v49 = vadd.f32 %v4418_v5, %v2489_v28  ;;  %v2613_v18 = vmax.f32 %v2554_v14, 0.0  ;;  %v2374_v45 = vmax.f32 %v4238_v29, %v3582_v17  ;;  %v2435_v15 = vmax.f32 %v4240_v30, %v3702_v53  ;;  %v1716_v16 = vpop.f32.mrb[77].mxu0  ;;  %v2196_v13 = vpop.f32.mrb[77].mxu1 }
 0x187   : > { %v3331_v60 = vpack.c.bf16 %v2611_v4, %v2611_v4  ;;  %v2612_v19 = vmax.f32 %v2553_v59, 0.0  ;;  %v2372_v6 = vmax.f32 %v4242_v31, %v1716_v16  ;;  %v3583_v7 = vpop.f32.mrb[78].mxu0  ;;  %v3703_v10 = vpop.f32.mrb[78].mxu1  ;;  %v2433_v12 = vmax.f32 %v4244_v32, %v2196_v13  ;;  %v4803_v16 = vld [vmem:[#allocation6_spill] sm:$0xff]  ;;  %v4804_v13 = vld [vmem:[#allocation7_spill] sm:$0xff] }
 0x188   : > { %v2614_v20 = vmax.f32 %v2555_v49, 0.0  ;;  %v3333_v50 = vpack.c.bf16 %v2613_v18, %v2613_v18  ;;  %v2375_v29 = vmax.f32 %v4250_v35, %v3583_v7  ;;  %v2436_v8 = vmax.f32 %v4252_v36, %v3703_v10  ;;  %v1719_v30 = vpop.f32.mrb[79].mxu0  ;;  %v2199_v47 = vpop.f32.mrb[79].mxu1 }
 0x189   : > { %2908 = vst.msk [vmem:[%s4430_s4 + $0x34] sm:$0xf] %vm2894_vm1, %v3331_v60  ;;  %v3332_v63 = vpack.c.bf16 %v2612_v19, %v2612_v19  ;;  %v2490_v51 = vmax.f32 %v2372_v6, %v2431_v11  ;;  %v2373_v31 = vmax.f32 %v4230_v25, %v1719_v30  ;;  %v2492_v1 = vmax.f32 %v2374_v45, %v2433_v12 }
 0x18a   : > { %v3334_v9 = vpack.c.bf16 %v2614_v20, %v2614_v20  ;;  %2910 = vst.msk [vmem:[%s4430_s4 + $0x3c] sm:$0xf] %vm2894_vm1, %v3333_v50  ;;  %v2434_v57 = vmax.f32 %v4232_v26, %v2199_v47  ;;  %v4805_v50 = vld [vmem:[#allocation8_spill] sm:$0xff]  ;;  %v4806_v47 = vld [vmem:[#allocation9_spill] sm:$0xff] }
 0x18b   : > { %2909 = vst.msk [vmem:[%s4430_s4 + $0x38] sm:$0xf] %vm2894_vm1, %v3332_v63  ;;  %v2556_v32 = vadd.f32 %v4418_v5, %v2490_v51  ;;  %v2491_v35 = vmax.f32 %v2373_v31, %v2432_v21  ;;  %v2558_v36 = vadd.f32 %v4418_v5, %v2492_v1  ;;  %v4808_v31 = vld [vmem:[#allocation13_spill] sm:$0xff] }
 0x18c   : > { %2911 = vst.msk [vmem:[%s4430_s4 + $0x40] sm:$0xf] %vm2894_vm1, %v3334_v9  ;;  %v2493_v2 = vmax.f32 %v2375_v29, %v2434_v57  ;;  %v4807_v9 = vld [vmem:[#allocation12_spill] sm:$0xff] }
 0x18d   : > { %v2615_v61 = vmax.f32 %v2556_v32, 0.0  ;;  %v2557_v11 = vadd.f32 %v4418_v5, %v2491_v35  ;;  %v3586_v62 = vpop.f32.mrb[80].mxu0  ;;  %v3706_v25 = vpop.f32.mrb[80].mxu1  ;;  %v2617_v41 = vmax.f32 %v2558_v36, 0.0 }
 0x18e   : > { %v2559_v46 = vadd.f32 %v4418_v5, %v2493_v2  ;;  %v2378_v26 = vmax.f32 %v4254_v37, %v3586_v62  ;;  %v2439_v48 = vmax.f32 %v4256_v38, %v3706_v25  ;;  %v1732_v56 = vpop.f32.mrb[81].mxu0  ;;  %v2212_v42 = vpop.f32.mrb[81].mxu1  ;;  %v4809_v2 = vld [vmem:[#allocation4_spill] sm:$0xff] }
 0x18f   : > { %v3335_v22 = vpack.c.bf16 %v2615_v61, %v2615_v61  ;;  %v2616_v21 = vmax.f32 %v2557_v11, 0.0  ;;  %v2376_v52 = vmax.f32 %v4258_v39, %v1732_v56  ;;  %v2437_v0 = vmax.f32 %v4260_v40, %v2212_v42  ;;  %v3587_v54 = vpop.f32.mrb[82].mxu0  ;;  %v3707_v23 = vpop.f32.mrb[82].mxu1  ;;  %v4810_v11 = vld [vmem:[#allocation5_spill] sm:$0xff] }
 0x190   : > { %v3337_v55 = vpack.c.bf16 %v2617_v41, %v2617_v41  ;;  %v2618_v3 = vmax.f32 %v2559_v46, 0.0  ;;  %v2379_v58 = vmax.f32 %v4266_v43, %v3587_v54  ;;  %v2440_v37 = vmax.f32 %v4268_v44, %v3707_v23  ;;  %v1735_v38 = vpop.f32.mrb[83].mxu0  ;;  %v2215_v24 = vpop.f32.mrb[83].mxu1  ;;  %v4811_v23 = vld [vmem:[#allocation14_spill] sm:$0xff] }
 0x191   : > { %2912 = vst.msk [vmem:[%s4430_s4 + $0x44] sm:$0xf] %vm2894_vm1, %v3335_v22  ;;  %v3336_v27 = vpack.c.bf16 %v2616_v21, %v2616_v21  ;;  %v2494_v28 = vmax.f32 %v2376_v52, %v2435_v15  ;;  %v2496_v14 = vmax.f32 %v2378_v26, %v2437_v0  ;;  %v2377_v39 = vmax.f32 %v4246_v33, %v1735_v38 }
 0x192   : > { %2914 = vst.msk [vmem:[%s4430_s4 + $0x4c] sm:$0xf] %vm2894_vm1, %v3337_v55  ;;  %v3338_v40 = vpack.c.bf16 %v2618_v3, %v2618_v3  ;;  %v2438_v4 = vmax.f32 %v4248_v34, %v2215_v24  ;;  %v4812_v3 = vld [vmem:[#allocation15_spill] sm:$0xff] }
 0x193   : > { %2913 = vst.msk [vmem:[%s4430_s4 + $0x48] sm:$0xf] %vm2894_vm1, %v3336_v27  ;;  %v2560_v43 = vadd.f32 %v4418_v5, %v2494_v28  ;;  %v2562_v44 = vadd.f32 %v4418_v5, %v2496_v14  ;;  %v2495_v59 = vmax.f32 %v2377_v39, %v2436_v8  ;;  %v4813_v14 = vld [vmem:[#allocation16_spill] sm:$0xff] }
 0x194   : > { %2915 = vst.msk [vmem:[%s4430_s4 + $0x50] sm:$0xf] %vm2894_vm1, %v3338_v40  ;;  %v2497_v49 = vmax.f32 %v2379_v58, %v2438_v4 }
 0x195   : > { %v2619_v17 = vmax.f32 %v2560_v43, 0.0  ;;  %v2621_v53 = vmax.f32 %v2562_v44, 0.0  ;;  %v2561_v18 = vadd.f32 %v4418_v5, %v2495_v59  ;;  %v3590_v33 = vpop.f32.mrb[84].mxu0  ;;  %v3710_v45 = vpop.f32.mrb[84].mxu1  ;;  %v4814_v44 = vld [vmem:[#allocation17_spill] sm:$0xff] }
 0x196   : > { %v2563_v15 = vadd.f32 %v4418_v5, %v2497_v49  ;;  %v2382_v34 = vmax.f32 %v4803_v16, %v3590_v33  ;;  %v2443_v60 = vmax.f32 %v4804_v13, %v3710_v45  ;;  %v1748_v19 = vpop.f32.mrb[85].mxu0  ;;  %v2228_v20 = vpop.f32.mrb[85].mxu1  ;;  %v4815_v49 = vld [vmem:[#allocation20_spill] sm:$0xff]  ;;  %v4817_v13 = vld [vmem:[#allocation10_spill] sm:$0xff] }
 0x197   : > { %v3339_v6 = vpack.c.bf16 %v2619_v17, %v2619_v17  ;;  %v3341_v7 = vpack.c.bf16 %v2621_v53, %v2621_v53  ;;  %v2620_v10 = vmax.f32 %v2561_v18, 0.0  ;;  %v2380_v12 = vmax.f32 %v4805_v50, %v1748_v19  ;;  %v3591_v29 = vpop.f32.mrb[86].mxu0  ;;  %v3711_v8 = vpop.f32.mrb[86].mxu1  ;;  %v4816_v53 = vld [vmem:[#allocation21_spill] sm:$0xff] }
 0x198   : > { %v2622_v30 = vmax.f32 %v2563_v15, 0.0  ;;  %v2441_v63 = vmax.f32 %v4806_v47, %v2228_v20  ;;  %v2383_v51 = vmax.f32 %v4807_v9, %v3591_v29  ;;  %v2444_v1 = vmax.f32 %v4808_v31, %v3711_v8  ;;  %v1751_v57 = vpop.f32.mrb[87].mxu0  ;;  %v2231_v32 = vpop.f32.mrb[87].mxu1 }
 0x199   : > { %2916 = vst.msk [vmem:[%s4430_s4 + $0x54] sm:$0xf] %vm2894_vm1, %v3339_v6  ;;  %2918 = vst.msk [vmem:[%s4430_s4 + $0x5c] sm:$0xf] %vm2894_vm1, %v3341_v7  ;;  %v3340_v35 = vpack.c.bf16 %v2620_v10, %v2620_v10  ;;  %v2498_v36 = vmax.f32 %v2380_v12, %v2439_v48  ;;  %v2381_v61 = vmax.f32 %v4809_v2, %v1751_v57  ;;  %v4818_v6 = vld [vmem:[#allocation11_spill] sm:$0xff] }
 0x19a   : > { %v2442_v62 = vmax.f32 %v4810_v11, %v2231_v32  ;;  %v3342_v25 = vpack.c.bf16 %v2622_v30, %v2622_v30  ;;  %v2500_v41 = vmax.f32 %v2382_v34, %v2441_v63  ;;  %v4820_v57 = vld [vmem:[#allocation23_spill] sm:$0xff] }
 0x19b   : > { %2917 = vst.msk [vmem:[%s4430_s4 + $0x58] sm:$0xf] %vm2894_vm1, %v3340_v35  ;;  %v2564_v46 = vadd.f32 %v4418_v5, %v2498_v36  ;;  %v2499_v26 = vmax.f32 %v2381_v61, %v2440_v37  ;;  %v4821_v61 = vld [vmem:[#allocation24_spill] sm:$0xff] }
 0x19c   : > { %v2501_v56 = vmax.f32 %v2383_v51, %v2442_v62  ;;  %2919 = vst.msk [vmem:[%s4430_s4 + $0x60] sm:$0xf] %vm2894_vm1, %v3342_v25  ;;  %v2566_v42 = vadd.f32 %v4418_v5, %v2500_v41  ;;  %v4819_v51 = vld [vmem:[#allocation22_spill] sm:$0xff]  ;;  %v4822_v62 = vld [vmem:[#allocation25_spill] sm:$0xff] }
 0x19d   : > { %v2623_v22 = vmax.f32 %v2564_v46, 0.0  ;;  %v2565_v21 = vadd.f32 %v4418_v5, %v2499_v26  ;;  %v3594_v52 = vpop.f32.mrb[88].mxu0  ;;  %v3714_v0 = vpop.f32.mrb[88].mxu1 }
 0x19e   : > { %v2567_v48 = vadd.f32 %v4418_v5, %v2501_v56  ;;  %v2625_v54 = vmax.f32 %v2566_v42, 0.0  ;;  %v2386_v55 = vmax.f32 %v4811_v23, %v3594_v52  ;;  %v2447_v58 = vmax.f32 %v4812_v3, %v3714_v0  ;;  %v1764_v38 = vpop.f32.mrb[89].mxu0  ;;  %v2244_v37 = vpop.f32.mrb[89].mxu1  ;;  %v4823_v42 = vld [vmem:[#allocation28_spill] sm:$0xff]  ;;  %v4825_v3 = vld [vmem:[#allocation18_spill] sm:$0xff] }
 0x19f   : > { %v3343_v24 = vpack.c.bf16 %v2623_v22, %v2623_v22  ;;  %v2624_v27 = vmax.f32 %v2565_v21, 0.0  ;;  %v2384_v39 = vmax.f32 %v4813_v14, %v1764_v38  ;;  %v3595_v40 = vpop.f32.mrb[90].mxu0  ;;  %v3715_v4 = vpop.f32.mrb[90].mxu1  ;;  %v2445_v59 = vmax.f32 %v4814_v44, %v2244_v37  ;;  %v4824_v21 = vld [vmem:[#allocation29_spill] sm:$0xff] }
 0x1a0   : > { %v2626_v28 = vmax.f32 %v2567_v48, 0.0  ;;  %v3345_v43 = vpack.c.bf16 %v2625_v54, %v2625_v54  ;;  %v2387_v17 = vmax.f32 %v4815_v49, %v3595_v40  ;;  %v2448_v18 = vmax.f32 %v4816_v53, %v3715_v4  ;;  %v1767_v33 = vpop.f32.mrb[91].mxu0  ;;  %v2247_v45 = vpop.f32.mrb[91].mxu1 }
 0x1a1   : > { %2920 = vst.msk [vmem:[%s4430_s4 + $0x64] sm:$0xf] %vm2894_vm1, %v3343_v24  ;;  %v3344_v15 = vpack.c.bf16 %v2624_v27, %v2624_v27  ;;  %v2502_v34 = vmax.f32 %v2384_v39, %v2443_v60  ;;  %v2385_v19 = vmax.f32 %v4817_v13, %v1767_v33  ;;  %v2504_v20 = vmax.f32 %v2386_v55, %v2445_v59  ;;  %v4826_v24 = vld [vmem:[#allocation19_spill] sm:$0xff] }
 0x1a2   : > { %v3346_v16 = vpack.c.bf16 %v2626_v28, %v2626_v28  ;;  %2922 = vst.msk [vmem:[%s4430_s4 + $0x6c] sm:$0xf] %vm2894_vm1, %v3345_v43  ;;  %v2446_v7 = vmax.f32 %v4818_v6, %v2247_v45  ;;  %v4828_v33 = vld [vmem:[#allocation31_spill] sm:$0xff] }
 0x1a3   : > { %2921 = vst.msk [vmem:[%s4430_s4 + $0x68] sm:$0xf] %vm2894_vm1, %v3344_v15  ;;  %v2568_v10 = vadd.f32 %v4418_v5, %v2502_v34  ;;  %v2503_v50 = vmax.f32 %v2385_v19, %v2444_v1  ;;  %v2570_v12 = vadd.f32 %v4418_v5, %v2504_v20  ;;  %v4829_v19 = vld [vmem:[#allocation32_spill] sm:$0xff] }
 0x1a4   : > { %2923 = vst.msk [vmem:[%s4430_s4 + $0x70] sm:$0xf] %vm2894_vm1, %v3346_v16  ;;  %v2505_v29 = vmax.f32 %v2387_v17, %v2446_v7  ;;  %v4827_v17 = vld [vmem:[#allocation30_spill] sm:$0xff] }
 0x1a5   : > { %v2627_v8 = vmax.f32 %v2568_v10, 0.0  ;;  %v2569_v60 = vadd.f32 %v4418_v5, %v2503_v50  ;;  %v3598_v30 = vpop.f32.mrb[92].mxu0  ;;  %v3718_v47 = vpop.f32.mrb[92].mxu1  ;;  %v2629_v63 = vmax.f32 %v2570_v12, 0.0  ;;  %v4830_v50 = vld [vmem:[#allocation33_spill] sm:$0xff] }
 0x1a6   : > { %v2571_v9 = vadd.f32 %v4418_v5, %v2505_v29  ;;  %v2390_v31 = vmax.f32 %v4819_v51, %v3598_v30  ;;  %v2451_v32 = vmax.f32 %v4820_v57, %v3718_v47  ;;  %v1780_v35 = vpop.f32.mrb[93].mxu0  ;;  %v2260_v36 = vpop.f32.mrb[93].mxu1  ;;  %v4831_v29 = vld [vmem:[#allocation36_spill] sm:$0xff] }
 0x1a7   : > { %v3347_v2 = vpack.c.bf16 %v2627_v8, %v2627_v8  ;;  %v2628_v1 = vmax.f32 %v2569_v60, 0.0  ;;  %v2388_v11 = vmax.f32 %v4821_v61, %v1780_v35  ;;  %v2449_v25 = vmax.f32 %v4822_v62, %v2260_v36  ;;  %v3599_v41 = vpop.f32.mrb[94].mxu0  ;;  %v3719_v46 = vpop.f32.mrb[94].mxu1  ;;  %v4832_v60 = vld [vmem:[#allocation37_spill] sm:$0xff]  ;;  %v4834_v35 = vld [vmem:[#allocation27_spill] sm:$0xff] }
 0x1a8   : > { %v3349_v26 = vpack.c.bf16 %v2629_v63, %v2629_v63  ;;  %v2630_v56 = vmax.f32 %v2571_v9, 0.0  ;;  %v2391_v22 = vmax.f32 %v4823_v42, %v3599_v41  ;;  %v2452_v48 = vmax.f32 %v4824_v21, %v3719_v46  ;;  %v1783_v52 = vpop.f32.mrb[95].mxu0  ;;  %v2263_v0 = vpop.f32.mrb[95].mxu1 }
 0x1a9   : > { %2924 = vst.msk [vmem:[%s4430_s4 + $0x74] sm:$0xf] %vm2894_vm1, %v3347_v2  ;;  %v3348_v54 = vpack.c.bf16 %v2628_v1, %v2628_v1  ;;  %v2506_v23 = vmax.f32 %v2388_v11, %v2447_v58  ;;  %v2508_v55 = vmax.f32 %v2390_v31, %v2449_v25  ;;  %v2389_v38 = vmax.f32 %v4825_v3, %v1783_v52  ;;  %v4833_v31 = vld [vmem:[#allocation26_spill] sm:$0xff]  ;;  %v4836_v52 = vld [vmem:[#allocation39_spill] sm:$0xff] }
 0x1aa   : > { %2926 = vst.msk [vmem:[%s4430_s4 + $0x7c] sm:$0xf] %vm2894_vm1, %v3349_v26  ;;  %v3350_v37 = vpack.c.bf16 %v2630_v56, %v2630_v56  ;;  %v2450_v27 = vmax.f32 %v4826_v24, %v2263_v0 }
 0x1ab   : > { %2925 = vst.msk [vmem:[%s4430_s4 + $0x78] sm:$0xf] %vm2894_vm1, %v3348_v54  ;;  %v2572_v28 = vadd.f32 %v4418_v5, %v2506_v23  ;;  %v2574_v14 = vadd.f32 %v4418_v5, %v2508_v55  ;;  %v2507_v39 = vmax.f32 %v2389_v38, %v2448_v18  ;;  %v4837_v38 = vld [vmem:[#allocation40_spill] sm:$0xff] }
 0x1ac   : > { %2927 = vst.msk [vmem:[%s4430_s4 + $0x80] sm:$0xf] %vm2894_vm1, %v3350_v37  ;;  %v2509_v40 = vmax.f32 %v2391_v22, %v2450_v27  ;;  %v4835_v22 = vld [vmem:[#allocation38_spill] sm:$0xff] }
 0x1ad   : > { %v2631_v4 = vmax.f32 %v2572_v28, 0.0  ;;  %v2633_v58 = vmax.f32 %v2574_v14, 0.0  ;;  %v2573_v43 = vadd.f32 %v4418_v5, %v2507_v39  ;;  %v3602_v44 = vpop.f32.mrb[96].mxu0  ;;  %v3722_v59 = vpop.f32.mrb[96].mxu1  ;;  %v4838_v14 = vld [vmem:[#allocation41_spill] sm:$0xff] }
 0x1ae   : > { %v2575_v49 = vadd.f32 %v4418_v5, %v2509_v40  ;;  %v2394_v53 = vmax.f32 %v4827_v17, %v3602_v44  ;;  %v2455_v45 = vmax.f32 %v4828_v33, %v3722_v59  ;;  %v1796_v15 = vpop.f32.mrb[97].mxu0  ;;  %v2276_v16 = vpop.f32.mrb[97].mxu1  ;;  %v4839_v40 = vld [vmem:[#allocation44_spill] sm:$0xff]  ;;  %v4841_v33 = vld [vmem:[#allocation34_spill] sm:$0xff] }
 0x1af   : > { %v3351_v18 = vpack.c.bf16 %v2631_v4, %v2631_v4  ;;  %v3353_v34 = vpack.c.bf16 %v2633_v58, %v2633_v58  ;;  %v2632_v13 = vmax.f32 %v2573_v43, 0.0  ;;  %v2392_v20 = vmax.f32 %v4829_v19, %v1796_v15  ;;  %v3603_v6 = vpop.f32.mrb[98].mxu0  ;;  %v3723_v7 = vpop.f32.mrb[98].mxu1  ;;  %v4840_v58 = vld [vmem:[#allocation45_spill] sm:$0xff] }
 0x1b0   : > { %v2634_v10 = vmax.f32 %v2575_v49, 0.0  ;;  %v2453_v12 = vmax.f32 %v4830_v50, %v2276_v16  ;;  %v2395_v8 = vmax.f32 %v4831_v29, %v3603_v6  ;;  %v2456_v30 = vmax.f32 %v4832_v60, %v3723_v7  ;;  %v1799_v47 = vpop.f32.mrb[99].mxu0  ;;  %v2279_v63 = vpop.f32.mrb[99].mxu1 }
 0x1b1   : > { %2928 = vst.msk [vmem:[%s4430_s4 + $0x84] sm:$0xf] %vm2894_vm1, %v3351_v18  ;;  %2930 = vst.msk [vmem:[%s4430_s4 + $0x8c] sm:$0xf] %vm2894_vm1, %v3353_v34  ;;  %v3352_v9 = vpack.c.bf16 %v2632_v13, %v2632_v13  ;;  %v2510_v51 = vmax.f32 %v2392_v20, %v2451_v32  ;;  %v2393_v57 = vmax.f32 %v4833_v31, %v1799_v47  ;;  %v4842_v18 = vld [vmem:[#allocation35_spill] sm:$0xff] }
 0x1b2   : > { %v2454_v36 = vmax.f32 %v4834_v35, %v2279_v63  ;;  %v3354_v2 = vpack.c.bf16 %v2634_v10, %v2634_v10  ;;  %v2512_v1 = vmax.f32 %v2394_v53, %v2453_v12  ;;  %v4844_v47 = vld [vmem:[#allocation47_spill] sm:$0xff] }
 0x1b3   : > { %2929 = vst.msk [vmem:[%s4430_s4 + $0x88] sm:$0xf] %vm2894_vm1, %v3352_v9  ;;  %v2576_v61 = vadd.f32 %v4418_v5, %v2510_v51  ;;  %v2511_v11 = vmax.f32 %v2393_v57, %v2452_v48  ;;  %v4845_v57 = vld [vmem:[#allocation48_spill] sm:$0xff] }
 0x1b4   : > { %v2513_v62 = vmax.f32 %v2395_v8, %v2454_v36  ;;  %2931 = vst.msk [vmem:[%s4430_s4 + $0x90] sm:$0xf] %vm2894_vm1, %v3354_v2  ;;  %v2578_v25 = vadd.f32 %v4418_v5, %v2512_v1  ;;  %v4843_v8 = vld [vmem:[#allocation46_spill] sm:$0xff]  ;;  %v4846_v36 = vld [vmem:[#allocation49_spill] sm:$0xff] }
 0x1b5   : > { %v2635_v41 = vmax.f32 %v2576_v61, 0.0  ;;  %v2577_v46 = vadd.f32 %v4418_v5, %v2511_v11  ;;  %v3606_v26 = vpop.f32.mrb[100].mxu0  ;;  %v3726_v56 = vpop.f32.mrb[100].mxu1 }
 0x1b6   : > { %v2579_v32 = vadd.f32 %v4418_v5, %v2513_v62  ;;  %v2637_v42 = vmax.f32 %v2578_v25, 0.0  ;;  %v2398_v21 = vmax.f32 %v4835_v22, %v3606_v26  ;;  %v2459_v0 = vmax.f32 %v4836_v52, %v3726_v56  ;;  %v1812_v54 = vpop.f32.mrb[101].mxu0  ;;  %v2292_v48 = vpop.f32.mrb[101].mxu1  ;;  %v4847_v25 = vld [vmem:[#allocation52_spill] sm:$0xff]  ;;  %v4849_v52 = vld [vmem:[#allocation42_spill] sm:$0xff] }
 0x1b7   : > { %v3355_v23 = vpack.c.bf16 %v2635_v41, %v2635_v41  ;;  %v2636_v55 = vmax.f32 %v2577_v46, 0.0  ;;  %v2396_v37 = vmax.f32 %v4837_v38, %v1812_v54  ;;  %v3607_v24 = vpop.f32.mrb[102].mxu0  ;;  %v3727_v27 = vpop.f32.mrb[102].mxu1  ;;  %v2457_v39 = vmax.f32 %v4838_v14, %v2292_v48  ;;  %v4848_v46 = vld [vmem:[#allocation53_spill] sm:$0xff] }
 0x1b8   : > { %v2638_v3 = vmax.f32 %v2579_v32, 0.0  ;;  %v3357_v28 = vpack.c.bf16 %v2637_v42, %v2637_v42  ;;  %v2399_v4 = vmax.f32 %v4839_v40, %v3607_v24  ;;  %v2460_v43 = vmax.f32 %v4840_v58, %v3727_v27  ;;  %v1815_v44 = vpop.f32.mrb[103].mxu0  ;;  %v2295_v59 = vpop.f32.mrb[103].mxu1 }
 0x1b9   : > { %2932 = vst.msk [vmem:[%s4430_s4 + $0x94] sm:$0xf] %vm2894_vm1, %v3355_v23  ;;  %v3356_v49 = vpack.c.bf16 %v2636_v55, %v2636_v55  ;;  %v2514_v53 = vmax.f32 %v2396_v37, %v2455_v45  ;;  %v2397_v15 = vmax.f32 %v4841_v33, %v1815_v44  ;;  %v2516_v16 = vmax.f32 %v2398_v21, %v2457_v39  ;;  %v4850_v23 = vld [vmem:[#allocation43_spill] sm:$0xff] }
 0x1ba   : > { %v3358_v17 = vpack.c.bf16 %v2638_v3, %v2638_v3  ;;  %2934 = vst.msk [vmem:[%s4430_s4 + $0x9c] sm:$0xf] %vm2894_vm1, %v3357_v28  ;;  %v2458_v34 = vmax.f32 %v4842_v18, %v2295_v59  ;;  %v4852_v44 = vld [vmem:[#allocation55_spill] sm:$0xff] }
 0x1bb   : > { %2933 = vst.msk [vmem:[%s4430_s4 + $0x98] sm:$0xf] %vm2894_vm1, %v3356_v49  ;;  %v2580_v13 = vadd.f32 %v4418_v5, %v2514_v53  ;;  %v2515_v19 = vmax.f32 %v2397_v15, %v2456_v30  ;;  %v2582_v20 = vadd.f32 %v4418_v5, %v2516_v16  ;;  %v4853_v15 = vld [vmem:[#allocation56_spill] sm:$0xff] }
 0x1bc   : > { %2935 = vst.msk [vmem:[%s4430_s4 + $0xa0] sm:$0xf] %vm2894_vm1, %v3358_v17  ;;  %v2517_v6 = vmax.f32 %v2399_v4, %v2458_v34  ;;  %v4851_v4 = vld [vmem:[#allocation54_spill] sm:$0xff] }
 0x1bd   : > { %v2639_v7 = vmax.f32 %v2580_v13, 0.0  ;;  %v2581_v45 = vadd.f32 %v4418_v5, %v2515_v19  ;;  %v3610_v10 = vpop.f32.mrb[104].mxu0  ;;  %v3730_v50 = vpop.f32.mrb[104].mxu1  ;;  %v2641_v12 = vmax.f32 %v2582_v20, 0.0  ;;  %v4854_v19 = vld [vmem:[#allocation57_spill] sm:$0xff] }
 0x1be   : > { %v2583_v29 = vadd.f32 %v4418_v5, %v2517_v6  ;;  %v2402_v60 = vmax.f32 %v4843_v8, %v3610_v10  ;;  %v2463_v63 = vmax.f32 %v4844_v47, %v3730_v50  ;;  %v1828_v9 = vpop.f32.mrb[105].mxu0  ;;  %v2308_v51 = vpop.f32.mrb[105].mxu1  ;;  %v4855_v6 = vld [vmem:[#allocation60_spill] sm:$0xff] }
 0x1bf   : > { %v3359_v31 = vpack.c.bf16 %v2639_v7, %v2639_v7  ;;  %v2640_v30 = vmax.f32 %v2581_v45, 0.0  ;;  %v2400_v35 = vmax.f32 %v4845_v57, %v1828_v9  ;;  %v2461_v2 = vmax.f32 %v4846_v36, %v2308_v51  ;;  %v3611_v1 = vpop.f32.mrb[106].mxu0  ;;  %v3731_v61 = vpop.f32.mrb[106].mxu1  ;;  %v4856_v45 = vld [vmem:[#allocation61_spill] sm:$0xff]  ;;  %v4858_v9 = vld [vmem:[#allocation51_spill] sm:$0xff] }
 0x1c0   : > { %v3361_v11 = vpack.c.bf16 %v2641_v12, %v2641_v12  ;;  %v2642_v62 = vmax.f32 %v2583_v29, 0.0  ;;  %v2403_v41 = vmax.f32 %v4847_v25, %v3611_v1  ;;  %v2464_v32 = vmax.f32 %v4848_v46, %v3731_v61  ;;  %v1831_v26 = vpop.f32.mrb[107].mxu0  ;;  %v2311_v56 = vpop.f32.mrb[107].mxu1 }
 0x1c1   : > { %2936 = vst.msk [vmem:[%s4430_s4 + $0xa4] sm:$0xf] %vm2894_vm1, %v3359_v31  ;;  %v3360_v42 = vpack.c.bf16 %v2640_v30, %v2640_v30  ;;  %v2518_v22 = vmax.f32 %v2400_v35, %v2459_v0  ;;  %v2520_v21 = vmax.f32 %v2402_v60, %v2461_v2  ;;  %v2401_v54 = vmax.f32 %v4849_v52, %v1831_v26  ;;  %v4857_v60 = vld [vmem:[#allocation50_spill] sm:$0xff]  ;;  %v4860_v26 = vld [vmem:[#allocation63_spill] sm:$0xff] }
 0x1c2   : > { %2938 = vst.msk [vmem:[%s4430_s4 + $0xac] sm:$0xf] %vm2894_vm1, %v3361_v11  ;;  %v3362_v48 = vpack.c.bf16 %v2642_v62, %v2642_v62  ;;  %v2462_v55 = vmax.f32 %v4850_v23, %v2311_v56 }
 0x1c3   : > { %2937 = vst.msk [vmem:[%s4430_s4 + $0xa8] sm:$0xf] %vm2894_vm1, %v3360_v42  ;;  %v2584_v3 = vadd.f32 %v4418_v5, %v2518_v22  ;;  %v2586_v38 = vadd.f32 %v4418_v5, %v2520_v21  ;;  %v2519_v37 = vmax.f32 %v2401_v54, %v2460_v43  ;;  %v4861_v54 = vld [vmem:[#allocation64_spill] sm:$0xff] }
 0x1c4   : > { %2939 = vst.msk [vmem:[%s4430_s4 + $0xb0] sm:$0xf] %vm2894_vm1, %v3362_v48  ;;  %v2521_v24 = vmax.f32 %v2403_v41, %v2462_v55  ;;  %v4859_v41 = vld [vmem:[#allocation62_spill] sm:$0xff] }
 0x1c5   : > { %v2643_v27 = vmax.f32 %v2584_v3, 0.0  ;;  %v2645_v0 = vmax.f32 %v2586_v38, 0.0  ;;  %v2585_v28 = vadd.f32 %v4418_v5, %v2519_v37  ;;  %v3614_v14 = vpop.f32.mrb[108].mxu0  ;;  %v3734_v39 = vpop.f32.mrb[108].mxu1  ;;  %v4862_v38 = vld [vmem:[#allocation65_spill] sm:$0xff] }
 0x1c6   : > { %v2587_v40 = vadd.f32 %v4418_v5, %v2521_v24  ;;  %v2406_v58 = vmax.f32 %v4851_v4, %v3614_v14  ;;  %v2467_v59 = vmax.f32 %v4852_v44, %v3734_v39  ;;  %v1844_v49 = vpop.f32.mrb[109].mxu0  ;;  %v2324_v17 = vpop.f32.mrb[109].mxu1  ;;  %v4863_v24 = vld [vmem:[#allocation68_spill] sm:$0xff]  ;;  %v4865_v44 = vld [vmem:[#allocation58_spill] sm:$0xff] }
 0x1c7   : > { %v3363_v43 = vpack.c.bf16 %v2643_v27, %v2643_v27  ;;  %v3365_v53 = vpack.c.bf16 %v2645_v0, %v2645_v0  ;;  %v2644_v33 = vmax.f32 %v2585_v28, 0.0  ;;  %v2404_v16 = vmax.f32 %v4853_v15, %v1844_v49  ;;  %v3615_v18 = vpop.f32.mrb[110].mxu0  ;;  %v3735_v34 = vpop.f32.mrb[110].mxu1  ;;  %v4864_v0 = vld [vmem:[#allocation69_spill] sm:$0xff] }
 0x1c8   : > { %v2646_v13 = vmax.f32 %v2587_v40, 0.0  ;;  %v2465_v20 = vmax.f32 %v4854_v19, %v2324_v17  ;;  %v2407_v7 = vmax.f32 %v4855_v6, %v3615_v18  ;;  %v2468_v10 = vmax.f32 %v4856_v45, %v3735_v34  ;;  %v1847_v50 = vpop.f32.mrb[111].mxu0  ;;  %v2327_v12 = vpop.f32.mrb[111].mxu1  ;;  %v4867_v6 = vld [vmem:[#allocation72_spill] sm:$0xff] }
 0x1c9   : > { %2940 = vst.msk [vmem:[%s4430_s4 + $0xb4] sm:$0xf] %vm2894_vm1, %v3363_v43  ;;  %2942 = vst.msk [vmem:[%s4430_s4 + $0xbc] sm:$0xf] %vm2894_vm1, %v3365_v53  ;;  %v3364_v29 = vpack.c.bf16 %v2644_v33, %v2644_v33  ;;  %v2522_v8 = vmax.f32 %v2404_v16, %v2463_v63  ;;  %v2405_v47 = vmax.f32 %v4857_v60, %v1847_v50  ;;  %v4866_v43 = vld [vmem:[#allocation59_spill] sm:$0xff] }
 0x1ca   : > { %v2466_v51 = vmax.f32 %v4858_v9, %v2327_v12  ;;  %v3366_v31 = vpack.c.bf16 %v2646_v13, %v2646_v13  ;;  %v2524_v30 = vmax.f32 %v2406_v58, %v2465_v20  ;;  %v4869_v9 = vld [vmem:[#allocation2_spill] sm:$0xff] }
 0x1cb   : > { %2941 = vst.msk [vmem:[%s4430_s4 + $0xb8] sm:$0xf] %vm2894_vm1, %v3364_v29  ;;  %v2588_v57 = vadd.f32 %v4418_v5, %v2522_v8  ;;  %v2523_v35 = vmax.f32 %v2405_v47, %v2464_v32  ;;  %v4868_v29 = vld [vmem:[#allocation71_spill] sm:$0xff] }
 0x1cc   : > { %v2525_v36 = vmax.f32 %v2407_v7, %v2466_v51  ;;  %2943 = vst.msk [vmem:[%s4430_s4 + $0xc0] sm:$0xf] %vm2894_vm1, %v3366_v31  ;;  %v2590_v2 = vadd.f32 %v4418_v5, %v2524_v30  ;;  %v4870_v51 = vld [vmem:[#allocation70_spill] sm:$0xff] }
 0x1cd   : > { %v2647_v1 = vmax.f32 %v2588_v57, 0.0  ;;  %v2589_v61 = vadd.f32 %v4418_v5, %v2523_v35  ;;  %v3618_v11 = vpop.f32.mrb[112].mxu0  ;;  %v3738_v62 = vpop.f32.mrb[112].mxu1  ;;  %v4871_v31 = vmax.f32 %v4869_v9, %v4870_v51  ;;  %v4872_v57 = vld [vmem:[#allocation67_spill] sm:$0xff] }
 0x1ce   : > { %v2591_v63 = vadd.f32 %v4418_v5, %v2525_v36  ;;  %v2649_v25 = vmax.f32 %v2590_v2, 0.0  ;;  %v2410_v46 = vmax.f32 %v4859_v41, %v3618_v11  ;;  %v2471_v56 = vmax.f32 %v4860_v26, %v3738_v62  ;;  %v1860_v42 = vpop.f32.mrb[113].mxu0  ;;  %v2340_v32 = vpop.f32.mrb[113].mxu1  ;;  %v4875_v41 = vld [vmem:[#allocation73_spill] sm:$0xff] }
 0x1cf   : > { %v3367_v22 = vpack.c.bf16 %v2647_v1, %v2647_v1  ;;  %v2648_v21 = vmax.f32 %v2589_v61, 0.0  ;;  %v2408_v48 = vmax.f32 %v4861_v54, %v1860_v42  ;;  %v3619_v23 = vpop.f32.mrb[114].mxu0  ;;  %v3739_v55 = vpop.f32.mrb[114].mxu1  ;;  %v2469_v37 = vmax.f32 %v4862_v38, %v2340_v32  ;;  %v4873_v61 = vld [vmem:[#allocation66_spill] sm:$0xff] }
 0x1d0   : > { %v2650_v52 = vmax.f32 %v2591_v63, 0.0  ;;  %v3369_v3 = vpack.c.bf16 %v2649_v25, %v2649_v25  ;;  %v2411_v27 = vmax.f32 %v4863_v24, %v3619_v23  ;;  %v2472_v28 = vmax.f32 %v4864_v0, %v3739_v55  ;;  %v1863_v14 = vpop.f32.mrb[115].mxu0  ;;  %v2343_v39 = vpop.f32.mrb[115].mxu1  ;;  %v4874_v25 = vld [vmem:[#allocation3_spill] sm:$0xff] }
 0x1d1   : > { %2944 = vst.msk [vmem:[%s4430_s4 + $0xc4] sm:$0xf] %vm2894_vm1, %v3367_v22  ;;  %v3368_v40 = vpack.c.bf16 %v2648_v21, %v2648_v21  ;;  %v2526_v58 = vmax.f32 %v2408_v48, %v2467_v59  ;;  %v2409_v49 = vmax.f32 %v4865_v44, %v1863_v14  ;;  %v2528_v17 = vmax.f32 %v2410_v46, %v2469_v37 }
 0x1d2   : > { %v3370_v4 = vpack.c.bf16 %v2650_v52, %v2650_v52  ;;  %2946 = vst.msk [vmem:[%s4430_s4 + $0xcc] sm:$0xf] %vm2894_vm1, %v3369_v3  ;;  %v2470_v53 = vmax.f32 %v4866_v43, %v2343_v39  ;;  %v4876_v46 = vmax.f32 %v4874_v25, %v4875_v41 }
 0x1d3   : > { %2945 = vst.msk [vmem:[%s4430_s4 + $0xc8] sm:$0xf] %vm2894_vm1, %v3368_v40  ;;  %v2592_v33 = vadd.f32 %v4418_v5, %v2526_v58  ;;  %v2527_v15 = vmax.f32 %v2409_v49, %v2468_v10  ;;  %v2594_v16 = vadd.f32 %v4418_v5, %v2528_v17 }
 0x1d4   : > { %2947 = vst.msk [vmem:[%s4430_s4 + $0xd0] sm:$0xf] %vm2894_vm1, %v3370_v4  ;;  %v2529_v18 = vmax.f32 %v2411_v27, %v2470_v53 }
 0x1d5   : > { %v2651_v34 = vmax.f32 %v2592_v33, 0.0  ;;  %v2593_v59 = vadd.f32 %v4418_v5, %v2527_v15  ;;  %v3622_v13 = vpop.f32.mrb[116].mxu0  ;;  %v2653_v19 = vmax.f32 %v2594_v16, 0.0 }
 0x1d6   : > { %v2595_v20 = vadd.f32 %v4418_v5, %v2529_v18  ;;  %v2414_v7 = vmax.f32 %v3622_v13, %v4867_v6  ;;  %v1876_v45 = vpop.f32.mrb[117].mxu0 }
 0x1d7   : > { %v3371_v50 = vpack.c.bf16 %v2651_v34, %v2651_v34  ;;  %v2652_v12 = vmax.f32 %v2593_v59, 0.0  ;;  %v2412_v10 = vmax.f32 %v4868_v29, %v1876_v45  ;;  %v3623_v8 = vpop.f32.mrb[118].mxu0  ;;  %v3373_v60 = vpack.c.bf16 %v2653_v19, %v2653_v19 }
 0x1d8   : > { %v2654_v47 = vmax.f32 %v2595_v20, 0.0  ;;  %v2473_v30 = vmax.f32 %v4871_v31, %v2414_v7  ;;  %v2415_v35 = vmax.f32 %v3623_v8, %v4872_v57  ;;  %v1879_v36 = vpop.f32.mrb[119].mxu0 }
 0x1d9   : > { %2948 = vst.msk [vmem:[%s4430_s4 + $0xd4] sm:$0xf] %vm2894_vm1, %v3371_v50  ;;  %v3372_v2 = vpack.c.bf16 %v2652_v12, %v2652_v12  ;;  %v2530_v1 = vmax.f32 %v2412_v10, %v2471_v56  ;;  %v2413_v63 = vmax.f32 %v4873_v61, %v1879_v36  ;;  %2950 = vst.msk [vmem:[%s4430_s4 + $0xdc] sm:$0xf] %vm2894_vm1, %v3373_v60 }
 0x1da   : > { %v3374_v11 = vpack.c.bf16 %v2654_v47, %v2654_v47  ;;  %v2539_v62 = vadd.f32 %v4418_v5, %v2473_v30  ;;  %v2474_v26 = vmax.f32 %v4876_v46, %v2415_v35 }
 0x1db   : > { %2949 = vst.msk [vmem:[%s4430_s4 + $0xd8] sm:$0xf] %vm2894_vm1, %v3372_v2  ;;  %v2596_v42 = vadd.f32 %v4418_v5, %v2530_v1  ;;  %v2531_v56 = vmax.f32 %v2413_v63, %v2472_v28 }
 0x1dc   : > { %2951 = vst.msk [vmem:[%s4430_s4 + $0xe0] sm:$0xf] %vm2894_vm1, %v3374_v11  ;;  %v2598_v32 = vmax.f32 %v2539_v62, 0.0  ;;  %v2540_v22 = vadd.f32 %v4418_v5, %v2474_v26 }
 0x1dd   : > { %v2655_v21 = vmax.f32 %v2596_v42, 0.0  ;;  %v2597_v52 = vadd.f32 %v4418_v5, %v2531_v56 }
 0x1de   : > { %v3318_v54 = vpack.c.bf16 %v2598_v32, %v2598_v32  ;;  %v2599_v48 = vmax.f32 %v2540_v22, 0.0 }
 0x1df   : > { %v3375_v23 = vpack.c.bf16 %v2655_v21, %v2655_v21  ;;  %v2656_v55 = vmax.f32 %v2597_v52, 0.0 }
 0x1e0   : > { %2895 = vst.msk [vmem:[%s4430_s4] sm:$0xf] %vm2894_vm1, %v3318_v54  ;;  %v3319_v3 = vpack.c.bf16 %v2599_v48, %v2599_v48 }
 0x1e1   : > { %2952 = vst.msk [vmem:[%s4430_s4 + $0xe4] sm:$0xf] %vm2894_vm1, %v3375_v23  ;;  %v3376_v38 = vpack.c.bf16 %v2656_v55, %v2656_v55 }
 0x1e2   : > { %2896 = vst.msk [vmem:[%s4430_s4 + $0x4] sm:$0xf] %vm2894_vm1, %v3319_v3 }
 0x1e3   : > { %2953 = vst.msk [vmem:[%s4430_s4 + $0xe8] sm:$0xf] %vm2894_vm1, %v3376_v38 }
 0x1e4 PF: > { %s13_s12 = sadd.s32 1, %s3882_s12  }
 0x1e5   : > { %p10_p5 = scmp.ge.s32.totalorder %s13_s12, 11  }
 0x1e7   :  { %12 = sbr.rel (!%p10_p5) target bundleno = 1 (0x1), region = 62 }

// kernel: net_forward.5
= control target key start
LH: loop header
LB: loop body
LE: loop exit
PB: predicated region body
PF: predicated region fallthrough
CT: control target
= control target key end

     0   :  { %s7169_s12 = smov 0   ;;  %s8621_s0 = inlined_call_operand.vmem [shape: bf16[2,1792,512], index: 0, kind: input, shape index: {}]   ;;  %s8622_s1 = inlined_call_operand.vmem [shape: bf16[512,64], index: 1, kind: input, shape index: {}]   ;;  %s8623_s2 = inlined_call_operand.vmem [shape: f32[1,64], index: 2, kind: input, shape index: {}]   ;;  %s8624_s3 = inlined_call_operand.vmem [shape: bf16[896,64], index: 3, kind: output, shape index: {}]  }
   0x1 LB: > { %s7175_s13 = sadd.s32 4294967295, %s7146_s12   ;;  %p5603_p0 = scmp.ge.s32.totalorder %s7146_s12, 1  ;;  %s7146_s12 = sphi %s7169_s12, %s13_s12  }
   0x2   : > { %p137_p1 = scmp.lt.s32.totalorder %s7146_s12, 3 }
   0x4   : > { %p138_p2 = pnand %p5603_p0, %p137_p1 }
   0x6   : > { %141 = sbr.rel (%p138_p2) target bundleno = 1193 (0x4a9), region = 32 }
   0xd   : > { %v6435_v0 = vld [vmem:[%s8622_s1] sm:$0xff]   ;;  %v7148_v1 = vmov 0   ;;  %v6437_v3 = vld [vmem:[%s8622_s1 + $0x8] sm:$0xff]   ;;  %v6439_v5 = vld [vmem:[%s8622_s1 + $0x10] sm:$0xff]   ;;  %p161_p3 = scmp.lt.s32.totalorder %s7175_s13, 1  ;;  %s166_s7 = smul.u32 56, %s7175_s13 }
   0xe   : > { %3117 = vmatprep.subr.bf16.mxu1 %v7148_v1  ;;  %4046 = vmatprep.subr.bf16.mxu0 %v7148_v1  ;;  %v6436_v2 = vld [vmem:[%s8622_s1 + $0x80] sm:$0xff]   ;;  %v6438_v4 = vld [vmem:[%s8622_s1 + $0x88] sm:$0xff]   ;;  %v6440_v6 = vld [vmem:[%s8622_s1 + $0x90] sm:$0xff]   ;;  %vm5486_vm0 = vcmask 519168  }
   0xf   : > { %3118 = vmatpush1.bf16.msra.mxu1 %v6435_v0  ;;  %4047 = vmatpush1.bf16.msra.mxu0 %v6436_v2  ;;  %v6441_v7 = vld [vmem:[%s8622_s1 + $0x18] sm:$0xff]   ;;  %v6443_v9 = vld [vmem:[%s8622_s1 + $0x20] sm:$0xff]   ;;  %v6445_v11 = vld [vmem:[%s8622_s1 + $0x28] sm:$0xff]   ;;  %s162_s15 = scalar_select %p161_p3, %s7175_s13, 1 }
  0x10   : > { %3119 = vmatprep.subr.bf16.mxu1 %v7148_v1  ;;  %4048 = vmatprep.subr.bf16.mxu0 %v7148_v1  ;;  %v6442_v8 = vld [vmem:[%s8622_s1 + $0x98] sm:$0xff]   ;;  %v6444_v10 = vld [vmem:[%s8622_s1 + $0xa0] sm:$0xff]   ;;  %v6446_v12 = vld [vmem:[%s8622_s1 + $0xa8] sm:$0xff]   ;;  %p167_p4 = scmp.lt.s32.totalorder %s166_s7, 111 }
  0x11   : > { %v6447_v13 = vld [vmem:[%s8622_s1 + $0x30] sm:$0xff]   ;;  %v6449_v15 = vld [vmem:[%s8622_s1 + $0x38] sm:$0xff]   ;;  %s6425_s20 = smul.u32 3584, %s162_s15  ;;  %v6451_v17 = vld [vmem:[%s8622_s1 + $0x40] sm:$0xff]  }
  0x12   : > { %v6448_v14 = vld [vmem:[%s8622_s1 + $0xb0] sm:$0xff]   ;;  %v6450_v16 = vld [vmem:[%s8622_s1 + $0xb8] sm:$0xff]   ;;  %v6452_v18 = vld [vmem:[%s8622_s1 + $0xc0] sm:$0xff]   ;;  %s9024_s7 = smov (!%p167_p4, %s166_s7), 111 }
  0x13   : > { %3120 = vmatpush1.bf16.msra.mxu1 %v6437_v3  ;;  %4049 = vmatpush1.bf16.msra.mxu0 %v6438_v4  ;;  %s7251_s27 = scalar_lea.vmem %s8621_s0, %s6425_s20  ;;  %v6453_v20 = vld [vmem:[%s8622_s1 + $0x48] sm:$0xff]   ;;  %v6455_v23 = vld [vmem:[%s8622_s1 + $0x50] sm:$0xff]   ;;  %v6457_v25 = vld [vmem:[%s8622_s1 + $0x58] sm:$0xff]  }
  0x14   : > { %3121 = vmatprep.subr.bf16.mxu1 %v7148_v1  ;;  %4050 = vmatprep.subr.bf16.mxu0 %v7148_v1  ;;  %v6469_v19 = vld [vmem:[%s7251_s27 + $0x4] ss:$16 sps:$4 sm:$0xff]   ;;  %v6472_v21 = vld [vmem:[%s7251_s27 + $0xc] ss:$16 sps:$4 sm:$0xff]   ;;  %v6467_v35 = vld [vmem:[%s7251_s27] ss:$16 sps:$4 sm:$0xff]  }
  0x15   : > { %v6454_v22 = vld [vmem:[%s8622_s1 + $0xc8] sm:$0xff]   ;;  %3149 = vmatprep.mubr.bf16.mxu1 %v6469_v19  ;;  %4078 = vmatprep.mubr.bf16.mxu0 %v6472_v21  ;;  %v6456_v24 = vld [vmem:[%s8622_s1 + $0xd0] sm:$0xff]   ;;  %v6458_v26 = vld [vmem:[%s8622_s1 + $0xd8] sm:$0xff]  }
  0x16   : > { %v6459_v27 = vld [vmem:[%s8622_s1 + $0x60] sm:$0xff]   ;;  %v6461_v29 = vld [vmem:[%s8622_s1 + $0x68] sm:$0xff]   ;;  %v6463_v31 = vld [vmem:[%s8622_s1 + $0x70] sm:$0xff]  }
  0x17   : > { %3122 = vmatpush1.bf16.msra.mxu1 %v6439_v5  ;;  %4051 = vmatpush1.bf16.msra.mxu0 %v6440_v6  ;;  %v6460_v28 = vld [vmem:[%s8622_s1 + $0xe0] sm:$0xff]   ;;  %v6462_v30 = vld [vmem:[%s8622_s1 + $0xe8] sm:$0xff]   ;;  %v6464_v32 = vld [vmem:[%s8622_s1 + $0xf0] sm:$0xff]  }
  0x18   : > { %3123 = vmatprep.subr.bf16.mxu1 %v7148_v1  ;;  %4052 = vmatprep.subr.bf16.mxu0 %v7148_v1  ;;  %v6465_v33 = vld [vmem:[%s8622_s1 + $0x78] sm:$0xff]   ;;  %v6473_v37 = vld [vmem:[%s7251_s27 + $0x24] ss:$16 sps:$4 sm:$0xff]   ;;  %v6477_v39 = vld [vmem:[%s7251_s27 + $0x20] ss:$16 sps:$4 sm:$0xff]  }
  0x19   : > { %v6466_v34 = vld [vmem:[%s8622_s1 + $0xf8] sm:$0xff]   ;;  %v6479_v41 = vld [vmem:[%s7251_s27 + $0x44] ss:$16 sps:$4 sm:$0xff]   ;;  %v6483_v43 = vld [vmem:[%s7251_s27 + $0x40] ss:$16 sps:$4 sm:$0xff]  }
  0x1a   : > { %v6470_v36 = vld [vmem:[%s7251_s27 + $0x8] ss:$16 sps:$4 sm:$0xff]   ;;  %v6475_v38 = vld [vmem:[%s7251_s27 + $0x2c] ss:$16 sps:$4 sm:$0xff]   ;;  %v6485_v45 = vld [vmem:[%s7251_s27 + $0x64] ss:$16 sps:$4 sm:$0xff]  }
  0x1b   : > { %3124 = vmatpush1.bf16.msra.mxu1 %v6441_v7  ;;  %4053 = vmatpush1.bf16.msra.mxu0 %v6442_v8  ;;  %v6478_v40 = vld [vmem:[%s7251_s27 + $0x28] ss:$16 sps:$4 sm:$0xff]   ;;  %v6481_v42 = vld [vmem:[%s7251_s27 + $0x4c] ss:$16 sps:$4 sm:$0xff]   ;;  %v6489_v47 = vld [vmem:[%s7251_s27 + $0x60] ss:$16 sps:$4 sm:$0xff]  }
  0x1c   : > { %3125 = vmatprep.subr.bf16.mxu1 %v7148_v1  ;;  %4054 = vmatprep.subr.bf16.mxu0 %v7148_v1  ;;  %v6484_v44 = vld [vmem:[%s7251_s27 + $0x48] ss:$16 sps:$4 sm:$0xff]   ;;  %v6487_v46 = vld [vmem:[%s7251_s27 + $0x6c] ss:$16 sps:$4 sm:$0xff]   ;;  %v6491_v49 = vld [vmem:[%s7251_s27 + $0x84] ss:$16 sps:$4 sm:$0xff]  }
  0x1d   : > { %v6490_v48 = vld [vmem:[%s7251_s27 + $0x68] ss:$16 sps:$4 sm:$0xff]   ;;  %v6493_v50 = vld [vmem:[%s7251_s27 + $0x8c] ss:$16 sps:$4 sm:$0xff]   ;;  %v6495_v51 = vld [vmem:[%s7251_s27 + $0x80] ss:$16 sps:$4 sm:$0xff]  }
  0x1e   : > { %v6496_v52 = vld [vmem:[%s7251_s27 + $0x88] ss:$16 sps:$4 sm:$0xff]   ;;  %v6497_v53 = vld [vmem:[%s7251_s27 + $0xa4] ss:$16 sps:$4 sm:$0xff]   ;;  %v6499_v54 = vld [vmem:[%s7251_s27 + $0xac] ss:$16 sps:$4 sm:$0xff]  }
  0x1f   : > { %3126 = vmatpush1.bf16.msra.mxu1 %v6443_v9  ;;  %4055 = vmatpush1.bf16.msra.mxu0 %v6444_v10  ;;  %v6501_v55 = vld [vmem:[%s7251_s27 + $0xa0] ss:$16 sps:$4 sm:$0xff]   ;;  %v6502_v56 = vld [vmem:[%s7251_s27 + $0xa8] ss:$16 sps:$4 sm:$0xff]   ;;  %v6503_v57 = vld [vmem:[%s7251_s27 + $0xc4] ss:$16 sps:$4 sm:$0xff]  }
  0x20   : > { %3127 = vmatprep.subr.bf16.mxu1 %v7148_v1  ;;  %4056 = vmatprep.subr.bf16.mxu0 %v7148_v1  ;;  %v6505_v58 = vld [vmem:[%s7251_s27 + $0xcc] ss:$16 sps:$4 sm:$0xff]   ;;  %v6507_v59 = vld [vmem:[%s7251_s27 + $0xc0] ss:$16 sps:$4 sm:$0xff]   ;;  %v6508_v60 = vld [vmem:[%s7251_s27 + $0xc8] ss:$16 sps:$4 sm:$0xff]  }
  0x21   : > { %v6509_v61 = vld [vmem:[%s7251_s27 + $0xe4] ss:$16 sps:$4 sm:$0xff]   ;;  %v6511_v62 = vld [vmem:[%s7251_s27 + $0xec] ss:$16 sps:$4 sm:$0xff]   ;;  %v6513_v63 = vld [vmem:[%s7251_s27 + $0xe0] ss:$16 sps:$4 sm:$0xff]  }
  0x22   : > { %v6514_v0 = vld [vmem:[%s7251_s27 + $0xe8] ss:$16 sps:$4 sm:$0xff]   ;;  %v6517_v2 = vld [vmem:[%s7251_s27 + $0x10c] ss:$16 sps:$4 sm:$0xff]   ;;  %v6519_v3 = vld [vmem:[%s7251_s27 + $0x100] ss:$16 sps:$4 sm:$0xff]  }
  0x23   : > { %3128 = vmatpush1.bf16.msra.mxu1 %v6445_v11  ;;  %4057 = vmatpush1.bf16.msra.mxu0 %v6446_v12  ;;  %v6520_v4 = vld [vmem:[%s7251_s27 + $0x108] ss:$16 sps:$4 sm:$0xff]   ;;  %v6521_v5 = vld [vmem:[%s7251_s27 + $0x124] ss:$16 sps:$4 sm:$0xff]   ;;  %v6523_v6 = vld [vmem:[%s7251_s27 + $0x12c] ss:$16 sps:$4 sm:$0xff]  }
  0x24   : > { %3129 = vmatprep.subr.bf16.mxu1 %v7148_v1  ;;  %4058 = vmatprep.subr.bf16.mxu0 %v7148_v1  ;;  %v6525_v7 = vld [vmem:[%s7251_s27 + $0x120] ss:$16 sps:$4 sm:$0xff]   ;;  %v6526_v8 = vld [vmem:[%s7251_s27 + $0x128] ss:$16 sps:$4 sm:$0xff]   ;;  %v6527_v9 = vld [vmem:[%s7251_s27 + $0x144] ss:$16 sps:$4 sm:$0xff]  }
  0x25   : > { %v6529_v10 = vld [vmem:[%s7251_s27 + $0x14c] ss:$16 sps:$4 sm:$0xff]   ;;  %v6531_v11 = vld [vmem:[%s7251_s27 + $0x140] ss:$16 sps:$4 sm:$0xff]   ;;  %v6532_v12 = vld [vmem:[%s7251_s27 + $0x148] ss:$16 sps:$4 sm:$0xff]  }
  0x26   : > { %v6543_v19 = vld [vmem:[%s7251_s27 + $0x180] ss:$16 sps:$4 sm:$0xff]   ;;  %v6545_v21 = vld [vmem:[%s7251_s27 + $0x1a4] ss:$16 sps:$4 sm:$0xff]  }
  0x27   : > { %3130 = vmatpush1.bf16.msra.mxu1 %v6447_v13  ;;  %4059 = vmatpush1.bf16.msra.mxu0 %v6448_v14  ;;  %v6533_v13 = vld [vmem:[%s7251_s27 + $0x164] ss:$16 sps:$4 sm:$0xff]   ;;  %v6535_v14 = vld [vmem:[%s7251_s27 + $0x16c] ss:$16 sps:$4 sm:$0xff]  }
  0x28   : > { %3131 = vmatprep.subr.bf16.mxu1 %v7148_v1  ;;  %4060 = vmatprep.subr.bf16.mxu0 %v7148_v1 }
  0x2b   : > { %3132 = vmatpush1.bf16.msra.mxu1 %v6449_v15  ;;  %4061 = vmatpush1.bf16.msra.mxu0 %v6450_v16  ;;  %v6537_v15 = vld [vmem:[%s7251_s27 + $0x160] ss:$16 sps:$4 sm:$0xff]   ;;  %v6538_v16 = vld [vmem:[%s7251_s27 + $0x168] ss:$16 sps:$4 sm:$0xff]  }
  0x2c   : > { %3133 = vmatprep.subr.bf16.mxu1 %v7148_v1  ;;  %4062 = vmatprep.subr.bf16.mxu0 %v7148_v1 }
  0x2f   : > { %3134 = vmatpush1.bf16.msra.mxu1 %v6451_v17  ;;  %4063 = vmatpush1.bf16.msra.mxu0 %v6452_v18  ;;  %v6539_v17 = vld [vmem:[%s7251_s27 + $0x184] ss:$16 sps:$4 sm:$0xff]   ;;  %v6541_v18 = vld [vmem:[%s7251_s27 + $0x18c] ss:$16 sps:$4 sm:$0xff]  }
  0x30   : > { %3135 = vmatprep.subr.bf16.mxu1 %v7148_v1  ;;  %4064 = vmatprep.subr.bf16.mxu0 %v7148_v1 }
  0x33   : > { %3136 = vmatpush1.bf16.msra.mxu1 %v6453_v20  ;;  %4065 = vmatpush1.bf16.msra.mxu0 %v6454_v22  ;;  %v6544_v20 = vld [vmem:[%s7251_s27 + $0x188] ss:$16 sps:$4 sm:$0xff]   ;;  %v6547_v22 = vld [vmem:[%s7251_s27 + $0x1ac] ss:$16 sps:$4 sm:$0xff]  }
  0x34   : > { %3137 = vmatprep.subr.bf16.mxu1 %v7148_v1  ;;  %4066 = vmatprep.subr.bf16.mxu0 %v7148_v1 }
  0x37   : > { %3138 = vmatpush1.bf16.msra.mxu1 %v6455_v23  ;;  %4067 = vmatpush1.bf16.msra.mxu0 %v6456_v24  ;;  %v6549_v23 = vld [vmem:[%s7251_s27 + $0x1a0] ss:$16 sps:$4 sm:$0xff]   ;;  %v6550_v24 = vld [vmem:[%s7251_s27 + $0x1a8] ss:$16 sps:$4 sm:$0xff]  }
  0x38   : > { %3139 = vmatprep.subr.bf16.mxu1 %v7148_v1  ;;  %4068 = vmatprep.subr.bf16.mxu0 %v7148_v1 }
  0x3b   : > { %3140 = vmatpush1.bf16.msra.mxu1 %v6457_v25  ;;  %4069 = vmatpush1.bf16.msra.mxu0 %v6458_v26  ;;  %v6551_v25 = vld [vmem:[%s7251_s27 + $0x1c4] ss:$16 sps:$4 sm:$0xff]   ;;  %v6553_v26 = vld [vmem:[%s7251_s27 + $0x1cc] ss:$16 sps:$4 sm:$0xff]  }
  0x3c   : > { %3141 = vmatprep.subr.bf16.mxu1 %v7148_v1  ;;  %4070 = vmatprep.subr.bf16.mxu0 %v7148_v1 }
  0x3f   : > { %3142 = vmatpush1.bf16.msra.mxu1 %v6459_v27  ;;  %4071 = vmatpush1.bf16.msra.mxu0 %v6460_v28  ;;  %v6555_v27 = vld [vmem:[%s7251_s27 + $0x1c0] ss:$16 sps:$4 sm:$0xff]   ;;  %v6556_v28 = vld [vmem:[%s7251_s27 + $0x1c8] ss:$16 sps:$4 sm:$0xff]  }
  0x40   : > { %3143 = vmatprep.subr.bf16.mxu1 %v7148_v1  ;;  %4072 = vmatprep.subr.bf16.mxu0 %v7148_v1 }
  0x43   : > { %3144 = vmatpush1.bf16.msra.mxu1 %v6461_v29  ;;  %4073 = vmatpush1.bf16.msra.mxu0 %v6462_v30  ;;  %v6557_v29 = vld [vmem:[%s7251_s27 + $0x1e4] ss:$16 sps:$4 sm:$0xff]   ;;  %v6559_v30 = vld [vmem:[%s7251_s27 + $0x1ec] ss:$16 sps:$4 sm:$0xff]  }
  0x44   : > { %3145 = vmatprep.subr.bf16.mxu1 %v7148_v1  ;;  %4074 = vmatprep.subr.bf16.mxu0 %v7148_v1 }
  0x47   : > { %3146 = vmatpush1.bf16.msra.mxu1 %v6463_v31  ;;  %4075 = vmatpush1.bf16.msra.mxu0 %v6464_v32  ;;  %v6561_v31 = vld [vmem:[%s7251_s27 + $0x1e0] ss:$16 sps:$4 sm:$0xff]   ;;  %v6562_v32 = vld [vmem:[%s7251_s27 + $0x1e8] ss:$16 sps:$4 sm:$0xff]  }
  0x48   : > { %3147 = vmatprep.subr.bf16.mxu1 %v7148_v1  ;;  %4076 = vmatprep.subr.bf16.mxu0 %v7148_v1  ;;  %v6515_v1 = vld [vmem:[%s7251_s27 + $0x104] ss:$16 sps:$4 sm:$0xff]  }
  0x4b   : > { %3148 = vmatpush1.bf16.msra.mxu1 %v6465_v33  ;;  %4077 = vmatpush1.bf16.msra.mxu0 %v6466_v34  ;;  %v6563_v33 = vld [vmem:[%s7251_s27 + $0x204] ss:$16 sps:$4 sm:$0xff]   ;;  %v6565_v34 = vld [vmem:[%s7251_s27 + $0x20c] ss:$16 sps:$4 sm:$0xff]  }
  0x4e   : > { %3150 = vmatmul.mubr.bf16.vlgmr.msra.gmra.mrb[0].mxu1 %v6467_v35  ;;  %4079 = vmatmul.mubr.bf16.vlgmr.msra.gmra.mrb[0].mxu0 %v6470_v36  ;;  %v6567_v35 = vld [vmem:[%s7251_s27 + $0x200] ss:$16 sps:$4 sm:$0xff]   ;;  %v6568_v36 = vld [vmem:[%s7251_s27 + $0x208] ss:$16 sps:$4 sm:$0xff]  }
  0x4f   : > { %3157 = vmatprep.mubr.bf16.mxu1 %v6473_v37  ;;  %4086 = vmatprep.mubr.bf16.mxu0 %v6475_v38  ;;  %v6569_v37 = vld [vmem:[%s7251_s27 + $0x224] ss:$16 sps:$4 sm:$0xff]   ;;  %v6571_v38 = vld [vmem:[%s7251_s27 + $0x22c] ss:$16 sps:$4 sm:$0xff]  }
  0x56   : > { %3158 = vmatmul.mubr.bf16.gmra.mrb[4].mxu1 %v6477_v39  ;;  %4087 = vmatmul.mubr.bf16.gmra.mrb[4].mxu0 %v6478_v40  ;;  %v6573_v39 = vld [vmem:[%s7251_s27 + $0x220] ss:$16 sps:$4 sm:$0xff]   ;;  %v6574_v40 = vld [vmem:[%s7251_s27 + $0x228] ss:$16 sps:$4 sm:$0xff]  }
  0x57   : > { %3165 = vmatprep.mubr.bf16.mxu1 %v6479_v41  ;;  %4094 = vmatprep.mubr.bf16.mxu0 %v6481_v42  ;;  %v6575_v41 = vld [vmem:[%s7251_s27 + $0x244] ss:$16 sps:$4 sm:$0xff]   ;;  %v6577_v42 = vld [vmem:[%s7251_s27 + $0x24c] ss:$16 sps:$4 sm:$0xff]  }
  0x5e   : > { %3166 = vmatmul.mubr.bf16.gmra.mrb[8].mxu1 %v6483_v43  ;;  %4095 = vmatmul.mubr.bf16.gmra.mrb[8].mxu0 %v6484_v44  ;;  %v6579_v43 = vld [vmem:[%s7251_s27 + $0x240] ss:$16 sps:$4 sm:$0xff]   ;;  %v6580_v44 = vld [vmem:[%s7251_s27 + $0x248] ss:$16 sps:$4 sm:$0xff]  }
  0x5f   : > { %3173 = vmatprep.mubr.bf16.mxu1 %v6485_v45  ;;  %4102 = vmatprep.mubr.bf16.mxu0 %v6487_v46  ;;  %v6581_v45 = vld [vmem:[%s7251_s27 + $0x264] ss:$16 sps:$4 sm:$0xff]   ;;  %v6583_v46 = vld [vmem:[%s7251_s27 + $0x26c] ss:$16 sps:$4 sm:$0xff]  }
  0x66   : > { %3174 = vmatmul.mubr.bf16.gmra.mrb[12].mxu1 %v6489_v47  ;;  %4103 = vmatmul.mubr.bf16.gmra.mrb[12].mxu0 %v6490_v48  ;;  %v6585_v47 = vld [vmem:[%s7251_s27 + $0x260] ss:$16 sps:$4 sm:$0xff]   ;;  %v6586_v48 = vld [vmem:[%s7251_s27 + $0x268] ss:$16 sps:$4 sm:$0xff]  }
  0x67   : > { %3181 = vmatprep.mubr.bf16.mxu1 %v6491_v49  ;;  %4110 = vmatprep.mubr.bf16.mxu0 %v6493_v50  ;;  %v6587_v49 = vld [vmem:[%s7251_s27 + $0x284] ss:$16 sps:$4 sm:$0xff]   ;;  %v6589_v50 = vld [vmem:[%s7251_s27 + $0x28c] ss:$16 sps:$4 sm:$0xff]  }
  0x6e   : > { %3182 = vmatmul.mubr.bf16.gmra.mrb[16].mxu1 %v6495_v51  ;;  %4111 = vmatmul.mubr.bf16.gmra.mrb[16].mxu0 %v6496_v52  ;;  %v6591_v51 = vld [vmem:[%s7251_s27 + $0x280] ss:$16 sps:$4 sm:$0xff]   ;;  %v6592_v52 = vld [vmem:[%s7251_s27 + $0x288] ss:$16 sps:$4 sm:$0xff]  }
  0x6f   : > { %3189 = vmatprep.mubr.bf16.mxu1 %v6497_v53  ;;  %4118 = vmatprep.mubr.bf16.mxu0 %v6499_v54  ;;  %v6593_v53 = vld [vmem:[%s7251_s27 + $0x2a4] ss:$16 sps:$4 sm:$0xff]   ;;  %v6595_v54 = vld [vmem:[%s7251_s27 + $0x2ac] ss:$16 sps:$4 sm:$0xff]  }
  0x76   : > { %3190 = vmatmul.mubr.bf16.gmra.mrb[20].mxu1 %v6501_v55  ;;  %4119 = vmatmul.mubr.bf16.gmra.mrb[20].mxu0 %v6502_v56  ;;  %v6597_v55 = vld [vmem:[%s7251_s27 + $0x2a0] ss:$16 sps:$4 sm:$0xff]   ;;  %v6598_v56 = vld [vmem:[%s7251_s27 + $0x2a8] ss:$16 sps:$4 sm:$0xff]  }
  0x77   : > { %3197 = vmatprep.mubr.bf16.mxu1 %v6503_v57  ;;  %4126 = vmatprep.mubr.bf16.mxu0 %v6505_v58  ;;  %v6599_v57 = vld [vmem:[%s7251_s27 + $0x2c4] ss:$16 sps:$4 sm:$0xff]   ;;  %v6601_v58 = vld [vmem:[%s7251_s27 + $0x2cc] ss:$16 sps:$4 sm:$0xff]  }
  0x7e   : > { %3198 = vmatmul.mubr.bf16.gmra.mrb[24].mxu1 %v6507_v59  ;;  %4127 = vmatmul.mubr.bf16.gmra.mrb[24].mxu0 %v6508_v60  ;;  %v6603_v59 = vld [vmem:[%s7251_s27 + $0x2c0] ss:$16 sps:$4 sm:$0xff]   ;;  %v6604_v60 = vld [vmem:[%s7251_s27 + $0x2c8] ss:$16 sps:$4 sm:$0xff]  }
  0x7f   : > { %3205 = vmatprep.mubr.bf16.mxu1 %v6509_v61  ;;  %4134 = vmatprep.mubr.bf16.mxu0 %v6511_v62  ;;  %v6605_v61 = vld [vmem:[%s7251_s27 + $0x2e4] ss:$16 sps:$4 sm:$0xff]   ;;  %v6607_v62 = vld [vmem:[%s7251_s27 + $0x2ec] ss:$16 sps:$4 sm:$0xff]  }
  0x86   : > { %3206 = vmatmul.mubr.bf16.gmra.mrb[28].mxu1 %v6513_v63  ;;  %4135 = vmatmul.mubr.bf16.gmra.mrb[28].mxu0 %v6514_v0  ;;  %v6609_v63 = vld [vmem:[%s7251_s27 + $0x2e0] ss:$16 sps:$4 sm:$0xff]   ;;  %v6610_v0 = vld [vmem:[%s7251_s27 + $0x2e8] ss:$16 sps:$4 sm:$0xff]  }
  0x87   : > { %3213 = vmatprep.mubr.bf16.mxu1 %v6515_v1  ;;  %4142 = vmatprep.mubr.bf16.mxu0 %v6517_v2  ;;  %v6611_v1 = vld [vmem:[%s7251_s27 + $0x304] ss:$16 sps:$4 sm:$0xff]   ;;  %v6613_v2 = vld [vmem:[%s7251_s27 + $0x30c] ss:$16 sps:$4 sm:$0xff]  }
  0x8e   : > { %3214 = vmatmul.mubr.bf16.gmra.mrb[32].mxu1 %v6519_v3  ;;  %4143 = vmatmul.mubr.bf16.gmra.mrb[32].mxu0 %v6520_v4  ;;  %v6615_v3 = vld [vmem:[%s7251_s27 + $0x300] ss:$16 sps:$4 sm:$0xff]   ;;  %v6616_v4 = vld [vmem:[%s7251_s27 + $0x308] ss:$16 sps:$4 sm:$0xff]  }
  0x8f   : > { %3221 = vmatprep.mubr.bf16.mxu1 %v6521_v5  ;;  %4150 = vmatprep.mubr.bf16.mxu0 %v6523_v6  ;;  %v6617_v5 = vld [vmem:[%s7251_s27 + $0x324] ss:$16 sps:$4 sm:$0xff]   ;;  %v6619_v6 = vld [vmem:[%s7251_s27 + $0x32c] ss:$16 sps:$4 sm:$0xff]  }
  0x96   : > { %3222 = vmatmul.mubr.bf16.gmra.mrb[36].mxu1 %v6525_v7  ;;  %4151 = vmatmul.mubr.bf16.gmra.mrb[36].mxu0 %v6526_v8  ;;  %v6621_v7 = vld [vmem:[%s7251_s27 + $0x320] ss:$16 sps:$4 sm:$0xff]   ;;  %v6622_v8 = vld [vmem:[%s7251_s27 + $0x328] ss:$16 sps:$4 sm:$0xff]  }
  0x97   : > { %3229 = vmatprep.mubr.bf16.mxu1 %v6527_v9  ;;  %4158 = vmatprep.mubr.bf16.mxu0 %v6529_v10  ;;  %v6623_v9 = vld [vmem:[%s7251_s27 + $0x344] ss:$16 sps:$4 sm:$0xff]   ;;  %v6625_v10 = vld [vmem:[%s7251_s27 + $0x34c] ss:$16 sps:$4 sm:$0xff]  }
  0x9e   : > { %3230 = vmatmul.mubr.bf16.gmra.mrb[40].mxu1 %v6531_v11  ;;  %4159 = vmatmul.mubr.bf16.gmra.mrb[40].mxu0 %v6532_v12  ;;  %v6627_v11 = vld [vmem:[%s7251_s27 + $0x340] ss:$16 sps:$4 sm:$0xff]   ;;  %v6628_v12 = vld [vmem:[%s7251_s27 + $0x348] ss:$16 sps:$4 sm:$0xff]  }
  0x9f   : > { %3237 = vmatprep.mubr.bf16.mxu1 %v6533_v13  ;;  %4166 = vmatprep.mubr.bf16.mxu0 %v6535_v14  ;;  %v6629_v13 = vld [vmem:[%s7251_s27 + $0x364] ss:$16 sps:$4 sm:$0xff]   ;;  %v6631_v14 = vld [vmem:[%s7251_s27 + $0x36c] ss:$16 sps:$4 sm:$0xff]  }
  0xa6   : > { %3238 = vmatmul.mubr.bf16.gmra.mrb[44].mxu1 %v6537_v15  ;;  %4167 = vmatmul.mubr.bf16.gmra.mrb[44].mxu0 %v6538_v16 }
  0xa7   : > { %3245 = vmatprep.mubr.bf16.mxu1 %v6539_v17  ;;  %4174 = vmatprep.mubr.bf16.mxu0 %v6541_v18  ;;  %v6633_v18 = vld [vmem:[%s7251_s27 + $0x360] ss:$16 sps:$4 sm:$0xff]  }
  0xae   : > { %3246 = vmatmul.mubr.bf16.gmra.mrb[48].mxu1 %v6543_v19  ;;  %4175 = vmatmul.mubr.bf16.gmra.mrb[48].mxu0 %v6544_v20 }
  0xaf   : > { %3253 = vmatprep.mubr.bf16.mxu1 %v6545_v21  ;;  %4182 = vmatprep.mubr.bf16.mxu0 %v6547_v22  ;;  %v6634_v22 = vld [vmem:[%s7251_s27 + $0x368] ss:$16 sps:$4 sm:$0xff]  }
  0xb6   : > { %3254 = vmatmul.mubr.bf16.gmra.mrb[52].mxu1 %v6549_v23  ;;  %4183 = vmatmul.mubr.bf16.gmra.mrb[52].mxu0 %v6550_v24  ;;  %v6635_v23 = vld [vmem:[%s7251_s27 + $0x384] ss:$16 sps:$4 sm:$0xff]  }
  0xb7   : > { %3261 = vmatprep.mubr.bf16.mxu1 %v6551_v25  ;;  %4190 = vmatprep.mubr.bf16.mxu0 %v6553_v26  ;;  %v6637_v26 = vld [vmem:[%s7251_s27 + $0x38c] ss:$16 sps:$4 sm:$0xff]  }
  0xbe   : > { %3262 = vmatmul.mubr.bf16.gmra.mrb[56].mxu1 %v6555_v27  ;;  %4191 = vmatmul.mubr.bf16.gmra.mrb[56].mxu0 %v6556_v28 }
  0xbf   : > { %3269 = vmatprep.mubr.bf16.mxu1 %v6557_v29  ;;  %4198 = vmatprep.mubr.bf16.mxu0 %v6559_v30 }
  0xc6   : > { %3270 = vmatmul.mubr.bf16.gmra.mrb[60].mxu1 %v6561_v31  ;;  %4199 = vmatmul.mubr.bf16.gmra.mrb[60].mxu0 %v6562_v32  ;;  %v6639_v32 = vld [vmem:[%s7251_s27 + $0x380] ss:$16 sps:$4 sm:$0xff]  }
  0xc7   : > { %3277 = vmatprep.mubr.bf16.mxu1 %v6563_v33  ;;  %4206 = vmatprep.mubr.bf16.mxu0 %v6565_v34 }
  0xce   : > { %3278 = vmatmul.mubr.bf16.gmra.mrb[64].mxu1 %v6567_v35  ;;  %4207 = vmatmul.mubr.bf16.gmra.mrb[64].mxu0 %v6568_v36  ;;  %v6640_v36 = vld [vmem:[%s7251_s27 + $0x388] ss:$16 sps:$4 sm:$0xff]  }
  0xcf   : > { %3285 = vmatprep.mubr.bf16.mxu1 %v6569_v37  ;;  %4214 = vmatprep.mubr.bf16.mxu0 %v6571_v38  ;;  %v6641_v37 = vld [vmem:[%s7251_s27 + $0x3a4] ss:$16 sps:$4 sm:$0xff]  }
  0xd6   : > { %3286 = vmatmul.mubr.bf16.gmra.mrb[68].mxu1 %v6573_v39  ;;  %4215 = vmatmul.mubr.bf16.gmra.mrb[68].mxu0 %v6574_v40  ;;  %v6643_v40 = vld [vmem:[%s7251_s27 + $0x3ac] ss:$16 sps:$4 sm:$0xff]  }
  0xd7   : > { %3293 = vmatprep.mubr.bf16.mxu1 %v6575_v41  ;;  %4222 = vmatprep.mubr.bf16.mxu0 %v6577_v42 }
  0xde   : > { %3294 = vmatmul.mubr.bf16.gmra.mrb[72].mxu1 %v6579_v43  ;;  %4223 = vmatmul.mubr.bf16.gmra.mrb[72].mxu0 %v6580_v44 }
  0xdf   : > { %3301 = vmatprep.mubr.bf16.mxu1 %v6581_v45  ;;  %4230 = vmatprep.mubr.bf16.mxu0 %v6583_v46  ;;  %v6645_v46 = vld [vmem:[%s7251_s27 + $0x3a0] ss:$16 sps:$4 sm:$0xff]  }
  0xe6   : > { %3302 = vmatmul.mubr.bf16.gmra.mrb[76].mxu1 %v6585_v47  ;;  %4231 = vmatmul.mubr.bf16.gmra.mrb[76].mxu0 %v6586_v48 }
  0xe7   : > { %3309 = vmatprep.mubr.bf16.mxu1 %v6587_v49  ;;  %4238 = vmatprep.mubr.bf16.mxu0 %v6589_v50  ;;  %v6646_v50 = vld [vmem:[%s7251_s27 + $0x3a8] ss:$16 sps:$4 sm:$0xff]  }
  0xee   : > { %3310 = vmatmul.mubr.bf16.gmra.mrb[80].mxu1 %v6591_v51  ;;  %4239 = vmatmul.mubr.bf16.gmra.mrb[80].mxu0 %v6592_v52  ;;  %v6647_v51 = vld [vmem:[%s7251_s27 + $0x3c4] ss:$16 sps:$4 sm:$0xff]  }
  0xef   : > { %3317 = vmatprep.mubr.bf16.mxu1 %v6593_v53  ;;  %4246 = vmatprep.mubr.bf16.mxu0 %v6595_v54  ;;  %v6649_v54 = vld [vmem:[%s7251_s27 + $0x3cc] ss:$16 sps:$4 sm:$0xff]  }
  0xf6   : > { %3318 = vmatmul.mubr.bf16.gmra.mrb[84].mxu1 %v6597_v55  ;;  %4247 = vmatmul.mubr.bf16.gmra.mrb[84].mxu0 %v6598_v56 }
  0xf7   : > { %3325 = vmatprep.mubr.bf16.mxu1 %v6599_v57  ;;  %4254 = vmatprep.mubr.bf16.mxu0 %v6601_v58 }
  0xfe   : > { %3326 = vmatmul.mubr.bf16.gmra.mrb[88].mxu1 %v6603_v59  ;;  %4255 = vmatmul.mubr.bf16.gmra.mrb[88].mxu0 %v6604_v60  ;;  %v6651_v60 = vld [vmem:[%s7251_s27 + $0x3c0] ss:$16 sps:$4 sm:$0xff]  }
  0xff   : > { %3333 = vmatprep.mubr.bf16.mxu1 %v6605_v61  ;;  %4262 = vmatprep.mubr.bf16.mxu0 %v6607_v62 }
 0x106   : > { %3334 = vmatmul.mubr.bf16.gmra.mrb[92].mxu1 %v6609_v63  ;;  %4263 = vmatmul.mubr.bf16.gmra.mrb[92].mxu0 %v6610_v0  ;;  %v6652_v0 = vld [vmem:[%s7251_s27 + $0x3c8] ss:$16 sps:$4 sm:$0xff]  }
 0x107   : > { %3341 = vmatprep.mubr.bf16.mxu1 %v6611_v1  ;;  %4270 = vmatprep.mubr.bf16.mxu0 %v6613_v2  ;;  %v6653_v1 = vld [vmem:[%s7251_s27 + $0x3e4] ss:$16 sps:$4 sm:$0xff]  }
 0x10e   : > { %3342 = vmatmul.mubr.bf16.gmra.mrb[96].mxu1 %v6615_v3  ;;  %4271 = vmatmul.mubr.bf16.gmra.mrb[96].mxu0 %v6616_v4  ;;  %v6655_v4 = vld [vmem:[%s7251_s27 + $0x3ec] ss:$16 sps:$4 sm:$0xff]  }
 0x10f   : > { %3349 = vmatprep.mubr.bf16.mxu1 %v6617_v5  ;;  %4278 = vmatprep.mubr.bf16.mxu0 %v6619_v6 }
 0x116   : > { %3350 = vmatmul.mubr.bf16.gmra.mrb[100].mxu1 %v6621_v7  ;;  %4279 = vmatmul.mubr.bf16.gmra.mrb[100].mxu0 %v6622_v8 }
 0x117   : > { %3357 = vmatprep.mubr.bf16.mxu1 %v6623_v9  ;;  %4286 = vmatprep.mubr.bf16.mxu0 %v6625_v10  ;;  %v6657_v10 = vld [vmem:[%s7251_s27 + $0x3e0] ss:$16 sps:$4 sm:$0xff]  }
 0x11e   : > { %3358 = vmatmul.mubr.bf16.gmra.mrb[104].mxu1 %v6627_v11  ;;  %4287 = vmatmul.mubr.bf16.gmra.mrb[104].mxu0 %v6628_v12 }
 0x11f   : > { %3365 = vmatprep.mubr.bf16.mxu1 %v6629_v13  ;;  %4294 = vmatprep.mubr.bf16.mxu0 %v6631_v14  ;;  %v6658_v14 = vld [vmem:[%s7251_s27 + $0x3e8] ss:$16 sps:$4 sm:$0xff]  }
 0x121   : > { %v3151_v15 = vpop.f32.mrb[0].mxu1  ;;  %v4080_v16 = vpop.f32.mrb[0].mxu0 }
 0x122   : > { %v3153_v17 = vpop.f32.mrb[1].mxu1  ;;  %v7425_v19 = vadd.f32 %v4080_v16, %v3151_v15  ;;  %v4082_v20 = vpop.f32.mrb[1].mxu0  ;;  %v6659_v15 = vld [vmem:[%s7251_s27 + $0x404] ss:$16 sps:$4 sm:$0xff]  }
 0x123   : > { %v3154_v21 = vpop.f32.mrb[2].mxu1  ;;  %v4083_v24 = vpop.f32.mrb[2].mxu0 }
 0x124   : > { %v3156_v25 = vpop.f32.mrb[3].mxu1  ;;  %v7430_v27 = vadd.f32 %v4083_v24, %v3154_v21  ;;  %v4085_v28 = vpop.f32.mrb[3].mxu0 }
 0x125   : > { %v6663_v25 = vld [vmem:[%s7251_s27 + $0x400] ss:$16 sps:$4 sm:$0xff]  }
 0x126   : > { %3366 = vmatmul.mubr.bf16.gmra.mrb[108].mxu1 %v6633_v18  ;;  %4295 = vmatmul.mubr.bf16.gmra.mrb[108].mxu0 %v6634_v22  ;;  %v6661_v18 = vld [vmem:[%s7251_s27 + $0x40c] ss:$16 sps:$4 sm:$0xff]  }
 0x127   : > { %3373 = vmatprep.mubr.bf16.mxu1 %v6635_v23  ;;  %4302 = vmatprep.mubr.bf16.mxu0 %v6637_v26 }
 0x129   : > { %v3159_v29 = vpop.f32.mrb[4].mxu1  ;;  %v4088_v30 = vpop.f32.mrb[4].mxu0 }
 0x12a   : > { %v3161_v31 = vpop.f32.mrb[5].mxu1  ;;  %v7433_v33 = vadd.f32 %v4088_v30, %v3159_v29  ;;  %v4090_v34 = vpop.f32.mrb[5].mxu0  ;;  %v6664_v30 = vld [vmem:[%s7251_s27 + $0x408] ss:$16 sps:$4 sm:$0xff]  }
 0x12b   : > { %v3162_v35 = vpop.f32.mrb[6].mxu1  ;;  %v4091_v38 = vpop.f32.mrb[6].mxu0  ;;  %v6665_v31 = vld [vmem:[%s7251_s27 + $0x424] ss:$16 sps:$4 sm:$0xff]  }
 0x12c   : > { %v3164_v39 = vpop.f32.mrb[7].mxu1  ;;  %v7438_v41 = vadd.f32 %v4091_v38, %v3162_v35  ;;  %v4093_v42 = vpop.f32.mrb[7].mxu0  ;;  %v6667_v35 = vld [vmem:[%s7251_s27 + $0x42c] ss:$16 sps:$4 sm:$0xff]  }
 0x12d   : > { %v6669_v42 = vld [vmem:[%s7251_s27 + $0x420] ss:$16 sps:$4 sm:$0xff]  }
 0x12e   : > { %3374 = vmatmul.mubr.bf16.gmra.mrb[112].mxu1 %v6639_v32  ;;  %4303 = vmatmul.mubr.bf16.gmra.mrb[112].mxu0 %v6640_v36 }
 0x12f   : > { %3381 = vmatprep.mubr.bf16.mxu1 %v6641_v37  ;;  %4310 = vmatprep.mubr.bf16.mxu0 %v6643_v40 }
 0x131   : > { %v3167_v43 = vpop.f32.mrb[8].mxu1  ;;  %v4096_v44 = vpop.f32.mrb[8].mxu0 }
 0x132   : > { %v3169_v45 = vpop.f32.mrb[9].mxu1  ;;  %v7441_v47 = vadd.f32 %v4096_v44, %v3167_v43  ;;  %v4098_v48 = vpop.f32.mrb[9].mxu0 }
 0x133   : > { %v3170_v49 = vpop.f32.mrb[10].mxu1  ;;  %v4099_v52 = vpop.f32.mrb[10].mxu0  ;;  %v6671_v48 = vld [vmem:[%s7251_s27 + $0x444] ss:$16 sps:$4 sm:$0xff]  }
 0x134   : > { %v3172_v53 = vpop.f32.mrb[11].mxu1  ;;  %v7446_v55 = vadd.f32 %v4099_v52, %v3170_v49  ;;  %v4101_v56 = vpop.f32.mrb[11].mxu0 }
 0x136   : > { %3382 = vmatmul.mubr.bf16.gmra.mrb[116].mxu1 %v6645_v46  ;;  %4311 = vmatmul.mubr.bf16.gmra.mrb[116].mxu0 %v6646_v50  ;;  %v6670_v46 = vld [vmem:[%s7251_s27 + $0x428] ss:$16 sps:$4 sm:$0xff]  }
 0x137   : > { %3389 = vmatprep.mubr.bf16.mxu1 %v6647_v51  ;;  %4318 = vmatprep.mubr.bf16.mxu0 %v6649_v54  ;;  %v6673_v51 = vld [vmem:[%s7251_s27 + $0x44c] ss:$16 sps:$4 sm:$0xff]  }
 0x139   : > { %v3175_v57 = vpop.f32.mrb[12].mxu1  ;;  %v4104_v58 = vpop.f32.mrb[12].mxu0 }
 0x13a   : > { %v3177_v59 = vpop.f32.mrb[13].mxu1  ;;  %v7449_v61 = vadd.f32 %v4104_v58, %v3175_v57  ;;  %v4106_v62 = vpop.f32.mrb[13].mxu0  ;;  %v6675_v58 = vld [vmem:[%s7251_s27 + $0x440] ss:$16 sps:$4 sm:$0xff]  }
 0x13b   : > { %v3178_v63 = vpop.f32.mrb[14].mxu1  ;;  %v4107_v2 = vpop.f32.mrb[14].mxu0 }
 0x13c   : > { %v3180_v3 = vpop.f32.mrb[15].mxu1  ;;  %v7454_v5 = vadd.f32 %v4107_v2, %v3178_v63  ;;  %v4109_v6 = vpop.f32.mrb[15].mxu0  ;;  %v6676_v63 = vld [vmem:[%s7251_s27 + $0x448] ss:$16 sps:$4 sm:$0xff]  }
 0x13d   : > { %v6679_v3 = vld [vmem:[%s7251_s27 + $0x46c] ss:$16 sps:$4 sm:$0xff]  }
 0x13e   : > { %3390 = vmatmul.mubr.bf16.gmra.mrb[120].mxu1 %v6651_v60  ;;  %4319 = vmatmul.mubr.bf16.gmra.mrb[120].mxu0 %v6652_v0  ;;  %v6677_v0 = vld [vmem:[%s7251_s27 + $0x464] ss:$16 sps:$4 sm:$0xff]  }
 0x13f   : > { %3397 = vmatprep.mubr.bf16.mxu1 %v6653_v1  ;;  %4326 = vmatprep.mubr.bf16.mxu0 %v6655_v4 }
 0x141   : > { %v3183_v7 = vpop.f32.mrb[16].mxu1  ;;  %v4112_v8 = vpop.f32.mrb[16].mxu0 }
 0x142   : > { %v3185_v9 = vpop.f32.mrb[17].mxu1  ;;  %v7457_v11 = vadd.f32 %v4112_v8, %v3183_v7  ;;  %v4114_v12 = vpop.f32.mrb[17].mxu0 }
 0x143   : > { %v3186_v13 = vpop.f32.mrb[18].mxu1  ;;  %v4115_v16 = vpop.f32.mrb[18].mxu0 }
 0x144   : > { %v3188_v17 = vpop.f32.mrb[19].mxu1  ;;  %v7462_v20 = vadd.f32 %v4115_v16, %v3186_v13  ;;  %v4117_v21 = vpop.f32.mrb[19].mxu0  ;;  %v6683_v16 = vld [vmem:[%s7251_s27 + $0x484] ss:$16 sps:$4 sm:$0xff]  }
 0x145   : > { %v6685_v21 = vld [vmem:[%s7251_s27 + $0x48c] ss:$16 sps:$4 sm:$0xff]  }
 0x146   : > { %3398 = vmatmul.mubr.bf16.gmra.mrb[124].mxu1 %v6657_v10  ;;  %4327 = vmatmul.mubr.bf16.gmra.mrb[124].mxu0 %v6658_v14  ;;  %v6681_v10 = vld [vmem:[%s7251_s27 + $0x460] ss:$16 sps:$4 sm:$0xff]  }
 0x147   : > { %3405 = vmatprep.mubr.bf16.mxu1 %v6659_v15  ;;  %4334 = vmatprep.mubr.bf16.mxu0 %v6661_v18  ;;  %v6682_v15 = vld [vmem:[%s7251_s27 + $0x468] ss:$16 sps:$4 sm:$0xff]  }
 0x149   : > { %v3191_v22 = vpop.f32.mrb[20].mxu1  ;;  %v4120_v23 = vpop.f32.mrb[20].mxu0 }
 0x14a   : > { %v3193_v24 = vpop.f32.mrb[21].mxu1  ;;  %v7465_v26 = vadd.f32 %v4120_v23, %v3191_v22  ;;  %v4122_v28 = vpop.f32.mrb[21].mxu0 }
 0x14b   : > { %v3194_v29 = vpop.f32.mrb[22].mxu1  ;;  %v4123_v32 = vpop.f32.mrb[22].mxu0 }
 0x14c   : > { %v3196_v34 = vpop.f32.mrb[23].mxu1  ;;  %v7470_v36 = vadd.f32 %v4123_v32, %v3194_v29  ;;  %v4125_v37 = vpop.f32.mrb[23].mxu0  ;;  %v6687_v29 = vld [vmem:[%s7251_s27 + $0x480] ss:$16 sps:$4 sm:$0xff]  }
 0x14d   : > { %v6688_v34 = vld [vmem:[%s7251_s27 + $0x488] ss:$16 sps:$4 sm:$0xff]  }
 0x14e   : > { %3406 = vmatmul.mubr.bf16.gmra.mrb[128].mxu1 %v6663_v25  ;;  %4335 = vmatmul.mubr.bf16.gmra.mrb[128].mxu0 %v6664_v30 }
 0x14f   : > { %3413 = vmatprep.mubr.bf16.mxu1 %v6665_v31  ;;  %4342 = vmatprep.mubr.bf16.mxu0 %v6667_v35  ;;  %v6689_v35 = vld [vmem:[%s7251_s27 + $0x4a4] ss:$16 sps:$4 sm:$0xff]  }
 0x151   : > { %v3199_v38 = vpop.f32.mrb[24].mxu1  ;;  %v4128_v39 = vpop.f32.mrb[24].mxu0 }
 0x152   : > { %v3201_v40 = vpop.f32.mrb[25].mxu1  ;;  %v7473_v43 = vadd.f32 %v4128_v39, %v3199_v38  ;;  %v4130_v44 = vpop.f32.mrb[25].mxu0  ;;  %v6691_v39 = vld [vmem:[%s7251_s27 + $0x4ac] ss:$16 sps:$4 sm:$0xff]  }
 0x153   : > { %v3202_v45 = vpop.f32.mrb[26].mxu1  ;;  %v4131_v49 = vpop.f32.mrb[26].mxu0 }
 0x154   : > { %v3204_v50 = vpop.f32.mrb[27].mxu1  ;;  %v7478_v52 = vadd.f32 %v4131_v49, %v3202_v45  ;;  %v4133_v53 = vpop.f32.mrb[27].mxu0 }
 0x155   : > { %v6694_v53 = vld [vmem:[%s7251_s27 + $0x4a8] ss:$16 sps:$4 sm:$0xff]  }
 0x156   : > { %3414 = vmatmul.mubr.bf16.gmra.mrb[132].mxu1 %v6669_v42  ;;  %4343 = vmatmul.mubr.bf16.gmra.mrb[132].mxu0 %v6670_v46 }
 0x157   : > { %3421 = vmatprep.mubr.bf16.mxu1 %v6671_v48  ;;  %4350 = vmatprep.mubr.bf16.mxu0 %v6673_v51  ;;  %v6693_v48 = vld [vmem:[%s7251_s27 + $0x4a0] ss:$16 sps:$4 sm:$0xff]  }
 0x159   : > { %v3207_v54 = vpop.f32.mrb[28].mxu1  ;;  %v4136_v56 = vpop.f32.mrb[28].mxu0 }
 0x15a   : > { %v3209_v57 = vpop.f32.mrb[29].mxu1  ;;  %v7481_v59 = vadd.f32 %v4136_v56, %v3207_v54  ;;  %v4138_v60 = vpop.f32.mrb[29].mxu0  ;;  %v6695_v54 = vld [vmem:[%s7251_s27 + $0x4c4] ss:$16 sps:$4 sm:$0xff]  }
 0x15b   : > { %v3210_v62 = vpop.f32.mrb[30].mxu1  ;;  %v4139_v1 = vpop.f32.mrb[30].mxu0 }
 0x15c   : > { %v3212_v2 = vpop.f32.mrb[31].mxu1  ;;  %v7486_v4 = vadd.f32 %v4139_v1, %v3210_v62  ;;  %v4141_v6 = vpop.f32.mrb[31].mxu0 }
 0x15d   : > { %v6699_v2 = vld [vmem:[%s7251_s27 + $0x4c0] ss:$16 sps:$4 sm:$0xff]  }
 0x15e   : > { %3422 = vmatmul.mubr.bf16.gmra.mrb[136].mxu1 %v6675_v58  ;;  %4351 = vmatmul.mubr.bf16.gmra.mrb[136].mxu0 %v6676_v63  ;;  %v6697_v58 = vld [vmem:[%s7251_s27 + $0x4cc] ss:$16 sps:$4 sm:$0xff]  }
 0x15f   : > { %3429 = vmatprep.mubr.bf16.mxu1 %v6677_v0  ;;  %4358 = vmatprep.mubr.bf16.mxu0 %v6679_v3 }
 0x161   : > { %v3215_v7 = vpop.f32.mrb[32].mxu1  ;;  %v4144_v8 = vpop.f32.mrb[32].mxu0 }
 0x162   : > { %v3217_v9 = vpop.f32.mrb[33].mxu1  ;;  %v7489_v12 = vadd.f32 %v4144_v8, %v3215_v7  ;;  %v4146_v13 = vpop.f32.mrb[33].mxu0  ;;  %v6700_v8 = vld [vmem:[%s7251_s27 + $0x4c8] ss:$16 sps:$4 sm:$0xff]  }
 0x163   : > { %v3218_v14 = vpop.f32.mrb[34].mxu1  ;;  %v4147_v17 = vpop.f32.mrb[34].mxu0  ;;  %v6701_v9 = vld [vmem:[%s7251_s27 + $0x4e4] ss:$16 sps:$4 sm:$0xff]  }
 0x164   : > { %v3220_v18 = vpop.f32.mrb[35].mxu1  ;;  %v7494_v22 = vadd.f32 %v4147_v17, %v3218_v14  ;;  %v4149_v23 = vpop.f32.mrb[35].mxu0  ;;  %v6703_v14 = vld [vmem:[%s7251_s27 + $0x4ec] ss:$16 sps:$4 sm:$0xff]  }
 0x165   : > { %v6705_v23 = vld [vmem:[%s7251_s27 + $0x4e0] ss:$16 sps:$4 sm:$0xff]  }
 0x166   : > { %3430 = vmatmul.mubr.bf16.gmra.mrb[140].mxu1 %v6681_v10  ;;  %4359 = vmatmul.mubr.bf16.gmra.mrb[140].mxu0 %v6682_v15 }
 0x167   : > { %3437 = vmatprep.mubr.bf16.mxu1 %v6683_v16  ;;  %4366 = vmatprep.mubr.bf16.mxu0 %v6685_v21 }
 0x169   : > { %v3223_v24 = vpop.f32.mrb[36].mxu1  ;;  %v4152_v25 = vpop.f32.mrb[36].mxu0 }
 0x16a   : > { %v3225_v28 = vpop.f32.mrb[37].mxu1  ;;  %v7497_v30 = vadd.f32 %v4152_v25, %v3223_v24  ;;  %v4154_v31 = vpop.f32.mrb[37].mxu0 }
 0x16b   : > { %v3226_v32 = vpop.f32.mrb[38].mxu1  ;;  %v4155_v37 = vpop.f32.mrb[38].mxu0  ;;  %v6707_v31 = vld [vmem:[%s7251_s27 + $0x504] ss:$16 sps:$4 sm:$0xff]  }
 0x16c   : > { %v3228_v38 = vpop.f32.mrb[39].mxu1  ;;  %v7502_v40 = vadd.f32 %v4155_v37, %v3226_v32  ;;  %v4157_v42 = vpop.f32.mrb[39].mxu0 }
 0x16e   : > { %3438 = vmatmul.mubr.bf16.gmra.mrb[144].mxu1 %v6687_v29  ;;  %4367 = vmatmul.mubr.bf16.gmra.mrb[144].mxu0 %v6688_v34  ;;  %v6706_v29 = vld [vmem:[%s7251_s27 + $0x4e8] ss:$16 sps:$4 sm:$0xff]  }
 0x16f   : > { %3445 = vmatprep.mubr.bf16.mxu1 %v6689_v35  ;;  %4374 = vmatprep.mubr.bf16.mxu0 %v6691_v39  ;;  %v6709_v35 = vld [vmem:[%s7251_s27 + $0x50c] ss:$16 sps:$4 sm:$0xff]  }
 0x171   : > { %v3231_v44 = vpop.f32.mrb[40].mxu1  ;;  %v4160_v45 = vpop.f32.mrb[40].mxu0 }
 0x172   : > { %v3233_v46 = vpop.f32.mrb[41].mxu1  ;;  %v7505_v49 = vadd.f32 %v4160_v45, %v3231_v44  ;;  %v4162_v50 = vpop.f32.mrb[41].mxu0  ;;  %v6711_v45 = vld [vmem:[%s7251_s27 + $0x500] ss:$16 sps:$4 sm:$0xff]  }
 0x173   : > { %v3234_v51 = vpop.f32.mrb[42].mxu1  ;;  %v4163_v56 = vpop.f32.mrb[42].mxu0 }
 0x174   : > { %v3236_v57 = vpop.f32.mrb[43].mxu1  ;;  %v7510_v60 = vadd.f32 %v4163_v56, %v3234_v51  ;;  %v4165_v62 = vpop.f32.mrb[43].mxu0  ;;  %v6712_v51 = vld [vmem:[%s7251_s27 + $0x508] ss:$16 sps:$4 sm:$0xff]  }
 0x175   : > { %v6715_v57 = vld [vmem:[%s7251_s27 + $0x52c] ss:$16 sps:$4 sm:$0xff]  }
 0x176   : > { %3446 = vmatmul.mubr.bf16.gmra.mrb[148].mxu1 %v6693_v48  ;;  %4375 = vmatmul.mubr.bf16.gmra.mrb[148].mxu0 %v6694_v53  ;;  %v6713_v53 = vld [vmem:[%s7251_s27 + $0x524] ss:$16 sps:$4 sm:$0xff]  }
 0x177   : > { %3453 = vmatprep.mubr.bf16.mxu1 %v6695_v54  ;;  %4382 = vmatprep.mubr.bf16.mxu0 %v6697_v58 }
 0x179   : > { %v3239_v63 = vpop.f32.mrb[44].mxu1  ;;  %v4168_v0 = vpop.f32.mrb[44].mxu0 }
 0x17a   : > { %v3241_v1 = vpop.f32.mrb[45].mxu1  ;;  %v7513_v3 = vadd.f32 %v4168_v0, %v3239_v63  ;;  %v4170_v6 = vpop.f32.mrb[45].mxu0 }
 0x17b   : > { %v3242_v7 = vpop.f32.mrb[46].mxu1  ;;  %v4171_v10 = vpop.f32.mrb[46].mxu0 }
 0x17c   : > { %v3244_v13 = vpop.f32.mrb[47].mxu1  ;;  %v7518_v15 = vadd.f32 %v4171_v10, %v3242_v7  ;;  %v4173_v16 = vpop.f32.mrb[47].mxu0  ;;  %v6719_v10 = vld [vmem:[%s7251_s27 + $0x544] ss:$16 sps:$4 sm:$0xff]  }
 0x17d   : > { %v6721_v16 = vld [vmem:[%s7251_s27 + $0x54c] ss:$16 sps:$4 sm:$0xff]  }
 0x17e   : > { %8714 = vst [vmem:[#allocation2_spill] sm:$0xff] %v7518_v15  ;;  %3454 = vmatmul.mubr.bf16.gmra.mrb[152].mxu1 %v6699_v2  ;;  %4383 = vmatmul.mubr.bf16.gmra.mrb[152].mxu0 %v6700_v8  ;;  %v6717_v2 = vld [vmem:[%s7251_s27 + $0x520] ss:$16 sps:$4 sm:$0xff]  }
 0x17f   : > { %3461 = vmatprep.mubr.bf16.mxu1 %v6701_v9  ;;  %4390 = vmatprep.mubr.bf16.mxu0 %v6703_v14  ;;  %v6718_v9 = vld [vmem:[%s7251_s27 + $0x528] ss:$16 sps:$4 sm:$0xff]  }
 0x181   : > { %v3247_v17 = vpop.f32.mrb[48].mxu1  ;;  %v4176_v18 = vpop.f32.mrb[48].mxu0 }
 0x182   : > { %v3249_v21 = vpop.f32.mrb[49].mxu1  ;;  %v7521_v24 = vadd.f32 %v4176_v18, %v3247_v17  ;;  %v4178_v25 = vpop.f32.mrb[49].mxu0 }
 0x183   : > { %v3250_v28 = vpop.f32.mrb[50].mxu1  ;;  %v4179_v32 = vpop.f32.mrb[50].mxu0 }
 0x184   : > { %8715 = vst [vmem:[#allocation3_spill] sm:$0xff] %v7521_v24  ;;  %v3252_v34 = vpop.f32.mrb[51].mxu1  ;;  %v7526_v37 = vadd.f32 %v4179_v32, %v3250_v28  ;;  %v4181_v38 = vpop.f32.mrb[51].mxu0  ;;  %v6723_v28 = vld [vmem:[%s7251_s27 + $0x540] ss:$16 sps:$4 sm:$0xff]  }
 0x185   : > { %v6724_v34 = vld [vmem:[%s7251_s27 + $0x548] ss:$16 sps:$4 sm:$0xff]   ;;  %v7045_v24 = vld [vmem:[%s7251_s27 + $0xc04] ss:$16 sps:$4 sm:$0xff]  }
 0x186   : > { %8716 = vst [vmem:[#allocation4_spill] sm:$0xff] %v7526_v37  ;;  %3462 = vmatmul.mubr.bf16.gmra.mrb[156].mxu1 %v6705_v23  ;;  %4391 = vmatmul.mubr.bf16.gmra.mrb[156].mxu0 %v6706_v29 }
 0x187   : > { %3469 = vmatprep.mubr.bf16.mxu1 %v6707_v31  ;;  %4398 = vmatprep.mubr.bf16.mxu0 %v6709_v35  ;;  %v6725_v35 = vld [vmem:[%s7251_s27 + $0x564] ss:$16 sps:$4 sm:$0xff]  }
 0x189   : > { %v3255_v39 = vpop.f32.mrb[52].mxu1  ;;  %v4184_v42 = vpop.f32.mrb[52].mxu0 }
 0x18a   : > { %v3257_v44 = vpop.f32.mrb[53].mxu1  ;;  %v7529_v46 = vadd.f32 %v4184_v42, %v3255_v39  ;;  %v4186_v48 = vpop.f32.mrb[53].mxu0  ;;  %v6727_v42 = vld [vmem:[%s7251_s27 + $0x56c] ss:$16 sps:$4 sm:$0xff]  }
 0x18b   : > { %v3258_v50 = vpop.f32.mrb[54].mxu1  ;;  %v4187_v54 = vpop.f32.mrb[54].mxu0 }
 0x18c   : > { %8717 = vst [vmem:[#allocation5_spill] sm:$0xff] %v7529_v46  ;;  %v3260_v56 = vpop.f32.mrb[55].mxu1  ;;  %v7534_v58 = vadd.f32 %v4187_v54, %v3258_v50  ;;  %v4189_v62 = vpop.f32.mrb[55].mxu0  ;;  %v7039_v46 = vld [vmem:[%s7251_s27 + $0xbe4] ss:$16 sps:$4 sm:$0xff]  }
 0x18d   : > { %v6730_v62 = vld [vmem:[%s7251_s27 + $0x568] ss:$16 sps:$4 sm:$0xff]  }
 0x18e   : > { %8718 = vst [vmem:[#allocation6_spill] sm:$0xff] %v7534_v58  ;;  %3470 = vmatmul.mubr.bf16.gmra.mrb[160].mxu1 %v6711_v45  ;;  %4399 = vmatmul.mubr.bf16.gmra.mrb[160].mxu0 %v6712_v51 }
 0x18f   : > { %3477 = vmatprep.mubr.bf16.mxu1 %v6713_v53  ;;  %4406 = vmatprep.mubr.bf16.mxu0 %v6715_v57  ;;  %v6729_v53 = vld [vmem:[%s7251_s27 + $0x560] ss:$16 sps:$4 sm:$0xff]  }
 0x191   : > { %v3263_v63 = vpop.f32.mrb[56].mxu1  ;;  %v4192_v0 = vpop.f32.mrb[56].mxu0 }
 0x192   : > { %v3265_v1 = vpop.f32.mrb[57].mxu1  ;;  %v7537_v6 = vadd.f32 %v4192_v0, %v3263_v63  ;;  %v4194_v7 = vpop.f32.mrb[57].mxu0  ;;  %v6731_v63 = vld [vmem:[%s7251_s27 + $0x584] ss:$16 sps:$4 sm:$0xff]  }
 0x193   : > { %v3266_v8 = vpop.f32.mrb[58].mxu1  ;;  %v4195_v13 = vpop.f32.mrb[58].mxu0 }
 0x194   : > { %8719 = vst [vmem:[#allocation7_spill] sm:$0xff] %v7537_v6  ;;  %v3268_v14 = vpop.f32.mrb[59].mxu1  ;;  %v7542_v17 = vadd.f32 %v4195_v13, %v3266_v8  ;;  %v4197_v18 = vpop.f32.mrb[59].mxu0  ;;  %v7033_v6 = vld [vmem:[%s7251_s27 + $0xbc4] ss:$16 sps:$4 sm:$0xff]  }
 0x195   : > { %v6735_v14 = vld [vmem:[%s7251_s27 + $0x580] ss:$16 sps:$4 sm:$0xff]  }
 0x196   : > { %8720 = vst [vmem:[#allocation8_spill] sm:$0xff] %v7542_v17  ;;  %3478 = vmatmul.mubr.bf16.gmra.mrb[164].mxu1 %v6717_v2  ;;  %4407 = vmatmul.mubr.bf16.gmra.mrb[164].mxu0 %v6718_v9  ;;  %v6733_v2 = vld [vmem:[%s7251_s27 + $0x58c] ss:$16 sps:$4 sm:$0xff]  }
 0x197   : > { %3485 = vmatprep.mubr.bf16.mxu1 %v6719_v10  ;;  %4414 = vmatprep.mubr.bf16.mxu0 %v6721_v16 }
 0x199   : > { %v3271_v21 = vpop.f32.mrb[60].mxu1  ;;  %v4200_v23 = vpop.f32.mrb[60].mxu0 }
 0x19a   : > { %v3273_v25 = vpop.f32.mrb[61].mxu1  ;;  %v7545_v29 = vadd.f32 %v4200_v23, %v3271_v21  ;;  %v4202_v31 = vpop.f32.mrb[61].mxu0  ;;  %v6736_v23 = vld [vmem:[%s7251_s27 + $0x588] ss:$16 sps:$4 sm:$0xff]  }
 0x19b   : > { %v3274_v32 = vpop.f32.mrb[62].mxu1  ;;  %v4203_v38 = vpop.f32.mrb[62].mxu0  ;;  %v6737_v25 = vld [vmem:[%s7251_s27 + $0x5a4] ss:$16 sps:$4 sm:$0xff]  }
 0x19c   : > { %8721 = vst [vmem:[#allocation9_spill] sm:$0xff] %v7545_v29  ;;  %v3276_v39 = vpop.f32.mrb[63].mxu1  ;;  %v7550_v44 = vadd.f32 %v4203_v38, %v3274_v32  ;;  %v4205_v45 = vpop.f32.mrb[63].mxu0  ;;  %v6739_v32 = vld [vmem:[%s7251_s27 + $0x5ac] ss:$16 sps:$4 sm:$0xff]  }
 0x19d   : > { %v6741_v45 = vld [vmem:[%s7251_s27 + $0x5a0] ss:$16 sps:$4 sm:$0xff]   ;;  %v7027_v29 = vld [vmem:[%s7251_s27 + $0xba4] ss:$16 sps:$4 sm:$0xff]  }
 0x19e   : > { %8722 = vst [vmem:[#allocation10_spill] sm:$0xff] %v7550_v44  ;;  %3486 = vmatmul.mubr.bf16.gmra.mrb[168].mxu1 %v6723_v28  ;;  %4415 = vmatmul.mubr.bf16.gmra.mrb[168].mxu0 %v6724_v34 }
 0x19f   : > { %3493 = vmatprep.mubr.bf16.mxu1 %v6725_v35  ;;  %4422 = vmatprep.mubr.bf16.mxu0 %v6727_v42 }
 0x1a1   : > { %v3279_v48 = vpop.f32.mrb[64].mxu1  ;;  %v4208_v50 = vpop.f32.mrb[64].mxu0 }
 0x1a2   : > { %v3281_v51 = vpop.f32.mrb[65].mxu1  ;;  %v7553_v54 = vadd.f32 %v4208_v50, %v3279_v48  ;;  %v4210_v56 = vpop.f32.mrb[65].mxu0 }
 0x1a3   : > { %v3282_v57 = vpop.f32.mrb[66].mxu1  ;;  %v4211_v0 = vpop.f32.mrb[66].mxu0  ;;  %v6743_v56 = vld [vmem:[%s7251_s27 + $0x5c4] ss:$16 sps:$4 sm:$0xff]  }
 0x1a4   : > { %8723 = vst [vmem:[#allocation11_spill] sm:$0xff] %v7553_v54  ;;  %v3284_v1 = vpop.f32.mrb[67].mxu1  ;;  %v7558_v7 = vadd.f32 %v4211_v0, %v3282_v57  ;;  %v4213_v8 = vpop.f32.mrb[67].mxu0  ;;  %v7021_v54 = vld [vmem:[%s7251_s27 + $0xb84] ss:$16 sps:$4 sm:$0xff]  }
 0x1a6   : > { %8724 = vst [vmem:[#allocation12_spill] sm:$0xff] %v7558_v7  ;;  %3494 = vmatmul.mubr.bf16.gmra.mrb[172].mxu1 %v6729_v53  ;;  %4423 = vmatmul.mubr.bf16.gmra.mrb[172].mxu0 %v6730_v62  ;;  %v6742_v53 = vld [vmem:[%s7251_s27 + $0x5a8] ss:$16 sps:$4 sm:$0xff]  }
 0x1a7   : > { %3501 = vmatprep.mubr.bf16.mxu1 %v6731_v63  ;;  %4430 = vmatprep.mubr.bf16.mxu0 %v6733_v2  ;;  %v6745_v63 = vld [vmem:[%s7251_s27 + $0x5cc] ss:$16 sps:$4 sm:$0xff]  }
 0x1a9   : > { %v3287_v9 = vpop.f32.mrb[68].mxu1  ;;  %v4216_v10 = vpop.f32.mrb[68].mxu0 }
 0x1aa   : > { %v3289_v13 = vpop.f32.mrb[69].mxu1  ;;  %v7561_v16 = vadd.f32 %v4216_v10, %v3287_v9  ;;  %v4218_v18 = vpop.f32.mrb[69].mxu0  ;;  %v6747_v10 = vld [vmem:[%s7251_s27 + $0x5c0] ss:$16 sps:$4 sm:$0xff]  }
 0x1ab   : > { %v3290_v21 = vpop.f32.mrb[70].mxu1  ;;  %v4219_v28 = vpop.f32.mrb[70].mxu0 }
 0x1ac   : > { %8725 = vst [vmem:[#allocation13_spill] sm:$0xff] %v7561_v16  ;;  %v3292_v31 = vpop.f32.mrb[71].mxu1  ;;  %v7566_v34 = vadd.f32 %v4219_v28, %v3290_v21  ;;  %v4221_v35 = vpop.f32.mrb[71].mxu0  ;;  %v6748_v21 = vld [vmem:[%s7251_s27 + $0x5c8] ss:$16 sps:$4 sm:$0xff]  }
 0x1ad   : > { %v6751_v31 = vld [vmem:[%s7251_s27 + $0x5ec] ss:$16 sps:$4 sm:$0xff]   ;;  %v7015_v16 = vld [vmem:[%s7251_s27 + $0xb64] ss:$16 sps:$4 sm:$0xff]  }
 0x1ae   : > { %8726 = vst [vmem:[#allocation14_spill] sm:$0xff] %v7566_v34  ;;  %3502 = vmatmul.mubr.bf16.gmra.mrb[176].mxu1 %v6735_v14  ;;  %4431 = vmatmul.mubr.bf16.gmra.mrb[176].mxu0 %v6736_v23  ;;  %v6749_v23 = vld [vmem:[%s7251_s27 + $0x5e4] ss:$16 sps:$4 sm:$0xff]  }
 0x1af   : > { %3509 = vmatprep.mubr.bf16.mxu1 %v6737_v25  ;;  %4438 = vmatprep.mubr.bf16.mxu0 %v6739_v32 }
 0x1b1   : > { %v3295_v38 = vpop.f32.mrb[72].mxu1  ;;  %v4224_v39 = vpop.f32.mrb[72].mxu0 }
 0x1b2   : > { %v3297_v42 = vpop.f32.mrb[73].mxu1  ;;  %v7569_v48 = vadd.f32 %v4224_v39, %v3295_v38  ;;  %v4226_v50 = vpop.f32.mrb[73].mxu0 }
 0x1b3   : > { %v3298_v51 = vpop.f32.mrb[74].mxu1  ;;  %v4227_v57 = vpop.f32.mrb[74].mxu0 }
 0x1b4   : > { %8727 = vst [vmem:[#allocation15_spill] sm:$0xff] %v7569_v48  ;;  %v3300_v62 = vpop.f32.mrb[75].mxu1  ;;  %v7574_v0 = vadd.f32 %v4227_v57, %v3298_v51  ;;  %v4229_v1 = vpop.f32.mrb[75].mxu0  ;;  %v6755_v57 = vld [vmem:[%s7251_s27 + $0x604] ss:$16 sps:$4 sm:$0xff]  }
 0x1b5   : > { %v6757_v1 = vld [vmem:[%s7251_s27 + $0x60c] ss:$16 sps:$4 sm:$0xff]   ;;  %v7009_v48 = vld [vmem:[%s7251_s27 + $0xb44] ss:$16 sps:$4 sm:$0xff]  }
 0x1b6   : > { %8728 = vst [vmem:[#allocation16_spill] sm:$0xff] %v7574_v0  ;;  %3510 = vmatmul.mubr.bf16.gmra.mrb[180].mxu1 %v6741_v45  ;;  %4439 = vmatmul.mubr.bf16.gmra.mrb[180].mxu0 %v6742_v53  ;;  %v6753_v45 = vld [vmem:[%s7251_s27 + $0x5e0] ss:$16 sps:$4 sm:$0xff]  }
 0x1b7   : > { %3517 = vmatprep.mubr.bf16.mxu1 %v6743_v56  ;;  %4446 = vmatprep.mubr.bf16.mxu0 %v6745_v63  ;;  %v6754_v56 = vld [vmem:[%s7251_s27 + $0x5e8] ss:$16 sps:$4 sm:$0xff]  }
 0x1b9   : > { %v3303_v2 = vpop.f32.mrb[76].mxu1  ;;  %v4232_v8 = vpop.f32.mrb[76].mxu0 }
 0x1ba   : > { %v3305_v9 = vpop.f32.mrb[77].mxu1  ;;  %v7577_v13 = vadd.f32 %v4232_v8, %v3303_v2  ;;  %v4234_v14 = vpop.f32.mrb[77].mxu0 }
 0x1bb   : > { %v3306_v18 = vpop.f32.mrb[78].mxu1  ;;  %v4235_v25 = vpop.f32.mrb[78].mxu0 }
 0x1bc   : > { %8729 = vst [vmem:[#allocation17_spill] sm:$0xff] %v7577_v13  ;;  %v3308_v28 = vpop.f32.mrb[79].mxu1  ;;  %v7582_v32 = vadd.f32 %v4235_v25, %v3306_v18  ;;  %v4237_v35 = vpop.f32.mrb[79].mxu0  ;;  %v6759_v18 = vld [vmem:[%s7251_s27 + $0x600] ss:$16 sps:$4 sm:$0xff]  }
 0x1bd   : > { %v6760_v28 = vld [vmem:[%s7251_s27 + $0x608] ss:$16 sps:$4 sm:$0xff]   ;;  %v7003_v13 = vld [vmem:[%s7251_s27 + $0xb24] ss:$16 sps:$4 sm:$0xff]  }
 0x1be   : > { %8730 = vst [vmem:[#allocation18_spill] sm:$0xff] %v7582_v32  ;;  %3518 = vmatmul.mubr.bf16.gmra.mrb[184].mxu1 %v6747_v10  ;;  %4447 = vmatmul.mubr.bf16.gmra.mrb[184].mxu0 %v6748_v21 }
 0x1bf   : > { %3525 = vmatprep.mubr.bf16.mxu1 %v6749_v23  ;;  %4454 = vmatprep.mubr.bf16.mxu0 %v6751_v31  ;;  %v6761_v31 = vld [vmem:[%s7251_s27 + $0x624] ss:$16 sps:$4 sm:$0xff]  }
 0x1c1   : > { %v3311_v38 = vpop.f32.mrb[80].mxu1  ;;  %v4240_v39 = vpop.f32.mrb[80].mxu0 }
 0x1c2   : > { %v3313_v42 = vpop.f32.mrb[81].mxu1  ;;  %v7585_v50 = vadd.f32 %v4240_v39, %v3311_v38  ;;  %v4242_v51 = vpop.f32.mrb[81].mxu0  ;;  %v6763_v39 = vld [vmem:[%s7251_s27 + $0x62c] ss:$16 sps:$4 sm:$0xff]  }
 0x1c3   : > { %v3314_v53 = vpop.f32.mrb[82].mxu1  ;;  %v4243_v62 = vpop.f32.mrb[82].mxu0 }
 0x1c4   : > { %8731 = vst [vmem:[#allocation19_spill] sm:$0xff] %v7585_v50  ;;  %v3316_v63 = vpop.f32.mrb[83].mxu1  ;;  %v7590_v2 = vadd.f32 %v4243_v62, %v3314_v53  ;;  %v4245_v8 = vpop.f32.mrb[83].mxu0  ;;  %v6997_v50 = vld [vmem:[%s7251_s27 + $0xb04] ss:$16 sps:$4 sm:$0xff]  }
 0x1c5   : > { %v6766_v8 = vld [vmem:[%s7251_s27 + $0x628] ss:$16 sps:$4 sm:$0xff]  }
 0x1c6   : > { %8732 = vst [vmem:[#allocation20_spill] sm:$0xff] %v7590_v2  ;;  %3526 = vmatmul.mubr.bf16.gmra.mrb[188].mxu1 %v6753_v45  ;;  %4455 = vmatmul.mubr.bf16.gmra.mrb[188].mxu0 %v6754_v56 }
 0x1c7   : > { %3533 = vmatprep.mubr.bf16.mxu1 %v6755_v57  ;;  %4462 = vmatprep.mubr.bf16.mxu0 %v6757_v1  ;;  %v6765_v57 = vld [vmem:[%s7251_s27 + $0x620] ss:$16 sps:$4 sm:$0xff]  }
 0x1c9   : > { %v3319_v9 = vpop.f32.mrb[84].mxu1  ;;  %v4248_v10 = vpop.f32.mrb[84].mxu0 }
 0x1ca   : > { %v3321_v14 = vpop.f32.mrb[85].mxu1  ;;  %v7593_v21 = vadd.f32 %v4248_v10, %v3319_v9  ;;  %v4250_v23 = vpop.f32.mrb[85].mxu0  ;;  %v6767_v9 = vld [vmem:[%s7251_s27 + $0x644] ss:$16 sps:$4 sm:$0xff]  }
 0x1cb   : > { %v3322_v25 = vpop.f32.mrb[86].mxu1  ;;  %v4251_v35 = vpop.f32.mrb[86].mxu0  ;;  %v6769_v23 = vld [vmem:[%s7251_s27 + $0x64c] ss:$16 sps:$4 sm:$0xff]  }
 0x1cc   : > { %8733 = vst [vmem:[#allocation21_spill] sm:$0xff] %v7593_v21  ;;  %v3324_v38 = vpop.f32.mrb[87].mxu1  ;;  %v7598_v42 = vadd.f32 %v4251_v35, %v3322_v25  ;;  %v4253_v45 = vpop.f32.mrb[87].mxu0  ;;  %v6991_v21 = vld [vmem:[%s7251_s27 + $0xae4] ss:$16 sps:$4 sm:$0xff]  }
 0x1cd   : > { %v6771_v38 = vld [vmem:[%s7251_s27 + $0x640] ss:$16 sps:$4 sm:$0xff]  }
 0x1ce   : > { %8734 = vst [vmem:[#allocation22_spill] sm:$0xff] %v7598_v42  ;;  %3534 = vmatmul.mubr.bf16.gmra.mrb[192].mxu1 %v6759_v18  ;;  %4463 = vmatmul.mubr.bf16.gmra.mrb[192].mxu0 %v6760_v28 }
 0x1cf   : > { %3541 = vmatprep.mubr.bf16.mxu1 %v6761_v31  ;;  %4470 = vmatprep.mubr.bf16.mxu0 %v6763_v39 }
 0x1d1   : > { %v3327_v51 = vpop.f32.mrb[88].mxu1  ;;  %v4256_v53 = vpop.f32.mrb[88].mxu0 }
 0x1d2   : > { %v3329_v56 = vpop.f32.mrb[89].mxu1  ;;  %v7601_v62 = vadd.f32 %v4256_v53, %v3327_v51  ;;  %v4258_v63 = vpop.f32.mrb[89].mxu0  ;;  %v6772_v53 = vld [vmem:[%s7251_s27 + $0x648] ss:$16 sps:$4 sm:$0xff]  }
 0x1d3   : > { %v3330_v1 = vpop.f32.mrb[90].mxu1  ;;  %v4259_v10 = vpop.f32.mrb[90].mxu0  ;;  %v6773_v56 = vld [vmem:[%s7251_s27 + $0x664] ss:$16 sps:$4 sm:$0xff]  }
 0x1d4   : > { %8735 = vst [vmem:[#allocation23_spill] sm:$0xff] %v7601_v62  ;;  %v3332_v14 = vpop.f32.mrb[91].mxu1  ;;  %v7606_v18 = vadd.f32 %v4259_v10, %v3330_v1  ;;  %v4261_v25 = vpop.f32.mrb[91].mxu0  ;;  %v6775_v10 = vld [vmem:[%s7251_s27 + $0x66c] ss:$16 sps:$4 sm:$0xff]  }
 0x1d5   : > { %v6777_v25 = vld [vmem:[%s7251_s27 + $0x660] ss:$16 sps:$4 sm:$0xff]  }
 0x1d6   : > { %8736 = vst [vmem:[#allocation24_spill] sm:$0xff] %v7606_v18  ;;  %3542 = vmatmul.mubr.bf16.gmra.mrb[196].mxu1 %v6765_v57  ;;  %4471 = vmatmul.mubr.bf16.gmra.mrb[196].mxu0 %v6766_v8 }
 0x1d7   : > { %3549 = vmatprep.mubr.bf16.mxu1 %v6767_v9  ;;  %4478 = vmatprep.mubr.bf16.mxu0 %v6769_v23 }
 0x1d9   : > { %v3335_v28 = vpop.f32.mrb[92].mxu1  ;;  %v4264_v31 = vpop.f32.mrb[92].mxu0 }
 0x1da   : > { %v3337_v35 = vpop.f32.mrb[93].mxu1  ;;  %v7609_v39 = vadd.f32 %v4264_v31, %v3335_v28  ;;  %v4266_v45 = vpop.f32.mrb[93].mxu0 }
 0x1db   : > { %v3338_v51 = vpop.f32.mrb[94].mxu1  ;;  %v4267_v63 = vpop.f32.mrb[94].mxu0  ;;  %v6778_v45 = vld [vmem:[%s7251_s27 + $0x668] ss:$16 sps:$4 sm:$0xff]  }
 0x1dc   : > { %8737 = vst [vmem:[#allocation25_spill] sm:$0xff] %v7609_v39  ;;  %v3340_v1 = vpop.f32.mrb[95].mxu1  ;;  %v7614_v57 = vadd.f32 %v4267_v63, %v3338_v51  ;;  %v4269_v8 = vpop.f32.mrb[95].mxu0  ;;  %v6781_v63 = vld [vmem:[%s7251_s27 + $0x68c] ss:$16 sps:$4 sm:$0xff]  }
 0x1dd   : > { %v6779_v1 = vld [vmem:[%s7251_s27 + $0x684] ss:$16 sps:$4 sm:$0xff]  }
 0x1de   : > { %8738 = vst [vmem:[#allocation26_spill] sm:$0xff] %v7614_v57  ;;  %3550 = vmatmul.mubr.bf16.gmra.mrb[200].mxu1 %v6771_v38  ;;  %4479 = vmatmul.mubr.bf16.gmra.mrb[200].mxu0 %v6772_v53 }
 0x1df   : > { %3557 = vmatprep.mubr.bf16.mxu1 %v6773_v56  ;;  %4486 = vmatprep.mubr.bf16.mxu0 %v6775_v10 }
 0x1e1   : > { %v3343_v9 = vpop.f32.mrb[96].mxu1  ;;  %v4272_v14 = vpop.f32.mrb[96].mxu0 }
 0x1e2   : > { %v3345_v23 = vpop.f32.mrb[97].mxu1  ;;  %v7617_v28 = vadd.f32 %v4272_v14, %v3343_v9  ;;  %v4274_v31 = vpop.f32.mrb[97].mxu0  ;;  %v6783_v9 = vld [vmem:[%s7251_s27 + $0x680] ss:$16 sps:$4 sm:$0xff]  }
 0x1e3   : > { %v3346_v35 = vpop.f32.mrb[98].mxu1  ;;  %v4275_v39 = vpop.f32.mrb[98].mxu0 }
 0x1e4   : > { %8739 = vst [vmem:[#allocation27_spill] sm:$0xff] %v7617_v28  ;;  %v3348_v51 = vpop.f32.mrb[99].mxu1  ;;  %v7622_v38 = vadd.f32 %v4275_v39, %v3346_v35  ;;  %v4277_v53 = vpop.f32.mrb[99].mxu0  ;;  %v6785_v28 = vld [vmem:[%s7251_s27 + $0x6a4] ss:$16 sps:$4 sm:$0xff]  }
 0x1e5   : > { %v6784_v51 = vld [vmem:[%s7251_s27 + $0x688] ss:$16 sps:$4 sm:$0xff]   ;;  %v6787_v35 = vld [vmem:[%s7251_s27 + $0x6ac] ss:$16 sps:$4 sm:$0xff]  }
 0x1e6   : > { %8740 = vst [vmem:[#allocation28_spill] sm:$0xff] %v7622_v38  ;;  %3558 = vmatmul.mubr.bf16.gmra.mrb[204].mxu1 %v6777_v25  ;;  %4487 = vmatmul.mubr.bf16.gmra.mrb[204].mxu0 %v6778_v45 }
 0x1e7   : > { %3565 = vmatprep.mubr.bf16.mxu1 %v6779_v1  ;;  %4494 = vmatprep.mubr.bf16.mxu0 %v6781_v63 }
 0x1e9   : > { %v3351_v56 = vpop.f32.mrb[100].mxu1  ;;  %v4280_v10 = vpop.f32.mrb[100].mxu0 }
 0x1ea   : > { %v3353_v8 = vpop.f32.mrb[101].mxu1  ;;  %v7625_v14 = vadd.f32 %v4280_v10, %v3351_v56  ;;  %v4282_v23 = vpop.f32.mrb[101].mxu0  ;;  %v6789_v56 = vld [vmem:[%s7251_s27 + $0x6a0] ss:$16 sps:$4 sm:$0xff]  }
 0x1eb   : > { %v3354_v31 = vpop.f32.mrb[102].mxu1  ;;  %v4283_v57 = vpop.f32.mrb[102].mxu0 }
 0x1ec   : > { %8741 = vst [vmem:[#allocation29_spill] sm:$0xff] %v7625_v14  ;;  %v3356_v39 = vpop.f32.mrb[103].mxu1  ;;  %v7630_v25 = vadd.f32 %v4283_v57, %v3354_v31  ;;  %v4285_v45 = vpop.f32.mrb[103].mxu0  ;;  %v6791_v14 = vld [vmem:[%s7251_s27 + $0x6c4] ss:$16 sps:$4 sm:$0xff]  }
 0x1ed   : > { %v6790_v39 = vld [vmem:[%s7251_s27 + $0x6a8] ss:$16 sps:$4 sm:$0xff]   ;;  %v6793_v31 = vld [vmem:[%s7251_s27 + $0x6cc] ss:$16 sps:$4 sm:$0xff]  }
 0x1ee   : > { %8742 = vst [vmem:[#allocation30_spill] sm:$0xff] %v7630_v25  ;;  %3566 = vmatmul.mubr.bf16.gmra.mrb[208].mxu1 %v6783_v9  ;;  %4495 = vmatmul.mubr.bf16.gmra.mrb[208].mxu0 %v6784_v51 }
 0x1ef   : > { %3573 = vmatprep.mubr.bf16.mxu1 %v6785_v28  ;;  %4502 = vmatprep.mubr.bf16.mxu0 %v6787_v35 }
 0x1f1   : > { %v3359_v1 = vpop.f32.mrb[104].mxu1  ;;  %v4288_v63 = vpop.f32.mrb[104].mxu0 }
 0x1f2   : > { %v3361_v53 = vpop.f32.mrb[105].mxu1  ;;  %v7633_v10 = vadd.f32 %v4288_v63, %v3359_v1  ;;  %v4290_v8 = vpop.f32.mrb[105].mxu0  ;;  %v6795_v1 = vld [vmem:[%s7251_s27 + $0x6c0] ss:$16 sps:$4 sm:$0xff]  }
 0x1f3   : > { %v3362_v23 = vpop.f32.mrb[106].mxu1  ;;  %v4291_v38 = vpop.f32.mrb[106].mxu0 }
 0x1f4   : > { %8743 = vst [vmem:[#allocation31_spill] sm:$0xff] %v7633_v10  ;;  %v3364_v57 = vpop.f32.mrb[107].mxu1  ;;  %v7638_v9 = vadd.f32 %v4291_v38, %v3362_v23  ;;  %v4293_v28 = vpop.f32.mrb[107].mxu0  ;;  %v6797_v10 = vld [vmem:[%s7251_s27 + $0x6e4] ss:$16 sps:$4 sm:$0xff]  }
 0x1f5   : > { %v6796_v57 = vld [vmem:[%s7251_s27 + $0x6c8] ss:$16 sps:$4 sm:$0xff]   ;;  %v6799_v23 = vld [vmem:[%s7251_s27 + $0x6ec] ss:$16 sps:$4 sm:$0xff]  }
 0x1f6   : > { %8744 = vst [vmem:[#allocation32_spill] sm:$0xff] %v7638_v9  ;;  %3574 = vmatmul.mubr.bf16.gmra.mrb[212].mxu1 %v6789_v56  ;;  %4503 = vmatmul.mubr.bf16.gmra.mrb[212].mxu0 %v6790_v39 }
 0x1f7   : > { %3581 = vmatprep.mubr.bf16.mxu1 %v6791_v14  ;;  %4510 = vmatprep.mubr.bf16.mxu0 %v6793_v31 }
 0x1f9   : > { %v3367_v51 = vpop.f32.mrb[108].mxu1  ;;  %v4296_v35 = vpop.f32.mrb[108].mxu0 }
 0x1fa   : > { %v3369_v45 = vpop.f32.mrb[109].mxu1  ;;  %v7641_v63 = vadd.f32 %v4296_v35, %v3367_v51  ;;  %v4298_v53 = vpop.f32.mrb[109].mxu0  ;;  %v6801_v51 = vld [vmem:[%s7251_s27 + $0x6e0] ss:$16 sps:$4 sm:$0xff]  }
 0x1fb   : > { %v3370_v8 = vpop.f32.mrb[110].mxu1  ;;  %v4299_v25 = vpop.f32.mrb[110].mxu0 }
 0x1fc   : > { %8745 = vst [vmem:[#allocation33_spill] sm:$0xff] %v7641_v63  ;;  %v3372_v38 = vpop.f32.mrb[111].mxu1  ;;  %v7646_v56 = vadd.f32 %v4299_v25, %v3370_v8  ;;  %v4301_v14 = vpop.f32.mrb[111].mxu0  ;;  %v6802_v63 = vld [vmem:[%s7251_s27 + $0x6e8] ss:$16 sps:$4 sm:$0xff]  }
 0x1fd   : > { %v6803_v38 = vld [vmem:[%s7251_s27 + $0x704] ss:$16 sps:$4 sm:$0xff]   ;;  %v6805_v8 = vld [vmem:[%s7251_s27 + $0x70c] ss:$16 sps:$4 sm:$0xff]  }
 0x1fe   : > { %8746 = vst [vmem:[#allocation34_spill] sm:$0xff] %v7646_v56  ;;  %3582 = vmatmul.mubr.bf16.gmra.mrb[216].mxu1 %v6795_v1  ;;  %4511 = vmatmul.mubr.bf16.gmra.mrb[216].mxu0 %v6796_v57  ;;  %v6979_v56 = vld [vmem:[%s7251_s27 + $0xaa4] ss:$16 sps:$4 sm:$0xff]  }
 0x1ff   : > { %3589 = vmatprep.mubr.bf16.mxu1 %v6797_v10  ;;  %4518 = vmatprep.mubr.bf16.mxu0 %v6799_v23 }
 0x201   : > { %v3375_v39 = vpop.f32.mrb[112].mxu1  ;;  %v4304_v31 = vpop.f32.mrb[112].mxu0 }
 0x202   : > { %v3377_v28 = vpop.f32.mrb[113].mxu1  ;;  %v7649_v35 = vadd.f32 %v4304_v31, %v3375_v39  ;;  %v4306_v45 = vpop.f32.mrb[113].mxu0 }
 0x203   : > { %v3378_v53 = vpop.f32.mrb[114].mxu1  ;;  %v4307_v9 = vpop.f32.mrb[114].mxu0  ;;  %v6807_v28 = vld [vmem:[%s7251_s27 + $0x700] ss:$16 sps:$4 sm:$0xff]  }
 0x204   : > { %8747 = vst [vmem:[#allocation35_spill] sm:$0xff] %v7649_v35  ;;  %v3380_v25 = vpop.f32.mrb[115].mxu1  ;;  %v7656_v10 = vadd.f32 %v4307_v9, %v3378_v53  ;;  %v4309_v57 = vpop.f32.mrb[115].mxu0  ;;  %v6808_v35 = vld [vmem:[%s7251_s27 + $0x708] ss:$16 sps:$4 sm:$0xff]  }
 0x205   : > { %v6809_v9 = vld [vmem:[%s7251_s27 + $0x724] ss:$16 sps:$4 sm:$0xff]   ;;  %v6811_v57 = vld [vmem:[%s7251_s27 + $0x72c] ss:$16 sps:$4 sm:$0xff]  }
 0x206   : > { %8748 = vst [vmem:[#allocation36_spill] sm:$0xff] %v7656_v10  ;;  %3590 = vmatmul.mubr.bf16.gmra.mrb[220].mxu1 %v6801_v51  ;;  %4519 = vmatmul.mubr.bf16.gmra.mrb[220].mxu0 %v6802_v63 }
 0x207   : > { %3597 = vmatprep.mubr.bf16.mxu1 %v6803_v38  ;;  %4526 = vmatprep.mubr.bf16.mxu0 %v6805_v8 }
 0x209   : > { %v3383_v14 = vpop.f32.mrb[116].mxu1  ;;  %v4312_v39 = vpop.f32.mrb[116].mxu0 }
 0x20a   : > { %v3385_v31 = vpop.f32.mrb[117].mxu1  ;;  %v7661_v45 = vadd.f32 %v4312_v39, %v3383_v14  ;;  %v4314_v25 = vpop.f32.mrb[117].mxu0 }
 0x20b   : > { %v3386_v1 = vpop.f32.mrb[118].mxu1  ;;  %v4315_v53 = vpop.f32.mrb[118].mxu0 }
 0x20c   : > { %8749 = vst [vmem:[#allocation37_spill] sm:$0xff] %v7661_v45  ;;  %v3388_v51 = vpop.f32.mrb[119].mxu1  ;;  %v7668_v38 = vadd.f32 %v4315_v53, %v3386_v1  ;;  %v4317_v8 = vpop.f32.mrb[119].mxu0  ;;  %v6814_v45 = vld [vmem:[%s7251_s27 + $0x728] ss:$16 sps:$4 sm:$0xff]  }
 0x20d   : > { %v6813_v51 = vld [vmem:[%s7251_s27 + $0x720] ss:$16 sps:$4 sm:$0xff]   ;;  %v6815_v1 = vld [vmem:[%s7251_s27 + $0x744] ss:$16 sps:$4 sm:$0xff]   ;;  %v6817_v8 = vld [vmem:[%s7251_s27 + $0x74c] ss:$16 sps:$4 sm:$0xff]  }
 0x20e   : > { %8750 = vst [vmem:[#allocation38_spill] sm:$0xff] %v7668_v38  ;;  %3598 = vmatmul.mubr.bf16.gmra.mrb[224].mxu1 %v6807_v28  ;;  %4527 = vmatmul.mubr.bf16.gmra.mrb[224].mxu0 %v6808_v35 }
 0x20f   : > { %3605 = vmatprep.mubr.bf16.mxu1 %v6809_v9  ;;  %4534 = vmatprep.mubr.bf16.mxu0 %v6811_v57 }
 0x211   : > { %v3391_v39 = vpop.f32.mrb[120].mxu1  ;;  %v4320_v31 = vpop.f32.mrb[120].mxu0 }
 0x212   : > { %v3393_v25 = vpop.f32.mrb[121].mxu1  ;;  %v7673_v23 = vadd.f32 %v4320_v31, %v3391_v39  ;;  %v4322_v10 = vpop.f32.mrb[121].mxu0 }
 0x213   : > { %v3394_v63 = vpop.f32.mrb[122].mxu1  ;;  %v4323_v53 = vpop.f32.mrb[122].mxu0 }
 0x214   : > { %8751 = vst [vmem:[#allocation39_spill] sm:$0xff] %v7673_v23  ;;  %v3396_v28 = vpop.f32.mrb[123].mxu1  ;;  %v7680_v9 = vadd.f32 %v4323_v53, %v3394_v63  ;;  %v4325_v57 = vpop.f32.mrb[123].mxu0  ;;  %v6820_v23 = vld [vmem:[%s7251_s27 + $0x748] ss:$16 sps:$4 sm:$0xff]  }
 0x215   : > { %v6819_v28 = vld [vmem:[%s7251_s27 + $0x740] ss:$16 sps:$4 sm:$0xff]   ;;  %v6821_v63 = vld [vmem:[%s7251_s27 + $0x764] ss:$16 sps:$4 sm:$0xff]   ;;  %v6823_v57 = vld [vmem:[%s7251_s27 + $0x76c] ss:$16 sps:$4 sm:$0xff]  }
 0x216   : > { %8752 = vst [vmem:[#allocation40_spill] sm:$0xff] %v7680_v9  ;;  %3606 = vmatmul.mubr.bf16.gmra.mrb[228].mxu1 %v6813_v51  ;;  %4535 = vmatmul.mubr.bf16.gmra.mrb[228].mxu0 %v6814_v45 }
 0x217   : > { %3613 = vmatprep.mubr.bf16.mxu1 %v6815_v1  ;;  %4542 = vmatprep.mubr.bf16.mxu0 %v6817_v8 }
 0x219   : > { %v3399_v39 = vpop.f32.mrb[124].mxu1  ;;  %v4328_v31 = vpop.f32.mrb[124].mxu0 }
 0x21a   : > { %v3401_v25 = vpop.f32.mrb[125].mxu1  ;;  %v7685_v14 = vadd.f32 %v4328_v31, %v3399_v39  ;;  %v4330_v38 = vpop.f32.mrb[125].mxu0 }
 0x21b   : > { %v3402_v35 = vpop.f32.mrb[126].mxu1  ;;  %v4331_v53 = vpop.f32.mrb[126].mxu0 }
 0x21c   : > { %8753 = vst [vmem:[#allocation41_spill] sm:$0xff] %v7685_v14  ;;  %v3404_v51 = vpop.f32.mrb[127].mxu1  ;;  %v7692_v1 = vadd.f32 %v4331_v53, %v3402_v35  ;;  %v4333_v8 = vpop.f32.mrb[127].mxu0  ;;  %v6826_v14 = vld [vmem:[%s7251_s27 + $0x768] ss:$16 sps:$4 sm:$0xff]  }
 0x21d   : > { %v6825_v51 = vld [vmem:[%s7251_s27 + $0x760] ss:$16 sps:$4 sm:$0xff]   ;;  %v6827_v35 = vld [vmem:[%s7251_s27 + $0x784] ss:$16 sps:$4 sm:$0xff]   ;;  %v6829_v8 = vld [vmem:[%s7251_s27 + $0x78c] ss:$16 sps:$4 sm:$0xff]  }
 0x21e   : > { %8754 = vst [vmem:[#allocation42_spill] sm:$0xff] %v7692_v1  ;;  %3614 = vmatmul.mubr.bf16.gmra.mrb[232].mxu1 %v6819_v28  ;;  %4543 = vmatmul.mubr.bf16.gmra.mrb[232].mxu0 %v6820_v23 }
 0x21f   : > { %3621 = vmatprep.mubr.bf16.mxu1 %v6821_v63  ;;  %4550 = vmatprep.mubr.bf16.mxu0 %v6823_v57 }
 0x221   : > { %v3407_v39 = vpop.f32.mrb[128].mxu1  ;;  %v4336_v31 = vpop.f32.mrb[128].mxu0 }
 0x222   : > { %v3409_v25 = vpop.f32.mrb[129].mxu1  ;;  %v7697_v10 = vadd.f32 %v4336_v31, %v3407_v39  ;;  %v4338_v9 = vpop.f32.mrb[129].mxu0 }
 0x223   : > { %v3410_v45 = vpop.f32.mrb[130].mxu1  ;;  %v4339_v53 = vpop.f32.mrb[130].mxu0 }
 0x224   : > { %8755 = vst [vmem:[#allocation43_spill] sm:$0xff] %v7697_v10  ;;  %v3412_v28 = vpop.f32.mrb[131].mxu1  ;;  %v7704_v63 = vadd.f32 %v4339_v53, %v3410_v45  ;;  %v4341_v57 = vpop.f32.mrb[131].mxu0  ;;  %v6832_v10 = vld [vmem:[%s7251_s27 + $0x788] ss:$16 sps:$4 sm:$0xff]  }
 0x225   : > { %v6831_v28 = vld [vmem:[%s7251_s27 + $0x780] ss:$16 sps:$4 sm:$0xff]   ;;  %v6833_v45 = vld [vmem:[%s7251_s27 + $0x7a4] ss:$16 sps:$4 sm:$0xff]   ;;  %v6835_v57 = vld [vmem:[%s7251_s27 + $0x7ac] ss:$16 sps:$4 sm:$0xff]  }
 0x226   : > { %8756 = vst [vmem:[#allocation44_spill] sm:$0xff] %v7704_v63  ;;  %3622 = vmatmul.mubr.bf16.gmra.mrb[236].mxu1 %v6825_v51  ;;  %4551 = vmatmul.mubr.bf16.gmra.mrb[236].mxu0 %v6826_v14 }
 0x227   : > { %3629 = vmatprep.mubr.bf16.mxu1 %v6827_v35  ;;  %4558 = vmatprep.mubr.bf16.mxu0 %v6829_v8 }
 0x229   : > { %v3415_v39 = vpop.f32.mrb[132].mxu1  ;;  %v4344_v31 = vpop.f32.mrb[132].mxu0 }
 0x22a   : > { %v3417_v25 = vpop.f32.mrb[133].mxu1  ;;  %v7709_v38 = vadd.f32 %v4344_v31, %v3415_v39  ;;  %v4346_v1 = vpop.f32.mrb[133].mxu0 }
 0x22b   : > { %v3418_v23 = vpop.f32.mrb[134].mxu1  ;;  %v4347_v53 = vpop.f32.mrb[134].mxu0 }
 0x22c   : > { %8757 = vst [vmem:[#allocation45_spill] sm:$0xff] %v7709_v38  ;;  %v3420_v51 = vpop.f32.mrb[135].mxu1  ;;  %v7716_v35 = vadd.f32 %v4347_v53, %v3418_v23  ;;  %v4349_v8 = vpop.f32.mrb[135].mxu0  ;;  %v6838_v38 = vld [vmem:[%s7251_s27 + $0x7a8] ss:$16 sps:$4 sm:$0xff]  }
 0x22d   : > { %v6837_v51 = vld [vmem:[%s7251_s27 + $0x7a0] ss:$16 sps:$4 sm:$0xff]   ;;  %v6839_v23 = vld [vmem:[%s7251_s27 + $0x7c4] ss:$16 sps:$4 sm:$0xff]   ;;  %v6841_v8 = vld [vmem:[%s7251_s27 + $0x7cc] ss:$16 sps:$4 sm:$0xff]  }
 0x22e   : > { %8758 = vst [vmem:[#allocation46_spill] sm:$0xff] %v7716_v35  ;;  %3630 = vmatmul.mubr.bf16.gmra.mrb[240].mxu1 %v6831_v28  ;;  %4559 = vmatmul.mubr.bf16.gmra.mrb[240].mxu0 %v6832_v10 }
 0x22f   : > { %3637 = vmatprep.mubr.bf16.mxu1 %v6833_v45  ;;  %4566 = vmatprep.mubr.bf16.mxu0 %v6835_v57 }
 0x231   : > { %v3423_v39 = vpop.f32.mrb[136].mxu1  ;;  %v4352_v31 = vpop.f32.mrb[136].mxu0 }
 0x232   : > { %v3425_v25 = vpop.f32.mrb[137].mxu1  ;;  %v7721_v9 = vadd.f32 %v4352_v31, %v3423_v39  ;;  %v4354_v63 = vpop.f32.mrb[137].mxu0 }
 0x233   : > { %v3426_v14 = vpop.f32.mrb[138].mxu1  ;;  %v4355_v53 = vpop.f32.mrb[138].mxu0 }
 0x234   : > { %8759 = vst [vmem:[#allocation47_spill] sm:$0xff] %v7721_v9  ;;  %v3428_v28 = vpop.f32.mrb[139].mxu1  ;;  %v7728_v45 = vadd.f32 %v4355_v53, %v3426_v14  ;;  %v4357_v57 = vpop.f32.mrb[139].mxu0  ;;  %v6844_v9 = vld [vmem:[%s7251_s27 + $0x7c8] ss:$16 sps:$4 sm:$0xff]  }
 0x235   : > { %v6843_v28 = vld [vmem:[%s7251_s27 + $0x7c0] ss:$16 sps:$4 sm:$0xff]   ;;  %v6845_v14 = vld [vmem:[%s7251_s27 + $0x7e4] ss:$16 sps:$4 sm:$0xff]   ;;  %v6847_v57 = vld [vmem:[%s7251_s27 + $0x7ec] ss:$16 sps:$4 sm:$0xff]  }
 0x236   : > { %8760 = vst [vmem:[#allocation48_spill] sm:$0xff] %v7728_v45  ;;  %3638 = vmatmul.mubr.bf16.gmra.mrb[244].mxu1 %v6837_v51  ;;  %4567 = vmatmul.mubr.bf16.gmra.mrb[244].mxu0 %v6838_v38 }
 0x237   : > { %3645 = vmatprep.mubr.bf16.mxu1 %v6839_v23  ;;  %4574 = vmatprep.mubr.bf16.mxu0 %v6841_v8 }
 0x239   : > { %v3431_v39 = vpop.f32.mrb[140].mxu1  ;;  %v4360_v31 = vpop.f32.mrb[140].mxu0 }
 0x23a   : > { %v3433_v25 = vpop.f32.mrb[141].mxu1  ;;  %v7733_v1 = vadd.f32 %v4360_v31, %v3431_v39  ;;  %v4362_v35 = vpop.f32.mrb[141].mxu0 }
 0x23b   : > { %v3434_v10 = vpop.f32.mrb[142].mxu1  ;;  %v4363_v53 = vpop.f32.mrb[142].mxu0 }
 0x23c   : > { %8761 = vst [vmem:[#allocation49_spill] sm:$0xff] %v7733_v1  ;;  %v3436_v51 = vpop.f32.mrb[143].mxu1  ;;  %v7740_v23 = vadd.f32 %v4363_v53, %v3434_v10  ;;  %v4365_v8 = vpop.f32.mrb[143].mxu0  ;;  %v6850_v1 = vld [vmem:[%s7251_s27 + $0x7e8] ss:$16 sps:$4 sm:$0xff]  }
 0x23d   : > { %v6849_v51 = vld [vmem:[%s7251_s27 + $0x7e0] ss:$16 sps:$4 sm:$0xff]   ;;  %v6853_v10 = vld [vmem:[%s7251_s27 + $0x804] ss:$16 sps:$4 sm:$0xff]   ;;  %v6856_v8 = vld [vmem:[%s7251_s27 + $0x80c] ss:$16 sps:$4 sm:$0xff]  }
 0x23e   : > { %8762 = vst [vmem:[#allocation50_spill] sm:$0xff] %v7740_v23  ;;  %3646 = vmatmul.mubr.bf16.gmra.mrb[248].mxu1 %v6843_v28  ;;  %4575 = vmatmul.mubr.bf16.gmra.mrb[248].mxu0 %v6844_v9 }
 0x23f   : > { %3653 = vmatprep.mubr.bf16.mxu1 %v6845_v14  ;;  %4582 = vmatprep.mubr.bf16.mxu0 %v6847_v57 }
 0x241   : > { %v3439_v39 = vpop.f32.mrb[144].mxu1  ;;  %v4368_v31 = vpop.f32.mrb[144].mxu0 }
 0x242   : > { %v3441_v25 = vpop.f32.mrb[145].mxu1  ;;  %v7745_v63 = vadd.f32 %v4368_v31, %v3439_v39  ;;  %v4370_v45 = vpop.f32.mrb[145].mxu0 }
 0x243   : > { %v3442_v38 = vpop.f32.mrb[146].mxu1  ;;  %v4371_v53 = vpop.f32.mrb[146].mxu0 }
 0x244   : > { %8763 = vst [vmem:[#allocation51_spill] sm:$0xff] %v7745_v63  ;;  %v3444_v28 = vpop.f32.mrb[147].mxu1  ;;  %v7752_v14 = vadd.f32 %v4371_v53, %v3442_v38  ;;  %v4373_v57 = vpop.f32.mrb[147].mxu0  ;;  %v6854_v63 = vld [vmem:[%s7251_s27 + $0x808] ss:$16 sps:$4 sm:$0xff]  }
 0x245   : > { %v6851_v28 = vld [vmem:[%s7251_s27 + $0x800] ss:$16 sps:$4 sm:$0xff]   ;;  %v6859_v38 = vld [vmem:[%s7251_s27 + $0x824] ss:$16 sps:$4 sm:$0xff]   ;;  %v6862_v57 = vld [vmem:[%s7251_s27 + $0x82c] ss:$16 sps:$4 sm:$0xff]  }
 0x246   : > { %8764 = vst [vmem:[#allocation52_spill] sm:$0xff] %v7752_v14  ;;  %3654 = vmatmul.mubr.bf16.gmra.mrb[252].mxu1 %v6849_v51  ;;  %4583 = vmatmul.mubr.bf16.gmra.mrb[252].mxu0 %v6850_v1 }
 0x247   : > { %3661 = vmatprep.mubr.bf16.mxu1 %v6853_v10  ;;  %4590 = vmatprep.mubr.bf16.mxu0 %v6856_v8 }
 0x249   : > { %v3447_v39 = vpop.f32.mrb[148].mxu1  ;;  %v4376_v31 = vpop.f32.mrb[148].mxu0 }
 0x24a   : > { %v3449_v25 = vpop.f32.mrb[149].mxu1  ;;  %v7757_v35 = vadd.f32 %v4376_v31, %v3447_v39  ;;  %v4378_v23 = vpop.f32.mrb[149].mxu0 }
 0x24b   : > { %v3450_v9 = vpop.f32.mrb[150].mxu1  ;;  %v4379_v53 = vpop.f32.mrb[150].mxu0 }
 0x24c   : > { %8765 = vst [vmem:[#allocation53_spill] sm:$0xff] %v7757_v35  ;;  %v3452_v51 = vpop.f32.mrb[151].mxu1  ;;  %v7764_v10 = vadd.f32 %v4379_v53, %v3450_v9  ;;  %v4381_v8 = vpop.f32.mrb[151].mxu0  ;;  %v6860_v35 = vld [vmem:[%s7251_s27 + $0x828] ss:$16 sps:$4 sm:$0xff]  }
 0x24d   : > { %v6857_v51 = vld [vmem:[%s7251_s27 + $0x820] ss:$16 sps:$4 sm:$0xff]   ;;  %v6865_v9 = vld [vmem:[%s7251_s27 + $0x844] ss:$16 sps:$4 sm:$0xff]   ;;  %v6868_v8 = vld [vmem:[%s7251_s27 + $0x84c] ss:$16 sps:$4 sm:$0xff]  }
 0x24e   : > { %8766 = vst [vmem:[#allocation54_spill] sm:$0xff] %v7764_v10  ;;  %3662 = vmatmul.mubr.bf16.gmra.mrb[148].mxu1 %v6851_v28  ;;  %4591 = vmatmul.mubr.bf16.gmra.mrb[0].mxu0 %v6854_v63 }
 0x24f   : > { %3669 = vmatprep.mubr.bf16.mxu1 %v6859_v38  ;;  %4598 = vmatprep.mubr.bf16.mxu0 %v6862_v57 }
 0x251   : > { %v3455_v39 = vpop.f32.mrb[152].mxu1  ;;  %v4384_v31 = vpop.f32.mrb[152].mxu0 }
 0x252   : > { %v3457_v25 = vpop.f32.mrb[153].mxu1  ;;  %v7769_v45 = vadd.f32 %v4384_v31, %v3455_v39  ;;  %v4386_v14 = vpop.f32.mrb[153].mxu0 }
 0x253   : > { %v3458_v1 = vpop.f32.mrb[154].mxu1  ;;  %v4387_v53 = vpop.f32.mrb[154].mxu0 }
 0x254   : > { %8767 = vst [vmem:[#allocation55_spill] sm:$0xff] %v7769_v45  ;;  %v3460_v28 = vpop.f32.mrb[155].mxu1  ;;  %v7776_v38 = vadd.f32 %v4387_v53, %v3458_v1  ;;  %v4389_v57 = vpop.f32.mrb[155].mxu0  ;;  %v6866_v45 = vld [vmem:[%s7251_s27 + $0x848] ss:$16 sps:$4 sm:$0xff]  }
 0x255   : > { %v6863_v28 = vld [vmem:[%s7251_s27 + $0x840] ss:$16 sps:$4 sm:$0xff]   ;;  %v6871_v1 = vld [vmem:[%s7251_s27 + $0x864] ss:$16 sps:$4 sm:$0xff]   ;;  %v6874_v57 = vld [vmem:[%s7251_s27 + $0x86c] ss:$16 sps:$4 sm:$0xff]  }
 0x256   : > { %8768 = vst [vmem:[#allocation56_spill] sm:$0xff] %v7776_v38  ;;  %3670 = vmatmul.mubr.bf16.gmra.mrb[152].mxu1 %v6857_v51  ;;  %4599 = vmatmul.mubr.bf16.gmra.mrb[4].mxu0 %v6860_v35 }
 0x257   : > { %3677 = vmatprep.mubr.bf16.mxu1 %v6865_v9  ;;  %4606 = vmatprep.mubr.bf16.mxu0 %v6868_v8 }
 0x259   : > { %v3463_v39 = vpop.f32.mrb[156].mxu1  ;;  %v4392_v31 = vpop.f32.mrb[156].mxu0 }
 0x25a   : > { %v3465_v25 = vpop.f32.mrb[157].mxu1  ;;  %v7781_v23 = vadd.f32 %v4392_v31, %v3463_v39  ;;  %v4394_v10 = vpop.f32.mrb[157].mxu0 }
 0x25b   : > { %v3466_v63 = vpop.f32.mrb[158].mxu1  ;;  %v4395_v53 = vpop.f32.mrb[158].mxu0 }
 0x25c   : > { %8769 = vst [vmem:[#allocation57_spill] sm:$0xff] %v7781_v23  ;;  %v3468_v51 = vpop.f32.mrb[159].mxu1  ;;  %v7788_v9 = vadd.f32 %v4395_v53, %v3466_v63  ;;  %v4397_v8 = vpop.f32.mrb[159].mxu0  ;;  %v6872_v23 = vld [vmem:[%s7251_s27 + $0x868] ss:$16 sps:$4 sm:$0xff]  }
 0x25d   : > { %v6869_v51 = vld [vmem:[%s7251_s27 + $0x860] ss:$16 sps:$4 sm:$0xff]   ;;  %v6877_v63 = vld [vmem:[%s7251_s27 + $0x884] ss:$16 sps:$4 sm:$0xff]   ;;  %v6880_v8 = vld [vmem:[%s7251_s27 + $0x88c] ss:$16 sps:$4 sm:$0xff]  }
 0x25e   : > { %8770 = vst [vmem:[#allocation58_spill] sm:$0xff] %v7788_v9  ;;  %3678 = vmatmul.mubr.bf16.gmra.mrb[156].mxu1 %v6863_v28  ;;  %4607 = vmatmul.mubr.bf16.gmra.mrb[8].mxu0 %v6866_v45 }
 0x25f   : > { %3685 = vmatprep.mubr.bf16.mxu1 %v6871_v1  ;;  %4614 = vmatprep.mubr.bf16.mxu0 %v6874_v57 }
 0x261   : > { %v3471_v39 = vpop.f32.mrb[160].mxu1  ;;  %v4400_v31 = vpop.f32.mrb[160].mxu0 }
 0x262   : > { %v3473_v25 = vpop.f32.mrb[161].mxu1  ;;  %v7793_v14 = vadd.f32 %v4400_v31, %v3471_v39  ;;  %v4402_v38 = vpop.f32.mrb[161].mxu0 }
 0x263   : > { %v3474_v35 = vpop.f32.mrb[162].mxu1  ;;  %v4403_v53 = vpop.f32.mrb[162].mxu0 }
 0x264   : > { %8771 = vst [vmem:[#allocation59_spill] sm:$0xff] %v7793_v14  ;;  %v3476_v28 = vpop.f32.mrb[163].mxu1  ;;  %v7800_v1 = vadd.f32 %v4403_v53, %v3474_v35  ;;  %v4405_v57 = vpop.f32.mrb[163].mxu0  ;;  %v6878_v14 = vld [vmem:[%s7251_s27 + $0x888] ss:$16 sps:$4 sm:$0xff]  }
 0x265   : > { %v6875_v28 = vld [vmem:[%s7251_s27 + $0x880] ss:$16 sps:$4 sm:$0xff]   ;;  %v6883_v35 = vld [vmem:[%s7251_s27 + $0x8a4] ss:$16 sps:$4 sm:$0xff]   ;;  %v6886_v57 = vld [vmem:[%s7251_s27 + $0x8ac] ss:$16 sps:$4 sm:$0xff]  }
 0x266   : > { %8772 = vst [vmem:[#allocation60_spill] sm:$0xff] %v7800_v1  ;;  %3686 = vmatmul.mubr.bf16.gmra.mrb[160].mxu1 %v6869_v51  ;;  %4615 = vmatmul.mubr.bf16.gmra.mrb[12].mxu0 %v6872_v23 }
 0x267   : > { %3693 = vmatprep.mubr.bf16.mxu1 %v6877_v63  ;;  %4622 = vmatprep.mubr.bf16.mxu0 %v6880_v8 }
 0x269   : > { %v3479_v39 = vpop.f32.mrb[164].mxu1  ;;  %v4408_v31 = vpop.f32.mrb[164].mxu0 }
 0x26a   : > { %v3481_v25 = vpop.f32.mrb[165].mxu1  ;;  %v7805_v10 = vadd.f32 %v4408_v31, %v3479_v39  ;;  %v4410_v9 = vpop.f32.mrb[165].mxu0 }
 0x26b   : > { %v3482_v45 = vpop.f32.mrb[166].mxu1  ;;  %v4411_v53 = vpop.f32.mrb[166].mxu0 }
 0x26c   : > { %8773 = vst [vmem:[#allocation61_spill] sm:$0xff] %v7805_v10  ;;  %v3484_v51 = vpop.f32.mrb[167].mxu1  ;;  %v7812_v63 = vadd.f32 %v4411_v53, %v3482_v45  ;;  %v4413_v8 = vpop.f32.mrb[167].mxu0  ;;  %v6884_v10 = vld [vmem:[%s7251_s27 + $0x8a8] ss:$16 sps:$4 sm:$0xff]  }
 0x26d   : > { %v6881_v51 = vld [vmem:[%s7251_s27 + $0x8a0] ss:$16 sps:$4 sm:$0xff]   ;;  %v6889_v45 = vld [vmem:[%s7251_s27 + $0x8c4] ss:$16 sps:$4 sm:$0xff]   ;;  %v6892_v8 = vld [vmem:[%s7251_s27 + $0x8cc] ss:$16 sps:$4 sm:$0xff]  }
 0x26e   : > { %8774 = vst [vmem:[#allocation62_spill] sm:$0xff] %v7812_v63  ;;  %3694 = vmatmul.mubr.bf16.gmra.mrb[164].mxu1 %v6875_v28  ;;  %4623 = vmatmul.mubr.bf16.gmra.mrb[16].mxu0 %v6878_v14 }
 0x26f   : > { %3701 = vmatprep.mubr.bf16.mxu1 %v6883_v35  ;;  %4630 = vmatprep.mubr.bf16.mxu0 %v6886_v57 }
 0x271   : > { %v3487_v39 = vpop.f32.mrb[168].mxu1  ;;  %v4416_v31 = vpop.f32.mrb[168].mxu0 }
 0x272   : > { %v3489_v25 = vpop.f32.mrb[169].mxu1  ;;  %v7817_v38 = vadd.f32 %v4416_v31, %v3487_v39  ;;  %v4418_v1 = vpop.f32.mrb[169].mxu0 }
 0x273   : > { %v3490_v23 = vpop.f32.mrb[170].mxu1  ;;  %v4419_v53 = vpop.f32.mrb[170].mxu0 }
 0x274   : > { %8775 = vst [vmem:[#allocation63_spill] sm:$0xff] %v7817_v38  ;;  %v3492_v28 = vpop.f32.mrb[171].mxu1  ;;  %v7824_v35 = vadd.f32 %v4419_v53, %v3490_v23  ;;  %v4421_v57 = vpop.f32.mrb[171].mxu0  ;;  %v6890_v38 = vld [vmem:[%s7251_s27 + $0x8c8] ss:$16 sps:$4 sm:$0xff]  }
 0x275   : > { %v6887_v28 = vld [vmem:[%s7251_s27 + $0x8c0] ss:$16 sps:$4 sm:$0xff]   ;;  %v6895_v23 = vld [vmem:[%s7251_s27 + $0x8e4] ss:$16 sps:$4 sm:$0xff]   ;;  %v6898_v57 = vld [vmem:[%s7251_s27 + $0x8ec] ss:$16 sps:$4 sm:$0xff]  }
 0x276   : > { %8776 = vst [vmem:[#allocation64_spill] sm:$0xff] %v7824_v35  ;;  %3702 = vmatmul.mubr.bf16.gmra.mrb[168].mxu1 %v6881_v51  ;;  %4631 = vmatmul.mubr.bf16.gmra.mrb[20].mxu0 %v6884_v10 }
 0x277   : > { %3709 = vmatprep.mubr.bf16.mxu1 %v6889_v45  ;;  %4638 = vmatprep.mubr.bf16.mxu0 %v6892_v8 }
 0x279   : > { %v3495_v39 = vpop.f32.mrb[172].mxu1  ;;  %v4424_v31 = vpop.f32.mrb[172].mxu0 }
 0x27a   : > { %v3497_v25 = vpop.f32.mrb[173].mxu1  ;;  %v7829_v9 = vadd.f32 %v4424_v31, %v3495_v39  ;;  %v4426_v63 = vpop.f32.mrb[173].mxu0 }
 0x27b   : > { %v3498_v14 = vpop.f32.mrb[174].mxu1  ;;  %v4427_v53 = vpop.f32.mrb[174].mxu0 }
 0x27c   : > { %8777 = vst [vmem:[#allocation65_spill] sm:$0xff] %v7829_v9  ;;  %v3500_v51 = vpop.f32.mrb[175].mxu1  ;;  %v7836_v45 = vadd.f32 %v4427_v53, %v3498_v14  ;;  %v4429_v8 = vpop.f32.mrb[175].mxu0  ;;  %v6896_v9 = vld [vmem:[%s7251_s27 + $0x8e8] ss:$16 sps:$4 sm:$0xff]  }
 0x27d   : > { %v6893_v51 = vld [vmem:[%s7251_s27 + $0x8e0] ss:$16 sps:$4 sm:$0xff]   ;;  %v6901_v14 = vld [vmem:[%s7251_s27 + $0x904] ss:$16 sps:$4 sm:$0xff]   ;;  %v6904_v8 = vld [vmem:[%s7251_s27 + $0x90c] ss:$16 sps:$4 sm:$0xff]  }
 0x27e   : > { %8778 = vst [vmem:[#allocation66_spill] sm:$0xff] %v7836_v45  ;;  %3710 = vmatmul.mubr.bf16.gmra.mrb[172].mxu1 %v6887_v28  ;;  %4639 = vmatmul.mubr.bf16.gmra.mrb[24].mxu0 %v6890_v38 }
 0x27f   : > { %3717 = vmatprep.mubr.bf16.mxu1 %v6895_v23  ;;  %4646 = vmatprep.mubr.bf16.mxu0 %v6898_v57 }
 0x281   : > { %v3503_v39 = vpop.f32.mrb[176].mxu1  ;;  %v4432_v31 = vpop.f32.mrb[176].mxu0 }
 0x282   : > { %v3505_v25 = vpop.f32.mrb[177].mxu1  ;;  %v7841_v1 = vadd.f32 %v4432_v31, %v3503_v39  ;;  %v4434_v35 = vpop.f32.mrb[177].mxu0 }
 0x283   : > { %v3506_v10 = vpop.f32.mrb[178].mxu1  ;;  %v4435_v53 = vpop.f32.mrb[178].mxu0 }
 0x284   : > { %8779 = vst [vmem:[#allocation67_spill] sm:$0xff] %v7841_v1  ;;  %v3508_v28 = vpop.f32.mrb[179].mxu1  ;;  %v7848_v23 = vadd.f32 %v4435_v53, %v3506_v10  ;;  %v4437_v57 = vpop.f32.mrb[179].mxu0  ;;  %v6902_v1 = vld [vmem:[%s7251_s27 + $0x908] ss:$16 sps:$4 sm:$0xff]  }
 0x285   : > { %v6899_v28 = vld [vmem:[%s7251_s27 + $0x900] ss:$16 sps:$4 sm:$0xff]   ;;  %v6907_v10 = vld [vmem:[%s7251_s27 + $0x924] ss:$16 sps:$4 sm:$0xff]   ;;  %v6910_v57 = vld [vmem:[%s7251_s27 + $0x92c] ss:$16 sps:$4 sm:$0xff]  }
 0x286   : > { %8780 = vst [vmem:[#allocation68_spill] sm:$0xff] %v7848_v23  ;;  %3718 = vmatmul.mubr.bf16.gmra.mrb[176].mxu1 %v6893_v51  ;;  %4647 = vmatmul.mubr.bf16.gmra.mrb[28].mxu0 %v6896_v9 }
 0x287   : > { %3725 = vmatprep.mubr.bf16.mxu1 %v6901_v14  ;;  %4654 = vmatprep.mubr.bf16.mxu0 %v6904_v8 }
 0x289   : > { %v3511_v39 = vpop.f32.mrb[180].mxu1  ;;  %v4440_v31 = vpop.f32.mrb[180].mxu0 }
 0x28a   : > { %v3513_v25 = vpop.f32.mrb[181].mxu1  ;;  %v7853_v63 = vadd.f32 %v4440_v31, %v3511_v39  ;;  %v4442_v45 = vpop.f32.mrb[181].mxu0 }
 0x28b   : > { %v3514_v38 = vpop.f32.mrb[182].mxu1  ;;  %v4443_v53 = vpop.f32.mrb[182].mxu0 }
 0x28c   : > { %8781 = vst [vmem:[#allocation69_spill] sm:$0xff] %v7853_v63  ;;  %v3516_v51 = vpop.f32.mrb[183].mxu1  ;;  %v7860_v14 = vadd.f32 %v4443_v53, %v3514_v38  ;;  %v4445_v8 = vpop.f32.mrb[183].mxu0  ;;  %v6908_v63 = vld [vmem:[%s7251_s27 + $0x928] ss:$16 sps:$4 sm:$0xff]  }
 0x28d   : > { %v6905_v51 = vld [vmem:[%s7251_s27 + $0x920] ss:$16 sps:$4 sm:$0xff]   ;;  %v6913_v38 = vld [vmem:[%s7251_s27 + $0x944] ss:$16 sps:$4 sm:$0xff]   ;;  %v6916_v8 = vld [vmem:[%s7251_s27 + $0x94c] ss:$16 sps:$4 sm:$0xff]  }
 0x28e   : > { %8782 = vst [vmem:[#allocation70_spill] sm:$0xff] %v7860_v14  ;;  %3726 = vmatmul.mubr.bf16.gmra.mrb[180].mxu1 %v6899_v28  ;;  %4655 = vmatmul.mubr.bf16.gmra.mrb[32].mxu0 %v6902_v1 }
 0x28f   : > { %3733 = vmatprep.mubr.bf16.mxu1 %v6907_v10  ;;  %4662 = vmatprep.mubr.bf16.mxu0 %v6910_v57 }
 0x291   : > { %v3519_v39 = vpop.f32.mrb[184].mxu1  ;;  %v4448_v31 = vpop.f32.mrb[184].mxu0 }
 0x292   : > { %v3521_v25 = vpop.f32.mrb[185].mxu1  ;;  %v7865_v35 = vadd.f32 %v4448_v31, %v3519_v39  ;;  %v4450_v23 = vpop.f32.mrb[185].mxu0 }
 0x293   : > { %v3522_v9 = vpop.f32.mrb[186].mxu1  ;;  %v4451_v53 = vpop.f32.mrb[186].mxu0 }
 0x294   : > { %8783 = vst [vmem:[#allocation71_spill] sm:$0xff] %v7865_v35  ;;  %v3524_v28 = vpop.f32.mrb[187].mxu1  ;;  %v7872_v10 = vadd.f32 %v4451_v53, %v3522_v9  ;;  %v4453_v57 = vpop.f32.mrb[187].mxu0  ;;  %v6914_v35 = vld [vmem:[%s7251_s27 + $0x948] ss:$16 sps:$4 sm:$0xff]  }
 0x295   : > { %v6911_v28 = vld [vmem:[%s7251_s27 + $0x940] ss:$16 sps:$4 sm:$0xff]   ;;  %v6919_v9 = vld [vmem:[%s7251_s27 + $0x964] ss:$16 sps:$4 sm:$0xff]   ;;  %v6922_v57 = vld [vmem:[%s7251_s27 + $0x96c] ss:$16 sps:$4 sm:$0xff]  }
 0x296   : > { %8784 = vst [vmem:[#allocation72_spill] sm:$0xff] %v7872_v10  ;;  %3734 = vmatmul.mubr.bf16.gmra.mrb[184].mxu1 %v6905_v51  ;;  %4663 = vmatmul.mubr.bf16.gmra.mrb[36].mxu0 %v6908_v63 }
 0x297   : > { %3741 = vmatprep.mubr.bf16.mxu1 %v6913_v38  ;;  %4670 = vmatprep.mubr.bf16.mxu0 %v6916_v8 }
 0x299   : > { %v3527_v39 = vpop.f32.mrb[188].mxu1  ;;  %v4456_v31 = vpop.f32.mrb[188].mxu0 }
 0x29a   : > { %v3529_v25 = vpop.f32.mrb[189].mxu1  ;;  %v7877_v45 = vadd.f32 %v4456_v31, %v3527_v39  ;;  %v4458_v14 = vpop.f32.mrb[189].mxu0 }
 0x29b   : > { %v3530_v1 = vpop.f32.mrb[190].mxu1  ;;  %v4459_v53 = vpop.f32.mrb[190].mxu0 }
 0x29c   : > { %8785 = vst [vmem:[#allocation73_spill] sm:$0xff] %v7877_v45  ;;  %v3532_v51 = vpop.f32.mrb[191].mxu1  ;;  %v7884_v38 = vadd.f32 %v4459_v53, %v3530_v1  ;;  %v4461_v8 = vpop.f32.mrb[191].mxu0  ;;  %v6920_v45 = vld [vmem:[%s7251_s27 + $0x968] ss:$16 sps:$4 sm:$0xff]  }
 0x29d   : > { %v6917_v51 = vld [vmem:[%s7251_s27 + $0x960] ss:$16 sps:$4 sm:$0xff]   ;;  %v6925_v1 = vld [vmem:[%s7251_s27 + $0x984] ss:$16 sps:$4 sm:$0xff]   ;;  %v6928_v8 = vld [vmem:[%s7251_s27 + $0x98c] ss:$16 sps:$4 sm:$0xff]  }
 0x29e   : > { %8786 = vst [vmem:[#allocation74_spill] sm:$0xff] %v7884_v38  ;;  %3742 = vmatmul.mubr.bf16.gmra.mrb[188].mxu1 %v6911_v28  ;;  %4671 = vmatmul.mubr.bf16.gmra.mrb[40].mxu0 %v6914_v35 }
 0x29f   : > { %3749 = vmatprep.mubr.bf16.mxu1 %v6919_v9  ;;  %4678 = vmatprep.mubr.bf16.mxu0 %v6922_v57 }
 0x2a1   : > { %v3535_v39 = vpop.f32.mrb[192].mxu1  ;;  %v4464_v31 = vpop.f32.mrb[192].mxu0 }
 0x2a2   : > { %v3537_v25 = vpop.f32.mrb[193].mxu1  ;;  %v7889_v23 = vadd.f32 %v4464_v31, %v3535_v39  ;;  %v4466_v10 = vpop.f32.mrb[193].mxu0 }
 0x2a3   : > { %v3538_v63 = vpop.f32.mrb[194].mxu1  ;;  %v4467_v53 = vpop.f32.mrb[194].mxu0 }
 0x2a4   : > { %8787 = vst [vmem:[#allocation75_spill] sm:$0xff] %v7889_v23  ;;  %v3540_v28 = vpop.f32.mrb[195].mxu1  ;;  %v7896_v9 = vadd.f32 %v4467_v53, %v3538_v63  ;;  %v4469_v57 = vpop.f32.mrb[195].mxu0  ;;  %v6926_v23 = vld [vmem:[%s7251_s27 + $0x988] ss:$16 sps:$4 sm:$0xff]  }
 0x2a5   : > { %v6923_v28 = vld [vmem:[%s7251_s27 + $0x980] ss:$16 sps:$4 sm:$0xff]   ;;  %v6931_v63 = vld [vmem:[%s7251_s27 + $0x9a4] ss:$16 sps:$4 sm:$0xff]   ;;  %v6934_v57 = vld [vmem:[%s7251_s27 + $0x9ac] ss:$16 sps:$4 sm:$0xff]  }
 0x2a6   : > { %8788 = vst [vmem:[#allocation76_spill] sm:$0xff] %v7896_v9  ;;  %3750 = vmatmul.mubr.bf16.gmra.mrb[192].mxu1 %v6917_v51  ;;  %4679 = vmatmul.mubr.bf16.gmra.mrb[44].mxu0 %v6920_v45 }
 0x2a7   : > { %3757 = vmatprep.mubr.bf16.mxu1 %v6925_v1  ;;  %4686 = vmatprep.mubr.bf16.mxu0 %v6928_v8 }
 0x2a9   : > { %v3543_v39 = vpop.f32.mrb[196].mxu1  ;;  %v4472_v31 = vpop.f32.mrb[196].mxu0 }
 0x2aa   : > { %v3545_v25 = vpop.f32.mrb[197].mxu1  ;;  %v7901_v14 = vadd.f32 %v4472_v31, %v3543_v39  ;;  %v4474_v38 = vpop.f32.mrb[197].mxu0 }
 0x2ab   : > { %v3546_v35 = vpop.f32.mrb[198].mxu1  ;;  %v4475_v53 = vpop.f32.mrb[198].mxu0 }
 0x2ac   : > { %8789 = vst [vmem:[#allocation77_spill] sm:$0xff] %v7901_v14  ;;  %v3548_v51 = vpop.f32.mrb[199].mxu1  ;;  %v7908_v1 = vadd.f32 %v4475_v53, %v3546_v35  ;;  %v4477_v8 = vpop.f32.mrb[199].mxu0  ;;  %v6932_v14 = vld [vmem:[%s7251_s27 + $0x9a8] ss:$16 sps:$4 sm:$0xff]  }
 0x2ad   : > { %v6929_v51 = vld [vmem:[%s7251_s27 + $0x9a0] ss:$16 sps:$4 sm:$0xff]   ;;  %v6937_v35 = vld [vmem:[%s7251_s27 + $0x9c4] ss:$16 sps:$4 sm:$0xff]   ;;  %v6940_v8 = vld [vmem:[%s7251_s27 + $0x9cc] ss:$16 sps:$4 sm:$0xff]  }
 0x2ae   : > { %8790 = vst [vmem:[#allocation78_spill] sm:$0xff] %v7908_v1  ;;  %3758 = vmatmul.mubr.bf16.gmra.mrb[196].mxu1 %v6923_v28  ;;  %4687 = vmatmul.mubr.bf16.gmra.mrb[48].mxu0 %v6926_v23 }
 0x2af   : > { %3765 = vmatprep.mubr.bf16.mxu1 %v6931_v63  ;;  %4694 = vmatprep.mubr.bf16.mxu0 %v6934_v57 }
 0x2b1   : > { %v3551_v39 = vpop.f32.mrb[200].mxu1  ;;  %v4480_v31 = vpop.f32.mrb[200].mxu0 }
 0x2b2   : > { %v3553_v25 = vpop.f32.mrb[201].mxu1  ;;  %v7913_v10 = vadd.f32 %v4480_v31, %v3551_v39  ;;  %v4482_v9 = vpop.f32.mrb[201].mxu0 }
 0x2b3   : > { %v3554_v45 = vpop.f32.mrb[202].mxu1  ;;  %v4483_v53 = vpop.f32.mrb[202].mxu0  ;;  %v6941_v9 = vld [vmem:[%s7251_s27 + $0x9e0] ss:$16 sps:$4 sm:$0xff]  }
 0x2b4   : > { %8791 = vst [vmem:[#allocation79_spill] sm:$0xff] %v7913_v10  ;;  %v3556_v28 = vpop.f32.mrb[203].mxu1  ;;  %v7920_v63 = vadd.f32 %v4483_v53, %v3554_v45  ;;  %v4485_v57 = vpop.f32.mrb[203].mxu0  ;;  %v6938_v10 = vld [vmem:[%s7251_s27 + $0x9c8] ss:$16 sps:$4 sm:$0xff]  }
 0x2b5   : > { %v6935_v28 = vld [vmem:[%s7251_s27 + $0x9c0] ss:$16 sps:$4 sm:$0xff]   ;;  %v6943_v45 = vld [vmem:[%s7251_s27 + $0x9e4] ss:$16 sps:$4 sm:$0xff]   ;;  %v6946_v57 = vld [vmem:[%s7251_s27 + $0x9ec] ss:$16 sps:$4 sm:$0xff]  }
 0x2b6   : > { %8792 = vst [vmem:[#allocation80_spill] sm:$0xff] %v7920_v63  ;;  %3766 = vmatmul.mubr.bf16.gmra.mrb[200].mxu1 %v6929_v51  ;;  %4695 = vmatmul.mubr.bf16.gmra.mrb[52].mxu0 %v6932_v14 }
 0x2b7   : > { %3773 = vmatprep.mubr.bf16.mxu1 %v6937_v35  ;;  %4702 = vmatprep.mubr.bf16.mxu0 %v6940_v8 }
 0x2b9   : > { %v3559_v39 = vpop.f32.mrb[204].mxu1  ;;  %v4488_v31 = vpop.f32.mrb[204].mxu0 }
 0x2ba   : > { %v3561_v25 = vpop.f32.mrb[205].mxu1  ;;  %v7925_v38 = vadd.f32 %v4488_v31, %v3559_v39  ;;  %v4490_v1 = vpop.f32.mrb[205].mxu0 }
 0x2bb   : > { %v3562_v23 = vpop.f32.mrb[206].mxu1  ;;  %v4491_v53 = vpop.f32.mrb[206].mxu0  ;;  %v6947_v1 = vld [vmem:[%s7251_s27 + $0xa00] ss:$16 sps:$4 sm:$0xff]  }
 0x2bc   : > { %8793 = vst [vmem:[#allocation81_spill] sm:$0xff] %v7925_v38  ;;  %v3564_v51 = vpop.f32.mrb[207].mxu1  ;;  %v7932_v35 = vadd.f32 %v4491_v53, %v3562_v23  ;;  %v4493_v8 = vpop.f32.mrb[207].mxu0  ;;  %v6944_v38 = vld [vmem:[%s7251_s27 + $0x9e8] ss:$16 sps:$4 sm:$0xff]  }
 0x2bd   : > { %v6949_v23 = vld [vmem:[%s7251_s27 + $0xa04] ss:$16 sps:$4 sm:$0xff]   ;;  %v6952_v8 = vld [vmem:[%s7251_s27 + $0xa0c] ss:$16 sps:$4 sm:$0xff]  }
 0x2be   : > { %8795 = vst [vmem:[#allocation82_spill] sm:$0xff] %v7932_v35  ;;  %3774 = vmatmul.mubr.bf16.gmra.mrb[204].mxu1 %v6935_v28  ;;  %4703 = vmatmul.mubr.bf16.gmra.mrb[56].mxu0 %v6938_v10 }
 0x2bf   : > { %3781 = vmatprep.mubr.bf16.mxu1 %v6943_v45  ;;  %4710 = vmatprep.mubr.bf16.mxu0 %v6946_v57 }
 0x2c1   : > { %v3567_v31 = vpop.f32.mrb[208].mxu1  ;;  %v4496_v25 = vpop.f32.mrb[208].mxu0 }
 0x2c2   : > { %v3569_v51 = vpop.f32.mrb[209].mxu1  ;;  %v7937_v63 = vadd.f32 %v4496_v25, %v3567_v31  ;;  %v4498_v18 = vpop.f32.mrb[209].mxu0 }
 0x2c3   : > { %v3570_v14 = vpop.f32.mrb[210].mxu1  ;;  %v4499_v53 = vpop.f32.mrb[210].mxu0  ;;  %v6953_v18 = vld [vmem:[%s7251_s27 + $0xa20] ss:$16 sps:$4 sm:$0xff]  }
 0x2c4   : > { %8797 = vst [vmem:[#allocation83_spill] sm:$0xff] %v7937_v63  ;;  %v3572_v28 = vpop.f32.mrb[211].mxu1  ;;  %v7944_v45 = vadd.f32 %v4499_v53, %v3570_v14  ;;  %v4501_v57 = vpop.f32.mrb[211].mxu0  ;;  %v6950_v63 = vld [vmem:[%s7251_s27 + $0xa08] ss:$16 sps:$4 sm:$0xff]  }
 0x2c5   : > { %v6955_v14 = vld [vmem:[%s7251_s27 + $0xa24] ss:$16 sps:$4 sm:$0xff]   ;;  %v6958_v57 = vld [vmem:[%s7251_s27 + $0xa2c] ss:$16 sps:$4 sm:$0xff]  }
 0x2c6   : > { %8799 = vst [vmem:[#allocation84_spill] sm:$0xff] %v7944_v45  ;;  %3782 = vmatmul.mubr.bf16.gmra.mrb[208].mxu1 %v6941_v9  ;;  %4711 = vmatmul.mubr.bf16.gmra.mrb[60].mxu0 %v6944_v38 }
 0x2c7   : > { %3789 = vmatprep.mubr.bf16.mxu1 %v6949_v23  ;;  %4718 = vmatprep.mubr.bf16.mxu0 %v6952_v8 }
 0x2c9   : > { %v3575_v25 = vpop.f32.mrb[212].mxu1  ;;  %v4504_v51 = vpop.f32.mrb[212].mxu0 }
 0x2ca   : > { %v3577_v28 = vpop.f32.mrb[213].mxu1  ;;  %v7949_v35 = vadd.f32 %v4504_v51, %v3575_v25  ;;  %v4506_v39 = vpop.f32.mrb[213].mxu0 }
 0x2cb   : > { %v3578_v10 = vpop.f32.mrb[214].mxu1  ;;  %v4507_v53 = vpop.f32.mrb[214].mxu0  ;;  %v6959_v39 = vld [vmem:[%s7251_s27 + $0xa40] ss:$16 sps:$4 sm:$0xff]  }
 0x2cc   : > { %8801 = vst [vmem:[#allocation85_spill] sm:$0xff] %v7949_v35  ;;  %v3580_v9 = vpop.f32.mrb[215].mxu1  ;;  %v7956_v23 = vadd.f32 %v4507_v53, %v3578_v10  ;;  %v4509_v8 = vpop.f32.mrb[215].mxu0  ;;  %v6956_v35 = vld [vmem:[%s7251_s27 + $0xa28] ss:$16 sps:$4 sm:$0xff]  }
 0x2cd   : > { %v6961_v10 = vld [vmem:[%s7251_s27 + $0xa44] ss:$16 sps:$4 sm:$0xff]   ;;  %v6964_v8 = vld [vmem:[%s7251_s27 + $0xa4c] ss:$16 sps:$4 sm:$0xff]  }
 0x2ce   : > { %8803 = vst [vmem:[#allocation86_spill] sm:$0xff] %v7956_v23  ;;  %3790 = vmatmul.mubr.bf16.gmra.mrb[212].mxu1 %v6947_v1  ;;  %4719 = vmatmul.mubr.bf16.gmra.mrb[64].mxu0 %v6950_v63 }
 0x2cf   : > { %3797 = vmatprep.mubr.bf16.mxu1 %v6955_v14  ;;  %4726 = vmatprep.mubr.bf16.mxu0 %v6958_v57 }
 0x2d1   : > { %v3583_v51 = vpop.f32.mrb[216].mxu1  ;;  %v4512_v28 = vpop.f32.mrb[216].mxu0 }
 0x2d2   : > { %v3585_v9 = vpop.f32.mrb[217].mxu1  ;;  %v7961_v45 = vadd.f32 %v4512_v28, %v3583_v51  ;;  %v4514_v31 = vpop.f32.mrb[217].mxu0  ;;  %v6985_v51 = vld [vmem:[%s7251_s27 + $0xac4] ss:$16 sps:$4 sm:$0xff]  }
 0x2d3   : > { %v3586_v38 = vpop.f32.mrb[218].mxu1  ;;  %v4515_v53 = vpop.f32.mrb[218].mxu0 }
 0x2d4   : > { %8805 = vst [vmem:[#allocation87_spill] sm:$0xff] %v7961_v45  ;;  %v3588_v1 = vpop.f32.mrb[219].mxu1  ;;  %v7968_v14 = vadd.f32 %v4515_v53, %v3586_v38  ;;  %v4517_v57 = vpop.f32.mrb[219].mxu0  ;;  %v6962_v45 = vld [vmem:[%s7251_s27 + $0xa48] ss:$16 sps:$4 sm:$0xff]  }
 0x2d5   : > { %v6967_v38 = vld [vmem:[%s7251_s27 + $0xa64] ss:$16 sps:$4 sm:$0xff]   ;;  %v6970_v57 = vld [vmem:[%s7251_s27 + $0xa6c] ss:$16 sps:$4 sm:$0xff]  }
 0x2d6   : > { %8807 = vst [vmem:[#allocation88_spill] sm:$0xff] %v7968_v14  ;;  %3798 = vmatmul.mubr.bf16.gmra.mrb[216].mxu1 %v6953_v18  ;;  %4727 = vmatmul.mubr.bf16.gmra.mrb[68].mxu0 %v6956_v35 }
 0x2d7   : > { %3805 = vmatprep.mubr.bf16.mxu1 %v6961_v10  ;;  %4734 = vmatprep.mubr.bf16.mxu0 %v6964_v8 }
 0x2d9   : > { %v3591_v28 = vpop.f32.mrb[220].mxu1  ;;  %v4520_v9 = vpop.f32.mrb[220].mxu0 }
 0x2da   : > { %v3593_v1 = vpop.f32.mrb[221].mxu1  ;;  %v7973_v23 = vadd.f32 %v4520_v9, %v3591_v28  ;;  %v4522_v25 = vpop.f32.mrb[221].mxu0 }
 0x2db   : > { %v3594_v63 = vpop.f32.mrb[222].mxu1  ;;  %v4523_v53 = vpop.f32.mrb[222].mxu0 }
 0x2dc   : > { %8809 = vst [vmem:[#allocation89_spill] sm:$0xff] %v7973_v23  ;;  %v3596_v18 = vpop.f32.mrb[223].mxu1  ;;  %v7980_v10 = vadd.f32 %v4523_v53, %v3594_v63  ;;  %v4525_v8 = vpop.f32.mrb[223].mxu0  ;;  %v6968_v63 = vld [vmem:[%s7251_s27 + $0xa68] ss:$16 sps:$4 sm:$0xff]  }
 0x2dd   : > { %v6965_v18 = vld [vmem:[%s7251_s27 + $0xa60] ss:$16 sps:$4 sm:$0xff]   ;;  %v6973_v53 = vld [vmem:[%s7251_s27 + $0xa84] ss:$16 sps:$4 sm:$0xff]   ;;  %v6976_v23 = vld [vmem:[%s7251_s27 + $0xa8c] ss:$16 sps:$4 sm:$0xff]  }
 0x2de   : > { %8811 = vst [vmem:[#allocation90_spill] sm:$0xff] %v7980_v10  ;;  %3806 = vmatmul.mubr.bf16.gmra.mrb[220].mxu1 %v6959_v39  ;;  %4735 = vmatmul.mubr.bf16.gmra.mrb[72].mxu0 %v6962_v45 }
 0x2df   : > { %3813 = vmatprep.mubr.bf16.mxu1 %v6967_v38  ;;  %4742 = vmatprep.mubr.bf16.mxu0 %v6970_v57 }
 0x2e1   : > { %v3599_v28 = vpop.f32.mrb[224].mxu1  ;;  %v4528_v9 = vpop.f32.mrb[224].mxu0 }
 0x2e2   : > { %v3601_v1 = vpop.f32.mrb[225].mxu1  ;;  %v7985_v31 = vadd.f32 %v4528_v9, %v3599_v28  ;;  %v4530_v14 = vpop.f32.mrb[225].mxu0  ;;  %v6971_v28 = vld [vmem:[%s7251_s27 + $0xa80] ss:$16 sps:$4 sm:$0xff]  }
 0x2e3   : > { %v3602_v35 = vpop.f32.mrb[226].mxu1  ;;  %v4531_v8 = vpop.f32.mrb[226].mxu0 }
 0x2e4   : > { %v3604_v39 = vpop.f32.mrb[227].mxu1  ;;  %v7990_v25 = vadd.f32 %v4531_v8, %v3602_v35  ;;  %v4533_v45 = vpop.f32.mrb[227].mxu0  ;;  %v6982_v8 = vld [vmem:[%s7251_s27 + $0xaac] ss:$16 sps:$4 sm:$0xff]  }
 0x2e5   : > { %v6974_v39 = vld [vmem:[%s7251_s27 + $0xa88] ss:$16 sps:$4 sm:$0xff]  }
 0x2e6   : > { %3814 = vmatmul.mubr.bf16.gmra.mrb[224].mxu1 %v6965_v18  ;;  %4743 = vmatmul.mubr.bf16.gmra.mrb[76].mxu0 %v6968_v63 }
 0x2e7   : > { %3821 = vmatprep.mubr.bf16.mxu1 %v6973_v53  ;;  %4750 = vmatprep.mubr.bf16.mxu0 %v6976_v23 }
 0x2e9   : > { %v3607_v38 = vpop.f32.mrb[228].mxu1  ;;  %v4536_v57 = vpop.f32.mrb[228].mxu0 }
 0x2ea   : > { %v3609_v14 = vpop.f32.mrb[229].mxu1  ;;  %v7993_v9 = vadd.f32 %v4536_v57, %v3607_v38  ;;  %v4538_v1 = vpop.f32.mrb[229].mxu0  ;;  %v6977_v38 = vld [vmem:[%s7251_s27 + $0xaa0] ss:$16 sps:$4 sm:$0xff]  }
 0x2eb   : > { %v3610_v10 = vpop.f32.mrb[230].mxu1  ;;  %v4539_v62 = vpop.f32.mrb[230].mxu0 }
 0x2ec   : > { %v3612_v35 = vpop.f32.mrb[231].mxu1  ;;  %v7998_v18 = vadd.f32 %v4539_v62, %v3610_v10  ;;  %v4541_v63 = vpop.f32.mrb[231].mxu0  ;;  %v6988_v10 = vld [vmem:[%s7251_s27 + $0xacc] ss:$16 sps:$4 sm:$0xff]  }
 0x2ed   : > { %v6980_v35 = vld [vmem:[%s7251_s27 + $0xaa8] ss:$16 sps:$4 sm:$0xff]  }
 0x2ee   : > { %3822 = vmatmul.mubr.bf16.gmra.mrb[228].mxu1 %v6971_v28  ;;  %4751 = vmatmul.mubr.bf16.gmra.mrb[80].mxu0 %v6974_v39 }
 0x2ef   : > { %3829 = vmatprep.mubr.bf16.mxu1 %v6979_v56  ;;  %4758 = vmatprep.mubr.bf16.mxu0 %v6982_v8 }
 0x2f1   : > { %v3615_v23 = vpop.f32.mrb[232].mxu1  ;;  %v4544_v53 = vpop.f32.mrb[232].mxu0 }
 0x2f2   : > { %v3617_v45 = vpop.f32.mrb[233].mxu1  ;;  %v8001_v57 = vadd.f32 %v4544_v53, %v3615_v23  ;;  %v4546_v14 = vpop.f32.mrb[233].mxu0  ;;  %v6983_v23 = vld [vmem:[%s7251_s27 + $0xac0] ss:$16 sps:$4 sm:$0xff]  }
 0x2f3   : > { %v3618_v1 = vpop.f32.mrb[234].mxu1  ;;  %v4547_v42 = vpop.f32.mrb[234].mxu0 }
 0x2f4   : > { %v3620_v62 = vpop.f32.mrb[235].mxu1  ;;  %v8006_v28 = vadd.f32 %v4547_v42, %v3618_v1  ;;  %v4549_v56 = vpop.f32.mrb[235].mxu0  ;;  %v6994_v1 = vld [vmem:[%s7251_s27 + $0xaec] ss:$16 sps:$4 sm:$0xff]  }
 0x2f5   : > { %v6986_v62 = vld [vmem:[%s7251_s27 + $0xac8] ss:$16 sps:$4 sm:$0xff]  }
 0x2f6   : > { %3830 = vmatmul.mubr.bf16.gmra.mrb[232].mxu1 %v6977_v38  ;;  %4759 = vmatmul.mubr.bf16.gmra.mrb[84].mxu0 %v6980_v35 }
 0x2f7   : > { %3837 = vmatprep.mubr.bf16.mxu1 %v6985_v51  ;;  %4766 = vmatprep.mubr.bf16.mxu0 %v6988_v10 }
 0x2f9   : > { %v3623_v39 = vpop.f32.mrb[236].mxu1  ;;  %v4552_v8 = vpop.f32.mrb[236].mxu0 }
 0x2fa   : > { %v3625_v63 = vpop.f32.mrb[237].mxu1  ;;  %v8009_v53 = vadd.f32 %v4552_v8, %v3623_v39  ;;  %v4554_v45 = vpop.f32.mrb[237].mxu0  ;;  %v6989_v39 = vld [vmem:[%s7251_s27 + $0xae0] ss:$16 sps:$4 sm:$0xff]  }
 0x2fb   : > { %v3626_v14 = vpop.f32.mrb[238].mxu1  ;;  %v4555_v2 = vpop.f32.mrb[238].mxu0 }
 0x2fc   : > { %v3628_v42 = vpop.f32.mrb[239].mxu1  ;;  %v8014_v38 = vadd.f32 %v4555_v2, %v3626_v14  ;;  %v4557_v51 = vpop.f32.mrb[239].mxu0  ;;  %v7000_v14 = vld [vmem:[%s7251_s27 + $0xb0c] ss:$16 sps:$4 sm:$0xff]  }
 0x2fd   : > { %v6992_v42 = vld [vmem:[%s7251_s27 + $0xae8] ss:$16 sps:$4 sm:$0xff]  }
 0x2fe   : > { %3838 = vmatmul.mubr.bf16.gmra.mrb[236].mxu1 %v6983_v23  ;;  %4767 = vmatmul.mubr.bf16.gmra.mrb[88].mxu0 %v6986_v62 }
 0x2ff   : > { %3845 = vmatprep.mubr.bf16.mxu1 %v6991_v21  ;;  %4774 = vmatprep.mubr.bf16.mxu0 %v6994_v1 }
 0x301   : > { %v3631_v35 = vpop.f32.mrb[240].mxu1  ;;  %v4560_v10 = vpop.f32.mrb[240].mxu0 }
 0x302   : > { %v3633_v56 = vpop.f32.mrb[241].mxu1  ;;  %v8017_v8 = vadd.f32 %v4560_v10, %v3631_v35  ;;  %v4562_v63 = vpop.f32.mrb[241].mxu0  ;;  %v6995_v35 = vld [vmem:[%s7251_s27 + $0xb00] ss:$16 sps:$4 sm:$0xff]  }
 0x303   : > { %v3634_v45 = vpop.f32.mrb[242].mxu1  ;;  %v4563_v32 = vpop.f32.mrb[242].mxu0 }
 0x304   : > { %v3636_v2 = vpop.f32.mrb[243].mxu1  ;;  %v8022_v23 = vadd.f32 %v4563_v32, %v3634_v45  ;;  %v4565_v21 = vpop.f32.mrb[243].mxu0  ;;  %v7006_v45 = vld [vmem:[%s7251_s27 + $0xb2c] ss:$16 sps:$4 sm:$0xff]  }
 0x305   : > { %v6998_v2 = vld [vmem:[%s7251_s27 + $0xb08] ss:$16 sps:$4 sm:$0xff]  }
 0x306   : > { %3846 = vmatmul.mubr.bf16.gmra.mrb[240].mxu1 %v6989_v39  ;;  %4775 = vmatmul.mubr.bf16.gmra.mrb[92].mxu0 %v6992_v42 }
 0x307   : > { %3853 = vmatprep.mubr.bf16.mxu1 %v6997_v50  ;;  %4782 = vmatprep.mubr.bf16.mxu0 %v7000_v14 }
 0x309   : > { %v3639_v62 = vpop.f32.mrb[244].mxu1  ;;  %v4568_v1 = vpop.f32.mrb[244].mxu0 }
 0x30a   : > { %v3641_v51 = vpop.f32.mrb[245].mxu1  ;;  %v8025_v10 = vadd.f32 %v4568_v1, %v3639_v62  ;;  %v4570_v56 = vpop.f32.mrb[245].mxu0  ;;  %v7001_v62 = vld [vmem:[%s7251_s27 + $0xb20] ss:$16 sps:$4 sm:$0xff]  }
 0x30b   : > { %v3642_v63 = vpop.f32.mrb[246].mxu1  ;;  %v4571_v0 = vpop.f32.mrb[246].mxu0 }
 0x30c   : > { %v3644_v32 = vpop.f32.mrb[247].mxu1  ;;  %v8030_v39 = vadd.f32 %v4571_v0, %v3642_v63  ;;  %v4573_v50 = vpop.f32.mrb[247].mxu0  ;;  %v7012_v63 = vld [vmem:[%s7251_s27 + $0xb4c] ss:$16 sps:$4 sm:$0xff]  }
 0x30d   : > { %v7004_v32 = vld [vmem:[%s7251_s27 + $0xb28] ss:$16 sps:$4 sm:$0xff]  }
 0x30e   : > { %3854 = vmatmul.mubr.bf16.gmra.mrb[244].mxu1 %v6995_v35  ;;  %4783 = vmatmul.mubr.bf16.gmra.mrb[96].mxu0 %v6998_v2 }
 0x30f   : > { %3861 = vmatprep.mubr.bf16.mxu1 %v7003_v13  ;;  %4790 = vmatprep.mubr.bf16.mxu0 %v7006_v45 }
 0x311   : > { %v3647_v42 = vpop.f32.mrb[248].mxu1  ;;  %v4576_v14 = vpop.f32.mrb[248].mxu0 }
 0x312   : > { %v3649_v21 = vpop.f32.mrb[249].mxu1  ;;  %v8033_v1 = vadd.f32 %v4576_v14, %v3647_v42  ;;  %v4578_v51 = vpop.f32.mrb[249].mxu0  ;;  %v7007_v42 = vld [vmem:[%s7251_s27 + $0xb40] ss:$16 sps:$4 sm:$0xff]  }
 0x313   : > { %v3650_v56 = vpop.f32.mrb[250].mxu1  ;;  %v4579_v34 = vpop.f32.mrb[250].mxu0 }
 0x314   : > { %v3652_v0 = vpop.f32.mrb[251].mxu1  ;;  %v8038_v35 = vadd.f32 %v4579_v34, %v3650_v56  ;;  %v4581_v13 = vpop.f32.mrb[251].mxu0  ;;  %v7018_v56 = vld [vmem:[%s7251_s27 + $0xb6c] ss:$16 sps:$4 sm:$0xff]  }
 0x315   : > { %v7010_v0 = vld [vmem:[%s7251_s27 + $0xb48] ss:$16 sps:$4 sm:$0xff]  }
 0x316   : > { %3862 = vmatmul.mubr.bf16.gmra.mrb[248].mxu1 %v7001_v62  ;;  %4791 = vmatmul.mubr.bf16.gmra.mrb[100].mxu0 %v7004_v32 }
 0x317   : > { %3869 = vmatprep.mubr.bf16.mxu1 %v7009_v48  ;;  %4798 = vmatprep.mubr.bf16.mxu0 %v7012_v63 }
 0x319   : > { %v3655_v2 = vpop.f32.mrb[252].mxu1  ;;  %v4584_v45 = vpop.f32.mrb[252].mxu0 }
 0x31a   : > { %v3657_v50 = vpop.f32.mrb[253].mxu1  ;;  %v8041_v14 = vadd.f32 %v4584_v45, %v3655_v2  ;;  %v4586_v21 = vpop.f32.mrb[253].mxu0  ;;  %v7013_v2 = vld [vmem:[%s7251_s27 + $0xb60] ss:$16 sps:$4 sm:$0xff]  }
 0x31b   : > { %v3658_v51 = vpop.f32.mrb[254].mxu1  ;;  %v4587_v7 = vpop.f32.mrb[254].mxu0 }
 0x31c   : > { %v3660_v34 = vpop.f32.mrb[255].mxu1  ;;  %v8046_v62 = vadd.f32 %v4587_v7, %v3658_v51  ;;  %v4589_v48 = vpop.f32.mrb[255].mxu0  ;;  %v7024_v51 = vld [vmem:[%s7251_s27 + $0xb8c] ss:$16 sps:$4 sm:$0xff]  }
 0x31d   : > { %v7016_v34 = vld [vmem:[%s7251_s27 + $0xb68] ss:$16 sps:$4 sm:$0xff]  }
 0x31e   : > { %3870 = vmatmul.mubr.bf16.gmra.mrb[252].mxu1 %v7007_v42  ;;  %4799 = vmatmul.mubr.bf16.gmra.mrb[104].mxu0 %v7010_v0 }
 0x31f   : > { %3877 = vmatprep.mubr.bf16.mxu1 %v7015_v16  ;;  %4806 = vmatprep.mubr.bf16.mxu0 %v7018_v56 }
 0x321   : > { %v3663_v32 = vpop.f32.mrb[148].mxu1  ;;  %v4592_v63 = vpop.f32.mrb[0].mxu0 }
 0x322   : > { %v3665_v13 = vpop.f32.mrb[149].mxu1  ;;  %v8049_v45 = vadd.f32 %v4592_v63, %v3663_v32  ;;  %v4594_v50 = vpop.f32.mrb[1].mxu0  ;;  %v7019_v32 = vld [vmem:[%s7251_s27 + $0xb80] ss:$16 sps:$4 sm:$0xff]  }
 0x323   : > { %v3666_v21 = vpop.f32.mrb[150].mxu1  ;;  %v4595_v44 = vpop.f32.mrb[2].mxu0 }
 0x324   : > { %v3668_v7 = vpop.f32.mrb[151].mxu1  ;;  %v8054_v42 = vadd.f32 %v4595_v44, %v3666_v21  ;;  %v4597_v16 = vpop.f32.mrb[3].mxu0  ;;  %v7030_v21 = vld [vmem:[%s7251_s27 + $0xbac] ss:$16 sps:$4 sm:$0xff]  }
 0x325   : > { %v7022_v7 = vld [vmem:[%s7251_s27 + $0xb88] ss:$16 sps:$4 sm:$0xff]  }
 0x326   : > { %3878 = vmatmul.mubr.bf16.gmra.mrb[148].mxu1 %v7013_v2  ;;  %4807 = vmatmul.mubr.bf16.gmra.mrb[108].mxu0 %v7016_v34 }
 0x327   : > { %3885 = vmatprep.mubr.bf16.mxu1 %v7021_v54  ;;  %4814 = vmatprep.mubr.bf16.mxu0 %v7024_v51 }
 0x329   : > { %v3671_v0 = vpop.f32.mrb[152].mxu1  ;;  %v4600_v56 = vpop.f32.mrb[4].mxu0 }
 0x32a   : > { %v3673_v48 = vpop.f32.mrb[153].mxu1  ;;  %v8057_v63 = vadd.f32 %v4600_v56, %v3671_v0  ;;  %v4602_v13 = vpop.f32.mrb[5].mxu0  ;;  %v7025_v0 = vld [vmem:[%s7251_s27 + $0xba0] ss:$16 sps:$4 sm:$0xff]  }
 0x32b   : > { %v3674_v50 = vpop.f32.mrb[154].mxu1  ;;  %v4603_v17 = vpop.f32.mrb[6].mxu0 }
 0x32c   : > { %v3676_v44 = vpop.f32.mrb[155].mxu1  ;;  %v8062_v2 = vadd.f32 %v4603_v17, %v3674_v50  ;;  %v4605_v54 = vpop.f32.mrb[7].mxu0  ;;  %v7036_v50 = vld [vmem:[%s7251_s27 + $0xbcc] ss:$16 sps:$4 sm:$0xff]  }
 0x32d   : > { %v7028_v44 = vld [vmem:[%s7251_s27 + $0xba8] ss:$16 sps:$4 sm:$0xff]  }
 0x32e   : > { %3886 = vmatmul.mubr.bf16.gmra.mrb[152].mxu1 %v7019_v32  ;;  %4815 = vmatmul.mubr.bf16.gmra.mrb[112].mxu0 %v7022_v7 }
 0x32f   : > { %3893 = vmatprep.mubr.bf16.mxu1 %v7027_v29  ;;  %4822 = vmatprep.mubr.bf16.mxu0 %v7030_v21 }
 0x331   : > { %v3679_v34 = vpop.f32.mrb[156].mxu1  ;;  %v4608_v51 = vpop.f32.mrb[8].mxu0 }
 0x332   : > { %v3681_v16 = vpop.f32.mrb[157].mxu1  ;;  %v8065_v56 = vadd.f32 %v4608_v51, %v3679_v34  ;;  %v4610_v48 = vpop.f32.mrb[9].mxu0  ;;  %v7031_v34 = vld [vmem:[%s7251_s27 + $0xbc0] ss:$16 sps:$4 sm:$0xff]  }
 0x333   : > { %v3682_v13 = vpop.f32.mrb[158].mxu1  ;;  %v4611_v58 = vpop.f32.mrb[10].mxu0 }
 0x334   : > { %v3684_v17 = vpop.f32.mrb[159].mxu1  ;;  %v8070_v32 = vadd.f32 %v4611_v58, %v3682_v13  ;;  %v4613_v29 = vpop.f32.mrb[11].mxu0  ;;  %v7042_v13 = vld [vmem:[%s7251_s27 + $0xbec] ss:$16 sps:$4 sm:$0xff]  }
 0x335   : > { %v7034_v17 = vld [vmem:[%s7251_s27 + $0xbc8] ss:$16 sps:$4 sm:$0xff]  }
 0x336   : > { %3894 = vmatmul.mubr.bf16.gmra.mrb[156].mxu1 %v7025_v0  ;;  %4823 = vmatmul.mubr.bf16.gmra.mrb[116].mxu0 %v7028_v44 }
 0x337   : > { %3901 = vmatprep.mubr.bf16.mxu1 %v7033_v6  ;;  %4830 = vmatprep.mubr.bf16.mxu0 %v7036_v50 }
 0x339   : > { %v3687_v7 = vpop.f32.mrb[160].mxu1  ;;  %v4616_v21 = vpop.f32.mrb[12].mxu0 }
 0x33a   : > { %v3689_v54 = vpop.f32.mrb[161].mxu1  ;;  %v8073_v51 = vadd.f32 %v4616_v21, %v3687_v7  ;;  %v4618_v16 = vpop.f32.mrb[13].mxu0  ;;  %v7037_v7 = vld [vmem:[%s7251_s27 + $0xbe0] ss:$16 sps:$4 sm:$0xff]  }
 0x33b   : > { %v3690_v48 = vpop.f32.mrb[162].mxu1  ;;  %v4619_v37 = vpop.f32.mrb[14].mxu0 }
 0x33c   : > { %v3692_v58 = vpop.f32.mrb[163].mxu1  ;;  %v8078_v0 = vadd.f32 %v4619_v37, %v3690_v48  ;;  %v4621_v6 = vpop.f32.mrb[15].mxu0  ;;  %v7048_v48 = vld [vmem:[%s7251_s27 + $0xc0c] ss:$16 sps:$4 sm:$0xff]  }
 0x33d   : > { %v7040_v58 = vld [vmem:[%s7251_s27 + $0xbe8] ss:$16 sps:$4 sm:$0xff]  }
 0x33e   : > { %8812 = vst [vmem:[#allocation91_spill] sm:$0xff] %v8078_v0  ;;  %3902 = vmatmul.mubr.bf16.gmra.mrb[160].mxu1 %v7031_v34  ;;  %4831 = vmatmul.mubr.bf16.gmra.mrb[120].mxu0 %v7034_v17 }
 0x33f   : > { %3909 = vmatprep.mubr.bf16.mxu1 %v7039_v46  ;;  %4838 = vmatprep.mubr.bf16.mxu0 %v7042_v13 }
 0x341   : > { %v3695_v44 = vpop.f32.mrb[164].mxu1  ;;  %v4624_v50 = vpop.f32.mrb[16].mxu0 }
 0x342   : > { %v3697_v29 = vpop.f32.mrb[165].mxu1  ;;  %v8081_v21 = vadd.f32 %v4624_v50, %v3695_v44  ;;  %v4626_v54 = vpop.f32.mrb[17].mxu0  ;;  %v7043_v44 = vld [vmem:[%s7251_s27 + $0xc00] ss:$16 sps:$4 sm:$0xff]  }
 0x343   : > { %v3698_v16 = vpop.f32.mrb[166].mxu1  ;;  %v4627_v15 = vpop.f32.mrb[18].mxu0 }
 0x344   : > { %8813 = vst [vmem:[#allocation92_spill] sm:$0xff] %v8081_v21  ;;  %v3700_v37 = vpop.f32.mrb[167].mxu1  ;;  %v8086_v34 = vadd.f32 %v4627_v15, %v3698_v16  ;;  %v4629_v46 = vpop.f32.mrb[19].mxu0  ;;  %v7051_v21 = vld [vmem:[%s7251_s27 + $0xc24] ss:$16 sps:$4 sm:$0xff]  }
 0x345   : > { %v7046_v37 = vld [vmem:[%s7251_s27 + $0xc08] ss:$16 sps:$4 sm:$0xff]   ;;  %v7054_v16 = vld [vmem:[%s7251_s27 + $0xc2c] ss:$16 sps:$4 sm:$0xff]  }
 0x346   : > { %8814 = vst [vmem:[#allocation93_spill] sm:$0xff] %v8086_v34  ;;  %3910 = vmatmul.mubr.bf16.gmra.mrb[164].mxu1 %v7037_v7  ;;  %4839 = vmatmul.mubr.bf16.gmra.mrb[124].mxu0 %v7040_v58 }
 0x347   : > { %3917 = vmatprep.mubr.bf16.mxu1 %v7045_v24  ;;  %4846 = vmatprep.mubr.bf16.mxu0 %v7048_v48 }
 0x349   : > { %v3703_v17 = vpop.f32.mrb[168].mxu1  ;;  %v4632_v13 = vpop.f32.mrb[20].mxu0 }
 0x34a   : > { %v3705_v6 = vpop.f32.mrb[169].mxu1  ;;  %v8089_v50 = vadd.f32 %v4632_v13, %v3703_v17  ;;  %v4634_v29 = vpop.f32.mrb[21].mxu0  ;;  %v7049_v17 = vld [vmem:[%s7251_s27 + $0xc20] ss:$16 sps:$4 sm:$0xff]  }
 0x34b   : > { %v3706_v54 = vpop.f32.mrb[170].mxu1  ;;  %v4635_v0 = vpop.f32.mrb[22].mxu0 }
 0x34c   : > { %8815 = vst [vmem:[#allocation94_spill] sm:$0xff] %v8089_v50  ;;  %v3708_v15 = vpop.f32.mrb[171].mxu1  ;;  %v8094_v7 = vadd.f32 %v4635_v0, %v3706_v54  ;;  %v4637_v24 = vpop.f32.mrb[23].mxu0  ;;  %v7057_v50 = vld [vmem:[%s7251_s27 + $0xc44] ss:$16 sps:$4 sm:$0xff]  }
 0x34d   : > { %v7052_v15 = vld [vmem:[%s7251_s27 + $0xc28] ss:$16 sps:$4 sm:$0xff]   ;;  %v7060_v54 = vld [vmem:[%s7251_s27 + $0xc4c] ss:$16 sps:$4 sm:$0xff]  }
 0x34e   : > { %8816 = vst [vmem:[#allocation95_spill] sm:$0xff] %v8094_v7  ;;  %3918 = vmatmul.mubr.bf16.gmra.mrb[168].mxu1 %v7043_v44  ;;  %4847 = vmatmul.mubr.bf16.gmra.mrb[128].mxu0 %v7046_v37 }
 0x34f   : > { %3925 = vmatprep.mubr.bf16.mxu1 %v7051_v21  ;;  %4854 = vmatprep.mubr.bf16.mxu0 %v7054_v16 }
 0x351   : > { %v3711_v58 = vpop.f32.mrb[172].mxu1  ;;  %v4640_v48 = vpop.f32.mrb[24].mxu0 }
 0x352   : > { %v3713_v46 = vpop.f32.mrb[173].mxu1  ;;  %v8097_v13 = vadd.f32 %v4640_v48, %v3711_v58  ;;  %v4642_v6 = vpop.f32.mrb[25].mxu0  ;;  %v7055_v58 = vld [vmem:[%s7251_s27 + $0xc40] ss:$16 sps:$4 sm:$0xff]  }
 0x353   : > { %v3714_v29 = vpop.f32.mrb[174].mxu1  ;;  %v4643_v34 = vpop.f32.mrb[26].mxu0 }
 0x354   : > { %8817 = vst [vmem:[#allocation96_spill] sm:$0xff] %v8097_v13  ;;  %v3716_v0 = vpop.f32.mrb[175].mxu1  ;;  %v8102_v44 = vadd.f32 %v4643_v34, %v3714_v29  ;;  %v4645_v21 = vpop.f32.mrb[27].mxu0  ;;  %v7063_v13 = vld [vmem:[%s7251_s27 + $0xc64] ss:$16 sps:$4 sm:$0xff]  }
 0x355   : > { %v7058_v0 = vld [vmem:[%s7251_s27 + $0xc48] ss:$16 sps:$4 sm:$0xff]   ;;  %v7066_v29 = vld [vmem:[%s7251_s27 + $0xc6c] ss:$16 sps:$4 sm:$0xff]  }
 0x356   : > { %8818 = vst [vmem:[#allocation97_spill] sm:$0xff] %v8102_v44  ;;  %3926 = vmatmul.mubr.bf16.gmra.mrb[172].mxu1 %v7049_v17  ;;  %4855 = vmatmul.mubr.bf16.gmra.mrb[132].mxu0 %v7052_v15 }
 0x357   : > { %3933 = vmatprep.mubr.bf16.mxu1 %v7057_v50  ;;  %4862 = vmatprep.mubr.bf16.mxu0 %v7060_v54 }
 0x359   : > { %v3719_v37 = vpop.f32.mrb[176].mxu1  ;;  %v4648_v16 = vpop.f32.mrb[28].mxu0 }
 0x35a   : > { %v3721_v24 = vpop.f32.mrb[177].mxu1  ;;  %v8105_v48 = vadd.f32 %v4648_v16, %v3719_v37  ;;  %v4650_v46 = vpop.f32.mrb[29].mxu0  ;;  %v7061_v37 = vld [vmem:[%s7251_s27 + $0xc60] ss:$16 sps:$4 sm:$0xff]  }
 0x35b   : > { %v3722_v6 = vpop.f32.mrb[178].mxu1  ;;  %v4651_v7 = vpop.f32.mrb[30].mxu0 }
 0x35c   : > { %8819 = vst [vmem:[#allocation98_spill] sm:$0xff] %v8105_v48  ;;  %v3724_v34 = vpop.f32.mrb[179].mxu1  ;;  %v8110_v17 = vadd.f32 %v4651_v7, %v3722_v6  ;;  %v4653_v50 = vpop.f32.mrb[31].mxu0  ;;  %v7069_v48 = vld [vmem:[%s7251_s27 + $0xc84] ss:$16 sps:$4 sm:$0xff]  }
 0x35d   : > { %v7064_v34 = vld [vmem:[%s7251_s27 + $0xc68] ss:$16 sps:$4 sm:$0xff]   ;;  %v7072_v6 = vld [vmem:[%s7251_s27 + $0xc8c] ss:$16 sps:$4 sm:$0xff]  }
 0x35e   : > { %8820 = vst [vmem:[#allocation99_spill] sm:$0xff] %v8110_v17  ;;  %3934 = vmatmul.mubr.bf16.gmra.mrb[176].mxu1 %v7055_v58  ;;  %4863 = vmatmul.mubr.bf16.gmra.mrb[136].mxu0 %v7058_v0 }
 0x35f   : > { %3941 = vmatprep.mubr.bf16.mxu1 %v7063_v13  ;;  %4870 = vmatprep.mubr.bf16.mxu0 %v7066_v29 }
 0x361   : > { %v3727_v15 = vpop.f32.mrb[180].mxu1  ;;  %v4656_v54 = vpop.f32.mrb[32].mxu0 }
 0x362   : > { %v3729_v21 = vpop.f32.mrb[181].mxu1  ;;  %v8113_v16 = vadd.f32 %v4656_v54, %v3727_v15  ;;  %v4658_v24 = vpop.f32.mrb[33].mxu0  ;;  %v7067_v15 = vld [vmem:[%s7251_s27 + $0xc80] ss:$16 sps:$4 sm:$0xff]  }
 0x363   : > { %v3730_v46 = vpop.f32.mrb[182].mxu1  ;;  %v4659_v44 = vpop.f32.mrb[34].mxu0 }
 0x364   : > { %8821 = vst [vmem:[#allocation100_spill] sm:$0xff] %v8113_v16  ;;  %v3732_v7 = vpop.f32.mrb[183].mxu1  ;;  %v8118_v58 = vadd.f32 %v4659_v44, %v3730_v46  ;;  %v4661_v13 = vpop.f32.mrb[35].mxu0  ;;  %v7075_v16 = vld [vmem:[%s7251_s27 + $0xca4] ss:$16 sps:$4 sm:$0xff]  }
 0x365   : > { %v7070_v7 = vld [vmem:[%s7251_s27 + $0xc88] ss:$16 sps:$4 sm:$0xff]   ;;  %v7078_v46 = vld [vmem:[%s7251_s27 + $0xcac] ss:$16 sps:$4 sm:$0xff]  }
 0x366   : > { %8822 = vst [vmem:[#allocation101_spill] sm:$0xff] %v8118_v58  ;;  %3942 = vmatmul.mubr.bf16.gmra.mrb[180].mxu1 %v7061_v37  ;;  %4871 = vmatmul.mubr.bf16.gmra.mrb[140].mxu0 %v7064_v34 }
 0x367   : > { %3949 = vmatprep.mubr.bf16.mxu1 %v7069_v48  ;;  %4878 = vmatprep.mubr.bf16.mxu0 %v7072_v6 }
 0x369   : > { %v3735_v0 = vpop.f32.mrb[184].mxu1  ;;  %v4664_v29 = vpop.f32.mrb[36].mxu0 }
 0x36a   : > { %v3737_v50 = vpop.f32.mrb[185].mxu1  ;;  %v8121_v54 = vadd.f32 %v4664_v29, %v3735_v0  ;;  %v4666_v21 = vpop.f32.mrb[37].mxu0  ;;  %v7073_v0 = vld [vmem:[%s7251_s27 + $0xca0] ss:$16 sps:$4 sm:$0xff]  }
 0x36b   : > { %v3738_v24 = vpop.f32.mrb[186].mxu1  ;;  %v4667_v17 = vpop.f32.mrb[38].mxu0 }
 0x36c   : > { %8823 = vst [vmem:[#allocation102_spill] sm:$0xff] %v8121_v54  ;;  %v3740_v44 = vpop.f32.mrb[187].mxu1  ;;  %v8126_v37 = vadd.f32 %v4667_v17, %v3738_v24  ;;  %v4669_v48 = vpop.f32.mrb[39].mxu0  ;;  %v7081_v54 = vld [vmem:[%s7251_s27 + $0xcc4] ss:$16 sps:$4 sm:$0xff]  }
 0x36d   : > { %v7076_v44 = vld [vmem:[%s7251_s27 + $0xca8] ss:$16 sps:$4 sm:$0xff]   ;;  %v7084_v24 = vld [vmem:[%s7251_s27 + $0xccc] ss:$16 sps:$4 sm:$0xff]  }
 0x36e   : > { %8824 = vst [vmem:[#allocation103_spill] sm:$0xff] %v8126_v37  ;;  %3950 = vmatmul.mubr.bf16.gmra.mrb[184].mxu1 %v7067_v15  ;;  %4879 = vmatmul.mubr.bf16.gmra.mrb[144].mxu0 %v7070_v7 }
 0x36f   : > { %3957 = vmatprep.mubr.bf16.mxu1 %v7075_v16  ;;  %4886 = vmatprep.mubr.bf16.mxu0 %v7078_v46 }
 0x371   : > { %v3743_v34 = vpop.f32.mrb[188].mxu1  ;;  %v4672_v6 = vpop.f32.mrb[40].mxu0 }
 0x372   : > { %v3745_v13 = vpop.f32.mrb[189].mxu1  ;;  %v8129_v29 = vadd.f32 %v4672_v6, %v3743_v34  ;;  %v4674_v50 = vpop.f32.mrb[41].mxu0  ;;  %v7079_v34 = vld [vmem:[%s7251_s27 + $0xcc0] ss:$16 sps:$4 sm:$0xff]  }
 0x373   : > { %v3746_v21 = vpop.f32.mrb[190].mxu1  ;;  %v4675_v58 = vpop.f32.mrb[42].mxu0 }
 0x374   : > { %8825 = vst [vmem:[#allocation104_spill] sm:$0xff] %v8129_v29  ;;  %v3748_v17 = vpop.f32.mrb[191].mxu1  ;;  %v8134_v15 = vadd.f32 %v4675_v58, %v3746_v21  ;;  %v4677_v16 = vpop.f32.mrb[43].mxu0  ;;  %v7087_v29 = vld [vmem:[%s7251_s27 + $0xce4] ss:$16 sps:$4 sm:$0xff]  }
 0x375   : > { %v7082_v17 = vld [vmem:[%s7251_s27 + $0xcc8] ss:$16 sps:$4 sm:$0xff]   ;;  %v7090_v21 = vld [vmem:[%s7251_s27 + $0xcec] ss:$16 sps:$4 sm:$0xff]  }
 0x376   : > { %8826 = vst [vmem:[#allocation105_spill] sm:$0xff] %v8134_v15  ;;  %3958 = vmatmul.mubr.bf16.gmra.mrb[188].mxu1 %v7073_v0  ;;  %4887 = vmatmul.mubr.bf16.gmra.mrb[148].mxu0 %v7076_v44 }
 0x377   : > { %3965 = vmatprep.mubr.bf16.mxu1 %v7081_v54  ;;  %4894 = vmatprep.mubr.bf16.mxu0 %v7084_v24 }
 0x379   : > { %v3751_v7 = vpop.f32.mrb[192].mxu1  ;;  %v4680_v46 = vpop.f32.mrb[44].mxu0 }
 0x37a   : > { %v3753_v48 = vpop.f32.mrb[193].mxu1  ;;  %v8137_v6 = vadd.f32 %v4680_v46, %v3751_v7  ;;  %v4682_v13 = vpop.f32.mrb[45].mxu0  ;;  %v7085_v7 = vld [vmem:[%s7251_s27 + $0xce0] ss:$16 sps:$4 sm:$0xff]  }
 0x37b   : > { %v3754_v50 = vpop.f32.mrb[194].mxu1  ;;  %v4683_v37 = vpop.f32.mrb[46].mxu0 }
 0x37c   : > { %8827 = vst [vmem:[#allocation106_spill] sm:$0xff] %v8137_v6  ;;  %v3756_v58 = vpop.f32.mrb[195].mxu1  ;;  %v8142_v0 = vadd.f32 %v4683_v37, %v3754_v50  ;;  %v4685_v54 = vpop.f32.mrb[47].mxu0  ;;  %v7093_v6 = vld [vmem:[%s7251_s27 + $0xd04] ss:$16 sps:$4 sm:$0xff]  }
 0x37d   : > { %v7088_v58 = vld [vmem:[%s7251_s27 + $0xce8] ss:$16 sps:$4 sm:$0xff]   ;;  %v7096_v50 = vld [vmem:[%s7251_s27 + $0xd0c] ss:$16 sps:$4 sm:$0xff]  }
 0x37e   : > { %8828 = vst [vmem:[#allocation107_spill] sm:$0xff] %v8142_v0  ;;  %3966 = vmatmul.mubr.bf16.gmra.mrb[192].mxu1 %v7079_v34  ;;  %4895 = vmatmul.mubr.bf16.gmra.mrb[152].mxu0 %v7082_v17 }
 0x37f   : > { %3973 = vmatprep.mubr.bf16.mxu1 %v7087_v29  ;;  %4902 = vmatprep.mubr.bf16.mxu0 %v7090_v21 }
 0x381   : > { %v3759_v44 = vpop.f32.mrb[196].mxu1  ;;  %v4688_v24 = vpop.f32.mrb[48].mxu0 }
 0x382   : > { %v3761_v16 = vpop.f32.mrb[197].mxu1  ;;  %v8145_v46 = vadd.f32 %v4688_v24, %v3759_v44  ;;  %v4690_v48 = vpop.f32.mrb[49].mxu0  ;;  %v7091_v44 = vld [vmem:[%s7251_s27 + $0xd00] ss:$16 sps:$4 sm:$0xff]  }
 0x383   : > { %v3762_v13 = vpop.f32.mrb[198].mxu1  ;;  %v4691_v15 = vpop.f32.mrb[50].mxu0 }
 0x384   : > { %8829 = vst [vmem:[#allocation108_spill] sm:$0xff] %v8145_v46  ;;  %v3764_v37 = vpop.f32.mrb[199].mxu1  ;;  %v8150_v34 = vadd.f32 %v4691_v15, %v3762_v13  ;;  %v4693_v29 = vpop.f32.mrb[51].mxu0  ;;  %v7099_v46 = vld [vmem:[%s7251_s27 + $0xd24] ss:$16 sps:$4 sm:$0xff]  }
 0x385   : > { %v7094_v37 = vld [vmem:[%s7251_s27 + $0xd08] ss:$16 sps:$4 sm:$0xff]   ;;  %v7102_v13 = vld [vmem:[%s7251_s27 + $0xd2c] ss:$16 sps:$4 sm:$0xff]  }
 0x386   : > { %8830 = vst [vmem:[#allocation109_spill] sm:$0xff] %v8150_v34  ;;  %3974 = vmatmul.mubr.bf16.gmra.mrb[196].mxu1 %v7085_v7  ;;  %4903 = vmatmul.mubr.bf16.gmra.mrb[156].mxu0 %v7088_v58 }
 0x387   : > { %3981 = vmatprep.mubr.bf16.mxu1 %v7093_v6  ;;  %4910 = vmatprep.mubr.bf16.mxu0 %v7096_v50 }
 0x389   : > { %v3767_v17 = vpop.f32.mrb[200].mxu1  ;;  %v4696_v21 = vpop.f32.mrb[52].mxu0 }
 0x38a   : > { %v3769_v54 = vpop.f32.mrb[201].mxu1  ;;  %v8153_v24 = vadd.f32 %v4696_v21, %v3767_v17  ;;  %v4698_v16 = vpop.f32.mrb[53].mxu0  ;;  %v7097_v17 = vld [vmem:[%s7251_s27 + $0xd20] ss:$16 sps:$4 sm:$0xff]  }
 0x38b   : > { %v3770_v48 = vpop.f32.mrb[202].mxu1  ;;  %v4699_v0 = vpop.f32.mrb[54].mxu0 }
 0x38c   : > { %8831 = vst [vmem:[#allocation110_spill] sm:$0xff] %v8153_v24  ;;  %v3772_v15 = vpop.f32.mrb[203].mxu1  ;;  %v8158_v7 = vadd.f32 %v4699_v0, %v3770_v48  ;;  %v4701_v6 = vpop.f32.mrb[55].mxu0  ;;  %v7105_v24 = vld [vmem:[%s7251_s27 + $0xd44] ss:$16 sps:$4 sm:$0xff]  }
 0x38d   : > { %v7100_v15 = vld [vmem:[%s7251_s27 + $0xd28] ss:$16 sps:$4 sm:$0xff]   ;;  %v7108_v48 = vld [vmem:[%s7251_s27 + $0xd4c] ss:$16 sps:$4 sm:$0xff]  }
 0x38e   : > { %8832 = vst [vmem:[#allocation111_spill] sm:$0xff] %v8158_v7  ;;  %3982 = vmatmul.mubr.bf16.gmra.mrb[200].mxu1 %v7091_v44  ;;  %4911 = vmatmul.mubr.bf16.gmra.mrb[160].mxu0 %v7094_v37 }
 0x38f   : > { %3989 = vmatprep.mubr.bf16.mxu1 %v7099_v46  ;;  %4918 = vmatprep.mubr.bf16.mxu0 %v7102_v13 }
 0x391   : > { %v3775_v58 = vpop.f32.mrb[204].mxu1  ;;  %v4704_v50 = vpop.f32.mrb[56].mxu0 }
 0x392   : > { %v3777_v29 = vpop.f32.mrb[205].mxu1  ;;  %v8161_v21 = vadd.f32 %v4704_v50, %v3775_v58  ;;  %v4706_v54 = vpop.f32.mrb[57].mxu0  ;;  %v7103_v58 = vld [vmem:[%s7251_s27 + $0xd40] ss:$16 sps:$4 sm:$0xff]  }
 0x393   : > { %v3778_v16 = vpop.f32.mrb[206].mxu1  ;;  %v4707_v34 = vpop.f32.mrb[58].mxu0 }
 0x394   : > { %8833 = vst [vmem:[#allocation112_spill] sm:$0xff] %v8161_v21  ;;  %v3780_v0 = vpop.f32.mrb[207].mxu1  ;;  %v8166_v44 = vadd.f32 %v4707_v34, %v3778_v16  ;;  %v4709_v46 = vpop.f32.mrb[59].mxu0  ;;  %v7111_v21 = vld [vmem:[%s7251_s27 + $0xd64] ss:$16 sps:$4 sm:$0xff]  }
 0x395   : > { %v7106_v0 = vld [vmem:[%s7251_s27 + $0xd48] ss:$16 sps:$4 sm:$0xff]   ;;  %v7114_v16 = vld [vmem:[%s7251_s27 + $0xd6c] ss:$16 sps:$4 sm:$0xff]  }
 0x396   : > { %8834 = vst [vmem:[#allocation113_spill] sm:$0xff] %v8166_v44  ;;  %3990 = vmatmul.mubr.bf16.gmra.mrb[204].mxu1 %v7097_v17  ;;  %4919 = vmatmul.mubr.bf16.gmra.mrb[164].mxu0 %v7100_v15 }
 0x397   : > { %3997 = vmatprep.mubr.bf16.mxu1 %v7105_v24  ;;  %4926 = vmatprep.mubr.bf16.mxu0 %v7108_v48 }
 0x399   : > { %v3783_v37 = vpop.f32.mrb[208].mxu1  ;;  %v4712_v13 = vpop.f32.mrb[60].mxu0 }
 0x39a   : > { %v3785_v6 = vpop.f32.mrb[209].mxu1  ;;  %v8169_v50 = vadd.f32 %v4712_v13, %v3783_v37  ;;  %v4714_v29 = vpop.f32.mrb[61].mxu0  ;;  %v7109_v37 = vld [vmem:[%s7251_s27 + $0xd60] ss:$16 sps:$4 sm:$0xff]  }
 0x39b   : > { %v3786_v54 = vpop.f32.mrb[210].mxu1  ;;  %v4715_v7 = vpop.f32.mrb[62].mxu0 }
 0x39c   : > { %8835 = vst [vmem:[#allocation114_spill] sm:$0xff] %v8169_v50  ;;  %v3788_v34 = vpop.f32.mrb[211].mxu1  ;;  %v8174_v17 = vadd.f32 %v4715_v7, %v3786_v54  ;;  %v4717_v24 = vpop.f32.mrb[63].mxu0  ;;  %v7117_v50 = vld [vmem:[%s7251_s27 + $0xd84] ss:$16 sps:$4 sm:$0xff]  }
 0x39d   : > { %v7112_v34 = vld [vmem:[%s7251_s27 + $0xd68] ss:$16 sps:$4 sm:$0xff]   ;;  %v7120_v54 = vld [vmem:[%s7251_s27 + $0xd8c] ss:$16 sps:$4 sm:$0xff]  }
 0x39e   : > { %8836 = vst [vmem:[#allocation115_spill] sm:$0xff] %v8174_v17  ;;  %3998 = vmatmul.mubr.bf16.gmra.mrb[208].mxu1 %v7103_v58  ;;  %4927 = vmatmul.mubr.bf16.gmra.mrb[168].mxu0 %v7106_v0 }
 0x39f   : > { %4005 = vmatprep.mubr.bf16.mxu1 %v7111_v21  ;;  %4934 = vmatprep.mubr.bf16.mxu0 %v7114_v16 }
 0x3a1   : > { %v3791_v15 = vpop.f32.mrb[212].mxu1  ;;  %v4720_v48 = vpop.f32.mrb[64].mxu0 }
 0x3a2   : > { %v3793_v46 = vpop.f32.mrb[213].mxu1  ;;  %v8177_v13 = vadd.f32 %v4720_v48, %v3791_v15  ;;  %v4722_v6 = vpop.f32.mrb[65].mxu0  ;;  %v7115_v15 = vld [vmem:[%s7251_s27 + $0xd80] ss:$16 sps:$4 sm:$0xff]  }
 0x3a3   : > { %v3794_v29 = vpop.f32.mrb[214].mxu1  ;;  %v4723_v44 = vpop.f32.mrb[66].mxu0 }
 0x3a4   : > { %8837 = vst [vmem:[#allocation116_spill] sm:$0xff] %v8177_v13  ;;  %v3796_v7 = vpop.f32.mrb[215].mxu1  ;;  %v8182_v58 = vadd.f32 %v4723_v44, %v3794_v29  ;;  %v4725_v21 = vpop.f32.mrb[67].mxu0  ;;  %v7123_v13 = vld [vmem:[%s7251_s27 + $0xda4] ss:$16 sps:$4 sm:$0xff]  }
 0x3a5   : > { %v7118_v7 = vld [vmem:[%s7251_s27 + $0xd88] ss:$16 sps:$4 sm:$0xff]   ;;  %v7126_v29 = vld [vmem:[%s7251_s27 + $0xdac] ss:$16 sps:$4 sm:$0xff]  }
 0x3a6   : > { %8838 = vst [vmem:[#allocation117_spill] sm:$0xff] %v8182_v58  ;;  %4006 = vmatmul.mubr.bf16.gmra.mrb[212].mxu1 %v7109_v37  ;;  %4935 = vmatmul.mubr.bf16.gmra.mrb[172].mxu0 %v7112_v34 }
 0x3a7   : > { %4013 = vmatprep.mubr.bf16.mxu1 %v7117_v50  ;;  %4942 = vmatprep.mubr.bf16.mxu0 %v7120_v54 }
 0x3a9   : > { %v3799_v0 = vpop.f32.mrb[216].mxu1  ;;  %v4728_v16 = vpop.f32.mrb[68].mxu0 }
 0x3aa   : > { %v3801_v24 = vpop.f32.mrb[217].mxu1  ;;  %v8185_v48 = vadd.f32 %v4728_v16, %v3799_v0  ;;  %v4730_v46 = vpop.f32.mrb[69].mxu0  ;;  %v7121_v0 = vld [vmem:[%s7251_s27 + $0xda0] ss:$16 sps:$4 sm:$0xff]  }
 0x3ab   : > { %v3802_v6 = vpop.f32.mrb[218].mxu1  ;;  %v4731_v17 = vpop.f32.mrb[70].mxu0 }
 0x3ac   : > { %8839 = vst [vmem:[#allocation118_spill] sm:$0xff] %v8185_v48  ;;  %v3804_v44 = vpop.f32.mrb[219].mxu1  ;;  %v8190_v37 = vadd.f32 %v4731_v17, %v3802_v6  ;;  %v4733_v50 = vpop.f32.mrb[71].mxu0  ;;  %v7129_v48 = vld [vmem:[%s7251_s27 + $0xdc4] ss:$16 sps:$4 sm:$0xff]  }
 0x3ad   : > { %v7124_v44 = vld [vmem:[%s7251_s27 + $0xda8] ss:$16 sps:$4 sm:$0xff]   ;;  %v7132_v6 = vld [vmem:[%s7251_s27 + $0xdcc] ss:$16 sps:$4 sm:$0xff]  }
 0x3ae   : > { %8840 = vst [vmem:[#allocation119_spill] sm:$0xff] %v8190_v37  ;;  %4014 = vmatmul.mubr.bf16.gmra.mrb[216].mxu1 %v7115_v15  ;;  %4943 = vmatmul.mubr.bf16.gmra.mrb[176].mxu0 %v7118_v7 }
 0x3af   : > { %4021 = vmatprep.mubr.bf16.mxu1 %v7123_v13  ;;  %4950 = vmatprep.mubr.bf16.mxu0 %v7126_v29 }
 0x3b1   : > { %v3807_v34 = vpop.f32.mrb[220].mxu1  ;;  %v4736_v54 = vpop.f32.mrb[72].mxu0 }
 0x3b2   : > { %v3809_v21 = vpop.f32.mrb[221].mxu1  ;;  %v8193_v16 = vadd.f32 %v4736_v54, %v3807_v34  ;;  %v4738_v24 = vpop.f32.mrb[73].mxu0  ;;  %v7127_v34 = vld [vmem:[%s7251_s27 + $0xdc0] ss:$16 sps:$4 sm:$0xff]  }
 0x3b3   : > { %v3810_v46 = vpop.f32.mrb[222].mxu1  ;;  %v4739_v58 = vpop.f32.mrb[74].mxu0 }
 0x3b4   : > { %8841 = vst [vmem:[#allocation120_spill] sm:$0xff] %v8193_v16  ;;  %v3812_v17 = vpop.f32.mrb[223].mxu1  ;;  %v8198_v15 = vadd.f32 %v4739_v58, %v3810_v46  ;;  %v4741_v13 = vpop.f32.mrb[75].mxu0  ;;  %v7135_v16 = vld [vmem:[%s7251_s27 + $0xde4] ss:$16 sps:$4 sm:$0xff]  }
 0x3b5   : > { %v7130_v17 = vld [vmem:[%s7251_s27 + $0xdc8] ss:$16 sps:$4 sm:$0xff]   ;;  %v7138_v13 = vld [vmem:[%s7251_s27 + $0xdec] ss:$16 sps:$4 sm:$0xff]  }
 0x3b6   : > { %8842 = vst [vmem:[#allocation121_spill] sm:$0xff] %v8198_v15  ;;  %4022 = vmatmul.mubr.bf16.gmra.mrb[220].mxu1 %v7121_v0  ;;  %4951 = vmatmul.mubr.bf16.gmra.mrb[180].mxu0 %v7124_v44  ;;  %v7136_v15 = vld [vmem:[%s7251_s27 + $0xde8] ss:$16 sps:$4 sm:$0xff]  }
 0x3b7   : > { %4029 = vmatprep.mubr.bf16.mxu1 %v7129_v48  ;;  %4958 = vmatprep.mubr.bf16.mxu0 %v7132_v6 }
 0x3b9   : > { %v3815_v7 = vpop.f32.mrb[224].mxu1  ;;  %v4744_v29 = vpop.f32.mrb[76].mxu0 }
 0x3ba   : > { %v3817_v50 = vpop.f32.mrb[225].mxu1  ;;  %v8201_v54 = vadd.f32 %v4744_v29, %v3815_v7  ;;  %v4746_v21 = vpop.f32.mrb[77].mxu0  ;;  %v7133_v29 = vld [vmem:[%s7251_s27 + $0xde0] ss:$16 sps:$4 sm:$0xff]   ;;  %s5605_s27 = sshll.u32 %s9024_s7, 2 }
 0x3bb   : > { %v3818_v24 = vpop.f32.mrb[226].mxu1  ;;  %v4747_v58 = vpop.f32.mrb[78].mxu0  ;;  %s8229_s11 = scalar_lea.vmem %s8624_s3, %s5605_s27 }
 0x3bc   : > { %8843 = vst [vmem:[#allocation122_spill] sm:$0xff] %v8201_v54  ;;  %v3820_v46 = vpop.f32.mrb[227].mxu1  ;;  %v8206_v0 = vadd.f32 %v4747_v58, %v3818_v24  ;;  %v4749_v48 = vpop.f32.mrb[79].mxu0 }
 0x3be   : > { %8844 = vst [vmem:[#allocation123_spill] sm:$0xff] %v8206_v0  ;;  %4030 = vmatmul.mubr.bf16.gmra.mrb[224].mxu1 %v7127_v34  ;;  %4959 = vmatmul.mubr.bf16.gmra.mrb[184].mxu0 %v7130_v17  ;;  %v8845_v34 = vld [vmem:[#allocation35_spill] sm:$0xff] }
 0x3bf   : > { %4037 = vmatprep.mubr.bf16.mxu1 %v7135_v16  ;;  %4966 = vmatprep.mubr.bf16.mxu0 %v7138_v13  ;;  %v8215_v16 = vld [vmem:[%s8623_s2] ss:$0 sm:$0xff]  ;;  %v8846_v17 = vmax.f32 %v7425_v19, %v8845_v34 }
 0x3c1   : > { %v3823_v44 = vpop.f32.mrb[228].mxu1  ;;  %v4752_v6 = vpop.f32.mrb[80].mxu0 }
 0x3c2   : > { %v3825_v7 = vpop.f32.mrb[229].mxu1  ;;  %v4753_v50 = vadd.f32 %v4752_v6, %v3823_v44  ;;  %v4754_v21 = vpop.f32.mrb[81].mxu0 }
 0x3c3   : > { %v3826_v54 = vpop.f32.mrb[230].mxu1  ;;  %v4755_v46 = vpop.f32.mrb[82].mxu0 }
 0x3c4   : > { %v3828_v37 = vpop.f32.mrb[231].mxu1  ;;  %v5031_v24 = vmax.f32 %v7985_v31, %v4753_v50  ;;  %v4756_v58 = vadd.f32 %v4755_v46, %v3826_v54  ;;  %v4757_v48 = vpop.f32.mrb[83].mxu0  ;;  %v8847_v31 = vld [vmem:[#allocation36_spill] sm:$0xff] }
 0x3c5   : > { %v8848_v54 = vmax.f32 %v7430_v27, %v8847_v31 }
 0x3c6   : > { %4038 = vmatmul.mubr.bf16.gmra.mrb[228].mxu1 %v7133_v29  ;;  %v5087_v13 = vmax.f32 %v8846_v17, %v5031_v24  ;;  %v5032_v44 = vmax.f32 %v7990_v25, %v4756_v58  ;;  %4967 = vmatmul.mubr.bf16.gmra.mrb[188].mxu0 %v7136_v15 }
 0x3c8   : > { %v5150_v37 = vadd.f32 %v8215_v16, %v5087_v13  ;;  %v5088_v6 = vmax.f32 %v8848_v54, %v5032_v44  ;;  %v8849_v13 = vld [vmem:[#allocation37_spill] sm:$0xff] }
 0x3c9   : > { %v3831_v7 = vpop.f32.mrb[232].mxu1  ;;  %v4760_v50 = vpop.f32.mrb[84].mxu0  ;;  %v8850_v44 = vmax.f32 %v7433_v33, %v8849_v13 }
 0x3ca   : > { %v3833_v21 = vpop.f32.mrb[233].mxu1  ;;  %v5206_v46 = vmax.f32 %v5150_v37, 0.0  ;;  %v5151_v29 = vadd.f32 %v8215_v16, %v5088_v6  ;;  %v4761_v48 = vadd.f32 %v4760_v50, %v3831_v7  ;;  %v4762_v0 = vpop.f32.mrb[85].mxu0  ;;  %v8851_v6 = vld [vmem:[#allocation38_spill] sm:$0xff] }
 0x3cb   : > { %v3834_v19 = vpop.f32.mrb[234].mxu1  ;;  %v4763_v25 = vpop.f32.mrb[86].mxu0  ;;  %v8852_v7 = vmax.f32 %v7438_v41, %v8851_v6 }
 0x3cc   : > { %v3836_v27 = vpop.f32.mrb[235].mxu1  ;;  %v6145_v15 = vpack.c.bf16 %v5206_v46, %v5206_v46  ;;  %v5207_v24 = vmax.f32 %v5151_v29, 0.0  ;;  %v5033_v58 = vmax.f32 %v7993_v9, %v4761_v48  ;;  %v4764_v34 = vadd.f32 %v4763_v25, %v3834_v19  ;;  %v4765_v17 = vpop.f32.mrb[87].mxu0 }
 0x3ce   : > { %5487 = vst.msk [vmem:[%s8229_s11] sm:$0xf] %vm5486_vm0, %v6145_v15  ;;  %v6146_v0 = vpack.c.bf16 %v5207_v24, %v5207_v24  ;;  %v5089_v37 = vmax.f32 %v8850_v44, %v5033_v58  ;;  %v5034_v31 = vmax.f32 %v7998_v18, %v4764_v34 }
 0x3d0   : > { %5488 = vst.msk [vmem:[%s8229_s11 + $0x4] sm:$0xf] %vm5486_vm0, %v6146_v0  ;;  %v5152_v54 = vadd.f32 %v8215_v16, %v5089_v37  ;;  %v5090_v50 = vmax.f32 %v8852_v7, %v5034_v31  ;;  %v8853_v0 = vld [vmem:[#allocation39_spill] sm:$0xff] }
 0x3d1   : > { %v3839_v9 = vpop.f32.mrb[236].mxu1  ;;  %v4768_v21 = vpop.f32.mrb[88].mxu0  ;;  %v8854_v13 = vmax.f32 %v7441_v47, %v8853_v0  ;;  %v8859_v0 = vld [vmem:[#allocation42_spill] sm:$0xff] }
 0x3d2   : > { %v3841_v46 = vpop.f32.mrb[237].mxu1  ;;  %v5208_v29 = vmax.f32 %v5152_v54, 0.0  ;;  %v5153_v48 = vadd.f32 %v8215_v16, %v5090_v50  ;;  %v4769_v33 = vadd.f32 %v4768_v21, %v3839_v9  ;;  %v4770_v19 = vpop.f32.mrb[89].mxu0  ;;  %v8855_v54 = vld [vmem:[#allocation40_spill] sm:$0xff] }
 0x3d3   : > { %v3842_v25 = vpop.f32.mrb[238].mxu1  ;;  %v4771_v18 = vpop.f32.mrb[90].mxu0  ;;  %v8856_v6 = vmax.f32 %v7446_v55, %v8855_v54 }
 0x3d4   : > { %v3844_v27 = vpop.f32.mrb[239].mxu1  ;;  %v6147_v15 = vpack.c.bf16 %v5208_v29, %v5208_v29  ;;  %v5209_v24 = vmax.f32 %v5153_v48, 0.0  ;;  %v5035_v58 = vmax.f32 %v8001_v57, %v4769_v33  ;;  %v4772_v34 = vadd.f32 %v4771_v18, %v3842_v25  ;;  %v4773_v41 = vpop.f32.mrb[91].mxu0 }
 0x3d6   : > { %5489 = vst.msk [vmem:[%s8229_s11 + $0x8] sm:$0xf] %vm5486_vm0, %v6147_v15  ;;  %v6148_v17 = vpack.c.bf16 %v5209_v24, %v5209_v24  ;;  %v5091_v44 = vmax.f32 %v8854_v13, %v5035_v58  ;;  %v5036_v37 = vmax.f32 %v8006_v28, %v4772_v34  ;;  %v8857_v24 = vld [vmem:[#allocation41_spill] sm:$0xff]  ;;  %v8860_v13 = vmax.f32 %v7454_v5, %v8859_v0 }
 0x3d7   : > { %v8858_v58 = vmax.f32 %v7449_v61, %v8857_v24 }
 0x3d8   : > { %5490 = vst.msk [vmem:[%s8229_s11 + $0xc] sm:$0xf] %vm5486_vm0, %v6148_v17  ;;  %v5154_v31 = vadd.f32 %v8215_v16, %v5091_v44  ;;  %v5092_v7 = vmax.f32 %v8856_v6, %v5036_v37 }
 0x3d9   : > { %v3847_v57 = vpop.f32.mrb[240].mxu1  ;;  %v4776_v50 = vpop.f32.mrb[92].mxu0 }
 0x3da   : > { %v3849_v9 = vpop.f32.mrb[241].mxu1  ;;  %v5210_v21 = vmax.f32 %v5154_v31, 0.0  ;;  %v5155_v46 = vadd.f32 %v8215_v16, %v5092_v7  ;;  %v4777_v47 = vadd.f32 %v4776_v50, %v3847_v57  ;;  %v4778_v29 = vpop.f32.mrb[93].mxu0 }
 0x3db   : > { %v3850_v48 = vpop.f32.mrb[242].mxu1  ;;  %v4779_v28 = vpop.f32.mrb[94].mxu0 }
 0x3dc   : > { %v3852_v33 = vpop.f32.mrb[243].mxu1  ;;  %v6149_v19 = vpack.c.bf16 %v5210_v21, %v5210_v21  ;;  %v5211_v25 = vmax.f32 %v5155_v46, 0.0  ;;  %v5037_v18 = vmax.f32 %v8009_v53, %v4777_v47  ;;  %v4780_v27 = vadd.f32 %v4779_v28, %v3850_v48  ;;  %v4781_v55 = vpop.f32.mrb[95].mxu0  ;;  %v8861_v48 = vld [vmem:[#allocation43_spill] sm:$0xff] }
 0x3dd   : > { %v8862_v28 = vmax.f32 %v7457_v11, %v8861_v48 }
 0x3de   : > { %5491 = vst.msk [vmem:[%s8229_s11 + $0x10] sm:$0xf] %vm5486_vm0, %v6149_v19  ;;  %v6150_v15 = vpack.c.bf16 %v5211_v25, %v5211_v25  ;;  %v5093_v34 = vmax.f32 %v8858_v58, %v5037_v18  ;;  %v5038_v41 = vmax.f32 %v8014_v38, %v4780_v27  ;;  %v8863_v18 = vld [vmem:[#allocation44_spill] sm:$0xff] }
 0x3df   : > { %v8864_v27 = vmax.f32 %v7462_v20, %v8863_v18 }
 0x3e0   : > { %5492 = vst.msk [vmem:[%s8229_s11 + $0x14] sm:$0xf] %vm5486_vm0, %v6150_v15  ;;  %v5156_v17 = vadd.f32 %v8215_v16, %v5093_v34  ;;  %v5094_v44 = vmax.f32 %v8860_v13, %v5038_v41 }
 0x3e1   : > { %v3855_v53 = vpop.f32.mrb[244].mxu1  ;;  %v4784_v37 = vpop.f32.mrb[96].mxu0 }
 0x3e2   : > { %v3857_v31 = vpop.f32.mrb[245].mxu1  ;;  %v5212_v54 = vmax.f32 %v5156_v17, 0.0  ;;  %v5157_v6 = vadd.f32 %v8215_v16, %v5094_v44  ;;  %v4785_v61 = vadd.f32 %v4784_v37, %v3855_v53  ;;  %v4786_v7 = vpop.f32.mrb[97].mxu0 }
 0x3e3   : > { %v3858_v57 = vpop.f32.mrb[246].mxu1  ;;  %v4787_v38 = vpop.f32.mrb[98].mxu0 }
 0x3e4   : > { %v3860_v50 = vpop.f32.mrb[247].mxu1  ;;  %v6151_v9 = vpack.c.bf16 %v5212_v54, %v5212_v54  ;;  %v5213_v21 = vmax.f32 %v5157_v6, 0.0  ;;  %v5039_v46 = vmax.f32 %v8017_v8, %v4785_v61  ;;  %v4788_v47 = vadd.f32 %v4787_v38, %v3858_v57  ;;  %v4789_v5 = vpop.f32.mrb[99].mxu0  ;;  %v8865_v54 = vld [vmem:[#allocation45_spill] sm:$0xff]  ;;  %v8867_v38 = vld [vmem:[#allocation46_spill] sm:$0xff] }
 0x3e5   : > { %v8866_v6 = vmax.f32 %v7465_v26, %v8865_v54  ;;  %v8868_v50 = vmax.f32 %v7470_v36, %v8867_v38 }
 0x3e6   : > { %5493 = vst.msk [vmem:[%s8229_s11 + $0x18] sm:$0xf] %vm5486_vm0, %v6151_v9  ;;  %v6152_v29 = vpack.c.bf16 %v5213_v21, %v5213_v21  ;;  %v5095_v33 = vmax.f32 %v8862_v28, %v5039_v46  ;;  %v5040_v19 = vmax.f32 %v8022_v23, %v4788_v47 }
 0x3e8   : > { %5494 = vst.msk [vmem:[%s8229_s11 + $0x1c] sm:$0xf] %vm5486_vm0, %v6152_v29  ;;  %v5158_v25 = vadd.f32 %v8215_v16, %v5095_v33  ;;  %v5096_v55 = vmax.f32 %v8864_v27, %v5040_v19 }
 0x3e9   : > { %v3863_v8 = vpop.f32.mrb[248].mxu1  ;;  %v4792_v15 = vpop.f32.mrb[100].mxu0 }
 0x3ea   : > { %v3865_v24 = vpop.f32.mrb[249].mxu1  ;;  %v5214_v58 = vmax.f32 %v5158_v25, 0.0  ;;  %v5159_v34 = vadd.f32 %v8215_v16, %v5096_v55  ;;  %v4793_v11 = vadd.f32 %v4792_v15, %v3863_v8  ;;  %v4794_v41 = vpop.f32.mrb[101].mxu0  ;;  %v8869_v55 = vld [vmem:[#allocation47_spill] sm:$0xff] }
 0x3eb   : > { %v3866_v17 = vpop.f32.mrb[250].mxu1  ;;  %v4795_v23 = vpop.f32.mrb[102].mxu0  ;;  %v8870_v8 = vmax.f32 %v7473_v43, %v8869_v55 }
 0x3ec   : > { %v3868_v0 = vpop.f32.mrb[251].mxu1  ;;  %v6153_v13 = vpack.c.bf16 %v5214_v58, %v5214_v58  ;;  %v5215_v44 = vmax.f32 %v5159_v34, 0.0  ;;  %v5041_v53 = vmax.f32 %v8025_v10, %v4793_v11  ;;  %v4796_v37 = vadd.f32 %v4795_v23, %v3866_v17  ;;  %v4797_v20 = vpop.f32.mrb[103].mxu0  ;;  %v8871_v34 = vld [vmem:[#allocation48_spill] sm:$0xff] }
 0x3ed   : > { %v8872_v11 = vmax.f32 %v7478_v52, %v8871_v34 }
 0x3ee   : > { %5495 = vst.msk [vmem:[%s8229_s11 + $0x20] sm:$0xf] %vm5486_vm0, %v6153_v13  ;;  %v6154_v31 = vpack.c.bf16 %v5215_v44, %v5215_v44  ;;  %v5097_v61 = vmax.f32 %v8866_v6, %v5041_v53  ;;  %v5042_v7 = vmax.f32 %v8030_v39, %v4796_v37 }
 0x3f0   : > { %5496 = vst.msk [vmem:[%s8229_s11 + $0x24] sm:$0xf] %vm5486_vm0, %v6154_v31  ;;  %v5160_v57 = vadd.f32 %v8215_v16, %v5097_v61  ;;  %v5098_v9 = vmax.f32 %v8868_v50, %v5042_v7  ;;  %v8873_v7 = vld [vmem:[#allocation49_spill] sm:$0xff] }
 0x3f1   : > { %v3871_v10 = vpop.f32.mrb[252].mxu1  ;;  %v4800_v21 = vpop.f32.mrb[104].mxu0 }
 0x3f2   : > { %v3873_v46 = vpop.f32.mrb[253].mxu1  ;;  %v5216_v47 = vmax.f32 %v5160_v57, 0.0  ;;  %v5161_v5 = vadd.f32 %v8215_v16, %v5098_v9  ;;  %v4801_v26 = vadd.f32 %v4800_v21, %v3871_v10  ;;  %v4802_v29 = vpop.f32.mrb[105].mxu0  ;;  %v8874_v57 = vmax.f32 %v7481_v59, %v8873_v7  ;;  %v8875_v10 = vld [vmem:[#allocation50_spill] sm:$0xff] }
 0x3f3   : > { %v3874_v48 = vpop.f32.mrb[254].mxu1  ;;  %v4803_v39 = vpop.f32.mrb[106].mxu0  ;;  %v8876_v21 = vmax.f32 %v7486_v4, %v8875_v10  ;;  %v8883_v7 = vld [vmem:[#allocation54_spill] sm:$0xff] }
 0x3f4   : > { %v3876_v28 = vpop.f32.mrb[255].mxu1  ;;  %v6155_v33 = vpack.c.bf16 %v5216_v47, %v5216_v47  ;;  %v5217_v19 = vmax.f32 %v5161_v5, 0.0  ;;  %v5043_v25 = vmax.f32 %v8033_v1, %v4801_v26  ;;  %v4804_v18 = vadd.f32 %v4803_v39, %v3874_v48  ;;  %v4805_v36 = vpop.f32.mrb[107].mxu0 }
 0x3f6   : > { %5497 = vst.msk [vmem:[%s8229_s11 + $0x28] sm:$0xf] %vm5486_vm0, %v6155_v33  ;;  %v6156_v27 = vpack.c.bf16 %v5217_v19, %v5217_v19  ;;  %v5099_v15 = vmax.f32 %v8870_v8, %v5043_v25  ;;  %v5044_v24 = vmax.f32 %v8038_v35, %v4804_v18 }
 0x3f8   : > { %5498 = vst.msk [vmem:[%s8229_s11 + $0x2c] sm:$0xf] %vm5486_vm0, %v6156_v27  ;;  %v5162_v58 = vadd.f32 %v8215_v16, %v5099_v15  ;;  %v5100_v41 = vmax.f32 %v8872_v11, %v5044_v24  ;;  %v8877_v27 = vld [vmem:[#allocation51_spill] sm:$0xff] }
 0x3f9   : > { %v3879_v1 = vpop.f32.mrb[148].mxu1  ;;  %v4808_v17 = vpop.f32.mrb[108].mxu0  ;;  %v8878_v55 = vmax.f32 %v7489_v12, %v8877_v27 }
 0x3fa   : > { %v3881_v23 = vpop.f32.mrb[149].mxu1  ;;  %v5218_v0 = vmax.f32 %v5162_v58, 0.0  ;;  %v5163_v13 = vadd.f32 %v8215_v16, %v5100_v41  ;;  %v4809_v43 = vadd.f32 %v4808_v17, %v3879_v1  ;;  %v4810_v44 = vpop.f32.mrb[109].mxu0  ;;  %v8879_v58 = vld [vmem:[#allocation52_spill] sm:$0xff] }
 0x3fb   : > { %v3882_v53 = vpop.f32.mrb[150].mxu1  ;;  %v4811_v35 = vpop.f32.mrb[110].mxu0  ;;  %v8880_v34 = vmax.f32 %v7494_v22, %v8879_v58 }
 0x3fc   : > { %v3884_v37 = vpop.f32.mrb[151].mxu1  ;;  %v6157_v20 = vpack.c.bf16 %v5218_v0, %v5218_v0  ;;  %v5219_v31 = vmax.f32 %v5163_v13, 0.0  ;;  %v5045_v54 = vmax.f32 %v8041_v14, %v4809_v43  ;;  %v4812_v6 = vadd.f32 %v4811_v35, %v3882_v53  ;;  %v4813_v52 = vpop.f32.mrb[111].mxu0 }
 0x3fe   : > { %5499 = vst.msk [vmem:[%s8229_s11 + $0x30] sm:$0xf] %vm5486_vm0, %v6157_v20  ;;  %v6158_v61 = vpack.c.bf16 %v5219_v31, %v5219_v31  ;;  %v5101_v38 = vmax.f32 %v8874_v57, %v5045_v54  ;;  %v5046_v50 = vmax.f32 %v8046_v62, %v4812_v6  ;;  %v8881_v31 = vld [vmem:[#allocation53_spill] sm:$0xff]  ;;  %v8884_v57 = vmax.f32 %v7502_v40, %v8883_v7 }
 0x3ff   : > { %v8882_v54 = vmax.f32 %v7497_v30, %v8881_v31 }
 0x400   : > { %5500 = vst.msk [vmem:[%s8229_s11 + $0x34] sm:$0xf] %vm5486_vm0, %v6158_v61  ;;  %v5164_v9 = vadd.f32 %v8215_v16, %v5101_v38  ;;  %v5102_v46 = vmax.f32 %v8876_v21, %v5046_v50 }
 0x401   : > { %v3887_v14 = vpop.f32.mrb[152].mxu1  ;;  %v4816_v47 = vpop.f32.mrb[112].mxu0 }
 0x402   : > { %v3889_v5 = vpop.f32.mrb[153].mxu1  ;;  %v5220_v26 = vmax.f32 %v5164_v9, 0.0  ;;  %v5165_v29 = vadd.f32 %v8215_v16, %v5102_v46  ;;  %v4817_v59 = vadd.f32 %v4816_v47, %v3887_v14  ;;  %v4818_v48 = vpop.f32.mrb[113].mxu0 }
 0x403   : > { %v3890_v39 = vpop.f32.mrb[154].mxu1  ;;  %v4819_v62 = vpop.f32.mrb[114].mxu0 }
 0x404   : > { %v3892_v28 = vpop.f32.mrb[155].mxu1  ;;  %v6159_v33 = vpack.c.bf16 %v5220_v26, %v5220_v26  ;;  %v5221_v19 = vmax.f32 %v5165_v29, 0.0  ;;  %v5047_v25 = vmax.f32 %v8049_v45, %v4817_v59  ;;  %v4820_v18 = vadd.f32 %v4819_v62, %v3890_v39  ;;  %v4821_v4 = vpop.f32.mrb[115].mxu0  ;;  %v8885_v39 = vld [vmem:[#allocation55_spill] sm:$0xff] }
 0x405   : > { %v8886_v62 = vmax.f32 %v7505_v49, %v8885_v39 }
 0x406   : > { %5501 = vst.msk [vmem:[%s8229_s11 + $0x38] sm:$0xf] %vm5486_vm0, %v6159_v33  ;;  %v6160_v36 = vpack.c.bf16 %v5221_v19, %v5221_v19  ;;  %v5103_v8 = vmax.f32 %v8878_v55, %v5047_v25  ;;  %v5048_v15 = vmax.f32 %v8054_v42, %v4820_v18  ;;  %v8887_v25 = vld [vmem:[#allocation56_spill] sm:$0xff] }
 0x407   : > { %v8888_v18 = vmax.f32 %v7510_v60, %v8887_v25 }
 0x408   : > { %5502 = vst.msk [vmem:[%s8229_s11 + $0x3c] sm:$0xf] %vm5486_vm0, %v6160_v36  ;;  %v5166_v24 = vadd.f32 %v8215_v16, %v5103_v8  ;;  %v5104_v11 = vmax.f32 %v8880_v34, %v5048_v15 }
 0x409   : > { %v3895_v45 = vpop.f32.mrb[156].mxu1  ;;  %v4824_v41 = vpop.f32.mrb[116].mxu0 }
 0x40a   : > { %v3897_v1 = vpop.f32.mrb[157].mxu1  ;;  %v5222_v17 = vmax.f32 %v5166_v24, 0.0  ;;  %v5167_v23 = vadd.f32 %v8215_v16, %v5104_v11  ;;  %v4825_v12 = vadd.f32 %v4824_v41, %v3895_v45  ;;  %v4826_v0 = vpop.f32.mrb[117].mxu0 }
 0x40b   : > { %v3898_v13 = vpop.f32.mrb[158].mxu1  ;;  %v4827_v42 = vpop.f32.mrb[118].mxu0  ;;  %v8891_v0 = vld [vmem:[#allocation91_spill] sm:$0xff] }
 0x40c   : > { %v3900_v43 = vpop.f32.mrb[159].mxu1  ;;  %v6161_v44 = vpack.c.bf16 %v5222_v17, %v5222_v17  ;;  %v5223_v53 = vmax.f32 %v5167_v23, 0.0  ;;  %v5049_v35 = vmax.f32 %v8057_v63, %v4825_v12  ;;  %v4828_v37 = vadd.f32 %v4827_v42, %v3898_v13  ;;  %v4829_v22 = vpop.f32.mrb[119].mxu0  ;;  %v8889_v17 = vld [vmem:[#allocation57_spill] sm:$0xff] }
 0x40d   : > { %v8890_v23 = vmax.f32 %v7513_v3, %v8889_v17  ;;  %v8892_v43 = vld [vmem:[#allocation2_spill] sm:$0xff] }
 0x40e   : > { %5503 = vst.msk [vmem:[%s8229_s11 + $0x40] sm:$0xf] %vm5486_vm0, %v6161_v44  ;;  %v6162_v20 = vpack.c.bf16 %v5223_v53, %v5223_v53  ;;  %v5105_v6 = vmax.f32 %v8882_v54, %v5049_v35  ;;  %v5050_v52 = vmax.f32 %v8062_v2, %v4828_v37  ;;  %v8893_v44 = vld [vmem:[#allocation58_spill] sm:$0xff] }
 0x40f   : > { %v8894_v53 = vmax.f32 %v8892_v43, %v8893_v44  ;;  %v8909_v17 = vld [vmem:[#allocation62_spill] sm:$0xff] }
 0x410   : > { %5504 = vst.msk [vmem:[%s8229_s11 + $0x44] sm:$0xf] %vm5486_vm0, %v6162_v20  ;;  %v5168_v61 = vadd.f32 %v8215_v16, %v5105_v6  ;;  %v5106_v38 = vmax.f32 %v8884_v57, %v5050_v52 }
 0x411   : > { %v3903_v63 = vpop.f32.mrb[160].mxu1  ;;  %v4832_v50 = vpop.f32.mrb[120].mxu0 }
 0x412   : > { %v3905_v9 = vpop.f32.mrb[161].mxu1  ;;  %v5224_v10 = vmax.f32 %v5168_v61, 0.0  ;;  %v5169_v21 = vadd.f32 %v8215_v16, %v5106_v38  ;;  %v4833_v30 = vadd.f32 %v4832_v50, %v3903_v63  ;;  %v4834_v46 = vpop.f32.mrb[121].mxu0  ;;  %v8895_v38 = vld [vmem:[#allocation92_spill] sm:$0xff] }
 0x413   : > { %v3906_v14 = vpop.f32.mrb[162].mxu1  ;;  %v4835_v2 = vpop.f32.mrb[122].mxu0 }
 0x414   : > { %v3908_v47 = vpop.f32.mrb[163].mxu1  ;;  %v6163_v5 = vpack.c.bf16 %v5224_v10, %v5224_v10  ;;  %v5225_v26 = vmax.f32 %v5169_v21, 0.0  ;;  %v5051_v29 = vmax.f32 %v8065_v56, %v4833_v30  ;;  %v4836_v59 = vadd.f32 %v4835_v2, %v3906_v14  ;;  %v4837_v40 = vpop.f32.mrb[123].mxu0  ;;  %v8896_v21 = vld [vmem:[#allocation3_spill] sm:$0xff]  ;;  %v8899_v2 = vld [vmem:[#allocation93_spill] sm:$0xff] }
 0x415   : > { %v8897_v30 = vld [vmem:[#allocation59_spill] sm:$0xff] }
 0x416   : > { %5505 = vst.msk [vmem:[%s8229_s11 + $0x48] sm:$0xf] %vm5486_vm0, %v6163_v5  ;;  %v6164_v48 = vpack.c.bf16 %v5225_v26, %v5225_v26  ;;  %v5107_v28 = vmax.f32 %v8886_v62, %v5051_v29  ;;  %v5052_v33 = vmax.f32 %v8070_v32, %v4836_v59  ;;  %v8898_v46 = vmax.f32 %v8896_v21, %v8897_v30  ;;  %v8900_v26 = vld [vmem:[#allocation4_spill] sm:$0xff] }
 0x417   : > { %v8901_v29 = vld [vmem:[#allocation60_spill] sm:$0xff] }
 0x418   : > { %5506 = vst.msk [vmem:[%s8229_s11 + $0x4c] sm:$0xf] %vm5486_vm0, %v6164_v48  ;;  %v5170_v19 = vadd.f32 %v8215_v16, %v5107_v28  ;;  %v5108_v4 = vmax.f32 %v8888_v18, %v5052_v33  ;;  %v8902_v59 = vmax.f32 %v8900_v26, %v8901_v29  ;;  %v8916_v21 = vld [vmem:[#allocation8_spill] sm:$0xff] }
 0x419   : > { %v3911_v56 = vpop.f32.mrb[164].mxu1  ;;  %v4840_v36 = vpop.f32.mrb[124].mxu0  ;;  %v8917_v30 = vld [vmem:[#allocation64_spill] sm:$0xff] }
 0x41a   : > { %v3913_v27 = vpop.f32.mrb[165].mxu1  ;;  %v5226_v55 = vmax.f32 %v5170_v19, 0.0  ;;  %v5171_v8 = vadd.f32 %v8215_v16, %v5108_v4  ;;  %v4841_v49 = vadd.f32 %v4840_v36, %v3911_v56  ;;  %v4842_v15 = vpop.f32.mrb[125].mxu0 }
 0x41b   : > { %v3914_v24 = vpop.f32.mrb[166].mxu1  ;;  %v4843_v32 = vpop.f32.mrb[126].mxu0 }
 0x41c   : > { %v3916_v58 = vpop.f32.mrb[167].mxu1  ;;  %v6165_v34 = vpack.c.bf16 %v5226_v55, %v5226_v55  ;;  %v5227_v11 = vmax.f32 %v5171_v8, 0.0  ;;  %v5053_v45 = vmax.f32 %v8073_v51, %v4841_v49  ;;  %v4844_v41 = vadd.f32 %v4843_v32, %v3914_v24  ;;  %v4845_v60 = vpop.f32.mrb[127].mxu0  ;;  %v8903_v55 = vld [vmem:[#allocation94_spill] sm:$0xff]  ;;  %v8904_v32 = vld [vmem:[#allocation5_spill] sm:$0xff] }
 0x41d   : > { %v8905_v58 = vld [vmem:[#allocation61_spill] sm:$0xff] }
 0x41e   : > { %5507 = vst.msk [vmem:[%s8229_s11 + $0x50] sm:$0xf] %vm5486_vm0, %v6165_v34  ;;  %v6166_v1 = vpack.c.bf16 %v5227_v11, %v5227_v11  ;;  %v5109_v12 = vmax.f32 %v8890_v23, %v5053_v45  ;;  %v5054_v13 = vmax.f32 %v8891_v0, %v4844_v41  ;;  %v8906_v34 = vmax.f32 %v8904_v32, %v8905_v58  ;;  %v8907_v45 = vld [vmem:[#allocation95_spill] sm:$0xff]  ;;  %v8924_v32 = vld [vmem:[#allocation10_spill] sm:$0xff] }
 0x41f   : > { %v8925_v58 = vld [vmem:[#allocation66_spill] sm:$0xff] }
 0x420   : > { %5508 = vst.msk [vmem:[%s8229_s11 + $0x54] sm:$0xf] %vm5486_vm0, %v6166_v1  ;;  %v5172_v42 = vadd.f32 %v8215_v16, %v5109_v12  ;;  %v5110_v35 = vmax.f32 %v8894_v53, %v5054_v13  ;;  %v8908_v1 = vld [vmem:[#allocation6_spill] sm:$0xff] }
 0x421   : > { %v3919_v51 = vpop.f32.mrb[168].mxu1  ;;  %v4848_v37 = vpop.f32.mrb[128].mxu0  ;;  %v8910_v23 = vmax.f32 %v8908_v1, %v8909_v17 }
 0x422   : > { %v3921_v22 = vpop.f32.mrb[169].mxu1  ;;  %v5228_v20 = vmax.f32 %v5172_v42, 0.0  ;;  %v5173_v31 = vadd.f32 %v8215_v16, %v5110_v35  ;;  %v4849_v3 = vadd.f32 %v4848_v37, %v3919_v51  ;;  %v4850_v54 = vpop.f32.mrb[129].mxu0 }
 0x423   : > { %v3922_v6 = vpop.f32.mrb[170].mxu1  ;;  %v4851_v52 = vpop.f32.mrb[130].mxu0 }
 0x424   : > { %v3924_v61 = vpop.f32.mrb[171].mxu1  ;;  %v6167_v7 = vpack.c.bf16 %v5228_v20, %v5228_v20  ;;  %v5229_v57 = vmax.f32 %v5173_v31, 0.0  ;;  %v5055_v63 = vmax.f32 %v8895_v38, %v4849_v3  ;;  %v4852_v50 = vadd.f32 %v4851_v52, %v3922_v6  ;;  %v4853_v9 = vpop.f32.mrb[131].mxu0  ;;  %v8911_v3 = vld [vmem:[#allocation96_spill] sm:$0xff] }
 0x426   : > { %5509 = vst.msk [vmem:[%s8229_s11 + $0x58] sm:$0xf] %vm5486_vm0, %v6167_v7  ;;  %v6168_v10 = vpack.c.bf16 %v5229_v57, %v5229_v57  ;;  %v5111_v14 = vmax.f32 %v8898_v46, %v5055_v63  ;;  %v5056_v47 = vmax.f32 %v8899_v2, %v4852_v50  ;;  %v8912_v7 = vld [vmem:[#allocation7_spill] sm:$0xff]  ;;  %v8915_v50 = vld [vmem:[#allocation97_spill] sm:$0xff]  ;;  %v8918_v46 = vmax.f32 %v8916_v21, %v8917_v30 }
 0x427   : > { %v8913_v57 = vld [vmem:[#allocation63_spill] sm:$0xff] }
 0x428   : > { %5510 = vst.msk [vmem:[%s8229_s11 + $0x5c] sm:$0xf] %vm5486_vm0, %v6168_v10  ;;  %v5174_v5 = vadd.f32 %v8215_v16, %v5111_v14  ;;  %v5112_v40 = vmax.f32 %v8902_v59, %v5056_v47  ;;  %v8914_v38 = vmax.f32 %v8912_v7, %v8913_v57  ;;  %v8932_v7 = vld [vmem:[#allocation12_spill] sm:$0xff] }
 0x429   : > { %v3927_v48 = vpop.f32.mrb[172].mxu1  ;;  %v4856_v39 = vpop.f32.mrb[132].mxu0  ;;  %v8933_v57 = vld [vmem:[#allocation68_spill] sm:$0xff] }
 0x42a   : > { %v3929_v62 = vpop.f32.mrb[173].mxu1  ;;  %v5230_v28 = vmax.f32 %v5174_v5, 0.0  ;;  %v5175_v33 = vadd.f32 %v8215_v16, %v5112_v40  ;;  %v4857_v19 = vadd.f32 %v4856_v39, %v3927_v48  ;;  %v4858_v25 = vpop.f32.mrb[133].mxu0 }
 0x42b   : > { %v3930_v18 = vpop.f32.mrb[174].mxu1  ;;  %v4859_v4 = vpop.f32.mrb[134].mxu0 }
 0x42c   : > { %v3932_v56 = vpop.f32.mrb[175].mxu1  ;;  %v6169_v36 = vpack.c.bf16 %v5230_v28, %v5230_v28  ;;  %v5231_v27 = vmax.f32 %v5175_v33, 0.0  ;;  %v5057_v8 = vmax.f32 %v8903_v55, %v4857_v19  ;;  %v4860_v49 = vadd.f32 %v4859_v4, %v3930_v18  ;;  %v4861_v15 = vpop.f32.mrb[135].mxu0  ;;  %v8919_v19 = vld [vmem:[#allocation98_spill] sm:$0xff] }
 0x42e   : > { %5511 = vst.msk [vmem:[%s8229_s11 + $0x60] sm:$0xf] %vm5486_vm0, %v6169_v36  ;;  %v6170_v24 = vpack.c.bf16 %v5231_v27, %v5231_v27  ;;  %v5113_v11 = vmax.f32 %v8906_v34, %v5057_v8  ;;  %v5058_v41 = vmax.f32 %v8907_v45, %v4860_v49  ;;  %v8920_v36 = vld [vmem:[#allocation9_spill] sm:$0xff]  ;;  %v8923_v49 = vld [vmem:[#allocation99_spill] sm:$0xff]  ;;  %v8926_v34 = vmax.f32 %v8924_v32, %v8925_v58 }
 0x42f   : > { %v8921_v27 = vld [vmem:[#allocation65_spill] sm:$0xff] }
 0x430   : > { %5512 = vst.msk [vmem:[%s8229_s11 + $0x64] sm:$0xf] %vm5486_vm0, %v6170_v24  ;;  %v5176_v60 = vadd.f32 %v8215_v16, %v5113_v11  ;;  %v5114_v12 = vmax.f32 %v8910_v23, %v5058_v41  ;;  %v8922_v55 = vmax.f32 %v8920_v36, %v8921_v27  ;;  %v8940_v36 = vld [vmem:[#allocation14_spill] sm:$0xff] }
 0x431   : > { %v3935_v0 = vpop.f32.mrb[176].mxu1  ;;  %v4864_v13 = vpop.f32.mrb[136].mxu0  ;;  %v8941_v27 = vld [vmem:[#allocation70_spill] sm:$0xff] }
 0x432   : > { %v3937_v42 = vpop.f32.mrb[177].mxu1  ;;  %v5232_v43 = vmax.f32 %v5176_v60, 0.0  ;;  %v5177_v44 = vadd.f32 %v8215_v16, %v5114_v12  ;;  %v4865_v53 = vadd.f32 %v4864_v13, %v3935_v0  ;;  %v4866_v35 = vpop.f32.mrb[137].mxu0 }
 0x433   : > { %v3938_v51 = vpop.f32.mrb[178].mxu1  ;;  %v4867_v37 = vpop.f32.mrb[138].mxu0 }
 0x434   : > { %v3940_v22 = vpop.f32.mrb[179].mxu1  ;;  %v6171_v20 = vpack.c.bf16 %v5232_v43, %v5232_v43  ;;  %v5233_v31 = vmax.f32 %v5177_v44, 0.0  ;;  %v5059_v54 = vmax.f32 %v8911_v3, %v4865_v53  ;;  %v4868_v6 = vadd.f32 %v4867_v37, %v3938_v51  ;;  %v4869_v52 = vpop.f32.mrb[139].mxu0  ;;  %v8927_v53 = vld [vmem:[#allocation100_spill] sm:$0xff] }
 0x436   : > { %5513 = vst.msk [vmem:[%s8229_s11 + $0x68] sm:$0xf] %vm5486_vm0, %v6171_v20  ;;  %v6172_v61 = vpack.c.bf16 %v5233_v31, %v5233_v31  ;;  %v5115_v63 = vmax.f32 %v8914_v38, %v5059_v54  ;;  %v5060_v9 = vmax.f32 %v8915_v50, %v4868_v6  ;;  %v8928_v20 = vld [vmem:[#allocation11_spill] sm:$0xff]  ;;  %v8931_v6 = vld [vmem:[#allocation101_spill] sm:$0xff]  ;;  %v8934_v38 = vmax.f32 %v8932_v7, %v8933_v57 }
 0x437   : > { %v8929_v31 = vld [vmem:[#allocation67_spill] sm:$0xff] }
 0x438   : > { %5514 = vst.msk [vmem:[%s8229_s11 + $0x6c] sm:$0xf] %vm5486_vm0, %v6172_v61  ;;  %v5178_v10 = vadd.f32 %v8215_v16, %v5115_v63  ;;  %v5116_v14 = vmax.f32 %v8918_v46, %v5060_v9  ;;  %v8930_v3 = vmax.f32 %v8928_v20, %v8929_v31  ;;  %v8948_v20 = vld [vmem:[#allocation16_spill] sm:$0xff] }
 0x439   : > { %v3943_v2 = vpop.f32.mrb[180].mxu1  ;;  %v4872_v47 = vpop.f32.mrb[140].mxu0  ;;  %v8949_v31 = vld [vmem:[#allocation72_spill] sm:$0xff] }
 0x43a   : > { %v3945_v5 = vpop.f32.mrb[181].mxu1  ;;  %v5234_v26 = vmax.f32 %v5178_v10, 0.0  ;;  %v5179_v29 = vadd.f32 %v8215_v16, %v5116_v14  ;;  %v4873_v59 = vadd.f32 %v4872_v47, %v3943_v2  ;;  %v4874_v40 = vpop.f32.mrb[141].mxu0 }
 0x43b   : > { %v3946_v48 = vpop.f32.mrb[182].mxu1  ;;  %v4875_v39 = vpop.f32.mrb[142].mxu0 }
 0x43c   : > { %v3948_v62 = vpop.f32.mrb[183].mxu1  ;;  %v6173_v28 = vpack.c.bf16 %v5234_v26, %v5234_v26  ;;  %v5235_v33 = vmax.f32 %v5179_v29, 0.0  ;;  %v5061_v25 = vmax.f32 %v8919_v19, %v4873_v59  ;;  %v4876_v18 = vadd.f32 %v4875_v39, %v3946_v48  ;;  %v4877_v4 = vpop.f32.mrb[143].mxu0  ;;  %v8935_v59 = vld [vmem:[#allocation102_spill] sm:$0xff] }
 0x43e   : > { %5515 = vst.msk [vmem:[%s8229_s11 + $0x70] sm:$0xf] %vm5486_vm0, %v6173_v28  ;;  %v6174_v56 = vpack.c.bf16 %v5235_v33, %v5235_v33  ;;  %v5117_v8 = vmax.f32 %v8922_v55, %v5061_v25  ;;  %v5062_v15 = vmax.f32 %v8923_v49, %v4876_v18  ;;  %v8936_v28 = vld [vmem:[#allocation13_spill] sm:$0xff]  ;;  %v8939_v18 = vld [vmem:[#allocation103_spill] sm:$0xff]  ;;  %v8942_v55 = vmax.f32 %v8940_v36, %v8941_v27 }
 0x43f   : > { %v8937_v33 = vld [vmem:[#allocation69_spill] sm:$0xff] }
 0x440   : > { %5516 = vst.msk [vmem:[%s8229_s11 + $0x74] sm:$0xf] %vm5486_vm0, %v6174_v56  ;;  %v5180_v24 = vadd.f32 %v8215_v16, %v5117_v8  ;;  %v5118_v11 = vmax.f32 %v8926_v34, %v5062_v15  ;;  %v8938_v19 = vmax.f32 %v8936_v28, %v8937_v33  ;;  %v8956_v28 = vld [vmem:[#allocation18_spill] sm:$0xff] }
 0x441   : > { %v3951_v45 = vpop.f32.mrb[184].mxu1  ;;  %v4880_v41 = vpop.f32.mrb[144].mxu0  ;;  %v8957_v33 = vld [vmem:[#allocation74_spill] sm:$0xff] }
 0x442   : > { %v3953_v60 = vpop.f32.mrb[185].mxu1  ;;  %v5236_v1 = vmax.f32 %v5180_v24, 0.0  ;;  %v5181_v17 = vadd.f32 %v8215_v16, %v5118_v11  ;;  %v4881_v23 = vadd.f32 %v4880_v41, %v3951_v45  ;;  %v4882_v12 = vpop.f32.mrb[145].mxu0 }
 0x443   : > { %v3954_v0 = vpop.f32.mrb[186].mxu1  ;;  %v4883_v13 = vpop.f32.mrb[146].mxu0 }
 0x444   : > { %v3956_v42 = vpop.f32.mrb[187].mxu1  ;;  %v6175_v43 = vpack.c.bf16 %v5236_v1, %v5236_v1  ;;  %v5237_v44 = vmax.f32 %v5181_v17, 0.0  ;;  %v5063_v35 = vmax.f32 %v8927_v53, %v4881_v23  ;;  %v4884_v51 = vadd.f32 %v4883_v13, %v3954_v0  ;;  %v4885_v37 = vpop.f32.mrb[147].mxu0  ;;  %v8943_v23 = vld [vmem:[#allocation104_spill] sm:$0xff] }
 0x446   : > { %5517 = vst.msk [vmem:[%s8229_s11 + $0x78] sm:$0xf] %vm5486_vm0, %v6175_v43  ;;  %v6176_v22 = vpack.c.bf16 %v5237_v44, %v5237_v44  ;;  %v5119_v54 = vmax.f32 %v8930_v3, %v5063_v35  ;;  %v5064_v52 = vmax.f32 %v8931_v6, %v4884_v51  ;;  %v8944_v43 = vld [vmem:[#allocation15_spill] sm:$0xff]  ;;  %v8947_v51 = vld [vmem:[#allocation105_spill] sm:$0xff]  ;;  %v8950_v3 = vmax.f32 %v8948_v20, %v8949_v31 }
 0x447   : > { %v8945_v44 = vld [vmem:[#allocation71_spill] sm:$0xff] }
 0x448   : > { %5518 = vst.msk [vmem:[%s8229_s11 + $0x7c] sm:$0xf] %vm5486_vm0, %v6176_v22  ;;  %v5182_v61 = vadd.f32 %v8215_v16, %v5119_v54  ;;  %v5120_v63 = vmax.f32 %v8934_v38, %v5064_v52  ;;  %v8946_v53 = vmax.f32 %v8944_v43, %v8945_v44  ;;  %v8964_v43 = vld [vmem:[#allocation20_spill] sm:$0xff] }
 0x449   : > { %v3959_v50 = vpop.f32.mrb[188].mxu1  ;;  %v4888_v9 = vpop.f32.mrb[148].mxu0  ;;  %v8965_v44 = vld [vmem:[#allocation76_spill] sm:$0xff] }
 0x44a   : > { %v3961_v10 = vpop.f32.mrb[189].mxu1  ;;  %v5238_v21 = vmax.f32 %v5182_v61, 0.0  ;;  %v5183_v30 = vadd.f32 %v8215_v16, %v5120_v63  ;;  %v4889_v46 = vadd.f32 %v4888_v9, %v3959_v50  ;;  %v4890_v14 = vpop.f32.mrb[149].mxu0 }
 0x44b   : > { %v3962_v2 = vpop.f32.mrb[190].mxu1  ;;  %v4891_v47 = vpop.f32.mrb[150].mxu0 }
 0x44c   : > { %v3964_v5 = vpop.f32.mrb[191].mxu1  ;;  %v6177_v26 = vpack.c.bf16 %v5238_v21, %v5238_v21  ;;  %v5239_v29 = vmax.f32 %v5183_v30, 0.0  ;;  %v5065_v40 = vmax.f32 %v8935_v59, %v4889_v46  ;;  %v4892_v48 = vadd.f32 %v4891_v47, %v3962_v2  ;;  %v4893_v39 = vpop.f32.mrb[151].mxu0  ;;  %v8951_v46 = vld [vmem:[#allocation106_spill] sm:$0xff] }
 0x44e   : > { %5519 = vst.msk [vmem:[%s8229_s11 + $0x80] sm:$0xf] %vm5486_vm0, %v6177_v26  ;;  %v6178_v62 = vpack.c.bf16 %v5239_v29, %v5239_v29  ;;  %v5121_v25 = vmax.f32 %v8938_v19, %v5065_v40  ;;  %v5066_v4 = vmax.f32 %v8939_v18, %v4892_v48  ;;  %v8952_v26 = vld [vmem:[#allocation17_spill] sm:$0xff]  ;;  %v8955_v48 = vld [vmem:[#allocation107_spill] sm:$0xff]  ;;  %v8958_v19 = vmax.f32 %v8956_v28, %v8957_v33 }
 0x44f   : > { %v8953_v29 = vld [vmem:[#allocation73_spill] sm:$0xff] }
 0x450   : > { %5520 = vst.msk [vmem:[%s8229_s11 + $0x84] sm:$0xf] %vm5486_vm0, %v6178_v62  ;;  %v5184_v56 = vadd.f32 %v8215_v16, %v5121_v25  ;;  %v5122_v8 = vmax.f32 %v8942_v55, %v5066_v4  ;;  %v8954_v59 = vmax.f32 %v8952_v26, %v8953_v29  ;;  %v8972_v26 = vld [vmem:[#allocation22_spill] sm:$0xff] }
 0x451   : > { %v3967_v49 = vpop.f32.mrb[192].mxu1  ;;  %v4896_v15 = vpop.f32.mrb[152].mxu0  ;;  %v8973_v29 = vld [vmem:[#allocation78_spill] sm:$0xff] }
 0x452   : > { %v3969_v24 = vpop.f32.mrb[193].mxu1  ;;  %v5240_v32 = vmax.f32 %v5184_v56, 0.0  ;;  %v5185_v58 = vadd.f32 %v8215_v16, %v5122_v8  ;;  %v4897_v34 = vadd.f32 %v4896_v15, %v3967_v49  ;;  %v4898_v11 = vpop.f32.mrb[153].mxu0 }
 0x453   : > { %v3970_v45 = vpop.f32.mrb[194].mxu1  ;;  %v4899_v41 = vpop.f32.mrb[154].mxu0 }
 0x454   : > { %v3972_v60 = vpop.f32.mrb[195].mxu1  ;;  %v6179_v1 = vpack.c.bf16 %v5240_v32, %v5240_v32  ;;  %v5241_v17 = vmax.f32 %v5185_v58, 0.0  ;;  %v5067_v12 = vmax.f32 %v8943_v23, %v4897_v34  ;;  %v4900_v0 = vadd.f32 %v4899_v41, %v3970_v45  ;;  %v4901_v13 = vpop.f32.mrb[155].mxu0  ;;  %v8959_v34 = vld [vmem:[#allocation108_spill] sm:$0xff] }
 0x456   : > { %5521 = vst.msk [vmem:[%s8229_s11 + $0x88] sm:$0xf] %vm5486_vm0, %v6179_v1  ;;  %v6180_v42 = vpack.c.bf16 %v5241_v17, %v5241_v17  ;;  %v5123_v35 = vmax.f32 %v8946_v53, %v5067_v12  ;;  %v5068_v37 = vmax.f32 %v8947_v51, %v4900_v0  ;;  %v8960_v1 = vld [vmem:[#allocation19_spill] sm:$0xff]  ;;  %v8963_v0 = vld [vmem:[#allocation109_spill] sm:$0xff]  ;;  %v8966_v53 = vmax.f32 %v8964_v43, %v8965_v44 }
 0x457   : > { %v8961_v17 = vld [vmem:[#allocation75_spill] sm:$0xff] }
 0x458   : > { %5522 = vst.msk [vmem:[%s8229_s11 + $0x8c] sm:$0xf] %vm5486_vm0, %v6180_v42  ;;  %v5186_v22 = vadd.f32 %v8215_v16, %v5123_v35  ;;  %v5124_v54 = vmax.f32 %v8950_v3, %v5068_v37  ;;  %v8962_v23 = vmax.f32 %v8960_v1, %v8961_v17  ;;  %v8980_v1 = vld [vmem:[#allocation24_spill] sm:$0xff] }
 0x459   : > { %v3975_v6 = vpop.f32.mrb[196].mxu1  ;;  %v4904_v52 = vpop.f32.mrb[156].mxu0  ;;  %v8981_v17 = vld [vmem:[#allocation80_spill] sm:$0xff] }
 0x45a   : > { %v3977_v61 = vpop.f32.mrb[197].mxu1  ;;  %v5242_v7 = vmax.f32 %v5186_v22, 0.0  ;;  %v5187_v57 = vadd.f32 %v8215_v16, %v5124_v54  ;;  %v4905_v38 = vadd.f32 %v4904_v52, %v3975_v6  ;;  %v4906_v63 = vpop.f32.mrb[157].mxu0 }
 0x45b   : > { %v3978_v50 = vpop.f32.mrb[198].mxu1  ;;  %v4907_v9 = vpop.f32.mrb[158].mxu0 }
 0x45c   : > { %v3980_v10 = vpop.f32.mrb[199].mxu1  ;;  %v6181_v21 = vpack.c.bf16 %v5242_v7, %v5242_v7  ;;  %v5243_v30 = vmax.f32 %v5187_v57, 0.0  ;;  %v5069_v14 = vmax.f32 %v8951_v46, %v4905_v38  ;;  %v4908_v2 = vadd.f32 %v4907_v9, %v3978_v50  ;;  %v4909_v47 = vpop.f32.mrb[159].mxu0  ;;  %v8967_v38 = vld [vmem:[#allocation110_spill] sm:$0xff] }
 0x45e   : > { %5523 = vst.msk [vmem:[%s8229_s11 + $0x90] sm:$0xf] %vm5486_vm0, %v6181_v21  ;;  %v6182_v5 = vpack.c.bf16 %v5243_v30, %v5243_v30  ;;  %v5125_v40 = vmax.f32 %v8954_v59, %v5069_v14  ;;  %v5070_v39 = vmax.f32 %v8955_v48, %v4908_v2  ;;  %v8968_v21 = vld [vmem:[#allocation21_spill] sm:$0xff]  ;;  %v8971_v2 = vld [vmem:[#allocation111_spill] sm:$0xff]  ;;  %v8974_v59 = vmax.f32 %v8972_v26, %v8973_v29 }
 0x45f   : > { %v8969_v30 = vld [vmem:[#allocation77_spill] sm:$0xff] }
 0x460   : > { %5524 = vst.msk [vmem:[%s8229_s11 + $0x94] sm:$0xf] %vm5486_vm0, %v6182_v5  ;;  %v5188_v62 = vadd.f32 %v8215_v16, %v5125_v40  ;;  %v5126_v25 = vmax.f32 %v8958_v19, %v5070_v39  ;;  %v8970_v46 = vmax.f32 %v8968_v21, %v8969_v30  ;;  %v8988_v21 = vld [vmem:[#allocation26_spill] sm:$0xff] }
 0x461   : > { %v3983_v18 = vpop.f32.mrb[200].mxu1  ;;  %v4912_v4 = vpop.f32.mrb[160].mxu0  ;;  %v8989_v30 = vld [vmem:[#allocation82_spill] sm:$0xff] }
 0x462   : > { %v3985_v56 = vpop.f32.mrb[201].mxu1  ;;  %v5244_v36 = vmax.f32 %v5188_v62, 0.0  ;;  %v5189_v27 = vadd.f32 %v8215_v16, %v5126_v25  ;;  %v4913_v55 = vadd.f32 %v4912_v4, %v3983_v18  ;;  %v4914_v8 = vpop.f32.mrb[161].mxu0 }
 0x463   : > { %v3986_v49 = vpop.f32.mrb[202].mxu1  ;;  %v4915_v15 = vpop.f32.mrb[162].mxu0 }
 0x464   : > { %v3988_v24 = vpop.f32.mrb[203].mxu1  ;;  %v6183_v32 = vpack.c.bf16 %v5244_v36, %v5244_v36  ;;  %v5245_v58 = vmax.f32 %v5189_v27, 0.0  ;;  %v5071_v11 = vmax.f32 %v8959_v34, %v4913_v55  ;;  %v4916_v45 = vadd.f32 %v4915_v15, %v3986_v49  ;;  %v4917_v41 = vpop.f32.mrb[163].mxu0  ;;  %v8975_v55 = vld [vmem:[#allocation112_spill] sm:$0xff] }
 0x466   : > { %5525 = vst.msk [vmem:[%s8229_s11 + $0x98] sm:$0xf] %vm5486_vm0, %v6183_v32  ;;  %v6184_v60 = vpack.c.bf16 %v5245_v58, %v5245_v58  ;;  %v5127_v12 = vmax.f32 %v8962_v23, %v5071_v11  ;;  %v5072_v13 = vmax.f32 %v8963_v0, %v4916_v45  ;;  %v8976_v32 = vld [vmem:[#allocation23_spill] sm:$0xff]  ;;  %v8979_v45 = vld [vmem:[#allocation113_spill] sm:$0xff]  ;;  %v8982_v23 = vmax.f32 %v8980_v1, %v8981_v17 }
 0x467   : > { %v8977_v58 = vld [vmem:[#allocation79_spill] sm:$0xff] }
 0x468   : > { %5526 = vst.msk [vmem:[%s8229_s11 + $0x9c] sm:$0xf] %vm5486_vm0, %v6184_v60  ;;  %v5190_v42 = vadd.f32 %v8215_v16, %v5127_v12  ;;  %v5128_v35 = vmax.f32 %v8966_v53, %v5072_v13  ;;  %v8978_v34 = vmax.f32 %v8976_v32, %v8977_v58  ;;  %v8996_v32 = vld [vmem:[#allocation28_spill] sm:$0xff] }
 0x469   : > { %v3991_v51 = vpop.f32.mrb[204].mxu1  ;;  %v4920_v37 = vpop.f32.mrb[164].mxu0  ;;  %v8997_v58 = vld [vmem:[#allocation84_spill] sm:$0xff] }
 0x46a   : > { %v3993_v22 = vpop.f32.mrb[205].mxu1  ;;  %v5246_v20 = vmax.f32 %v5190_v42, 0.0  ;;  %v5191_v31 = vadd.f32 %v8215_v16, %v5128_v35  ;;  %v4921_v3 = vadd.f32 %v4920_v37, %v3991_v51  ;;  %v4922_v54 = vpop.f32.mrb[165].mxu0 }
 0x46b   : > { %v3994_v6 = vpop.f32.mrb[206].mxu1  ;;  %v4923_v52 = vpop.f32.mrb[166].mxu0 }
 0x46c   : > { %v3996_v61 = vpop.f32.mrb[207].mxu1  ;;  %v6185_v7 = vpack.c.bf16 %v5246_v20, %v5246_v20  ;;  %v5247_v57 = vmax.f32 %v5191_v31, 0.0  ;;  %v5073_v63 = vmax.f32 %v8967_v38, %v4921_v3  ;;  %v4924_v50 = vadd.f32 %v4923_v52, %v3994_v6  ;;  %v4925_v9 = vpop.f32.mrb[167].mxu0  ;;  %v8983_v3 = vld [vmem:[#allocation114_spill] sm:$0xff] }
 0x46d   : > { %v8551_v9 = vld [vmem:[%s8623_s2] ss:$0 sm:$0xff] }
 0x46e   : > { %5527 = vst.msk [vmem:[%s8229_s11 + $0xa0] sm:$0xf] %vm5486_vm0, %v6185_v7  ;;  %v6186_v10 = vpack.c.bf16 %v5247_v57, %v5247_v57  ;;  %v5129_v14 = vmax.f32 %v8970_v46, %v5073_v63  ;;  %v5074_v47 = vmax.f32 %v8971_v2, %v4924_v50  ;;  %v8984_v7 = vld [vmem:[#allocation25_spill] sm:$0xff]  ;;  %v8987_v50 = vld [vmem:[#allocation115_spill] sm:$0xff]  ;;  %v8990_v46 = vmax.f32 %v8988_v21, %v8989_v30 }
 0x46f   : > { %v8985_v57 = vld [vmem:[#allocation81_spill] sm:$0xff] }
 0x470   : > { %5528 = vst.msk [vmem:[%s8229_s11 + $0xa4] sm:$0xf] %vm5486_vm0, %v6186_v10  ;;  %v5192_v5 = vadd.f32 %v8215_v16, %v5129_v14  ;;  %v5130_v40 = vmax.f32 %v8974_v59, %v5074_v47  ;;  %v8986_v38 = vmax.f32 %v8984_v7, %v8985_v57  ;;  %v9004_v7 = vld [vmem:[#allocation30_spill] sm:$0xff] }
 0x471   : > { %v3999_v48 = vpop.f32.mrb[208].mxu1  ;;  %v4928_v39 = vpop.f32.mrb[168].mxu0  ;;  %v9005_v57 = vld [vmem:[#allocation86_spill] sm:$0xff] }
 0x472   : > { %v4001_v62 = vpop.f32.mrb[209].mxu1  ;;  %v5248_v28 = vmax.f32 %v5192_v5, 0.0  ;;  %v5193_v33 = vadd.f32 %v8215_v16, %v5130_v40  ;;  %v4929_v19 = vadd.f32 %v4928_v39, %v3999_v48  ;;  %v4930_v25 = vpop.f32.mrb[169].mxu0 }
 0x473   : > { %v4002_v18 = vpop.f32.mrb[210].mxu1  ;;  %v4931_v4 = vpop.f32.mrb[170].mxu0 }
 0x474   : > { %v4004_v56 = vpop.f32.mrb[211].mxu1  ;;  %v6187_v36 = vpack.c.bf16 %v5248_v28, %v5248_v28  ;;  %v5249_v27 = vmax.f32 %v5193_v33, 0.0  ;;  %v5075_v8 = vmax.f32 %v8975_v55, %v4929_v19  ;;  %v4932_v49 = vadd.f32 %v4931_v4, %v4002_v18  ;;  %v4933_v15 = vpop.f32.mrb[171].mxu0  ;;  %v8991_v19 = vld [vmem:[#allocation116_spill] sm:$0xff] }
 0x476   : > { %5529 = vst.msk [vmem:[%s8229_s11 + $0xa8] sm:$0xf] %vm5486_vm0, %v6187_v36  ;;  %v6188_v24 = vpack.c.bf16 %v5249_v27, %v5249_v27  ;;  %v5131_v11 = vmax.f32 %v8978_v34, %v5075_v8  ;;  %v5076_v41 = vmax.f32 %v8979_v45, %v4932_v49  ;;  %v8992_v36 = vld [vmem:[#allocation27_spill] sm:$0xff]  ;;  %v8995_v49 = vld [vmem:[#allocation117_spill] sm:$0xff]  ;;  %v8998_v34 = vmax.f32 %v8996_v32, %v8997_v58 }
 0x477   : > { %v8993_v27 = vld [vmem:[#allocation83_spill] sm:$0xff] }
 0x478   : > { %5530 = vst.msk [vmem:[%s8229_s11 + $0xac] sm:$0xf] %vm5486_vm0, %v6188_v24  ;;  %v5194_v60 = vadd.f32 %v8215_v16, %v5131_v11  ;;  %v5132_v12 = vmax.f32 %v8982_v23, %v5076_v41  ;;  %v8994_v55 = vmax.f32 %v8992_v36, %v8993_v27  ;;  %v9012_v36 = vld [vmem:[#allocation32_spill] sm:$0xff] }
 0x479   : > { %v4007_v0 = vpop.f32.mrb[212].mxu1  ;;  %v4936_v13 = vpop.f32.mrb[172].mxu0  ;;  %v9013_v27 = vld [vmem:[#allocation88_spill] sm:$0xff] }
 0x47a   : > { %v4009_v42 = vpop.f32.mrb[213].mxu1  ;;  %v5250_v43 = vmax.f32 %v5194_v60, 0.0  ;;  %v5195_v44 = vadd.f32 %v8215_v16, %v5132_v12  ;;  %v4937_v53 = vadd.f32 %v4936_v13, %v4007_v0  ;;  %v4938_v35 = vpop.f32.mrb[173].mxu0 }
 0x47b   : > { %v4010_v51 = vpop.f32.mrb[214].mxu1  ;;  %v4939_v37 = vpop.f32.mrb[174].mxu0 }
 0x47c   : > { %v4012_v22 = vpop.f32.mrb[215].mxu1  ;;  %v6189_v20 = vpack.c.bf16 %v5250_v43, %v5250_v43  ;;  %v5251_v31 = vmax.f32 %v5195_v44, 0.0  ;;  %v5077_v54 = vmax.f32 %v8983_v3, %v4937_v53  ;;  %v4940_v6 = vadd.f32 %v4939_v37, %v4010_v51  ;;  %v4941_v52 = vpop.f32.mrb[175].mxu0  ;;  %v8999_v53 = vld [vmem:[#allocation118_spill] sm:$0xff] }
 0x47e   : > { %5531 = vst.msk [vmem:[%s8229_s11 + $0xb0] sm:$0xf] %vm5486_vm0, %v6189_v20  ;;  %v6190_v61 = vpack.c.bf16 %v5251_v31, %v5251_v31  ;;  %v5133_v63 = vmax.f32 %v8986_v38, %v5077_v54  ;;  %v5078_v16 = vmax.f32 %v8987_v50, %v4940_v6  ;;  %v9000_v20 = vld [vmem:[#allocation29_spill] sm:$0xff]  ;;  %v9003_v6 = vld [vmem:[#allocation119_spill] sm:$0xff]  ;;  %v9006_v38 = vmax.f32 %v9004_v7, %v9005_v57 }
 0x47f   : > { %v9001_v31 = vld [vmem:[#allocation85_spill] sm:$0xff] }
 0x480   : > { %5532 = vst.msk [vmem:[%s8229_s11 + $0xb4] sm:$0xf] %vm5486_vm0, %v6190_v61  ;;  %v5196_v10 = vadd.f32 %v8551_v9, %v5133_v63  ;;  %v5134_v14 = vmax.f32 %v8990_v46, %v5078_v16  ;;  %v9002_v3 = vmax.f32 %v9000_v20, %v9001_v31  ;;  %v9020_v20 = vld [vmem:[#allocation34_spill] sm:$0xff] }
 0x481   : > { %v4015_v2 = vpop.f32.mrb[216].mxu1  ;;  %v4944_v47 = vpop.f32.mrb[176].mxu0  ;;  %v9021_v31 = vld [vmem:[#allocation90_spill] sm:$0xff] }
 0x482   : > { %v4017_v5 = vpop.f32.mrb[217].mxu1  ;;  %v5252_v26 = vmax.f32 %v5196_v10, 0.0  ;;  %v5197_v29 = vadd.f32 %v8551_v9, %v5134_v14  ;;  %v4945_v59 = vadd.f32 %v4944_v47, %v4015_v2  ;;  %v4946_v40 = vpop.f32.mrb[177].mxu0 }
 0x483   : > { %v4018_v48 = vpop.f32.mrb[218].mxu1  ;;  %v4947_v39 = vpop.f32.mrb[178].mxu0 }
 0x484   : > { %v4020_v62 = vpop.f32.mrb[219].mxu1  ;;  %v6191_v28 = vpack.c.bf16 %v5252_v26, %v5252_v26  ;;  %v5253_v33 = vmax.f32 %v5197_v29, 0.0  ;;  %v5079_v25 = vmax.f32 %v8991_v19, %v4945_v59  ;;  %v4948_v18 = vadd.f32 %v4947_v39, %v4018_v48  ;;  %v4949_v4 = vpop.f32.mrb[179].mxu0  ;;  %v9007_v59 = vld [vmem:[#allocation120_spill] sm:$0xff] }
 0x486   : > { %5533 = vst.msk [vmem:[%s8229_s11 + $0xb8] sm:$0xf] %vm5486_vm0, %v6191_v28  ;;  %v6192_v56 = vpack.c.bf16 %v5253_v33, %v5253_v33  ;;  %v5135_v8 = vmax.f32 %v8994_v55, %v5079_v25  ;;  %v5080_v15 = vmax.f32 %v8995_v49, %v4948_v18  ;;  %v9008_v28 = vld [vmem:[#allocation31_spill] sm:$0xff]  ;;  %v9011_v18 = vld [vmem:[#allocation121_spill] sm:$0xff]  ;;  %v9014_v55 = vmax.f32 %v9012_v36, %v9013_v27 }
 0x487   : > { %v9009_v33 = vld [vmem:[#allocation87_spill] sm:$0xff] }
 0x488   : > { %5534 = vst.msk [vmem:[%s8229_s11 + $0xbc] sm:$0xf] %vm5486_vm0, %v6192_v56  ;;  %v5198_v24 = vadd.f32 %v8551_v9, %v5135_v8  ;;  %v5136_v11 = vmax.f32 %v8998_v34, %v5080_v15  ;;  %v9010_v19 = vmax.f32 %v9008_v28, %v9009_v33 }
 0x489   : > { %v4023_v45 = vpop.f32.mrb[220].mxu1  ;;  %v4952_v41 = vpop.f32.mrb[180].mxu0 }
 0x48a   : > { %v4025_v60 = vpop.f32.mrb[221].mxu1  ;;  %v5254_v1 = vmax.f32 %v5198_v24, 0.0  ;;  %v5199_v17 = vadd.f32 %v8551_v9, %v5136_v11  ;;  %v4953_v23 = vadd.f32 %v4952_v41, %v4023_v45  ;;  %v4954_v12 = vpop.f32.mrb[181].mxu0 }
 0x48b   : > { %v4026_v0 = vpop.f32.mrb[222].mxu1  ;;  %v4955_v13 = vpop.f32.mrb[182].mxu0 }
 0x48c   : > { %v4028_v42 = vpop.f32.mrb[223].mxu1  ;;  %v6193_v43 = vpack.c.bf16 %v5254_v1, %v5254_v1  ;;  %v5255_v44 = vmax.f32 %v5199_v17, 0.0  ;;  %v5081_v35 = vmax.f32 %v8999_v53, %v4953_v23  ;;  %v4956_v51 = vadd.f32 %v4955_v13, %v4026_v0  ;;  %v4957_v37 = vpop.f32.mrb[183].mxu0  ;;  %v9015_v23 = vld [vmem:[#allocation122_spill] sm:$0xff] }
 0x48e   : > { %5535 = vst.msk [vmem:[%s8229_s11 + $0xc0] sm:$0xf] %vm5486_vm0, %v6193_v43  ;;  %v6194_v22 = vpack.c.bf16 %v5255_v44, %v5255_v44  ;;  %v5137_v54 = vmax.f32 %v9002_v3, %v5081_v35  ;;  %v5082_v52 = vmax.f32 %v9003_v6, %v4956_v51  ;;  %v9016_v43 = vld [vmem:[#allocation33_spill] sm:$0xff]  ;;  %v9019_v51 = vld [vmem:[#allocation123_spill] sm:$0xff]  ;;  %v9022_v3 = vmax.f32 %v9020_v20, %v9021_v31 }
 0x48f   : > { %v9017_v44 = vld [vmem:[#allocation89_spill] sm:$0xff] }
 0x490   : > { %5536 = vst.msk [vmem:[%s8229_s11 + $0xc4] sm:$0xf] %vm5486_vm0, %v6194_v22  ;;  %v5200_v61 = vadd.f32 %v8551_v9, %v5137_v54  ;;  %v5138_v63 = vmax.f32 %v9006_v38, %v5082_v52  ;;  %v9018_v53 = vmax.f32 %v9016_v43, %v9017_v44 }
 0x491   : > { %v4031_v50 = vpop.f32.mrb[224].mxu1  ;;  %v4960_v16 = vpop.f32.mrb[184].mxu0 }
 0x492   : > { %v4033_v10 = vpop.f32.mrb[225].mxu1  ;;  %v5256_v21 = vmax.f32 %v5200_v61, 0.0  ;;  %v5201_v30 = vadd.f32 %v8551_v9, %v5138_v63  ;;  %v4961_v46 = vadd.f32 %v4960_v16, %v4031_v50  ;;  %v4962_v14 = vpop.f32.mrb[185].mxu0 }
 0x493   : > { %v4034_v2 = vpop.f32.mrb[226].mxu1  ;;  %v4963_v47 = vpop.f32.mrb[186].mxu0 }
 0x494   : > { %v4036_v5 = vpop.f32.mrb[227].mxu1  ;;  %v6195_v26 = vpack.c.bf16 %v5256_v21, %v5256_v21  ;;  %v5257_v29 = vmax.f32 %v5201_v30, 0.0  ;;  %v5083_v40 = vmax.f32 %v9007_v59, %v4961_v46  ;;  %v4964_v48 = vadd.f32 %v4963_v47, %v4034_v2  ;;  %v4965_v39 = vpop.f32.mrb[187].mxu0 }
 0x496   : > { %5537 = vst.msk [vmem:[%s8229_s11 + $0xc8] sm:$0xf] %vm5486_vm0, %v6195_v26  ;;  %v6196_v62 = vpack.c.bf16 %v5257_v29, %v5257_v29  ;;  %v5139_v25 = vmax.f32 %v9010_v19, %v5083_v40  ;;  %v5084_v4 = vmax.f32 %v9011_v18, %v4964_v48 }
 0x498   : > { %5538 = vst.msk [vmem:[%s8229_s11 + $0xcc] sm:$0xf] %vm5486_vm0, %v6196_v62  ;;  %v5202_v56 = vadd.f32 %v8551_v9, %v5139_v25  ;;  %v5140_v8 = vmax.f32 %v9014_v55, %v5084_v4 }
 0x499   : > { %v4039_v49 = vpop.f32.mrb[228].mxu1  ;;  %v4968_v15 = vpop.f32.mrb[188].mxu0 }
 0x49a   : > { %v4041_v24 = vpop.f32.mrb[229].mxu1  ;;  %v5258_v32 = vmax.f32 %v5202_v56, 0.0  ;;  %v5203_v58 = vadd.f32 %v8551_v9, %v5140_v8  ;;  %v4969_v34 = vadd.f32 %v4968_v15, %v4039_v49  ;;  %v4970_v11 = vpop.f32.mrb[189].mxu0 }
 0x49b   : > { %v4042_v45 = vpop.f32.mrb[230].mxu1  ;;  %v4971_v41 = vpop.f32.mrb[190].mxu0 }
 0x49c   : > { %v4044_v60 = vpop.f32.mrb[231].mxu1  ;;  %v6197_v1 = vpack.c.bf16 %v5258_v32, %v5258_v32  ;;  %v5259_v17 = vmax.f32 %v5203_v58, 0.0  ;;  %v5085_v12 = vmax.f32 %v9015_v23, %v4969_v34  ;;  %v4972_v0 = vadd.f32 %v4971_v41, %v4042_v45  ;;  %v4973_v13 = vpop.f32.mrb[191].mxu0 }
 0x49e   : > { %5539 = vst.msk [vmem:[%s8229_s11 + $0xd0] sm:$0xf] %vm5486_vm0, %v6197_v1  ;;  %v6198_v42 = vpack.c.bf16 %v5259_v17, %v5259_v17  ;;  %v5141_v35 = vmax.f32 %v9018_v53, %v5085_v12  ;;  %v5086_v37 = vmax.f32 %v9019_v51, %v4972_v0 }
 0x4a0   : > { %5540 = vst.msk [vmem:[%s8229_s11 + $0xd4] sm:$0xf] %vm5486_vm0, %v6198_v42  ;;  %v5204_v22 = vadd.f32 %v8551_v9, %v5141_v35  ;;  %v5142_v54 = vmax.f32 %v9022_v3, %v5086_v37 }
 0x4a2   : > { %v5260_v6 = vmax.f32 %v5204_v22, 0.0  ;;  %v5205_v52 = vadd.f32 %v8551_v9, %v5142_v54 }
 0x4a4   : > { %v6199_v61 = vpack.c.bf16 %v5260_v6, %v5260_v6  ;;  %v5261_v7 = vmax.f32 %v5205_v52, 0.0 }
 0x4a6   : > { %5541 = vst.msk [vmem:[%s8229_s11 + $0xd8] sm:$0xf] %vm5486_vm0, %v6199_v61  ;;  %v6200_v57 = vpack.c.bf16 %v5261_v7, %v5261_v7 }
 0x4a8   : > { %5542 = vst.msk [vmem:[%s8229_s11 + $0xdc] sm:$0xf] %vm5486_vm0, %v6200_v57 }
 0x4a9 PF: > { %s13_s12 = sadd.s32 1, %s7146_s12  }
 0x4aa   : > { %p10_p5 = scmp.ge.s32.totalorder %s13_s12, 4  }
 0x4ac   :  { %12 = sbr.rel (!%p10_p5) target bundleno = 1 (0x1), region = 62 }

// kernel: net_forward.6
= control target key start
LH: loop header
LB: loop body
LE: loop exit
PB: predicated region body
PF: predicated region fallthrough
CT: control target
= control target key end

     0   :  { %s3375_s12 = smov 0   ;;  %s3996_s0 = inlined_call_operand.vmem [shape: bf16[2,352,1024], index: 0, kind: input, shape index: {}]   ;;  %s3997_s1 = inlined_call_operand.vmem [shape: bf16[1024,128], index: 1, kind: input, shape index: {}]   ;;  %s3998_s2 = inlined_call_operand.vmem [shape: f32[1,128], index: 2, kind: input, shape index: {}]   ;;  %s3999_s3 = inlined_call_operand.vmem [shape: bf16[176,128], index: 3, kind: output, shape index: {}]  }
   0x1 LB: > { %s3381_s13 = sadd.s32 4294967295, %s3352_s12   ;;  %p2755_p0 = scmp.ge.s32.totalorder %s3352_s12, 1  ;;  %s3352_s12 = sphi %s3375_s12, %s13_s12  }
   0x2   : > { %p137_p1 = scmp.lt.s32.totalorder %s3352_s12, 3 }
   0x4   : > { %p138_p2 = pnand %p2755_p0, %p137_p1 }
   0x5   : > { %v3282_v0 = vld [vmem:[%s3997_s1] sm:$0xff] (!%p138_p2)   ;;  %v3354_v1 = vmov (!%p138_p2), 0   ;;  %v3284_v3 = vld [vmem:[%s3997_s1 + $0x8] sm:$0xff] (!%p138_p2)   ;;  %v3286_v5 = vld [vmem:[%s3997_s1 + $0x10] sm:$0xff] (!%p138_p2)   ;;  %p161_p3 = scmp.lt.s32.totalorder (!%p138_p2), %s3381_s13, 1 }
   0x6   : > { %141 = sbr.rel (%p138_p2) target bundleno = 641 (0x281), region = 32  ;;  %1741 = vmatprep.subr.bf16.mxu1 (!%p138_p2), %v3354_v1  ;;  %2159 = vmatprep.subr.bf16.mxu0 (!%p138_p2), %v3354_v1  ;;  %v3283_v2 = vld [vmem:[%s3997_s1 + $0x100] sm:$0xff] (!%p138_p2)   ;;  %v3285_v4 = vld [vmem:[%s3997_s1 + $0x108] sm:$0xff] (!%p138_p2)   ;;  %v3287_v6 = vld [vmem:[%s3997_s1 + $0x110] sm:$0xff] (!%p138_p2)  }
   0x7   : > { %1742 = vmatpush1.bf16.msra.mxu1 (!%p138_p2), %v3282_v0  ;;  %2160 = vmatpush1.bf16.msra.mxu0 (!%p138_p2), %v3283_v2  ;;  %v3288_v7 = vld [vmem:[%s3997_s1 + $0x18] sm:$0xff] (!%p138_p2)   ;;  %v3290_v9 = vld [vmem:[%s3997_s1 + $0x20] sm:$0xff] (!%p138_p2)   ;;  %v3292_v11 = vld [vmem:[%s3997_s1 + $0x28] sm:$0xff] (!%p138_p2)  }
   0x8   : > { %1743 = vmatprep.subr.bf16.mxu1 (!%p138_p2), %v3354_v1  ;;  %2161 = vmatprep.subr.bf16.mxu0 (!%p138_p2), %v3354_v1  ;;  %v3289_v8 = vld [vmem:[%s3997_s1 + $0x118] sm:$0xff] (!%p138_p2)   ;;  %v3291_v10 = vld [vmem:[%s3997_s1 + $0x120] sm:$0xff] (!%p138_p2)   ;;  %v3293_v12 = vld [vmem:[%s3997_s1 + $0x128] sm:$0xff] (!%p138_p2)  }
   0x9   : > { %v3294_v13 = vld [vmem:[%s3997_s1 + $0x30] sm:$0xff] (!%p138_p2)   ;;  %v3296_v15 = vld [vmem:[%s3997_s1 + $0x38] sm:$0xff] (!%p138_p2)   ;;  %v3298_v17 = vld [vmem:[%s3997_s1 + $0x40] sm:$0xff] (!%p138_p2)  }
   0xa   : > { %v3295_v14 = vld [vmem:[%s3997_s1 + $0x130] sm:$0xff] (!%p138_p2)   ;;  %v3297_v16 = vld [vmem:[%s3997_s1 + $0x138] sm:$0xff] (!%p138_p2)   ;;  %v3299_v18 = vld [vmem:[%s3997_s1 + $0x140] sm:$0xff] (!%p138_p2)  }
   0xb   : > { %1744 = vmatpush1.bf16.msra.mxu1 (!%p138_p2), %v3284_v3  ;;  %2162 = vmatpush1.bf16.msra.mxu0 (!%p138_p2), %v3285_v4  ;;  %v3300_v24 = vld [vmem:[%s3997_s1 + $0x48] sm:$0xff] (!%p138_p2)   ;;  %v3302_v27 = vld [vmem:[%s3997_s1 + $0x50] sm:$0xff] (!%p138_p2)   ;;  %v3304_v29 = vld [vmem:[%s3997_s1 + $0x58] sm:$0xff] (!%p138_p2)  }
   0xc   : > { %1745 = vmatprep.subr.bf16.mxu1 (!%p138_p2), %v3354_v1  ;;  %2163 = vmatprep.subr.bf16.mxu0 (!%p138_p2), %v3354_v1  ;;  %v3301_v26 = vld [vmem:[%s3997_s1 + $0x148] sm:$0xff] (!%p138_p2)   ;;  %v3303_v28 = vld [vmem:[%s3997_s1 + $0x150] sm:$0xff] (!%p138_p2)   ;;  %v3305_v30 = vld [vmem:[%s3997_s1 + $0x158] sm:$0xff] (!%p138_p2)  }
   0xd   : > { %s162_s11 = scalar_select %p161_p3, %s3381_s13, 1  ;;  %v3306_v31 = vld [vmem:[%s3997_s1 + $0x60] sm:$0xff]   ;;  %v3308_v33 = vld [vmem:[%s3997_s1 + $0x68] sm:$0xff]   ;;  %v3310_v35 = vld [vmem:[%s3997_s1 + $0x70] sm:$0xff]  }
   0xe   : > { %v3307_v32 = vld [vmem:[%s3997_s1 + $0x160] sm:$0xff]   ;;  %v3309_v34 = vld [vmem:[%s3997_s1 + $0x168] sm:$0xff]   ;;  %v3311_v36 = vld [vmem:[%s3997_s1 + $0x170] sm:$0xff]  }
   0xf   : > { %1746 = vmatpush1.bf16.msra.mxu1 %v3286_v5  ;;  %2164 = vmatpush1.bf16.msra.mxu0 %v3287_v6  ;;  %s3272_s18 = smul.u32 1408, %s162_s11  ;;  %v3312_v37 = vld [vmem:[%s3997_s1 + $0x78] sm:$0xff]   ;;  %v3314_v45 = vld [vmem:[%s3997_s1 + $0x80] sm:$0xff]   ;;  %v3316_v49 = vld [vmem:[%s3997_s1 + $0x88] sm:$0xff]  }
  0x10   : > { %1747 = vmatprep.subr.bf16.mxu1 %v3354_v1  ;;  %2165 = vmatprep.subr.bf16.mxu0 %v3354_v1  ;;  %v3313_v38 = vld [vmem:[%s3997_s1 + $0x178] sm:$0xff]   ;;  %v3315_v46 = vld [vmem:[%s3997_s1 + $0x180] sm:$0xff]   ;;  %v3317_v50 = vld [vmem:[%s3997_s1 + $0x188] sm:$0xff]  }
  0x11   : > { %s3454_s25 = scalar_lea.vmem %s3996_s0, %s3272_s18  ;;  %v3318_v59 = vld [vmem:[%s3997_s1 + $0x90] sm:$0xff]   ;;  %v3320_v2 = vld [vmem:[%s3997_s1 + $0x98] sm:$0xff]  }
  0x12   : > { %v3465_v19 = vld [vmem:[%s3454_s25] sm:$0xff]  ;;  %v3471_v21 = vld [vmem:[%s3454_s25 + $0x10] sm:$0xff]  ;;  %v3321_v3 = vld [vmem:[%s3997_s1 + $0x198] sm:$0xff]  }
  0x13   : > { %1748 = vmatpush1.bf16.msra.mxu1 %v3288_v7  ;;  %2166 = vmatpush1.bf16.msra.mxu0 %v3289_v8  ;;  %v3468_v20 = vld [vmem:[%s3454_s25 + $0x20] sm:$0xff]  ;;  %v179_v23 = vld [vmem:[%s3454_s25 + $0x30] sm:$0xff] }
  0x14   : > { %1749 = vmatprep.subr.bf16.mxu1 %v3354_v1  ;;  %2167 = vmatprep.subr.bf16.mxu0 %v3354_v1  ;;  %v2759_v22 = vcombine.high %v3465_v19, %v3468_v20  ;;  %v2763_v25 = vcombine.high %v3471_v21, %v179_v23  ;;  %v181_v39 = vld [vmem:[%s3454_s25 + $0x40] sm:$0xff]  ;;  %v2758_v41 = vcombine.low %v3465_v19, %v3468_v20  ;;  %v183_v42 = vld [vmem:[%s3454_s25 + $0x50] sm:$0xff] }
  0x15   : > { %v185_v40 = vld [vmem:[%s3454_s25 + $0x60] sm:$0xff]  ;;  %v187_v43 = vld [vmem:[%s3454_s25 + $0x70] sm:$0xff]  ;;  %v2762_v44 = vcombine.low %v3471_v21, %v179_v23 }
  0x16   : > { %1773 = vmatprep.mubr.bf16.mxu1 %v2759_v22  ;;  %2191 = vmatprep.mubr.bf16.mxu0 %v2763_v25  ;;  %v2767_v47 = vcombine.high %v181_v39, %v185_v40  ;;  %v2771_v48 = vcombine.high %v183_v42, %v187_v43  ;;  %v189_v51 = vld [vmem:[%s3454_s25 + $0x80] sm:$0xff]  ;;  %v191_v53 = vld [vmem:[%s3454_s25 + $0x90] sm:$0xff]  ;;  %v2766_v55 = vcombine.low %v181_v39, %v185_v40  ;;  %v3333_v39 = vld [vmem:[%s3997_s1 + $0x1c8] sm:$0xff]  }
  0x17   : > { %1750 = vmatpush1.bf16.msra.mxu1 %v3290_v9  ;;  %2168 = vmatpush1.bf16.msra.mxu0 %v3291_v10  ;;  %v193_v52 = vld [vmem:[%s3454_s25 + $0xa0] sm:$0xff]  ;;  %v195_v54 = vld [vmem:[%s3454_s25 + $0xb0] sm:$0xff]  ;;  %v2770_v56 = vcombine.low %v183_v42, %v187_v43 }
  0x18   : > { %1751 = vmatprep.subr.bf16.mxu1 %v3354_v1  ;;  %2169 = vmatprep.subr.bf16.mxu0 %v3354_v1  ;;  %v2775_v57 = vcombine.high %v189_v51, %v193_v52  ;;  %v2779_v58 = vcombine.high %v191_v53, %v195_v54  ;;  %v3319_v60 = vld [vmem:[%s3997_s1 + $0x190] sm:$0xff]   ;;  %v197_v61 = vld [vmem:[%s3454_s25 + $0xc0] sm:$0xff]  ;;  %v2774_v4 = vcombine.low %v189_v51, %v193_v52  ;;  %v3337_v51 = vld [vmem:[%s3997_s1 + $0x1d8] sm:$0xff]  }
  0x19   : > { %v201_v62 = vld [vmem:[%s3454_s25 + $0xe0] sm:$0xff]  ;;  %v199_v63 = vld [vmem:[%s3454_s25 + $0xd0] sm:$0xff]  ;;  %v2778_v5 = vcombine.low %v191_v53, %v195_v54 }
  0x1a   : > { %v203_v0 = vld [vmem:[%s3454_s25 + $0xf0] sm:$0xff]  ;;  %v2783_v6 = vcombine.high %v197_v61, %v201_v62  ;;  %v3322_v8 = vld [vmem:[%s3997_s1 + $0xa0] sm:$0xff]  }
  0x1b   : > { %1752 = vmatpush1.bf16.msra.mxu1 %v3292_v11  ;;  %2170 = vmatpush1.bf16.msra.mxu0 %v3293_v12  ;;  %v2787_v7 = vcombine.high %v199_v63, %v203_v0  ;;  %v3323_v9 = vld [vmem:[%s3997_s1 + $0x1a0] sm:$0xff]   ;;  %v207_v12 = vld [vmem:[%s3454_s25 + $0x110] sm:$0xff] }
  0x1c   : > { %1753 = vmatprep.subr.bf16.mxu1 %v3354_v1  ;;  %2171 = vmatprep.subr.bf16.mxu0 %v3354_v1  ;;  %v205_v10 = vld [vmem:[%s3454_s25 + $0x100] sm:$0xff]  ;;  %v3326_v19 = vld [vmem:[%s3997_s1 + $0xb0] sm:$0xff]  }
  0x1d   : > { %v209_v11 = vld [vmem:[%s3454_s25 + $0x120] sm:$0xff]  ;;  %v3327_v20 = vld [vmem:[%s3997_s1 + $0x1b0] sm:$0xff]  }
  0x1e   : > { %v213_v22 = vld [vmem:[%s3454_s25 + $0x140] sm:$0xff]  ;;  %v215_v25 = vld [vmem:[%s3454_s25 + $0x150] sm:$0xff] }
  0x1f   : > { %1754 = vmatpush1.bf16.msra.mxu1 %v3294_v13  ;;  %2172 = vmatpush1.bf16.msra.mxu0 %v3295_v14  ;;  %v211_v13 = vld [vmem:[%s3454_s25 + $0x130] sm:$0xff]  ;;  %v3324_v14 = vld [vmem:[%s3997_s1 + $0xa8] sm:$0xff]   ;;  %v217_v23 = vld [vmem:[%s3454_s25 + $0x160] sm:$0xff] }
  0x20   : > { %1755 = vmatprep.subr.bf16.mxu1 %v3354_v1  ;;  %2173 = vmatprep.subr.bf16.mxu0 %v3354_v1  ;;  %v2795_v21 = vcombine.high %v207_v12, %v211_v13  ;;  %v2798_v40 = vcombine.low %v213_v22, %v217_v23 }
  0x23   : > { %1756 = vmatpush1.bf16.msra.mxu1 %v3296_v15  ;;  %2174 = vmatpush1.bf16.msra.mxu0 %v3297_v16  ;;  %v3325_v15 = vld [vmem:[%s3997_s1 + $0x1a8] sm:$0xff]   ;;  %v2782_v16 = vcombine.low %v197_v61, %v201_v62  ;;  %v239_v61 = vld [vmem:[%s3454_s25 + $0x210] sm:$0xff] }
  0x24   : > { %1757 = vmatprep.subr.bf16.mxu1 %v3354_v1  ;;  %2175 = vmatprep.subr.bf16.mxu0 %v3354_v1  ;;  %v243_v62 = vld [vmem:[%s3454_s25 + $0x230] sm:$0xff] }
  0x27   : > { %1758 = vmatpush1.bf16.msra.mxu1 %v3298_v17  ;;  %2176 = vmatpush1.bf16.msra.mxu0 %v3299_v18  ;;  %v2786_v17 = vcombine.low %v199_v63, %v203_v0  ;;  %v2791_v18 = vcombine.high %v205_v10, %v209_v11  ;;  %v3341_v63 = vld [vmem:[%s3997_s1 + $0x1e8] sm:$0xff]  }
  0x28   : > { %1759 = vmatprep.subr.bf16.mxu1 %v3354_v1  ;;  %2177 = vmatprep.subr.bf16.mxu0 %v3354_v1 }
  0x2b   : > { %1760 = vmatpush1.bf16.msra.mxu1 %v3300_v24  ;;  %2178 = vmatpush1.bf16.msra.mxu0 %v3301_v26  ;;  %v3328_v24 = vld [vmem:[%s3997_s1 + $0xb8] sm:$0xff]   ;;  %v219_v26 = vld [vmem:[%s3454_s25 + $0x170] sm:$0xff] }
  0x2c   : > { %1761 = vmatprep.subr.bf16.mxu1 %v3354_v1  ;;  %2179 = vmatprep.subr.bf16.mxu0 %v3354_v1 }
  0x2f   : > { %1762 = vmatpush1.bf16.msra.mxu1 %v3302_v27  ;;  %2180 = vmatpush1.bf16.msra.mxu0 %v3303_v28  ;;  %v3329_v27 = vld [vmem:[%s3997_s1 + $0x1b8] sm:$0xff]   ;;  %v2790_v28 = vcombine.low %v205_v10, %v209_v11  ;;  %v247_v10 = vld [vmem:[%s3454_s25 + $0x250] sm:$0xff] }
  0x30   : > { %1763 = vmatprep.subr.bf16.mxu1 %v3354_v1  ;;  %2181 = vmatprep.subr.bf16.mxu0 %v3354_v1  ;;  %v251_v11 = vld [vmem:[%s3454_s25 + $0x270] sm:$0xff] }
  0x33   : > { %1764 = vmatpush1.bf16.msra.mxu1 %v3304_v29  ;;  %2182 = vmatpush1.bf16.msra.mxu0 %v3305_v30  ;;  %v2794_v29 = vcombine.low %v207_v12, %v211_v13  ;;  %v2799_v30 = vcombine.high %v213_v22, %v217_v23  ;;  %v3345_v12 = vld [vmem:[%s3997_s1 + $0x1f8] sm:$0xff]   ;;  %v2834_v22 = vcombine.low %v247_v10, %v251_v11 }
  0x34   : > { %1765 = vmatprep.subr.bf16.mxu1 %v3354_v1  ;;  %2183 = vmatprep.subr.bf16.mxu0 %v3354_v1 }
  0x37   : > { %1766 = vmatpush1.bf16.msra.mxu1 %v3306_v31  ;;  %2184 = vmatpush1.bf16.msra.mxu0 %v3307_v32  ;;  %v2803_v31 = vcombine.high %v215_v25, %v219_v26  ;;  %v3330_v32 = vld [vmem:[%s3997_s1 + $0xc0] sm:$0xff]  }
  0x38   : > { %1767 = vmatprep.subr.bf16.mxu1 %v3354_v1  ;;  %2185 = vmatprep.subr.bf16.mxu0 %v3354_v1 }
  0x3b   : > { %1768 = vmatpush1.bf16.msra.mxu1 %v3308_v33  ;;  %2186 = vmatpush1.bf16.msra.mxu0 %v3309_v34  ;;  %v3331_v33 = vld [vmem:[%s3997_s1 + $0x1c0] sm:$0xff]  }
  0x3c   : > { %1769 = vmatprep.subr.bf16.mxu1 %v3354_v1  ;;  %2187 = vmatprep.subr.bf16.mxu0 %v3354_v1  ;;  %v221_v34 = vld [vmem:[%s3454_s25 + $0x180] sm:$0xff] }
  0x3f   : > { %1770 = vmatpush1.bf16.msra.mxu1 %v3310_v35  ;;  %2188 = vmatpush1.bf16.msra.mxu0 %v3311_v36  ;;  %v225_v35 = vld [vmem:[%s3454_s25 + $0x1a0] sm:$0xff]  ;;  %v3332_v36 = vld [vmem:[%s3997_s1 + $0xc8] sm:$0xff]  }
  0x40   : > { %1771 = vmatprep.subr.bf16.mxu1 %v3354_v1  ;;  %2189 = vmatprep.subr.bf16.mxu0 %v3354_v1  ;;  %v2807_v42 = vcombine.high %v221_v34, %v225_v35  ;;  %v2806_v52 = vcombine.low %v221_v34, %v225_v35  ;;  %v271_v34 = vld [vmem:[%s3454_s25 + $0x310] sm:$0xff] }
  0x41   : > { %v275_v35 = vld [vmem:[%s3454_s25 + $0x330] sm:$0xff] }
  0x43   : > { %1772 = vmatpush1.bf16.msra.mxu1 %v3312_v37  ;;  %2190 = vmatpush1.bf16.msra.mxu0 %v3313_v38  ;;  %v223_v37 = vld [vmem:[%s3454_s25 + $0x190] sm:$0xff] }
  0x44   : > { %1950 = vmatprep.subr.bf16.mxu1 %v3354_v1  ;;  %2368 = vmatprep.subr.bf16.mxu0 %v3354_v1  ;;  %v227_v38 = vld [vmem:[%s3454_s25 + $0x1b0] sm:$0xff] }
  0x45   : > { %v2811_v43 = vcombine.high %v223_v37, %v227_v38  ;;  %v2810_v53 = vcombine.low %v223_v37, %v227_v38 }
  0x46   : > { %1774 = vmatmul.mubr.bf16.vlgmr.msra.gmra.mrb[0].mxu1 %v2758_v41  ;;  %2192 = vmatmul.mubr.bf16.vlgmr.msra.gmra.mrb[0].mxu0 %v2762_v44  ;;  %v2802_v41 = vcombine.low %v215_v25, %v219_v26  ;;  %v3334_v44 = vld [vmem:[%s3997_s1 + $0xd0] sm:$0xff]   ;;  %v265_v25 = vld [vmem:[%s3454_s25 + $0x2e0] sm:$0xff] }
  0x47   : > { %1951 = vmatpush1.bf16.msra.mxu1 %v3314_v45  ;;  %2369 = vmatpush1.bf16.msra.mxu0 %v3315_v46  ;;  %v3335_v45 = vld [vmem:[%s3997_s1 + $0x1d0] sm:$0xff]   ;;  %v229_v46 = vld [vmem:[%s3454_s25 + $0x1c0] sm:$0xff] }
  0x48   : > { %1781 = vmatprep.mubr.bf16.mxu1 %v2767_v47  ;;  %2199 = vmatprep.mubr.bf16.mxu0 %v2771_v48  ;;  %v233_v47 = vld [vmem:[%s3454_s25 + $0x1e0] sm:$0xff]  ;;  %v3336_v48 = vld [vmem:[%s3997_s1 + $0xd8] sm:$0xff]   ;;  %v263_v26 = vld [vmem:[%s3454_s25 + $0x2d0] sm:$0xff] }
  0x49   : > { %1952 = vmatprep.subr.bf16.mxu1 %v3354_v1  ;;  %2370 = vmatprep.subr.bf16.mxu0 %v3354_v1  ;;  %v2815_v54 = vcombine.high %v229_v46, %v233_v47  ;;  %v2814_v0 = vcombine.low %v229_v46, %v233_v47 }
  0x4b   : > { %1953 = vmatpush1.bf16.msra.mxu1 %v3316_v49  ;;  %2371 = vmatpush1.bf16.msra.mxu0 %v3317_v50  ;;  %v231_v49 = vld [vmem:[%s3454_s25 + $0x1d0] sm:$0xff] }
  0x4c   : > { %1954 = vmatprep.subr.bf16.mxu1 %v3354_v1  ;;  %2372 = vmatprep.subr.bf16.mxu0 %v3354_v1  ;;  %v235_v50 = vld [vmem:[%s3454_s25 + $0x1f0] sm:$0xff] }
  0x4e   : > { %1782 = vmatmul.mubr.bf16.gmra.mrb[4].mxu1 %v2766_v55  ;;  %2200 = vmatmul.mubr.bf16.gmra.mrb[4].mxu0 %v2770_v56  ;;  %v2819_v55 = vcombine.high %v231_v49, %v235_v50  ;;  %v3338_v56 = vld [vmem:[%s3997_s1 + $0xe0] sm:$0xff]  }
  0x4f   : > { %1789 = vmatprep.mubr.bf16.mxu1 %v2775_v57  ;;  %2207 = vmatprep.mubr.bf16.mxu0 %v2779_v58  ;;  %v3339_v57 = vld [vmem:[%s3997_s1 + $0x1e0] sm:$0xff]  }
  0x50   : > { %1955 = vmatpush1.bf16.msra.mxu1 %v3318_v59  ;;  %2373 = vmatpush1.bf16.msra.mxu0 %v3319_v60  ;;  %v237_v58 = vld [vmem:[%s3454_s25 + $0x200] sm:$0xff]  ;;  %v3340_v60 = vld [vmem:[%s3997_s1 + $0xe8] sm:$0xff]  }
  0x51   : > { %1956 = vmatprep.subr.bf16.mxu1 %v3354_v1  ;;  %2374 = vmatprep.subr.bf16.mxu0 %v3354_v1  ;;  %v241_v59 = vld [vmem:[%s3454_s25 + $0x220] sm:$0xff] }
  0x52   : > { %v2822_v13 = vcombine.low %v237_v58, %v241_v59 }
  0x54   : > { %1957 = vmatpush1.bf16.msra.mxu1 %v3320_v2  ;;  %2375 = vmatpush1.bf16.msra.mxu0 %v3321_v3  ;;  %v2818_v2 = vcombine.low %v231_v49, %v235_v50  ;;  %v2823_v3 = vcombine.high %v237_v58, %v241_v59  ;;  %v289_v49 = vld [vmem:[%s3454_s25 + $0x3a0] sm:$0xff]  ;;  %v287_v50 = vld [vmem:[%s3454_s25 + $0x390] sm:$0xff] }
  0x55   : > { %1958 = vmatprep.subr.bf16.mxu1 %v3354_v1  ;;  %2376 = vmatprep.subr.bf16.mxu0 %v3354_v1  ;;  %v295_v58 = vld [vmem:[%s3454_s25 + $0x3d0] sm:$0xff] }
  0x56   : > { %1790 = vmatmul.mubr.bf16.gmra.mrb[8].mxu1 %v2774_v4  ;;  %2208 = vmatmul.mubr.bf16.gmra.mrb[8].mxu0 %v2778_v5  ;;  %v2827_v4 = vcombine.high %v239_v61, %v243_v62  ;;  %v3342_v5 = vld [vmem:[%s3997_s1 + $0xf0] sm:$0xff]  }
  0x57   : > { %1797 = vmatprep.mubr.bf16.mxu1 %v2783_v6  ;;  %2215 = vmatprep.mubr.bf16.mxu0 %v2787_v7  ;;  %v3343_v6 = vld [vmem:[%s3997_s1 + $0x1f0] sm:$0xff]   ;;  %v245_v7 = vld [vmem:[%s3454_s25 + $0x240] sm:$0xff] }
  0x58   : > { %1959 = vmatpush1.bf16.msra.mxu1 %v3322_v8  ;;  %2377 = vmatpush1.bf16.msra.mxu0 %v3323_v9  ;;  %v249_v8 = vld [vmem:[%s3454_s25 + $0x260] sm:$0xff]  ;;  %v3344_v9 = vld [vmem:[%s3997_s1 + $0xf8] sm:$0xff]   ;;  %v299_v59 = vld [vmem:[%s3454_s25 + $0x3f0] sm:$0xff] }
  0x59   : > { %1960 = vmatprep.subr.bf16.mxu1 %v3354_v1  ;;  %2378 = vmatprep.subr.bf16.mxu0 %v3354_v1 }
  0x5c   : > { %1961 = vmatpush1.bf16.msra.mxu1 %v3324_v14  ;;  %2379 = vmatpush1.bf16.msra.mxu0 %v3325_v15  ;;  %v2826_v14 = vcombine.low %v239_v61, %v243_v62  ;;  %v2831_v15 = vcombine.high %v245_v7, %v249_v8 }
  0x5d   : > { %1962 = vmatprep.subr.bf16.mxu1 %v3354_v1  ;;  %2380 = vmatprep.subr.bf16.mxu0 %v3354_v1 }
  0x5e   : > { %1798 = vmatmul.mubr.bf16.gmra.mrb[12].mxu1 %v2782_v16  ;;  %2216 = vmatmul.mubr.bf16.gmra.mrb[12].mxu0 %v2786_v17  ;;  %v2835_v16 = vcombine.high %v247_v10, %v251_v11  ;;  %v253_v17 = vld [vmem:[%s3454_s25 + $0x280] sm:$0xff]  ;;  %v311_v11 = vld [vmem:[%s3454_s25 + $0x450] sm:$0xff] }
  0x5f   : > { %1805 = vmatprep.mubr.bf16.mxu1 %v2791_v18  ;;  %2223 = vmatprep.mubr.bf16.mxu0 %v2795_v21  ;;  %v257_v18 = vld [vmem:[%s3454_s25 + $0x2a0] sm:$0xff]  ;;  %v2830_v21 = vcombine.low %v245_v7, %v249_v8 }
  0x60   : > { %1963 = vmatpush1.bf16.msra.mxu1 %v3326_v19  ;;  %2381 = vmatpush1.bf16.msra.mxu0 %v3327_v20  ;;  %v255_v19 = vld [vmem:[%s3454_s25 + $0x290] sm:$0xff]  ;;  %v313_v10 = vld [vmem:[%s3454_s25 + $0x460] sm:$0xff] }
  0x61   : > { %1964 = vmatprep.subr.bf16.mxu1 %v3354_v1  ;;  %2382 = vmatprep.subr.bf16.mxu0 %v3354_v1  ;;  %v259_v20 = vld [vmem:[%s3454_s25 + $0x2b0] sm:$0xff] }
  0x62   : > { %v2843_v23 = vcombine.high %v255_v19, %v259_v20 }
  0x64   : > { %1965 = vmatpush1.bf16.msra.mxu1 %v3328_v24  ;;  %2383 = vmatpush1.bf16.msra.mxu0 %v3329_v27  ;;  %v261_v24 = vld [vmem:[%s3454_s25 + $0x2c0] sm:$0xff]  ;;  %v267_v27 = vld [vmem:[%s3454_s25 + $0x2f0] sm:$0xff] }
  0x65   : > { %1966 = vmatprep.subr.bf16.mxu1 %v3354_v1  ;;  %2384 = vmatprep.subr.bf16.mxu0 %v3354_v1  ;;  %v2850_v37 = vcombine.low %v263_v26, %v267_v27 }
  0x66   : > { %1806 = vmatmul.mubr.bf16.gmra.mrb[16].mxu1 %v2790_v28  ;;  %2224 = vmatmul.mubr.bf16.gmra.mrb[16].mxu0 %v2794_v29  ;;  %v2838_v28 = vcombine.low %v253_v17, %v257_v18  ;;  %v2842_v29 = vcombine.low %v255_v19, %v259_v20  ;;  %v319_v19 = vld [vmem:[%s3454_s25 + $0x490] sm:$0xff] }
  0x67   : > { %1813 = vmatprep.mubr.bf16.mxu1 %v2799_v30  ;;  %2231 = vmatprep.mubr.bf16.mxu0 %v2803_v31  ;;  %v2847_v30 = vcombine.high %v261_v24, %v265_v25  ;;  %v2851_v31 = vcombine.high %v263_v26, %v267_v27  ;;  %v323_v20 = vld [vmem:[%s3454_s25 + $0x4b0] sm:$0xff] }
  0x68   : > { %1967 = vmatpush1.bf16.msra.mxu1 %v3330_v32  ;;  %2385 = vmatpush1.bf16.msra.mxu0 %v3331_v33  ;;  %v269_v32 = vld [vmem:[%s3454_s25 + $0x300] sm:$0xff]  ;;  %v327_v26 = vld [vmem:[%s3454_s25 + $0x4d0] sm:$0xff] }
  0x69   : > { %1968 = vmatprep.subr.bf16.mxu1 %v3354_v1  ;;  %2386 = vmatprep.subr.bf16.mxu0 %v3354_v1  ;;  %v273_v33 = vld [vmem:[%s3454_s25 + $0x320] sm:$0xff]  ;;  %v331_v27 = vld [vmem:[%s3454_s25 + $0x4f0] sm:$0xff] }
  0x6a   : > { %v2855_v38 = vcombine.high %v269_v32, %v273_v33 }
  0x6c   : > { %1969 = vmatpush1.bf16.msra.mxu1 %v3332_v36  ;;  %2387 = vmatpush1.bf16.msra.mxu0 %v3333_v39  ;;  %v2846_v36 = vcombine.low %v261_v24, %v265_v25  ;;  %v2859_v39 = vcombine.high %v271_v34, %v275_v35  ;;  %v325_v24 = vld [vmem:[%s3454_s25 + $0x4c0] sm:$0xff] }
  0x6d   : > { %1970 = vmatprep.subr.bf16.mxu1 %v3354_v1  ;;  %2388 = vmatprep.subr.bf16.mxu0 %v3354_v1  ;;  %v329_v25 = vld [vmem:[%s3454_s25 + $0x4e0] sm:$0xff] }
  0x6e   : > { %1814 = vmatmul.mubr.bf16.gmra.mrb[20].mxu1 %v2798_v40  ;;  %2232 = vmatmul.mubr.bf16.gmra.mrb[20].mxu0 %v2802_v41  ;;  %v277_v40 = vld [vmem:[%s3454_s25 + $0x340] sm:$0xff] }
  0x6f   : > { %1821 = vmatprep.mubr.bf16.mxu1 %v2807_v42  ;;  %2239 = vmatprep.mubr.bf16.mxu0 %v2811_v43  ;;  %v281_v41 = vld [vmem:[%s3454_s25 + $0x360] sm:$0xff]  ;;  %v279_v42 = vld [vmem:[%s3454_s25 + $0x350] sm:$0xff] }
  0x70   : > { %1971 = vmatpush1.bf16.msra.mxu1 %v3334_v44  ;;  %2389 = vmatpush1.bf16.msra.mxu0 %v3335_v45  ;;  %v283_v43 = vld [vmem:[%s3454_s25 + $0x370] sm:$0xff]  ;;  %v2854_v44 = vcombine.low %v269_v32, %v273_v33  ;;  %v2858_v45 = vcombine.low %v271_v34, %v275_v35  ;;  %v2863_v46 = vcombine.high %v277_v40, %v281_v41  ;;  %v333_v32 = vld [vmem:[%s3454_s25 + $0x500] sm:$0xff] }
  0x71   : > { %1972 = vmatprep.subr.bf16.mxu1 %v3354_v1  ;;  %2390 = vmatprep.subr.bf16.mxu0 %v3354_v1  ;;  %v2867_v47 = vcombine.high %v279_v42, %v283_v43  ;;  %v337_v33 = vld [vmem:[%s3454_s25 + $0x520] sm:$0xff]  ;;  %v335_v34 = vld [vmem:[%s3454_s25 + $0x510] sm:$0xff] }
  0x72   : > { %v339_v35 = vld [vmem:[%s3454_s25 + $0x530] sm:$0xff] }
  0x74   : > { %1973 = vmatpush1.bf16.msra.mxu1 %v3336_v48  ;;  %2391 = vmatpush1.bf16.msra.mxu0 %v3337_v51  ;;  %v285_v48 = vld [vmem:[%s3454_s25 + $0x380] sm:$0xff]  ;;  %v291_v51 = vld [vmem:[%s3454_s25 + $0x3b0] sm:$0xff] }
  0x75   : > { %1974 = vmatprep.subr.bf16.mxu1 %v3354_v1  ;;  %2392 = vmatprep.subr.bf16.mxu0 %v3354_v1  ;;  %v2874_v61 = vcombine.low %v287_v50, %v291_v51 }
  0x76   : > { %1822 = vmatmul.mubr.bf16.gmra.mrb[24].mxu1 %v2806_v52  ;;  %2240 = vmatmul.mubr.bf16.gmra.mrb[24].mxu0 %v2810_v53  ;;  %v2862_v52 = vcombine.low %v277_v40, %v281_v41  ;;  %v2866_v53 = vcombine.low %v279_v42, %v283_v43  ;;  %v341_v40 = vld [vmem:[%s3454_s25 + $0x540] sm:$0xff]  ;;  %v343_v42 = vld [vmem:[%s3454_s25 + $0x550] sm:$0xff] }
  0x77   : > { %1829 = vmatprep.mubr.bf16.mxu1 %v2815_v54  ;;  %2247 = vmatprep.mubr.bf16.mxu0 %v2819_v55  ;;  %v2871_v54 = vcombine.high %v285_v48, %v289_v49  ;;  %v2875_v55 = vcombine.high %v287_v50, %v291_v51  ;;  %v345_v41 = vld [vmem:[%s3454_s25 + $0x560] sm:$0xff]  ;;  %v347_v43 = vld [vmem:[%s3454_s25 + $0x570] sm:$0xff]  ;;  %v176_v50 = vld [vmem:[%s3454_s25 + $0x18] sm:$0xff] }
  0x78   : > { %1975 = vmatpush1.bf16.msra.mxu1 %v3338_v56  ;;  %2393 = vmatpush1.bf16.msra.mxu0 %v3339_v57  ;;  %v293_v56 = vld [vmem:[%s3454_s25 + $0x3c0] sm:$0xff]  ;;  %v180_v51 = vld [vmem:[%s3454_s25 + $0x38] sm:$0xff] }
  0x79   : > { %1976 = vmatprep.subr.bf16.mxu1 %v3354_v1  ;;  %2394 = vmatprep.subr.bf16.mxu0 %v3354_v1  ;;  %v297_v57 = vld [vmem:[%s3454_s25 + $0x3e0] sm:$0xff] }
  0x7a   : > { %v2879_v62 = vcombine.high %v293_v56, %v297_v57 }
  0x7c   : > { %1977 = vmatpush1.bf16.msra.mxu1 %v3340_v60  ;;  %2395 = vmatpush1.bf16.msra.mxu0 %v3341_v63  ;;  %v2870_v60 = vcombine.low %v285_v48, %v289_v49  ;;  %v2883_v63 = vcombine.high %v295_v58, %v299_v59  ;;  %v174_v48 = vld [vmem:[%s3454_s25 + $0x8] sm:$0xff] }
  0x7d   : > { %1978 = vmatprep.subr.bf16.mxu1 %v3354_v1  ;;  %2396 = vmatprep.subr.bf16.mxu0 %v3354_v1  ;;  %v178_v49 = vld [vmem:[%s3454_s25 + $0x28] sm:$0xff] }
  0x7e   : > { %1830 = vmatmul.mubr.bf16.gmra.mrb[28].mxu1 %v2814_v0  ;;  %2248 = vmatmul.mubr.bf16.gmra.mrb[28].mxu0 %v2818_v2  ;;  %v301_v0 = vld [vmem:[%s3454_s25 + $0x400] sm:$0xff] }
  0x7f   : > { %1837 = vmatprep.mubr.bf16.mxu1 %v2823_v3  ;;  %2255 = vmatprep.mubr.bf16.mxu0 %v2827_v4  ;;  %v305_v2 = vld [vmem:[%s3454_s25 + $0x420] sm:$0xff]  ;;  %v303_v3 = vld [vmem:[%s3454_s25 + $0x410] sm:$0xff] }
  0x80   : > { %1979 = vmatpush1.bf16.msra.mxu1 %v3342_v5  ;;  %2397 = vmatpush1.bf16.msra.mxu0 %v3343_v6  ;;  %v307_v4 = vld [vmem:[%s3454_s25 + $0x430] sm:$0xff]  ;;  %v2878_v5 = vcombine.low %v293_v56, %v297_v57  ;;  %v2882_v6 = vcombine.low %v295_v58, %v299_v59  ;;  %v2887_v7 = vcombine.high %v301_v0, %v305_v2  ;;  %v182_v56 = vld [vmem:[%s3454_s25 + $0x48] sm:$0xff]  ;;  %v184_v58 = vld [vmem:[%s3454_s25 + $0x58] sm:$0xff] }
  0x81   : > { %1980 = vmatprep.subr.bf16.mxu1 %v3354_v1  ;;  %2398 = vmatprep.subr.bf16.mxu0 %v3354_v1  ;;  %v2839_v1 = vcombine.high %v253_v17, %v257_v18  ;;  %v2891_v8 = vcombine.high %v303_v3, %v307_v4  ;;  %v317_v17 = vld [vmem:[%s3454_s25 + $0x480] sm:$0xff]  ;;  %v186_v57 = vld [vmem:[%s3454_s25 + $0x68] sm:$0xff]  ;;  %v188_v59 = vld [vmem:[%s3454_s25 + $0x78] sm:$0xff] }
  0x82   : > { %v321_v18 = vld [vmem:[%s3454_s25 + $0x4a0] sm:$0xff] }
  0x84   : > { %1981 = vmatpush1.bf16.msra.mxu1 %v3344_v9  ;;  %2399 = vmatpush1.bf16.msra.mxu0 %v3345_v12  ;;  %v309_v9 = vld [vmem:[%s3454_s25 + $0x440] sm:$0xff]  ;;  %v315_v12 = vld [vmem:[%s3454_s25 + $0x470] sm:$0xff] }
  0x86   : > { %1838 = vmatmul.mubr.bf16.gmra.mrb[32].mxu1 %v2822_v13  ;;  %2256 = vmatmul.mubr.bf16.gmra.mrb[32].mxu0 %v2826_v14  ;;  %v2886_v13 = vcombine.low %v301_v0, %v305_v2  ;;  %v2890_v14 = vcombine.low %v303_v3, %v307_v4  ;;  %v190_v0 = vld [vmem:[%s3454_s25 + $0x88] sm:$0xff]  ;;  %v192_v3 = vld [vmem:[%s3454_s25 + $0x98] sm:$0xff] }
  0x87   : > { %1845 = vmatprep.mubr.bf16.mxu1 %v2831_v15  ;;  %2263 = vmatprep.mubr.bf16.mxu0 %v2835_v16  ;;  %v2895_v15 = vcombine.high %v309_v9, %v313_v10  ;;  %v2899_v16 = vcombine.high %v311_v11, %v315_v12  ;;  %v194_v2 = vld [vmem:[%s3454_s25 + $0xa8] sm:$0xff]  ;;  %v196_v4 = vld [vmem:[%s3454_s25 + $0xb8] sm:$0xff] }
  0x8e   : > { %1846 = vmatmul.mubr.bf16.gmra.mrb[36].mxu1 %v2830_v21  ;;  %2264 = vmatmul.mubr.bf16.gmra.mrb[36].mxu0 %v2834_v22  ;;  %v2894_v21 = vcombine.low %v309_v9, %v313_v10  ;;  %v2898_v22 = vcombine.low %v311_v11, %v315_v12  ;;  %v198_v9 = vld [vmem:[%s3454_s25 + $0xc8] sm:$0xff]  ;;  %v200_v11 = vld [vmem:[%s3454_s25 + $0xd8] sm:$0xff] }
  0x8f   : > { %1853 = vmatprep.mubr.bf16.mxu1 %v2839_v1  ;;  %2271 = vmatprep.mubr.bf16.mxu0 %v2843_v23  ;;  %v2903_v1 = vcombine.high %v317_v17, %v321_v18  ;;  %v2907_v23 = vcombine.high %v319_v19, %v323_v20  ;;  %v202_v10 = vld [vmem:[%s3454_s25 + $0xe8] sm:$0xff]  ;;  %v204_v12 = vld [vmem:[%s3454_s25 + $0xf8] sm:$0xff] }
  0x96   : > { %1854 = vmatmul.mubr.bf16.gmra.mrb[40].mxu1 %v2838_v28  ;;  %2272 = vmatmul.mubr.bf16.gmra.mrb[40].mxu0 %v2842_v29  ;;  %v2902_v28 = vcombine.low %v317_v17, %v321_v18  ;;  %v2906_v29 = vcombine.low %v319_v19, %v323_v20  ;;  %v206_v17 = vld [vmem:[%s3454_s25 + $0x108] sm:$0xff]  ;;  %v208_v19 = vld [vmem:[%s3454_s25 + $0x118] sm:$0xff] }
  0x97   : > { %1861 = vmatprep.mubr.bf16.mxu1 %v2847_v30  ;;  %2279 = vmatprep.mubr.bf16.mxu0 %v2851_v31  ;;  %v2911_v30 = vcombine.high %v325_v24, %v329_v25  ;;  %v2915_v31 = vcombine.high %v327_v26, %v331_v27  ;;  %v210_v18 = vld [vmem:[%s3454_s25 + $0x128] sm:$0xff]  ;;  %v212_v20 = vld [vmem:[%s3454_s25 + $0x138] sm:$0xff] }
  0x9e   : > { %1862 = vmatmul.mubr.bf16.gmra.mrb[44].mxu1 %v2846_v36  ;;  %2280 = vmatmul.mubr.bf16.gmra.mrb[44].mxu0 %v2850_v37  ;;  %v2910_v36 = vcombine.low %v325_v24, %v329_v25  ;;  %v2914_v37 = vcombine.low %v327_v26, %v331_v27  ;;  %v214_v24 = vld [vmem:[%s3454_s25 + $0x148] sm:$0xff]  ;;  %v216_v26 = vld [vmem:[%s3454_s25 + $0x158] sm:$0xff] }
  0x9f   : > { %1869 = vmatprep.mubr.bf16.mxu1 %v2855_v38  ;;  %2287 = vmatprep.mubr.bf16.mxu0 %v2859_v39  ;;  %v2919_v38 = vcombine.high %v333_v32, %v337_v33  ;;  %v2923_v39 = vcombine.high %v335_v34, %v339_v35  ;;  %v218_v25 = vld [vmem:[%s3454_s25 + $0x168] sm:$0xff]  ;;  %v220_v27 = vld [vmem:[%s3454_s25 + $0x178] sm:$0xff] }
  0xa6   : > { %1870 = vmatmul.mubr.bf16.gmra.mrb[48].mxu1 %v2854_v44  ;;  %2288 = vmatmul.mubr.bf16.gmra.mrb[48].mxu0 %v2858_v45  ;;  %v2918_v44 = vcombine.low %v333_v32, %v337_v33  ;;  %v2922_v45 = vcombine.low %v335_v34, %v339_v35  ;;  %v222_v32 = vld [vmem:[%s3454_s25 + $0x188] sm:$0xff]  ;;  %v224_v34 = vld [vmem:[%s3454_s25 + $0x198] sm:$0xff] }
  0xa7   : > { %1877 = vmatprep.mubr.bf16.mxu1 %v2863_v46  ;;  %2295 = vmatprep.mubr.bf16.mxu0 %v2867_v47  ;;  %v2927_v46 = vcombine.high %v341_v40, %v345_v41  ;;  %v2931_v47 = vcombine.high %v343_v42, %v347_v43  ;;  %v226_v33 = vld [vmem:[%s3454_s25 + $0x1a8] sm:$0xff]  ;;  %v228_v35 = vld [vmem:[%s3454_s25 + $0x1b8] sm:$0xff] }
  0xae   : > { %1878 = vmatmul.mubr.bf16.gmra.mrb[52].mxu1 %v2862_v52  ;;  %2296 = vmatmul.mubr.bf16.gmra.mrb[52].mxu0 %v2866_v53  ;;  %v2926_v52 = vcombine.low %v341_v40, %v345_v41  ;;  %v2930_v53 = vcombine.low %v343_v42, %v347_v43  ;;  %v230_v40 = vld [vmem:[%s3454_s25 + $0x1c8] sm:$0xff]  ;;  %v232_v42 = vld [vmem:[%s3454_s25 + $0x1d8] sm:$0xff] }
  0xaf   : > { %1885 = vmatprep.mubr.bf16.mxu1 %v2871_v54  ;;  %2303 = vmatprep.mubr.bf16.mxu0 %v2875_v55  ;;  %v2761_v54 = vcombine.high %v174_v48, %v178_v49  ;;  %v2765_v55 = vcombine.high %v176_v50, %v180_v51  ;;  %v234_v41 = vld [vmem:[%s3454_s25 + $0x1e8] sm:$0xff]  ;;  %v236_v43 = vld [vmem:[%s3454_s25 + $0x1f8] sm:$0xff] }
  0xb6   : > { %1886 = vmatmul.mubr.bf16.gmra.mrb[56].mxu1 %v2870_v60  ;;  %2304 = vmatmul.mubr.bf16.gmra.mrb[56].mxu0 %v2874_v61  ;;  %v2760_v60 = vcombine.low %v174_v48, %v178_v49  ;;  %v2764_v61 = vcombine.low %v176_v50, %v180_v51  ;;  %v238_v48 = vld [vmem:[%s3454_s25 + $0x208] sm:$0xff]  ;;  %v240_v50 = vld [vmem:[%s3454_s25 + $0x218] sm:$0xff] }
  0xb7   : > { %1893 = vmatprep.mubr.bf16.mxu1 %v2879_v62  ;;  %2311 = vmatprep.mubr.bf16.mxu0 %v2883_v63  ;;  %v2769_v62 = vcombine.high %v182_v56, %v186_v57  ;;  %v2773_v63 = vcombine.high %v184_v58, %v188_v59  ;;  %v242_v49 = vld [vmem:[%s3454_s25 + $0x228] sm:$0xff]  ;;  %v244_v51 = vld [vmem:[%s3454_s25 + $0x238] sm:$0xff] }
  0xbe   : > { %1894 = vmatmul.mubr.bf16.gmra.mrb[60].mxu1 %v2878_v5  ;;  %2312 = vmatmul.mubr.bf16.gmra.mrb[60].mxu0 %v2882_v6  ;;  %v2768_v5 = vcombine.low %v182_v56, %v186_v57  ;;  %v2772_v6 = vcombine.low %v184_v58, %v188_v59  ;;  %v246_v56 = vld [vmem:[%s3454_s25 + $0x248] sm:$0xff]  ;;  %v248_v58 = vld [vmem:[%s3454_s25 + $0x258] sm:$0xff] }
  0xbf   : > { %1901 = vmatprep.mubr.bf16.mxu1 %v2887_v7  ;;  %2319 = vmatprep.mubr.bf16.mxu0 %v2891_v8  ;;  %v2777_v7 = vcombine.high %v190_v0, %v194_v2  ;;  %v2781_v8 = vcombine.high %v192_v3, %v196_v4  ;;  %v250_v57 = vld [vmem:[%s3454_s25 + $0x268] sm:$0xff]  ;;  %v252_v59 = vld [vmem:[%s3454_s25 + $0x278] sm:$0xff] }
  0xc6   : > { %1902 = vmatmul.mubr.bf16.gmra.mrb[64].mxu1 %v2886_v13  ;;  %2320 = vmatmul.mubr.bf16.gmra.mrb[64].mxu0 %v2890_v14  ;;  %v2776_v13 = vcombine.low %v190_v0, %v194_v2  ;;  %v2780_v14 = vcombine.low %v192_v3, %v196_v4  ;;  %v254_v0 = vld [vmem:[%s3454_s25 + $0x288] sm:$0xff]  ;;  %v256_v3 = vld [vmem:[%s3454_s25 + $0x298] sm:$0xff] }
  0xc7   : > { %1909 = vmatprep.mubr.bf16.mxu1 %v2895_v15  ;;  %2327 = vmatprep.mubr.bf16.mxu0 %v2899_v16  ;;  %v2785_v15 = vcombine.high %v198_v9, %v202_v10  ;;  %v2789_v16 = vcombine.high %v200_v11, %v204_v12  ;;  %v258_v2 = vld [vmem:[%s3454_s25 + $0x2a8] sm:$0xff]  ;;  %v260_v4 = vld [vmem:[%s3454_s25 + $0x2b8] sm:$0xff] }
  0xce   : > { %1910 = vmatmul.mubr.bf16.gmra.mrb[68].mxu1 %v2894_v21  ;;  %2328 = vmatmul.mubr.bf16.gmra.mrb[68].mxu0 %v2898_v22  ;;  %v2784_v21 = vcombine.low %v198_v9, %v202_v10  ;;  %v2788_v22 = vcombine.low %v200_v11, %v204_v12  ;;  %v262_v9 = vld [vmem:[%s3454_s25 + $0x2c8] sm:$0xff]  ;;  %v264_v11 = vld [vmem:[%s3454_s25 + $0x2d8] sm:$0xff] }
  0xcf   : > { %1917 = vmatprep.mubr.bf16.mxu1 %v2903_v1  ;;  %2335 = vmatprep.mubr.bf16.mxu0 %v2907_v23  ;;  %v2793_v1 = vcombine.high %v206_v17, %v210_v18  ;;  %v2797_v23 = vcombine.high %v208_v19, %v212_v20  ;;  %v266_v10 = vld [vmem:[%s3454_s25 + $0x2e8] sm:$0xff]  ;;  %v268_v12 = vld [vmem:[%s3454_s25 + $0x2f8] sm:$0xff] }
  0xd6   : > { %1918 = vmatmul.mubr.bf16.gmra.mrb[72].mxu1 %v2902_v28  ;;  %2336 = vmatmul.mubr.bf16.gmra.mrb[72].mxu0 %v2906_v29  ;;  %v2792_v28 = vcombine.low %v206_v17, %v210_v18  ;;  %v2796_v29 = vcombine.low %v208_v19, %v212_v20  ;;  %v270_v17 = vld [vmem:[%s3454_s25 + $0x308] sm:$0xff]  ;;  %v272_v19 = vld [vmem:[%s3454_s25 + $0x318] sm:$0xff] }
  0xd7   : > { %1925 = vmatprep.mubr.bf16.mxu1 %v2911_v30  ;;  %2343 = vmatprep.mubr.bf16.mxu0 %v2915_v31  ;;  %v2801_v30 = vcombine.high %v214_v24, %v218_v25  ;;  %v2805_v31 = vcombine.high %v216_v26, %v220_v27  ;;  %v274_v18 = vld [vmem:[%s3454_s25 + $0x328] sm:$0xff]  ;;  %v276_v20 = vld [vmem:[%s3454_s25 + $0x338] sm:$0xff] }
  0xde   : > { %1926 = vmatmul.mubr.bf16.gmra.mrb[76].mxu1 %v2910_v36  ;;  %2344 = vmatmul.mubr.bf16.gmra.mrb[76].mxu0 %v2914_v37  ;;  %v2800_v36 = vcombine.low %v214_v24, %v218_v25  ;;  %v2804_v37 = vcombine.low %v216_v26, %v220_v27  ;;  %v278_v24 = vld [vmem:[%s3454_s25 + $0x348] sm:$0xff]  ;;  %v280_v26 = vld [vmem:[%s3454_s25 + $0x358] sm:$0xff] }
  0xdf   : > { %1933 = vmatprep.mubr.bf16.mxu1 %v2919_v38  ;;  %2351 = vmatprep.mubr.bf16.mxu0 %v2923_v39  ;;  %v2809_v38 = vcombine.high %v222_v32, %v226_v33  ;;  %v2813_v39 = vcombine.high %v224_v34, %v228_v35  ;;  %v282_v25 = vld [vmem:[%s3454_s25 + $0x368] sm:$0xff]  ;;  %v284_v27 = vld [vmem:[%s3454_s25 + $0x378] sm:$0xff] }
  0xe6   : > { %1934 = vmatmul.mubr.bf16.gmra.mrb[80].mxu1 %v2918_v44  ;;  %2352 = vmatmul.mubr.bf16.gmra.mrb[80].mxu0 %v2922_v45  ;;  %v2808_v44 = vcombine.low %v222_v32, %v226_v33  ;;  %v2812_v45 = vcombine.low %v224_v34, %v228_v35  ;;  %v286_v32 = vld [vmem:[%s3454_s25 + $0x388] sm:$0xff]  ;;  %v288_v34 = vld [vmem:[%s3454_s25 + $0x398] sm:$0xff] }
  0xe7   : > { %1941 = vmatprep.mubr.bf16.mxu1 %v2927_v46  ;;  %2359 = vmatprep.mubr.bf16.mxu0 %v2931_v47  ;;  %v2817_v46 = vcombine.high %v230_v40, %v234_v41  ;;  %v2821_v47 = vcombine.high %v232_v42, %v236_v43  ;;  %v290_v33 = vld [vmem:[%s3454_s25 + $0x3a8] sm:$0xff]  ;;  %v292_v35 = vld [vmem:[%s3454_s25 + $0x3b8] sm:$0xff] }
  0xee   : > { %1942 = vmatmul.mubr.bf16.gmra.mrb[84].mxu1 %v2926_v52  ;;  %2360 = vmatmul.mubr.bf16.gmra.mrb[84].mxu0 %v2930_v53  ;;  %v2816_v52 = vcombine.low %v230_v40, %v234_v41  ;;  %v2820_v53 = vcombine.low %v232_v42, %v236_v43  ;;  %v294_v40 = vld [vmem:[%s3454_s25 + $0x3c8] sm:$0xff]  ;;  %v296_v42 = vld [vmem:[%s3454_s25 + $0x3d8] sm:$0xff] }
  0xef   : > { %1982 = vmatprep.mubr.bf16.mxu1 %v2761_v54  ;;  %2400 = vmatprep.mubr.bf16.mxu0 %v2765_v55  ;;  %v2825_v54 = vcombine.high %v238_v48, %v242_v49  ;;  %v2829_v55 = vcombine.high %v240_v50, %v244_v51  ;;  %v298_v41 = vld [vmem:[%s3454_s25 + $0x3e8] sm:$0xff]  ;;  %v300_v43 = vld [vmem:[%s3454_s25 + $0x3f8] sm:$0xff] }
  0xf6   : > { %1983 = vmatmul.mubr.bf16.vlgmr.msra.gmra.mrb[0].mxu1 %v2760_v60  ;;  %2401 = vmatmul.mubr.bf16.vlgmr.msra.gmra.mrb[0].mxu0 %v2764_v61  ;;  %v2824_v60 = vcombine.low %v238_v48, %v242_v49  ;;  %v2828_v61 = vcombine.low %v240_v50, %v244_v51  ;;  %v302_v48 = vld [vmem:[%s3454_s25 + $0x408] sm:$0xff]  ;;  %v304_v50 = vld [vmem:[%s3454_s25 + $0x418] sm:$0xff] }
  0xf7   : > { %1990 = vmatprep.mubr.bf16.mxu1 %v2769_v62  ;;  %2408 = vmatprep.mubr.bf16.mxu0 %v2773_v63  ;;  %v2833_v62 = vcombine.high %v246_v56, %v250_v57  ;;  %v2837_v63 = vcombine.high %v248_v58, %v252_v59  ;;  %v306_v49 = vld [vmem:[%s3454_s25 + $0x428] sm:$0xff]  ;;  %v308_v51 = vld [vmem:[%s3454_s25 + $0x438] sm:$0xff] }
  0xfe   : > { %1991 = vmatmul.mubr.bf16.gmra.mrb[4].mxu1 %v2768_v5  ;;  %2409 = vmatmul.mubr.bf16.gmra.mrb[4].mxu0 %v2772_v6  ;;  %v2832_v5 = vcombine.low %v246_v56, %v250_v57  ;;  %v2836_v6 = vcombine.low %v248_v58, %v252_v59  ;;  %v310_v56 = vld [vmem:[%s3454_s25 + $0x448] sm:$0xff]  ;;  %v312_v58 = vld [vmem:[%s3454_s25 + $0x458] sm:$0xff] }
  0xff   : > { %1998 = vmatprep.mubr.bf16.mxu1 %v2777_v7  ;;  %2416 = vmatprep.mubr.bf16.mxu0 %v2781_v8  ;;  %v2841_v7 = vcombine.high %v254_v0, %v258_v2  ;;  %v2845_v8 = vcombine.high %v256_v3, %v260_v4  ;;  %v314_v57 = vld [vmem:[%s3454_s25 + $0x468] sm:$0xff]  ;;  %v316_v59 = vld [vmem:[%s3454_s25 + $0x478] sm:$0xff] }
 0x106   : > { %1999 = vmatmul.mubr.bf16.gmra.mrb[8].mxu1 %v2776_v13  ;;  %2417 = vmatmul.mubr.bf16.gmra.mrb[8].mxu0 %v2780_v14  ;;  %v2840_v13 = vcombine.low %v254_v0, %v258_v2  ;;  %v2844_v14 = vcombine.low %v256_v3, %v260_v4  ;;  %v318_v0 = vld [vmem:[%s3454_s25 + $0x488] sm:$0xff]  ;;  %v320_v3 = vld [vmem:[%s3454_s25 + $0x498] sm:$0xff] }
 0x107   : > { %2006 = vmatprep.mubr.bf16.mxu1 %v2785_v15  ;;  %2424 = vmatprep.mubr.bf16.mxu0 %v2789_v16  ;;  %v2849_v15 = vcombine.high %v262_v9, %v266_v10  ;;  %v2853_v16 = vcombine.high %v264_v11, %v268_v12  ;;  %v322_v2 = vld [vmem:[%s3454_s25 + $0x4a8] sm:$0xff]  ;;  %v324_v4 = vld [vmem:[%s3454_s25 + $0x4b8] sm:$0xff] }
 0x10e   : > { %2007 = vmatmul.mubr.bf16.gmra.mrb[12].mxu1 %v2784_v21  ;;  %2425 = vmatmul.mubr.bf16.gmra.mrb[12].mxu0 %v2788_v22  ;;  %v2848_v21 = vcombine.low %v262_v9, %v266_v10  ;;  %v2852_v22 = vcombine.low %v264_v11, %v268_v12  ;;  %v326_v9 = vld [vmem:[%s3454_s25 + $0x4c8] sm:$0xff]  ;;  %v328_v11 = vld [vmem:[%s3454_s25 + $0x4d8] sm:$0xff] }
 0x10f   : > { %2014 = vmatprep.mubr.bf16.mxu1 %v2793_v1  ;;  %2432 = vmatprep.mubr.bf16.mxu0 %v2797_v23  ;;  %v2857_v1 = vcombine.high %v270_v17, %v274_v18  ;;  %v2861_v23 = vcombine.high %v272_v19, %v276_v20  ;;  %v330_v10 = vld [vmem:[%s3454_s25 + $0x4e8] sm:$0xff]  ;;  %v332_v12 = vld [vmem:[%s3454_s25 + $0x4f8] sm:$0xff] }
 0x116   : > { %2015 = vmatmul.mubr.bf16.gmra.mrb[16].mxu1 %v2792_v28  ;;  %2433 = vmatmul.mubr.bf16.gmra.mrb[16].mxu0 %v2796_v29  ;;  %v2856_v28 = vcombine.low %v270_v17, %v274_v18  ;;  %v2860_v29 = vcombine.low %v272_v19, %v276_v20  ;;  %v334_v17 = vld [vmem:[%s3454_s25 + $0x508] sm:$0xff]  ;;  %v336_v19 = vld [vmem:[%s3454_s25 + $0x518] sm:$0xff] }
 0x117   : > { %2022 = vmatprep.mubr.bf16.mxu1 %v2801_v30  ;;  %2440 = vmatprep.mubr.bf16.mxu0 %v2805_v31  ;;  %v2865_v30 = vcombine.high %v278_v24, %v282_v25  ;;  %v2869_v31 = vcombine.high %v280_v26, %v284_v27  ;;  %v338_v18 = vld [vmem:[%s3454_s25 + $0x528] sm:$0xff]  ;;  %v340_v20 = vld [vmem:[%s3454_s25 + $0x538] sm:$0xff] }
 0x11e   : > { %2023 = vmatmul.mubr.bf16.gmra.mrb[20].mxu1 %v2800_v36  ;;  %2441 = vmatmul.mubr.bf16.gmra.mrb[20].mxu0 %v2804_v37  ;;  %v2864_v36 = vcombine.low %v278_v24, %v282_v25  ;;  %v2868_v37 = vcombine.low %v280_v26, %v284_v27  ;;  %v342_v24 = vld [vmem:[%s3454_s25 + $0x548] sm:$0xff]  ;;  %v344_v26 = vld [vmem:[%s3454_s25 + $0x558] sm:$0xff] }
 0x11f   : > { %2030 = vmatprep.mubr.bf16.mxu1 %v2809_v38  ;;  %2448 = vmatprep.mubr.bf16.mxu0 %v2813_v39  ;;  %v2873_v38 = vcombine.high %v286_v32, %v290_v33  ;;  %v2877_v39 = vcombine.high %v288_v34, %v292_v35  ;;  %v346_v25 = vld [vmem:[%s3454_s25 + $0x568] sm:$0xff]  ;;  %v348_v27 = vld [vmem:[%s3454_s25 + $0x578] sm:$0xff]  ;;  %s166_s25 = smul.u32 11, %s3381_s13 }
 0x121   : > { %p167_p4 = scmp.lt.s32.totalorder %s166_s25, 21 }
 0x123   : > { %s4001_s25 = smov (!%p167_p4, %s166_s25), 21 }
 0x124   : > { %s2757_s13 = sshll.u32 %s4001_s25, 2 }
 0x125   : > { %s3944_s30 = scalar_lea.vmem %s3999_s3, %s2757_s13 }
 0x126   : > { %2031 = vmatmul.mubr.bf16.gmra.mrb[24].mxu1 %v2808_v44  ;;  %2449 = vmatmul.mubr.bf16.gmra.mrb[24].mxu0 %v2812_v45  ;;  %v2872_v44 = vcombine.low %v286_v32, %v290_v33  ;;  %v2876_v45 = vcombine.low %v288_v34, %v292_v35  ;;  %v2928_v32 = vcombine.low %v342_v24, %v346_v25 }
 0x127   : > { %2038 = vmatprep.mubr.bf16.mxu1 %v2817_v46  ;;  %2456 = vmatprep.mubr.bf16.mxu0 %v2821_v47  ;;  %v2881_v46 = vcombine.high %v294_v40, %v298_v41  ;;  %v2885_v47 = vcombine.high %v296_v42, %v300_v43  ;;  %v2932_v33 = vcombine.low %v344_v26, %v348_v27 }
 0x12e   : > { %2039 = vmatmul.mubr.bf16.gmra.mrb[28].mxu1 %v2816_v52  ;;  %2457 = vmatmul.mubr.bf16.gmra.mrb[28].mxu0 %v2820_v53  ;;  %v2880_v52 = vcombine.low %v294_v40, %v298_v41  ;;  %v2884_v53 = vcombine.low %v296_v42, %v300_v43 }
 0x12f   : > { %2046 = vmatprep.mubr.bf16.mxu1 %v2825_v54  ;;  %2464 = vmatprep.mubr.bf16.mxu0 %v2829_v55  ;;  %v2889_v54 = vcombine.high %v302_v48, %v306_v49  ;;  %v2893_v55 = vcombine.high %v304_v50, %v308_v51 }
 0x136   : > { %2047 = vmatmul.mubr.bf16.gmra.mrb[32].mxu1 %v2824_v60  ;;  %2465 = vmatmul.mubr.bf16.gmra.mrb[32].mxu0 %v2828_v61  ;;  %v2888_v60 = vcombine.low %v302_v48, %v306_v49  ;;  %v2892_v61 = vcombine.low %v304_v50, %v308_v51 }
 0x137   : > { %2054 = vmatprep.mubr.bf16.mxu1 %v2833_v62  ;;  %2472 = vmatprep.mubr.bf16.mxu0 %v2837_v63  ;;  %v2897_v62 = vcombine.high %v310_v56, %v314_v57  ;;  %v2901_v63 = vcombine.high %v312_v58, %v316_v59 }
 0x13e   : > { %2055 = vmatmul.mubr.bf16.gmra.mrb[36].mxu1 %v2832_v5  ;;  %2473 = vmatmul.mubr.bf16.gmra.mrb[36].mxu0 %v2836_v6  ;;  %v2896_v5 = vcombine.low %v310_v56, %v314_v57  ;;  %v2900_v6 = vcombine.low %v312_v58, %v316_v59 }
 0x13f   : > { %2062 = vmatprep.mubr.bf16.mxu1 %v2841_v7  ;;  %2480 = vmatprep.mubr.bf16.mxu0 %v2845_v8  ;;  %v2905_v7 = vcombine.high %v318_v0, %v322_v2  ;;  %v2909_v8 = vcombine.high %v320_v3, %v324_v4 }
 0x146   : > { %2063 = vmatmul.mubr.bf16.gmra.mrb[40].mxu1 %v2840_v13  ;;  %2481 = vmatmul.mubr.bf16.gmra.mrb[40].mxu0 %v2844_v14  ;;  %v2904_v13 = vcombine.low %v318_v0, %v322_v2  ;;  %v2908_v14 = vcombine.low %v320_v3, %v324_v4 }
 0x147   : > { %2070 = vmatprep.mubr.bf16.mxu1 %v2849_v15  ;;  %2488 = vmatprep.mubr.bf16.mxu0 %v2853_v16  ;;  %v2913_v15 = vcombine.high %v326_v9, %v330_v10  ;;  %v2917_v16 = vcombine.high %v328_v11, %v332_v12 }
 0x14e   : > { %2071 = vmatmul.mubr.bf16.gmra.mrb[44].mxu1 %v2848_v21  ;;  %2489 = vmatmul.mubr.bf16.gmra.mrb[44].mxu0 %v2852_v22  ;;  %v2912_v21 = vcombine.low %v326_v9, %v330_v10  ;;  %v2916_v22 = vcombine.low %v328_v11, %v332_v12 }
 0x14f   : > { %2078 = vmatprep.mubr.bf16.mxu1 %v2857_v1  ;;  %2496 = vmatprep.mubr.bf16.mxu0 %v2861_v23  ;;  %v2921_v1 = vcombine.high %v334_v17, %v338_v18  ;;  %v2925_v23 = vcombine.high %v336_v19, %v340_v20 }
 0x156   : > { %2079 = vmatmul.mubr.bf16.gmra.mrb[48].mxu1 %v2856_v28  ;;  %2497 = vmatmul.mubr.bf16.gmra.mrb[48].mxu0 %v2860_v29  ;;  %v2920_v28 = vcombine.low %v334_v17, %v338_v18  ;;  %v2924_v29 = vcombine.low %v336_v19, %v340_v20 }
 0x157   : > { %2086 = vmatprep.mubr.bf16.mxu1 %v2865_v30  ;;  %2504 = vmatprep.mubr.bf16.mxu0 %v2869_v31  ;;  %v2929_v30 = vcombine.high %v342_v24, %v346_v25  ;;  %v2933_v31 = vcombine.high %v344_v26, %v348_v27 }
 0x15e   : > { %2087 = vmatmul.mubr.bf16.gmra.mrb[52].mxu1 %v2864_v36  ;;  %2505 = vmatmul.mubr.bf16.gmra.mrb[52].mxu0 %v2868_v37 }
 0x15f   : > { %2094 = vmatprep.mubr.bf16.mxu1 %v2873_v38  ;;  %2512 = vmatprep.mubr.bf16.mxu0 %v2877_v39 }
 0x166   : > { %2095 = vmatmul.mubr.bf16.gmra.mrb[56].mxu1 %v2872_v44  ;;  %2513 = vmatmul.mubr.bf16.gmra.mrb[56].mxu0 %v2876_v45 }
 0x167   : > { %2102 = vmatprep.mubr.bf16.mxu1 %v2881_v46  ;;  %2520 = vmatprep.mubr.bf16.mxu0 %v2885_v47 }
 0x16e   : > { %2103 = vmatmul.mubr.bf16.gmra.mrb[60].mxu1 %v2880_v52  ;;  %2521 = vmatmul.mubr.bf16.gmra.mrb[60].mxu0 %v2884_v53 }
 0x16f   : > { %2110 = vmatprep.mubr.bf16.mxu1 %v2889_v54  ;;  %2528 = vmatprep.mubr.bf16.mxu0 %v2893_v55 }
 0x176   : > { %2111 = vmatmul.mubr.bf16.gmra.mrb[64].mxu1 %v2888_v60  ;;  %2529 = vmatmul.mubr.bf16.gmra.mrb[64].mxu0 %v2892_v61 }
 0x177   : > { %2118 = vmatprep.mubr.bf16.mxu1 %v2897_v62  ;;  %2536 = vmatprep.mubr.bf16.mxu0 %v2901_v63 }
 0x17e   : > { %2119 = vmatmul.mubr.bf16.gmra.mrb[68].mxu1 %v2896_v5  ;;  %2537 = vmatmul.mubr.bf16.gmra.mrb[68].mxu0 %v2900_v6 }
 0x17f   : > { %2126 = vmatprep.mubr.bf16.mxu1 %v2905_v7  ;;  %2544 = vmatprep.mubr.bf16.mxu0 %v2909_v8 }
 0x186   : > { %2127 = vmatmul.mubr.bf16.gmra.mrb[72].mxu1 %v2904_v13  ;;  %2545 = vmatmul.mubr.bf16.gmra.mrb[72].mxu0 %v2908_v14 }
 0x187   : > { %2134 = vmatprep.mubr.bf16.mxu1 %v2913_v15  ;;  %2552 = vmatprep.mubr.bf16.mxu0 %v2917_v16 }
 0x18e   : > { %2135 = vmatmul.mubr.bf16.gmra.mrb[76].mxu1 %v2912_v21  ;;  %2553 = vmatmul.mubr.bf16.gmra.mrb[76].mxu0 %v2916_v22 }
 0x18f   : > { %2142 = vmatprep.mubr.bf16.mxu1 %v2921_v1  ;;  %2560 = vmatprep.mubr.bf16.mxu0 %v2925_v23 }
 0x196   : > { %2143 = vmatmul.mubr.bf16.gmra.mrb[80].mxu1 %v2920_v28  ;;  %2561 = vmatmul.mubr.bf16.gmra.mrb[80].mxu0 %v2924_v29 }
 0x197   : > { %2150 = vmatprep.mubr.bf16.mxu1 %v2929_v30  ;;  %2568 = vmatprep.mubr.bf16.mxu0 %v2933_v31 }
 0x19e   : > { %2151 = vmatmul.mubr.bf16.gmra.mrb[84].mxu1 %v2928_v32  ;;  %2569 = vmatmul.mubr.bf16.gmra.mrb[84].mxu0 %v2932_v33 }
 0x1c9   : > { %v1984_v34 = vpop.f32.mrb[0].mxu1  ;;  %v2402_v35 = vpop.f32.mrb[0].mxu0 }
 0x1ca   : > { %v1986_v36 = vpop.f32.mrb[1].mxu1  ;;  %v3836_v37 = vadd.f32 %v2402_v35, %v1984_v34  ;;  %v2404_v38 = vpop.f32.mrb[1].mxu0 }
 0x1cb   : > { %v1987_v39 = vpop.f32.mrb[2].mxu1  ;;  %v2405_v40 = vpop.f32.mrb[2].mxu0 }
 0x1cc   : > { %v1989_v41 = vpop.f32.mrb[3].mxu1  ;;  %v3838_v42 = vadd.f32 %v2405_v40, %v1987_v39  ;;  %v2407_v43 = vpop.f32.mrb[3].mxu0 }
 0x1d1   : > { %v1992_v44 = vpop.f32.mrb[4].mxu1  ;;  %v2410_v45 = vpop.f32.mrb[4].mxu0 }
 0x1d2   : > { %v1994_v46 = vpop.f32.mrb[5].mxu1  ;;  %v3840_v47 = vadd.f32 %v2410_v45, %v1992_v44  ;;  %v2412_v48 = vpop.f32.mrb[5].mxu0 }
 0x1d3   : > { %v1995_v49 = vpop.f32.mrb[6].mxu1  ;;  %v2413_v50 = vpop.f32.mrb[6].mxu0 }
 0x1d4   : > { %v1997_v51 = vpop.f32.mrb[7].mxu1  ;;  %v3842_v52 = vadd.f32 %v2413_v50, %v1995_v49  ;;  %v2415_v53 = vpop.f32.mrb[7].mxu0 }
 0x1d9   : > { %v2000_v54 = vpop.f32.mrb[8].mxu1  ;;  %v2418_v55 = vpop.f32.mrb[8].mxu0 }
 0x1da   : > { %v2002_v56 = vpop.f32.mrb[9].mxu1  ;;  %v3844_v57 = vadd.f32 %v2418_v55, %v2000_v54  ;;  %v2420_v58 = vpop.f32.mrb[9].mxu0 }
 0x1db   : > { %v2003_v59 = vpop.f32.mrb[10].mxu1  ;;  %v2421_v60 = vpop.f32.mrb[10].mxu0 }
 0x1dc   : > { %v2005_v61 = vpop.f32.mrb[11].mxu1  ;;  %v3846_v62 = vadd.f32 %v2421_v60, %v2003_v59  ;;  %v2423_v63 = vpop.f32.mrb[11].mxu0 }
 0x1e1   : > { %v2008_v0 = vpop.f32.mrb[12].mxu1  ;;  %v2426_v2 = vpop.f32.mrb[12].mxu0 }
 0x1e2   : > { %v2010_v3 = vpop.f32.mrb[13].mxu1  ;;  %v3848_v4 = vadd.f32 %v2426_v2, %v2008_v0  ;;  %v2428_v5 = vpop.f32.mrb[13].mxu0 }
 0x1e3   : > { %v2011_v6 = vpop.f32.mrb[14].mxu1  ;;  %v2429_v7 = vpop.f32.mrb[14].mxu0 }
 0x1e4   : > { %v2013_v8 = vpop.f32.mrb[15].mxu1  ;;  %v3850_v9 = vadd.f32 %v2429_v7, %v2011_v6  ;;  %v2431_v10 = vpop.f32.mrb[15].mxu0 }
 0x1e9   : > { %v2016_v11 = vpop.f32.mrb[16].mxu1  ;;  %v2434_v12 = vpop.f32.mrb[16].mxu0 }
 0x1ea   : > { %v2018_v13 = vpop.f32.mrb[17].mxu1  ;;  %v3852_v14 = vadd.f32 %v2434_v12, %v2016_v11  ;;  %v2436_v15 = vpop.f32.mrb[17].mxu0 }
 0x1eb   : > { %v2019_v16 = vpop.f32.mrb[18].mxu1  ;;  %v2437_v17 = vpop.f32.mrb[18].mxu0 }
 0x1ec   : > { %v2021_v18 = vpop.f32.mrb[19].mxu1  ;;  %v3854_v19 = vadd.f32 %v2437_v17, %v2019_v16  ;;  %v2439_v20 = vpop.f32.mrb[19].mxu0 }
 0x1f1   : > { %v2024_v21 = vpop.f32.mrb[20].mxu1  ;;  %v2442_v22 = vpop.f32.mrb[20].mxu0 }
 0x1f2   : > { %v2026_v1 = vpop.f32.mrb[21].mxu1  ;;  %v3856_v23 = vadd.f32 %v2442_v22, %v2024_v21  ;;  %v2444_v24 = vpop.f32.mrb[21].mxu0 }
 0x1f3   : > { %v2027_v25 = vpop.f32.mrb[22].mxu1  ;;  %v2445_v26 = vpop.f32.mrb[22].mxu0 }
 0x1f4   : > { %v2029_v27 = vpop.f32.mrb[23].mxu1  ;;  %v3858_v28 = vadd.f32 %v2445_v26, %v2027_v25  ;;  %v2447_v29 = vpop.f32.mrb[23].mxu0 }
 0x1f6   : > { %v2577_v30 = vmax.f32 %v3836_v37, %v3858_v28 }
 0x1f9   : > { %v2032_v31 = vpop.f32.mrb[24].mxu1  ;;  %v2450_v32 = vpop.f32.mrb[24].mxu0 }
 0x1fa   : > { %v2034_v33 = vpop.f32.mrb[25].mxu1  ;;  %v3862_v34 = vadd.f32 %v2450_v32, %v2032_v31  ;;  %v2452_v35 = vpop.f32.mrb[25].mxu0 }
 0x1fb   : > { %v2035_v36 = vpop.f32.mrb[26].mxu1  ;;  %v2453_v38 = vpop.f32.mrb[26].mxu0 }
 0x1fc   : > { %v2037_v39 = vpop.f32.mrb[27].mxu1  ;;  %v2578_v40 = vmax.f32 %v3838_v42, %v3862_v34  ;;  %v3866_v41 = vadd.f32 %v2453_v38, %v2035_v36  ;;  %v2455_v43 = vpop.f32.mrb[27].mxu0 }
 0x1fe   : > { %v2579_v44 = vmax.f32 %v3840_v47, %v3866_v41 }
 0x201   : > { %v2040_v45 = vpop.f32.mrb[28].mxu1  ;;  %v2458_v46 = vpop.f32.mrb[28].mxu0 }
 0x202   : > { %v2042_v48 = vpop.f32.mrb[29].mxu1  ;;  %v3870_v49 = vadd.f32 %v2458_v46, %v2040_v45  ;;  %v2460_v50 = vpop.f32.mrb[29].mxu0 }
 0x203   : > { %v2043_v51 = vpop.f32.mrb[30].mxu1  ;;  %v2461_v53 = vpop.f32.mrb[30].mxu0 }
 0x204   : > { %v2045_v54 = vpop.f32.mrb[31].mxu1  ;;  %v2580_v55 = vmax.f32 %v3842_v52, %v3870_v49  ;;  %v3874_v56 = vadd.f32 %v2461_v53, %v2043_v51  ;;  %v2463_v58 = vpop.f32.mrb[31].mxu0 }
 0x206   : > { %v2581_v59 = vmax.f32 %v3844_v57, %v3874_v56 }
 0x209   : > { %v2048_v60 = vpop.f32.mrb[32].mxu1  ;;  %v2466_v61 = vpop.f32.mrb[32].mxu0 }
 0x20a   : > { %v2050_v63 = vpop.f32.mrb[33].mxu1  ;;  %v3878_v0 = vadd.f32 %v2466_v61, %v2048_v60  ;;  %v2468_v2 = vpop.f32.mrb[33].mxu0 }
 0x20b   : > { %v2051_v3 = vpop.f32.mrb[34].mxu1  ;;  %v2469_v5 = vpop.f32.mrb[34].mxu0 }
 0x20c   : > { %v2053_v6 = vpop.f32.mrb[35].mxu1  ;;  %v2582_v7 = vmax.f32 %v3846_v62, %v3878_v0  ;;  %v3882_v8 = vadd.f32 %v2469_v5, %v2051_v3  ;;  %v2471_v10 = vpop.f32.mrb[35].mxu0 }
 0x20e   : > { %v2583_v11 = vmax.f32 %v3848_v4, %v3882_v8 }
 0x211   : > { %v2056_v12 = vpop.f32.mrb[36].mxu1  ;;  %v2474_v13 = vpop.f32.mrb[36].mxu0 }
 0x212   : > { %v2058_v15 = vpop.f32.mrb[37].mxu1  ;;  %v3886_v16 = vadd.f32 %v2474_v13, %v2056_v12  ;;  %v2476_v17 = vpop.f32.mrb[37].mxu0 }
 0x213   : > { %v2059_v18 = vpop.f32.mrb[38].mxu1  ;;  %v2477_v20 = vpop.f32.mrb[38].mxu0 }
 0x214   : > { %v2061_v21 = vpop.f32.mrb[39].mxu1  ;;  %v2584_v22 = vmax.f32 %v3850_v9, %v3886_v16  ;;  %v3890_v1 = vadd.f32 %v2477_v20, %v2059_v18  ;;  %v2479_v24 = vpop.f32.mrb[39].mxu0 }
 0x216   : > { %v2585_v25 = vmax.f32 %v3852_v14, %v3890_v1 }
 0x219   : > { %v2064_v26 = vpop.f32.mrb[40].mxu1  ;;  %v2482_v27 = vpop.f32.mrb[40].mxu0 }
 0x21a   : > { %v2066_v29 = vpop.f32.mrb[41].mxu1  ;;  %v3894_v31 = vadd.f32 %v2482_v27, %v2064_v26  ;;  %v2484_v32 = vpop.f32.mrb[41].mxu0 }
 0x21b   : > { %v2067_v33 = vpop.f32.mrb[42].mxu1  ;;  %v2485_v35 = vpop.f32.mrb[42].mxu0 }
 0x21c   : > { %v2069_v36 = vpop.f32.mrb[43].mxu1  ;;  %v2586_v38 = vmax.f32 %v3854_v19, %v3894_v31  ;;  %v3898_v39 = vadd.f32 %v2485_v35, %v2067_v33  ;;  %v2487_v43 = vpop.f32.mrb[43].mxu0 }
 0x21e   : > { %v2587_v45 = vmax.f32 %v3856_v23, %v3898_v39 }
 0x221   : > { %v2072_v46 = vpop.f32.mrb[44].mxu1  ;;  %v2490_v48 = vpop.f32.mrb[44].mxu0 }
 0x222   : > { %v2074_v50 = vpop.f32.mrb[45].mxu1  ;;  %v3074_v51 = vadd.f32 %v2490_v48, %v2072_v46  ;;  %v2492_v53 = vpop.f32.mrb[45].mxu0 }
 0x223   : > { %v2075_v54 = vpop.f32.mrb[46].mxu1  ;;  %v2493_v58 = vpop.f32.mrb[46].mxu0 }
 0x224   : > { %v2077_v60 = vpop.f32.mrb[47].mxu1  ;;  %v3902_v61 = vadd.f32 %v2493_v58, %v2075_v54  ;;  %v2495_v63 = vpop.f32.mrb[47].mxu0 }
 0x229   : > { %v2080_v2 = vpop.f32.mrb[48].mxu1  ;;  %v2498_v3 = vpop.f32.mrb[48].mxu0 }
 0x22a   : > { %v2082_v5 = vpop.f32.mrb[49].mxu1  ;;  %v3904_v6 = vadd.f32 %v2498_v3, %v2080_v2  ;;  %v2500_v10 = vpop.f32.mrb[49].mxu0 }
 0x22b   : > { %v2083_v12 = vpop.f32.mrb[50].mxu1  ;;  %v2501_v13 = vpop.f32.mrb[50].mxu0 }
 0x22c   : > { %v2085_v15 = vpop.f32.mrb[51].mxu1  ;;  %v3906_v17 = vadd.f32 %v2501_v13, %v2083_v12  ;;  %v2503_v18 = vpop.f32.mrb[51].mxu0 }
 0x231   : > { %v2088_v20 = vpop.f32.mrb[52].mxu1  ;;  %v2506_v21 = vpop.f32.mrb[52].mxu0 }
 0x232   : > { %v2090_v24 = vpop.f32.mrb[53].mxu1  ;;  %v3908_v26 = vadd.f32 %v2506_v21, %v2088_v20  ;;  %v2508_v27 = vpop.f32.mrb[53].mxu0 }
 0x233   : > { %v2091_v29 = vpop.f32.mrb[54].mxu1  ;;  %v2509_v32 = vpop.f32.mrb[54].mxu0 }
 0x234   : > { %v2093_v33 = vpop.f32.mrb[55].mxu1  ;;  %v3910_v35 = vadd.f32 %v2509_v32, %v2091_v29  ;;  %v2511_v36 = vpop.f32.mrb[55].mxu0 }
 0x239   : > { %v2096_v43 = vpop.f32.mrb[56].mxu1  ;;  %v2514_v46 = vpop.f32.mrb[56].mxu0 }
 0x23a   : > { %v2098_v48 = vpop.f32.mrb[57].mxu1  ;;  %v3912_v50 = vadd.f32 %v2514_v46, %v2096_v43  ;;  %v2516_v53 = vpop.f32.mrb[57].mxu0 }
 0x23b   : > { %v2099_v54 = vpop.f32.mrb[58].mxu1  ;;  %v2517_v58 = vpop.f32.mrb[58].mxu0 }
 0x23c   : > { %v2101_v60 = vpop.f32.mrb[59].mxu1  ;;  %v3914_v63 = vadd.f32 %v2517_v58, %v2099_v54  ;;  %v2519_v2 = vpop.f32.mrb[59].mxu0 }
 0x241   : > { %v2104_v3 = vpop.f32.mrb[60].mxu1  ;;  %v2522_v5 = vpop.f32.mrb[60].mxu0 }
 0x242   : > { %v2106_v10 = vpop.f32.mrb[61].mxu1  ;;  %v3916_v12 = vadd.f32 %v2522_v5, %v2104_v3  ;;  %v2524_v13 = vpop.f32.mrb[61].mxu0 }
 0x243   : > { %v2107_v15 = vpop.f32.mrb[62].mxu1  ;;  %v2525_v18 = vpop.f32.mrb[62].mxu0 }
 0x244   : > { %v2109_v20 = vpop.f32.mrb[63].mxu1  ;;  %v3918_v21 = vadd.f32 %v2525_v18, %v2107_v15  ;;  %v2527_v24 = vpop.f32.mrb[63].mxu0  ;;  %v3929_v18 = vld [vmem:[%s3998_s2] ss:$0 sm:$0xff] }
 0x249   : > { %v2112_v27 = vpop.f32.mrb[64].mxu1  ;;  %v2530_v29 = vpop.f32.mrb[64].mxu0 }
 0x24a   : > { %v2114_v32 = vpop.f32.mrb[65].mxu1  ;;  %v3920_v33 = vadd.f32 %v2530_v29, %v2112_v27  ;;  %v2532_v36 = vpop.f32.mrb[65].mxu0 }
 0x24b   : > { %v2115_v43 = vpop.f32.mrb[66].mxu1  ;;  %v2533_v46 = vpop.f32.mrb[66].mxu0 }
 0x24c   : > { %v2117_v48 = vpop.f32.mrb[67].mxu1  ;;  %v3085_v53 = vadd.f32 %v2533_v46, %v2115_v43  ;;  %v2535_v54 = vpop.f32.mrb[67].mxu0 }
 0x24e   : > { %v2588_v58 = vmax.f32 %v3074_v51, %v3085_v53 }
 0x250   : > { %v2599_v60 = vmax.f32 %v2577_v30, %v2588_v58 }
 0x251   : > { %v2120_v2 = vpop.f32.mrb[68].mxu1  ;;  %v2538_v3 = vpop.f32.mrb[68].mxu0 }
 0x252   : > { %v2122_v5 = vpop.f32.mrb[69].mxu1  ;;  %v3086_v10 = vadd.f32 %v2538_v3, %v2120_v2  ;;  %v2540_v13 = vpop.f32.mrb[69].mxu0  ;;  %v2617_v28 = vadd.f32 %v3929_v18, %v2599_v60 }
 0x253   : > { %v2123_v15 = vpop.f32.mrb[70].mxu1  ;;  %v2541_v20 = vpop.f32.mrb[70].mxu0 }
 0x254   : > { %v2125_v24 = vpop.f32.mrb[71].mxu1  ;;  %v2589_v51 = vmax.f32 %v3902_v61, %v3086_v10  ;;  %v3087_v27 = vadd.f32 %v2541_v20, %v2123_v15  ;;  %v2543_v37 = vpop.f32.mrb[71].mxu0  ;;  %v2628_v48 = vmax.f32 %v2617_v28, 0.0 }
 0x256   : > { %v2600_v30 = vmax.f32 %v2578_v40, %v2589_v51  ;;  %v2590_v29 = vmax.f32 %v3904_v6, %v3087_v27 }
 0x258   : > { %v2618_v32 = vadd.f32 %v3929_v18, %v2600_v30  ;;  %v2601_v36 = vmax.f32 %v2579_v44, %v2590_v29 }
 0x259   : > { %v2128_v43 = vpop.f32.mrb[72].mxu1  ;;  %v2546_v46 = vpop.f32.mrb[72].mxu0 }
 0x25a   : > { %v2130_v61 = vpop.f32.mrb[73].mxu1  ;;  %v2629_v53 = vmax.f32 %v2618_v32, 0.0  ;;  %v3088_v54 = vadd.f32 %v2546_v46, %v2128_v43  ;;  %v2548_v58 = vpop.f32.mrb[73].mxu0  ;;  %v2619_v6 = vadd.f32 %v3929_v18, %v2601_v36 }
 0x25b   : > { %v2131_v60 = vpop.f32.mrb[74].mxu1  ;;  %v2549_v42 = vpop.f32.mrb[74].mxu0 }
 0x25c   : > { %v2133_v34 = vpop.f32.mrb[75].mxu1  ;;  %v3026_v40 = vpack.c.bf16 %v2629_v53, %v2628_v48  ;;  %v2591_v47 = vmax.f32 %v3906_v17, %v3088_v54  ;;  %v3089_v41 = vadd.f32 %v2549_v42, %v2131_v60  ;;  %v2551_v44 = vpop.f32.mrb[75].mxu0  ;;  %v2630_v20 = vmax.f32 %v2619_v6, 0.0 }
 0x25e   : > { %3027 = vst [vmem:[%s3944_s30] sm:$0xff] %v3026_v40   ;;  %v2602_v2 = vmax.f32 %v2580_v55, %v2591_v47  ;;  %v2592_v3 = vmax.f32 %v3908_v26, %v3089_v41 }
 0x260   : > { %v2620_v5 = vadd.f32 %v3929_v18, %v2602_v2  ;;  %v2603_v10 = vmax.f32 %v2581_v59, %v2592_v3 }
 0x261   : > { %v2136_v13 = vpop.f32.mrb[76].mxu1  ;;  %v2554_v17 = vpop.f32.mrb[76].mxu0 }
 0x262   : > { %v2138_v15 = vpop.f32.mrb[77].mxu1  ;;  %v2631_v24 = vmax.f32 %v2620_v5, 0.0  ;;  %v3090_v51 = vadd.f32 %v2554_v17, %v2136_v13  ;;  %v2556_v27 = vpop.f32.mrb[77].mxu0  ;;  %v2621_v57 = vadd.f32 %v3929_v18, %v2603_v10 }
 0x263   : > { %v2139_v37 = vpop.f32.mrb[78].mxu1  ;;  %v2557_v28 = vpop.f32.mrb[78].mxu0 }
 0x264   : > { %v2141_v52 = vpop.f32.mrb[79].mxu1  ;;  %v3031_v49 = vpack.c.bf16 %v2631_v24, %v2630_v20  ;;  %v2593_v55 = vmax.f32 %v3910_v35, %v3090_v51  ;;  %v3091_v26 = vadd.f32 %v2557_v28, %v2139_v37  ;;  %v2559_v30 = vpop.f32.mrb[79].mxu0  ;;  %v2632_v46 = vmax.f32 %v2621_v57, 0.0 }
 0x266   : > { %3048 = vst [vmem:[%s3944_s30 + $0x8] sm:$0xff] %v3031_v49   ;;  %v2604_v56 = vmax.f32 %v2582_v7, %v2593_v55  ;;  %v2594_v59 = vmax.f32 %v3912_v50, %v3091_v26 }
 0x268   : > { %v2622_v29 = vadd.f32 %v3929_v18, %v2604_v56  ;;  %v2605_v32 = vmax.f32 %v2583_v11, %v2594_v59 }
 0x269   : > { %v2144_v36 = vpop.f32.mrb[80].mxu1  ;;  %v2562_v35 = vpop.f32.mrb[80].mxu0 }
 0x26a   : > { %v2146_v43 = vpop.f32.mrb[81].mxu1  ;;  %v2633_v61 = vmax.f32 %v2622_v29, 0.0  ;;  %v3092_v48 = vadd.f32 %v2562_v35, %v2144_v36  ;;  %v2564_v53 = vpop.f32.mrb[81].mxu0  ;;  %v2623_v4 = vadd.f32 %v3929_v18, %v2605_v32 }
 0x26b   : > { %v2147_v54 = vpop.f32.mrb[82].mxu1  ;;  %v2565_v58 = vpop.f32.mrb[82].mxu0 }
 0x26c   : > { %v2149_v62 = vpop.f32.mrb[83].mxu1  ;;  %v3036_v0 = vpack.c.bf16 %v2633_v61, %v2632_v46  ;;  %v2595_v7 = vmax.f32 %v3914_v63, %v3092_v48  ;;  %v3093_v50 = vadd.f32 %v2565_v58, %v2147_v54  ;;  %v2567_v60 = vpop.f32.mrb[83].mxu0  ;;  %v2634_v41 = vmax.f32 %v2623_v4, 0.0 }
 0x26e   : > { %3049 = vst [vmem:[%s3944_s30 + $0x10] sm:$0xff] %v3036_v0   ;;  %v2606_v8 = vmax.f32 %v2584_v22, %v2595_v7  ;;  %v2596_v11 = vmax.f32 %v3916_v12, %v3093_v50 }
 0x270   : > { %v2624_v42 = vadd.f32 %v3929_v18, %v2606_v8  ;;  %v2607_v34 = vmax.f32 %v2585_v25, %v2596_v11 }
 0x271   : > { %v2152_v40 = vpop.f32.mrb[84].mxu1  ;;  %v2570_v63 = vpop.f32.mrb[84].mxu0 }
 0x272   : > { %v2154_v47 = vpop.f32.mrb[85].mxu1  ;;  %v2635_v44 = vmax.f32 %v2624_v42, 0.0  ;;  %v3094_v6 = vadd.f32 %v2570_v63, %v2152_v40  ;;  %v2572_v2 = vpop.f32.mrb[85].mxu0  ;;  %v2625_v14 = vadd.f32 %v3929_v18, %v2607_v34 }
 0x273   : > { %v2155_v3 = vpop.f32.mrb[86].mxu1  ;;  %v2573_v5 = vpop.f32.mrb[86].mxu0 }
 0x274   : > { %v2157_v9 = vpop.f32.mrb[87].mxu1  ;;  %v3041_v16 = vpack.c.bf16 %v2635_v44, %v2634_v41  ;;  %v2597_v22 = vmax.f32 %v3918_v21, %v3094_v6  ;;  %v3095_v12 = vadd.f32 %v2573_v5, %v2155_v3  ;;  %v2575_v10 = vpop.f32.mrb[87].mxu0  ;;  %v2636_v15 = vmax.f32 %v2625_v14, 0.0 }
 0x276   : > { %3050 = vst [vmem:[%s3944_s30 + $0x18] sm:$0xff] %v3041_v16   ;;  %v2608_v1 = vmax.f32 %v2586_v38, %v2597_v22  ;;  %v2598_v25 = vmax.f32 %v3920_v33, %v3095_v12 }
 0x278   : > { %v2626_v13 = vadd.f32 %v3929_v18, %v2608_v1  ;;  %v2609_v17 = vmax.f32 %v2587_v45, %v2598_v25 }
 0x27a   : > { %v2637_v21 = vmax.f32 %v2626_v13, 0.0  ;;  %v2627_v20 = vadd.f32 %v3929_v18, %v2609_v17 }
 0x27c   : > { %v3046_v24 = vpack.c.bf16 %v2637_v21, %v2636_v15  ;;  %v2638_v51 = vmax.f32 %v2627_v20, 0.0 }
 0x27e   : > { %3051 = vst [vmem:[%s3944_s30 + $0x20] sm:$0xff] %v3046_v24   ;;  %v3022_v27 = vpack.c.bf16 %v2638_v51, %v2638_v51 }
 0x280   : > { %2694 = vst [vmem:[%s3944_s30 + $0x28] sm:$0xf] %v3022_v27 }
 0x281 PF: > { %s13_s12 = sadd.s32 1, %s3352_s12  }
 0x282   : > { %p10_p5 = scmp.ge.s32.totalorder %s13_s12, 4  }
 0x284   :  { %12 = sbr.rel (!%p10_p5) target bundleno = 1 (0x1), region = 62 }

// kernel: net_forward.7
= control target key start
LH: loop header
LB: loop body
LE: loop exit
PB: predicated region body
PF: predicated region fallthrough
CT: control target
= control target key end

     0   :  { %v9719_v0 = vmov 0   ;;  %vm7231_vm0 = vmmov 0   ;;  %s9709_s1 = inlined_call_operand.vmem [shape: bf16[2048,128], index: 1, kind: input, shape index: {}]   ;;  %s9710_s0 = inlined_call_operand.vmem [shape: bf16[288,2048], index: 0, kind: input, shape index: {}]   ;;  %s9711_s3 = inlined_call_operand.vmem [shape: f32[9,128,128], index: 3, kind: input, shape index: {}]   ;;  %s9712_s2 = inlined_call_operand.vmem [shape: f32[1,128], index: 2, kind: input, shape index: {}]   ;;  %s9713_s5 = inlined_call_operand.vmem [shape: f32[128,128], index: 5, kind: input, shape index: {}]   ;;  %s9714_s4 = inlined_call_operand.vmem [shape: f32[1,128], index: 4, kind: input, shape index: {}]   ;;  %s9715_s7 = inlined_call_operand.vmem [shape: f32[128,128], index: 7, kind: input, shape index: {}]   ;;  %s9716_s6 = inlined_call_operand.vmem [shape: f32[1,128], index: 6, kind: input, shape index: {}]   ;;  %s9717_s8 = inlined_call_operand.vmem [shape: f32[1,128], index: 8, kind: input, shape index: {}]   ;;  %s9718_s9 = inlined_call_operand.vmem [shape: f32[8,128], index: 9, kind: output, shape index: {}]  }
   0x1   :  { %3139 = vmatprep.subr.bf16.mxu0 %v9719_v0  ;;  %v7101_v1 = vld [vmem:[%s9709_s1 + $0x100] sm:$0xff]   ;;  %2785 = vmatprep.subr.bf16.mxu1 %v9719_v0  ;;  %v7102_v2 = vld [vmem:[%s9709_s1 + $0x108] sm:$0xff]   ;;  %v7103_v3 = vld [vmem:[%s9709_s1 + $0x110] sm:$0xff]  }
   0x2   :  { %3140 = vmatpush1.bf16.msra.mxu0 %v7101_v1  ;;  %v7104_v4 = vld [vmem:[%s9709_s1 + $0x118] sm:$0xff]   ;;  %v7105_v5 = vld [vmem:[%s9709_s1 + $0x120] sm:$0xff]   ;;  %v35_v6 = vld [vmem:[%s9710_s0 + $0x10] sm:$0xff] }
   0x3   :  { %3141 = vmatprep.subr.bf16.mxu0 %v9719_v0  ;;  %v43_v7 = vld [vmem:[%s9710_s0 + $0x50] sm:$0xff]  ;;  %v7106_v9 = vld [vmem:[%s9709_s1 + $0x128] sm:$0xff]   ;;  %v7108_v11 = vld [vmem:[%s9709_s1 + $0x138] sm:$0xff]  }
   0x4   :  { %v5248_v8 = vcombine.high %v35_v6, %v43_v7  ;;  %v7107_v10 = vld [vmem:[%s9709_s1 + $0x130] sm:$0xff]   ;;  %v7109_v12 = vld [vmem:[%s9709_s1 + $0x140] sm:$0xff]   ;;  %v7110_v13 = vld [vmem:[%s9709_s1 + $0x148] sm:$0xff]   ;;  %v5247_v23 = vcombine.low %v35_v6, %v43_v7 }
   0x5   :  { %v7111_v14 = vld [vmem:[%s9709_s1 + $0x150] sm:$0xff]   ;;  %v7112_v15 = vld [vmem:[%s9709_s1 + $0x158] sm:$0xff]   ;;  %v7113_v16 = vld [vmem:[%s9709_s1 + $0x160] sm:$0xff]  }
   0x6   :  { %3142 = vmatpush1.bf16.msra.mxu0 %v7102_v2  ;;  %3171 = vmatprep.mubr.bf16.mxu0 %v5248_v8  ;;  %v7114_v17 = vld [vmem:[%s9709_s1 + $0x168] sm:$0xff]   ;;  %v7115_v18 = vld [vmem:[%s9709_s1 + $0x170] sm:$0xff]   ;;  %v7116_v19 = vld [vmem:[%s9709_s1 + $0x178] sm:$0xff]  }
   0x7   :  { %3143 = vmatprep.subr.bf16.mxu0 %v9719_v0  ;;  %v51_v20 = vld [vmem:[%s9710_s0 + $0x90] sm:$0xff]  ;;  %v7117_v22 = vld [vmem:[%s9709_s1 + $0x180] sm:$0xff]   ;;  %v7118_v25 = vld [vmem:[%s9709_s1 + $0x188] sm:$0xff]  }
   0x8   :  { %v59_v21 = vld [vmem:[%s9710_s0 + $0xd0] sm:$0xff]  ;;  %v7133_v31 = vld [vmem:[%s9709_s1] sm:$0xff]   ;;  %v7134_v34 = vld [vmem:[%s9709_s1 + $0x8] sm:$0xff]  }
   0x9   :  { %v5264_v24 = vcombine.high %v51_v20, %v59_v21  ;;  %v67_v26 = vld [vmem:[%s9710_s0 + $0x110] sm:$0xff]  ;;  %v5263_v29 = vcombine.low %v51_v20, %v59_v21  ;;  %2786 = vmatpush1.bf16.msra.mxu1 %v7133_v31  ;;  %v7120_v35 = vld [vmem:[%s9709_s1 + $0x198] sm:$0xff]   ;;  %v7121_v36 = vld [vmem:[%s9709_s1 + $0x1a0] sm:$0xff]  }
   0xa   :  { %3144 = vmatpush1.bf16.msra.mxu0 %v7103_v3  ;;  %v75_v27 = vld [vmem:[%s9710_s0 + $0x150] sm:$0xff]  ;;  %2787 = vmatprep.subr.bf16.mxu1 %v9719_v0  ;;  %v7122_v42 = vld [vmem:[%s9709_s1 + $0x1a8] sm:$0xff]   ;;  %v7137_v43 = vld [vmem:[%s9709_s1 + $0x18] sm:$0xff]  }
   0xb   :  { %3145 = vmatprep.subr.bf16.mxu0 %v9719_v0  ;;  %v7119_v28 = vld [vmem:[%s9709_s1 + $0x190] sm:$0xff]   ;;  %v5280_v30 = vcombine.high %v67_v26, %v75_v27  ;;  %v5279_v37 = vcombine.low %v67_v26, %v75_v27  ;;  %v7138_v47 = vld [vmem:[%s9709_s1 + $0x20] sm:$0xff]   ;;  %v7140_v50 = vld [vmem:[%s9709_s1 + $0x28] sm:$0xff]  }
   0xc   :  { %v83_v32 = vld [vmem:[%s9710_s0 + $0x190] sm:$0xff]  ;;  %v7124_v51 = vld [vmem:[%s9709_s1 + $0x1b8] sm:$0xff]   ;;  %v7125_v52 = vld [vmem:[%s9709_s1 + $0x1c0] sm:$0xff]  }
   0xd   :  { %v91_v33 = vld [vmem:[%s9710_s0 + $0x1d0] sm:$0xff]  ;;  %2788 = vmatpush1.bf16.msra.mxu1 %v7134_v34  ;;  %v7143_v58 = vld [vmem:[%s9709_s1 + $0x38] sm:$0xff]   ;;  %v7126_v59 = vld [vmem:[%s9709_s1 + $0x1c8] sm:$0xff]  }
   0xe   :  { %3146 = vmatpush1.bf16.msra.mxu0 %v7104_v4  ;;  %v5296_v38 = vcombine.high %v83_v32, %v91_v33  ;;  %2789 = vmatprep.subr.bf16.mxu1 %v9719_v0  ;;  %v7135_v39 = vld [vmem:[%s9709_s1 + $0x10] sm:$0xff]   ;;  %v5295_v45 = vcombine.low %v83_v32, %v91_v33  ;;  %v7144_v63 = vld [vmem:[%s9709_s1 + $0x40] sm:$0xff]   ;;  %v7146_v3 = vld [vmem:[%s9709_s1 + $0x48] sm:$0xff]  }
   0xf   :  { %3147 = vmatprep.subr.bf16.mxu0 %v9719_v0  ;;  %v99_v40 = vld [vmem:[%s9710_s0 + $0x210] sm:$0xff]  ;;  %v7128_v4 = vld [vmem:[%s9709_s1 + $0x1d8] sm:$0xff]   ;;  %v41_v26 = vld [vmem:[%s9710_s0 + $0x40] sm:$0xff] }
  0x10   :  { %v107_v41 = vld [vmem:[%s9710_s0 + $0x250] sm:$0xff]  ;;  %v49_v33 = vld [vmem:[%s9710_s0 + $0x80] sm:$0xff] }
  0x11   :  { %2790 = vmatpush1.bf16.msra.mxu1 %v7135_v39  ;;  %v7123_v44 = vld [vmem:[%s9709_s1 + $0x1b0] sm:$0xff]   ;;  %v5312_v46 = vcombine.high %v99_v40, %v107_v41  ;;  %v5311_v53 = vcombine.low %v99_v40, %v107_v41  ;;  %v57_v34 = vld [vmem:[%s9710_s0 + $0xc0] sm:$0xff] }
  0x12   :  { %3148 = vmatpush1.bf16.msra.mxu0 %v7105_v5  ;;  %2791 = vmatprep.subr.bf16.mxu1 %v9719_v0  ;;  %v115_v48 = vld [vmem:[%s9710_s0 + $0x290] sm:$0xff]  ;;  %v7129_v5 = vld [vmem:[%s9709_s1 + $0x1e0] sm:$0xff]  }
  0x13   :  { %3149 = vmatprep.subr.bf16.mxu0 %v9719_v0  ;;  %v123_v49 = vld [vmem:[%s9710_s0 + $0x2d0] sm:$0xff]  ;;  %v65_v41 = vld [vmem:[%s9710_s0 + $0x100] sm:$0xff] }
  0x14   :  { %v5328_v54 = vcombine.high %v115_v48, %v123_v49  ;;  %v7141_v55 = vld [vmem:[%s9709_s1 + $0x30] sm:$0xff]   ;;  %v5327_v61 = vcombine.low %v115_v48, %v123_v49  ;;  %v81_v49 = vld [vmem:[%s9710_s0 + $0x180] sm:$0xff] }
  0x15   :  { %2792 = vmatpush1.bf16.msra.mxu1 %v7137_v43  ;;  %v131_v56 = vld [vmem:[%s9710_s0 + $0x310] sm:$0xff] }
  0x16   :  { %3150 = vmatpush1.bf16.msra.mxu0 %v7106_v9  ;;  %2793 = vmatprep.subr.bf16.mxu1 %v9719_v0  ;;  %v139_v57 = vld [vmem:[%s9710_s0 + $0x350] sm:$0xff] }
  0x17   :  { %3151 = vmatprep.subr.bf16.mxu0 %v9719_v0  ;;  %v7127_v60 = vld [vmem:[%s9709_s1 + $0x1d0] sm:$0xff]   ;;  %v5344_v62 = vcombine.high %v131_v56, %v139_v57  ;;  %v5343_v6 = vcombine.low %v131_v56, %v139_v57  ;;  %v97_v57 = vld [vmem:[%s9710_s0 + $0x200] sm:$0xff] }
  0x18   :  { %v147_v1 = vld [vmem:[%s9710_s0 + $0x390] sm:$0xff] }
  0x19   :  { %2794 = vmatpush1.bf16.msra.mxu1 %v7138_v47  ;;  %v155_v2 = vld [vmem:[%s9710_s0 + $0x3d0] sm:$0xff] }
  0x1a   :  { %3152 = vmatpush1.bf16.msra.mxu0 %v7107_v10  ;;  %2795 = vmatprep.subr.bf16.mxu1 %v9719_v0  ;;  %v5360_v7 = vcombine.high %v147_v1, %v155_v2  ;;  %v7147_v8 = vld [vmem:[%s9709_s1 + $0x50] sm:$0xff]  }
  0x1b   :  { %3153 = vmatprep.subr.bf16.mxu0 %v9719_v0  ;;  %v163_v9 = vld [vmem:[%s9710_s0 + $0x410] sm:$0xff] }
  0x1c   :  { %v171_v10 = vld [vmem:[%s9710_s0 + $0x450] sm:$0xff] }
  0x1d   :  { %2796 = vmatpush1.bf16.msra.mxu1 %v7140_v50  ;;  %v187_v20 = vld [vmem:[%s9710_s0 + $0x4d0] sm:$0xff]  ;;  %v5375_v21 = vcombine.low %v163_v9, %v171_v10  ;;  %v89_v50 = vld [vmem:[%s9710_s0 + $0x1c0] sm:$0xff] }
  0x1e   :  { %3154 = vmatpush1.bf16.msra.mxu0 %v7108_v11  ;;  %2797 = vmatprep.subr.bf16.mxu1 %v9719_v0  ;;  %v7148_v11 = vld [vmem:[%s9709_s1 + $0x58] sm:$0xff]  }
  0x1f   :  { %3155 = vmatprep.subr.bf16.mxu0 %v9719_v0 }
  0x21   :  { %2798 = vmatpush1.bf16.msra.mxu1 %v7141_v55 }
  0x22   :  { %3156 = vmatpush1.bf16.msra.mxu0 %v7109_v12  ;;  %2799 = vmatprep.subr.bf16.mxu1 %v9719_v0  ;;  %v7130_v12 = vld [vmem:[%s9709_s1 + $0x1e8] sm:$0xff]  }
  0x23   :  { %3157 = vmatprep.subr.bf16.mxu0 %v9719_v0 }
  0x25   :  { %2800 = vmatpush1.bf16.msra.mxu1 %v7143_v58  ;;  %v105_v58 = vld [vmem:[%s9710_s0 + $0x240] sm:$0xff] }
  0x26   :  { %3158 = vmatpush1.bf16.msra.mxu0 %v7110_v13  ;;  %2801 = vmatprep.subr.bf16.mxu1 %v9719_v0  ;;  %v5359_v13 = vcombine.low %v147_v1, %v155_v2  ;;  %v113_v2 = vld [vmem:[%s9710_s0 + $0x280] sm:$0xff] }
  0x27   :  { %3159 = vmatprep.subr.bf16.mxu0 %v9719_v0 }
  0x29   :  { %2802 = vmatpush1.bf16.msra.mxu1 %v7144_v63 }
  0x2a   :  { %3160 = vmatpush1.bf16.msra.mxu0 %v7111_v14  ;;  %2803 = vmatprep.subr.bf16.mxu1 %v9719_v0  ;;  %v5376_v14 = vcombine.high %v163_v9, %v171_v10  ;;  %v129_v10 = vld [vmem:[%s9710_s0 + $0x300] sm:$0xff] }
  0x2b   :  { %3161 = vmatprep.subr.bf16.mxu0 %v9719_v0 }
  0x2d   :  { %2804 = vmatpush1.bf16.msra.mxu1 %v7146_v3  ;;  %v121_v3 = vld [vmem:[%s9710_s0 + $0x2c0] sm:$0xff] }
  0x2e   :  { %3162 = vmatpush1.bf16.msra.mxu0 %v7112_v15  ;;  %2805 = vmatprep.subr.bf16.mxu1 %v9719_v0  ;;  %v7131_v15 = vld [vmem:[%s9709_s1 + $0x1f0] sm:$0xff]  }
  0x2f   :  { %3163 = vmatprep.subr.bf16.mxu0 %v9719_v0 }
  0x31   :  { %2806 = vmatpush1.bf16.msra.mxu1 %v7147_v8 }
  0x32   :  { %3164 = vmatpush1.bf16.msra.mxu0 %v7113_v16  ;;  %2807 = vmatprep.subr.bf16.mxu1 %v9719_v0  ;;  %v7150_v16 = vld [vmem:[%s9709_s1 + $0x60] sm:$0xff]  }
  0x33   :  { %3165 = vmatprep.subr.bf16.mxu0 %v9719_v0 }
  0x35   :  { %2808 = vmatpush1.bf16.msra.mxu1 %v7148_v11  ;;  %v137_v11 = vld [vmem:[%s9710_s0 + $0x340] sm:$0xff] }
  0x36   :  { %3166 = vmatpush1.bf16.msra.mxu0 %v7114_v17  ;;  %2809 = vmatprep.subr.bf16.mxu1 %v9719_v0  ;;  %v7151_v17 = vld [vmem:[%s9709_s1 + $0x68] sm:$0xff]  }
  0x37   :  { %3167 = vmatprep.subr.bf16.mxu0 %v9719_v0 }
  0x39   :  { %2810 = vmatpush1.bf16.msra.mxu1 %v7150_v16 }
  0x3a   :  { %3168 = vmatpush1.bf16.msra.mxu0 %v7115_v18  ;;  %v7132_v18 = vld [vmem:[%s9709_s1 + $0x1f8] sm:$0xff]   ;;  %2811 = vmatprep.subr.bf16.mxu1 %v9719_v0 }
  0x3b   :  { %3169 = vmatprep.subr.bf16.mxu0 %v9719_v0 }
  0x3d   :  { %2812 = vmatpush1.bf16.msra.mxu1 %v7151_v17 }
  0x3e   :  { %3170 = vmatpush1.bf16.msra.mxu0 %v7116_v19  ;;  %v179_v19 = vld [vmem:[%s9710_s0 + $0x490] sm:$0xff]  ;;  %2813 = vmatprep.subr.bf16.mxu1 %v9719_v0 }
  0x3f   :  { %3316 = vmatprep.subr.bf16.mxu0 %v9719_v0  ;;  %v5391_v31 = vcombine.low %v179_v19, %v187_v20 }
  0x41   :  { %3172 = vmatmul.mubr.bf16.vlgmr.msra.gmra.mrb[0].mxu0 %v5247_v23  ;;  %v7153_v23 = vld [vmem:[%s9709_s1 + $0x70] sm:$0xff]  }
  0x42   :  { %3317 = vmatpush1.bf16.msra.mxu0 %v7117_v22  ;;  %3179 = vmatprep.mubr.bf16.mxu0 %v5264_v24  ;;  %v5392_v22 = vcombine.high %v179_v19, %v187_v20  ;;  %v7154_v24 = vld [vmem:[%s9709_s1 + $0x78] sm:$0xff]   ;;  %v153_v19 = vld [vmem:[%s9710_s0 + $0x3c0] sm:$0xff] }
  0x43   :  { %3318 = vmatprep.subr.bf16.mxu0 %v9719_v0  ;;  %2814 = vmatpush1.bf16.msra.mxu1 %v7153_v23 }
  0x44   :  { %2815 = vmatprep.subr.bf16.mxu1 %v9719_v0 }
  0x46   :  { %3319 = vmatpush1.bf16.msra.mxu0 %v7118_v25  ;;  %v33_v25 = vld [vmem:[%s9710_s0] sm:$0xff] }
  0x47   :  { %3320 = vmatprep.subr.bf16.mxu0 %v9719_v0  ;;  %v5244_v27 = vcombine.high %v33_v25, %v41_v26  ;;  %2816 = vmatpush1.bf16.msra.mxu1 %v7154_v24 }
  0x48   :  { %2962 = vmatprep.subr.bf16.mxu1 %v9719_v0 }
  0x49   :  { %3180 = vmatmul.mubr.bf16.gmra.mrb[4].mxu0 %v5263_v29  ;;  %v203_v29 = vld [vmem:[%s9710_s0 + $0x550] sm:$0xff]  ;;  %2817 = vmatprep.mubr.bf16.mxu1 %v5244_v27  ;;  %v169_v27 = vld [vmem:[%s9710_s0 + $0x440] sm:$0xff] }
  0x4a   :  { %3187 = vmatprep.mubr.bf16.mxu0 %v5280_v30  ;;  %3321 = vmatpush1.bf16.msra.mxu0 %v7119_v28  ;;  %v195_v28 = vld [vmem:[%s9710_s0 + $0x510] sm:$0xff]  ;;  %v5243_v30 = vcombine.low %v33_v25, %v41_v26  ;;  %v161_v26 = vld [vmem:[%s9710_s0 + $0x400] sm:$0xff] }
  0x4b   :  { %3322 = vmatprep.subr.bf16.mxu0 %v9719_v0  ;;  %v5408_v32 = vcombine.high %v195_v28, %v203_v29  ;;  %v5407_v39 = vcombine.low %v195_v28, %v203_v29  ;;  %v5372_v28 = vcombine.high %v161_v26, %v169_v27  ;;  %v36_v29 = vld [vmem:[%s9710_s0 + $0x18] sm:$0xff] }
  0x4c   :  { %2818 = vmatmul.mubr.bf16.vlgmr.msra.gmra.mrb[0].mxu1 %v5243_v30  ;;  %v44_v30 = vld [vmem:[%s9710_s0 + $0x58] sm:$0xff] }
  0x4e   :  { %3323 = vmatpush1.bf16.msra.mxu0 %v7120_v35  ;;  %v5260_v35 = vcombine.high %v49_v33, %v57_v34 }
  0x4f   :  { %3324 = vmatprep.subr.bf16.mxu0 %v9719_v0 }
  0x50   :  { %2825 = vmatprep.mubr.bf16.mxu1 %v5260_v35  ;;  %v185_v35 = vld [vmem:[%s9710_s0 + $0x4c0] sm:$0xff] }
  0x51   :  { %3188 = vmatmul.mubr.bf16.gmra.mrb[8].mxu0 %v5279_v37  ;;  %v219_v37 = vld [vmem:[%s9710_s0 + $0x5d0] sm:$0xff] }
  0x52   :  { %3195 = vmatprep.mubr.bf16.mxu0 %v5296_v38  ;;  %3325 = vmatpush1.bf16.msra.mxu0 %v7121_v36  ;;  %v211_v36 = vld [vmem:[%s9710_s0 + $0x590] sm:$0xff]  ;;  %v5259_v38 = vcombine.low %v49_v33, %v57_v34  ;;  %v5250_v33 = vcombine.high %v36_v29, %v44_v30  ;;  %v177_v34 = vld [vmem:[%s9710_s0 + $0x480] sm:$0xff] }
  0x53   :  { %3326 = vmatprep.subr.bf16.mxu0 %v9719_v0  ;;  %v5424_v40 = vcombine.high %v211_v36, %v219_v37  ;;  %v5423_v47 = vcombine.low %v211_v36, %v219_v37  ;;  %v5388_v36 = vcombine.high %v177_v34, %v185_v35  ;;  %v52_v37 = vld [vmem:[%s9710_s0 + $0x98] sm:$0xff] }
  0x54   :  { %2826 = vmatmul.mubr.bf16.gmra.mrb[4].mxu1 %v5259_v38  ;;  %v60_v38 = vld [vmem:[%s9710_s0 + $0xd8] sm:$0xff] }
  0x56   :  { %3327 = vmatpush1.bf16.msra.mxu0 %v7122_v42  ;;  %v73_v42 = vld [vmem:[%s9710_s0 + $0x140] sm:$0xff] }
  0x57   :  { %3328 = vmatprep.subr.bf16.mxu0 %v9719_v0  ;;  %v5276_v43 = vcombine.high %v65_v41, %v73_v42 }
  0x59   :  { %3196 = vmatmul.mubr.bf16.gmra.mrb[12].mxu0 %v5295_v45  ;;  %v235_v45 = vld [vmem:[%s9710_s0 + $0x650] sm:$0xff]  ;;  %2833 = vmatprep.mubr.bf16.mxu1 %v5276_v43  ;;  %v193_v43 = vld [vmem:[%s9710_s0 + $0x500] sm:$0xff] }
  0x5a   :  { %3203 = vmatprep.mubr.bf16.mxu0 %v5312_v46  ;;  %3329 = vmatpush1.bf16.msra.mxu0 %v7123_v44  ;;  %v227_v44 = vld [vmem:[%s9710_s0 + $0x610] sm:$0xff]  ;;  %v5275_v46 = vcombine.low %v65_v41, %v73_v42  ;;  %v7136_v41 = vld [vmem:[%s9709_s1 + $0x200] sm:$0xff]   ;;  %v5266_v42 = vcombine.high %v52_v37, %v60_v38 }
  0x5b   :  { %3330 = vmatprep.subr.bf16.mxu0 %v9719_v0  ;;  %v5440_v48 = vcombine.high %v227_v44, %v235_v45  ;;  %v5439_v55 = vcombine.low %v227_v44, %v235_v45  ;;  %v201_v44 = vld [vmem:[%s9710_s0 + $0x540] sm:$0xff]  ;;  %v7139_v45 = vld [vmem:[%s9709_s1 + $0x208] sm:$0xff]  }
  0x5c   :  { %2834 = vmatmul.mubr.bf16.gmra.mrb[8].mxu1 %v5275_v46  ;;  %v5404_v46 = vcombine.high %v193_v43, %v201_v44 }
  0x5e   :  { %3331 = vmatpush1.bf16.msra.mxu0 %v7124_v51  ;;  %v5292_v51 = vcombine.high %v81_v49, %v89_v50 }
  0x5f   :  { %3332 = vmatprep.subr.bf16.mxu0 %v9719_v0 }
  0x60   :  { %2841 = vmatprep.mubr.bf16.mxu1 %v5292_v51 }
  0x61   :  { %3204 = vmatmul.mubr.bf16.gmra.mrb[16].mxu0 %v5311_v53  ;;  %v251_v53 = vld [vmem:[%s9710_s0 + $0x6d0] sm:$0xff] }
  0x62   :  { %3211 = vmatprep.mubr.bf16.mxu0 %v5328_v54  ;;  %3333 = vmatpush1.bf16.msra.mxu0 %v7125_v52  ;;  %v243_v52 = vld [vmem:[%s9710_s0 + $0x690] sm:$0xff]  ;;  %v5291_v54 = vcombine.low %v81_v49, %v89_v50  ;;  %v5403_v49 = vcombine.low %v193_v43, %v201_v44  ;;  %v5265_v50 = vcombine.low %v52_v37, %v60_v38  ;;  %v7176_v38 = vld [vmem:[%s9709_s1 + $0xc0] sm:$0xff]   ;;  %v148_v43 = vld [vmem:[%s9710_s0 + $0x398] sm:$0xff] }
  0x63   :  { %3334 = vmatprep.subr.bf16.mxu0 %v9719_v0  ;;  %v5456_v56 = vcombine.high %v243_v52, %v251_v53  ;;  %v5455_v63 = vcombine.low %v243_v52, %v251_v53  ;;  %v7142_v52 = vld [vmem:[%s9709_s1 + $0x210] sm:$0xff]   ;;  %v7165_v53 = vld [vmem:[%s9709_s1 + $0x80] sm:$0xff]   ;;  %v156_v44 = vld [vmem:[%s9710_s0 + $0x3d8] sm:$0xff] }
  0x64   :  { %2842 = vmatmul.mubr.bf16.gmra.mrb[12].mxu1 %v5291_v54  ;;  %v7166_v54 = vld [vmem:[%s9709_s1 + $0x88] sm:$0xff]   ;;  %v7159_v37 = vld [vmem:[%s9709_s1 + $0x250] sm:$0xff]  }
  0x65   :  { %2963 = vmatpush1.bf16.msra.mxu1 %v7165_v53  ;;  %v7162_v53 = vld [vmem:[%s9709_s1 + $0x268] sm:$0xff]  }
  0x66   :  { %3335 = vmatpush1.bf16.msra.mxu0 %v7126_v59  ;;  %v5308_v59 = vcombine.high %v97_v57, %v105_v58  ;;  %2964 = vmatprep.subr.bf16.mxu1 %v9719_v0 }
  0x67   :  { %3336 = vmatprep.subr.bf16.mxu0 %v9719_v0 }
  0x68   :  { %2849 = vmatprep.mubr.bf16.mxu1 %v5308_v59  ;;  %v92_v59 = vld [vmem:[%s9710_s0 + $0x1d8] sm:$0xff] }
  0x69   :  { %3212 = vmatmul.mubr.bf16.gmra.mrb[20].mxu0 %v5327_v61  ;;  %v267_v61 = vld [vmem:[%s9710_s0 + $0x750] sm:$0xff]  ;;  %2965 = vmatpush1.bf16.msra.mxu1 %v7166_v54  ;;  %v297_v54 = vld [vmem:[%s9710_s0 + $0x840] sm:$0xff] }
  0x6a   :  { %3219 = vmatprep.mubr.bf16.mxu0 %v5344_v62  ;;  %3337 = vmatpush1.bf16.msra.mxu0 %v7127_v60  ;;  %v259_v60 = vld [vmem:[%s9710_s0 + $0x710] sm:$0xff]  ;;  %v5307_v62 = vcombine.low %v97_v57, %v105_v58  ;;  %v217_v57 = vld [vmem:[%s9710_s0 + $0x5c0] sm:$0xff]  ;;  %v84_v58 = vld [vmem:[%s9710_s0 + $0x198] sm:$0xff] }
  0x6b   :  { %3338 = vmatprep.subr.bf16.mxu0 %v9719_v0  ;;  %v5472_v1 = vcombine.high %v259_v60, %v267_v61  ;;  %v5471_v8 = vcombine.low %v259_v60, %v267_v61  ;;  %2966 = vmatprep.subr.bf16.mxu1 %v9719_v0 }
  0x6c   :  { %2850 = vmatmul.mubr.bf16.gmra.mrb[16].mxu1 %v5307_v62 }
  0x6e   :  { %3339 = vmatpush1.bf16.msra.mxu0 %v7128_v4  ;;  %v5324_v4 = vcombine.high %v113_v2, %v121_v3 }
  0x6f   :  { %3340 = vmatprep.subr.bf16.mxu0 %v9719_v0 }
  0x70   :  { %2857 = vmatprep.mubr.bf16.mxu1 %v5324_v4  ;;  %v7169_v4 = vld [vmem:[%s9709_s1 + $0x98] sm:$0xff]  }
  0x71   :  { %3220 = vmatmul.mubr.bf16.gmra.mrb[24].mxu0 %v5343_v6  ;;  %v283_v6 = vld [vmem:[%s9710_s0 + $0x7d0] sm:$0xff] }
  0x72   :  { %3227 = vmatprep.mubr.bf16.mxu0 %v5360_v7  ;;  %3341 = vmatpush1.bf16.msra.mxu0 %v7129_v5  ;;  %v275_v5 = vld [vmem:[%s9710_s0 + $0x790] sm:$0xff]  ;;  %v5323_v7 = vcombine.low %v113_v2, %v121_v3  ;;  %v7152_v3 = vld [vmem:[%s9709_s1 + $0x228] sm:$0xff]  }
  0x73   :  { %3342 = vmatprep.subr.bf16.mxu0 %v9719_v0  ;;  %v5488_v9 = vcombine.high %v275_v5, %v283_v6  ;;  %v5487_v16 = vcombine.low %v275_v5, %v283_v6  ;;  %v7167_v2 = vld [vmem:[%s9709_s1 + $0x90] sm:$0xff]   ;;  %v225_v5 = vld [vmem:[%s9710_s0 + $0x600] sm:$0xff] }
  0x74   :  { %2858 = vmatmul.mubr.bf16.gmra.mrb[20].mxu1 %v5323_v7  ;;  %v233_v6 = vld [vmem:[%s9710_s0 + $0x640] sm:$0xff]  ;;  %v100_v7 = vld [vmem:[%s9710_s0 + $0x218] sm:$0xff] }
  0x75   :  { %2967 = vmatpush1.bf16.msra.mxu1 %v7167_v2  ;;  %v7164_v2 = vld [vmem:[%s9709_s1 + $0x278] sm:$0xff]  }
  0x76   :  { %3343 = vmatpush1.bf16.msra.mxu0 %v7130_v12  ;;  %v5340_v12 = vcombine.high %v129_v10, %v137_v11  ;;  %2968 = vmatprep.subr.bf16.mxu1 %v9719_v0 }
  0x77   :  { %3344 = vmatprep.subr.bf16.mxu0 %v9719_v0 }
  0x78   :  { %2865 = vmatprep.mubr.bf16.mxu1 %v5340_v12 }
  0x79   :  { %3228 = vmatmul.mubr.bf16.gmra.mrb[28].mxu0 %v5359_v13  ;;  %v291_v13 = vld [vmem:[%s9710_s0 + $0x810] sm:$0xff]  ;;  %2969 = vmatpush1.bf16.msra.mxu1 %v7169_v4  ;;  %v180_v4 = vld [vmem:[%s9710_s0 + $0x498] sm:$0xff] }
  0x7a   :  { %3235 = vmatprep.mubr.bf16.mxu0 %v5376_v14  ;;  %3345 = vmatpush1.bf16.msra.mxu0 %v7131_v15  ;;  %v299_v14 = vld [vmem:[%s9710_s0 + $0x850] sm:$0xff]  ;;  %v5339_v15 = vcombine.low %v129_v10, %v137_v11  ;;  %v5435_v10 = vcombine.low %v225_v5, %v233_v6  ;;  %v5297_v11 = vcombine.low %v84_v58, %v92_v59 }
  0x7b   :  { %3346 = vmatprep.subr.bf16.mxu0 %v9719_v0  ;;  %v5504_v17 = vcombine.high %v291_v13, %v299_v14  ;;  %v5503_v24 = vcombine.low %v291_v13, %v299_v14  ;;  %v7155_v13 = vld [vmem:[%s9709_s1 + $0x230] sm:$0xff]   ;;  %2970 = vmatprep.subr.bf16.mxu1 %v9719_v0  ;;  %v7170_v14 = vld [vmem:[%s9709_s1 + $0xa0] sm:$0xff]  }
  0x7c   :  { %2866 = vmatmul.mubr.bf16.gmra.mrb[24].mxu1 %v5339_v15  ;;  %v7172_v15 = vld [vmem:[%s9709_s1 + $0xa8] sm:$0xff]  }
  0x7d   :  { %2971 = vmatpush1.bf16.msra.mxu1 %v7170_v14 }
  0x7e   :  { %3347 = vmatpush1.bf16.msra.mxu0 %v7132_v18  ;;  %v145_v18 = vld [vmem:[%s9710_s0 + $0x380] sm:$0xff]  ;;  %2972 = vmatprep.subr.bf16.mxu1 %v9719_v0 }
  0x7f   :  { %3493 = vmatprep.subr.bf16.mxu0 %v9719_v0  ;;  %v5356_v20 = vcombine.high %v145_v18, %v153_v19  ;;  %v5355_v23 = vcombine.low %v145_v18, %v153_v19  ;;  %v249_v18 = vld [vmem:[%s9710_s0 + $0x6c0] sm:$0xff]  ;;  %v116_v19 = vld [vmem:[%s9710_s0 + $0x298] sm:$0xff] }
  0x81   :  { %3236 = vmatmul.mubr.bf16.gmra.mrb[32].mxu0 %v5375_v21  ;;  %v307_v21 = vld [vmem:[%s9710_s0 + $0x890] sm:$0xff]  ;;  %2873 = vmatprep.mubr.bf16.mxu1 %v5356_v20  ;;  %v124_v20 = vld [vmem:[%s9710_s0 + $0x2d8] sm:$0xff] }
  0x82   :  { %3243 = vmatprep.mubr.bf16.mxu0 %v5392_v22  ;;  %v315_v22 = vld [vmem:[%s9710_s0 + $0x8d0] sm:$0xff]  ;;  %2973 = vmatpush1.bf16.msra.mxu1 %v7172_v15  ;;  %v196_v15 = vld [vmem:[%s9710_s0 + $0x518] sm:$0xff] }
  0x83   :  { %v5520_v25 = vcombine.high %v307_v21, %v315_v22  ;;  %2974 = vmatprep.subr.bf16.mxu1 %v9719_v0 }
  0x84   :  { %2874 = vmatmul.mubr.bf16.gmra.mrb[28].mxu1 %v5355_v23 }
  0x85   :  { %2881 = vmatprep.mubr.bf16.mxu1 %v5372_v28  ;;  %v257_v28 = vld [vmem:[%s9710_s0 + $0x700] sm:$0xff] }
  0x89   :  { %3244 = vmatmul.mubr.bf16.gmra.mrb[36].mxu0 %v5391_v31  ;;  %v5371_v31 = vcombine.low %v161_v26, %v169_v27  ;;  %v7173_v26 = vld [vmem:[%s9709_s1 + $0xb0] sm:$0xff]   ;;  %v7175_v27 = vld [vmem:[%s9709_s1 + $0xb8] sm:$0xff]  }
  0x8a   :  { %3251 = vmatprep.mubr.bf16.mxu0 %v5408_v32  ;;  %v5519_v32 = vcombine.low %v307_v21, %v315_v22  ;;  %2975 = vmatpush1.bf16.msra.mxu1 %v7173_v26 }
  0x8b   :  { %2976 = vmatprep.subr.bf16.mxu1 %v9719_v0 }
  0x8c   :  { %2882 = vmatmul.mubr.bf16.gmra.mrb[32].mxu1 %v5371_v31  ;;  %v132_v31 = vld [vmem:[%s9710_s0 + $0x318] sm:$0xff] }
  0x8d   :  { %2889 = vmatprep.mubr.bf16.mxu1 %v5388_v36 }
  0x8e   :  { %2977 = vmatpush1.bf16.msra.mxu1 %v7175_v27 }
  0x8f   :  { %2978 = vmatprep.subr.bf16.mxu1 %v9719_v0 }
  0x91   :  { %3252 = vmatmul.mubr.bf16.gmra.mrb[40].mxu0 %v5407_v39  ;;  %v5387_v39 = vcombine.low %v177_v34, %v185_v35  ;;  %v5329_v35 = vcombine.low %v116_v19, %v124_v20 }
  0x92   :  { %3259 = vmatprep.mubr.bf16.mxu0 %v5424_v40  ;;  %v5249_v40 = vcombine.low %v36_v29, %v44_v30  ;;  %v7158_v29 = vld [vmem:[%s9709_s1 + $0x248] sm:$0xff]   ;;  %v265_v30 = vld [vmem:[%s9710_s0 + $0x740] sm:$0xff]  ;;  %2979 = vmatpush1.bf16.msra.mxu1 %v7176_v38 }
  0x93   :  { %v5467_v34 = vcombine.low %v257_v28, %v265_v30  ;;  %2980 = vmatprep.subr.bf16.mxu1 %v9719_v0 }
  0x94   :  { %2890 = vmatmul.mubr.bf16.gmra.mrb[36].mxu1 %v5387_v39  ;;  %v7178_v39 = vld [vmem:[%s9709_s1 + $0xc8] sm:$0xff]  }
  0x95   :  { %2897 = vmatprep.mubr.bf16.mxu1 %v5404_v46 }
  0x96   :  { %2981 = vmatpush1.bf16.msra.mxu1 %v7178_v39  ;;  %v244_v39 = vld [vmem:[%s9710_s0 + $0x698] sm:$0xff] }
  0x97   :  { %2982 = vmatprep.subr.bf16.mxu1 %v9719_v0 }
  0x99   :  { %3260 = vmatmul.mubr.bf16.gmra.mrb[44].mxu0 %v5423_v47  ;;  %v68_v47 = vld [vmem:[%s9710_s0 + $0x118] sm:$0xff] }
  0x9a   :  { %3267 = vmatprep.mubr.bf16.mxu0 %v5440_v48  ;;  %v76_v48 = vld [vmem:[%s9710_s0 + $0x158] sm:$0xff] }
  0x9b   :  { %v5282_v51 = vcombine.high %v68_v47, %v76_v48  ;;  %v5281_v62 = vcombine.low %v68_v47, %v76_v48  ;;  %v5362_v48 = vcombine.high %v148_v43, %v156_v44 }
  0x9c   :  { %2898 = vmatmul.mubr.bf16.gmra.mrb[40].mxu1 %v5403_v49  ;;  %v7161_v49 = vld [vmem:[%s9709_s1 + $0x260] sm:$0xff]  }
  0xa1   :  { %3268 = vmatmul.mubr.bf16.gmra.mrb[48].mxu0 %v5439_v55  ;;  %v209_v55 = vld [vmem:[%s9710_s0 + $0x580] sm:$0xff] }
  0xa2   :  { %3275 = vmatprep.mubr.bf16.mxu0 %v5456_v56  ;;  %v7145_v56 = vld [vmem:[%s9709_s1 + $0x218] sm:$0xff]   ;;  %v5420_v60 = vcombine.high %v209_v55, %v217_v57  ;;  %v5419_v61 = vcombine.low %v209_v55, %v217_v57 }
  0xa3   :  { %v164_v55 = vld [vmem:[%s9710_s0 + $0x418] sm:$0xff] }
  0xa4   :  { %2905 = vmatprep.mubr.bf16.mxu1 %v5420_v60 }
  0xa5   :  { %2906 = vmatmul.mubr.bf16.gmra.mrb[44].mxu1 %v5419_v61  ;;  %v7163_v61 = vld [vmem:[%s9709_s1 + $0x270] sm:$0xff]  }
  0xa9   :  { %3276 = vmatmul.mubr.bf16.gmra.mrb[52].mxu0 %v5455_v63  ;;  %v5298_v63 = vcombine.high %v84_v58, %v92_v59  ;;  %v5361_v59 = vcombine.low %v148_v43, %v156_v44  ;;  %v98_v44 = vld [vmem:[%s9710_s0 + $0x208] sm:$0xff] }
  0xaa   :  { %3283 = vmatprep.mubr.bf16.mxu0 %v5472_v1  ;;  %v7149_v1 = vld [vmem:[%s9709_s1 + $0x220] sm:$0xff]  }
  0xb1   :  { %3284 = vmatmul.mubr.bf16.gmra.mrb[56].mxu0 %v5471_v8  ;;  %v108_v8 = vld [vmem:[%s9710_s0 + $0x258] sm:$0xff] }
  0xb2   :  { %3291 = vmatprep.mubr.bf16.mxu0 %v5488_v9  ;;  %v5436_v9 = vcombine.high %v225_v5, %v233_v6  ;;  %v5314_v12 = vcombine.high %v100_v7, %v108_v8  ;;  %v5313_v23 = vcombine.low %v100_v7, %v108_v8  ;;  %v188_v5 = vld [vmem:[%s9710_s0 + $0x4d8] sm:$0xff] }
  0xb4   :  { %2913 = vmatprep.mubr.bf16.mxu1 %v5436_v9  ;;  %v5394_v9 = vcombine.high %v180_v4, %v188_v5 }
  0xb5   :  { %2914 = vmatmul.mubr.bf16.gmra.mrb[48].mxu1 %v5435_v10  ;;  %v7185_v10 = vld [vmem:[%s9709_s1 + $0xf0] sm:$0xff]  }
  0xb9   :  { %3292 = vmatmul.mubr.bf16.gmra.mrb[60].mxu0 %v5487_v16  ;;  %v241_v16 = vld [vmem:[%s9710_s0 + $0x680] sm:$0xff] }
  0xba   :  { %3299 = vmatprep.mubr.bf16.mxu0 %v5504_v17  ;;  %v7156_v17 = vld [vmem:[%s9709_s1 + $0x238] sm:$0xff]   ;;  %v5452_v21 = vcombine.high %v241_v16, %v249_v18  ;;  %v5451_v22 = vcombine.low %v241_v16, %v249_v18  ;;  %v5393_v18 = vcombine.low %v180_v4, %v188_v5  ;;  %v146_v5 = vld [vmem:[%s9710_s0 + $0x388] sm:$0xff] }
  0xbb   :  { %v204_v16 = vld [vmem:[%s9710_s0 + $0x558] sm:$0xff] }
  0xbc   :  { %2921 = vmatprep.mubr.bf16.mxu1 %v5452_v21  ;;  %v58_v21 = vld [vmem:[%s9710_s0 + $0xc8] sm:$0xff]  ;;  %v5409_v26 = vcombine.low %v196_v15, %v204_v16 }
  0xbd   :  { %2922 = vmatmul.mubr.bf16.gmra.mrb[52].mxu1 %v5451_v22 }
  0xc1   :  { %3300 = vmatmul.mubr.bf16.gmra.mrb[64].mxu0 %v5503_v24  ;;  %v5330_v24 = vcombine.high %v116_v19, %v124_v20  ;;  %v5410_v19 = vcombine.high %v196_v15, %v204_v16  ;;  %v50_v20 = vld [vmem:[%s9710_s0 + $0x88] sm:$0xff]  ;;  %v37_v16 = vld [vmem:[%s9710_s0 + $0x20] sm:$0xff] }
  0xc2   :  { %3307 = vmatprep.mubr.bf16.mxu0 %v5520_v25  ;;  %v7157_v25 = vld [vmem:[%s9709_s1 + $0x240] sm:$0xff]   ;;  %v5262_v22 = vcombine.high %v50_v20, %v58_v21 }
  0xc9   :  { %3308 = vmatmul.mubr.bf16.gmra.mrb[68].mxu0 %v5519_v32  ;;  %v140_v32 = vld [vmem:[%s9710_s0 + $0x358] sm:$0xff] }
  0xca   :  { %3348 = vmatprep.mubr.bf16.mxu0 %v5250_v33  ;;  %v5468_v33 = vcombine.high %v257_v28, %v265_v30  ;;  %v5346_v36 = vcombine.high %v132_v31, %v140_v32  ;;  %v5345_v47 = vcombine.low %v132_v31, %v140_v32  ;;  %v66_v28 = vld [vmem:[%s9710_s0 + $0x108] sm:$0xff]  ;;  %v228_v31 = vld [vmem:[%s9710_s0 + $0x618] sm:$0xff] }
  0xcb   :  { %v236_v32 = vld [vmem:[%s9710_s0 + $0x658] sm:$0xff] }
  0xcc   :  { %2929 = vmatprep.mubr.bf16.mxu1 %v5468_v33 }
  0xcd   :  { %2930 = vmatmul.mubr.bf16.gmra.mrb[56].mxu1 %v5467_v34 }
  0xd1   :  { %3349 = vmatmul.mubr.bf16.vlgmr.msra.gmra.mrb[0].mxu0 %v5249_v40  ;;  %v273_v40 = vld [vmem:[%s9710_s0 + $0x780] sm:$0xff] }
  0xd2   :  { %3494 = vmatpush1.bf16.msra.mxu0 %v7136_v41  ;;  %3356 = vmatprep.mubr.bf16.mxu0 %v5266_v42  ;;  %v7160_v41 = vld [vmem:[%s9709_s1 + $0x258] sm:$0xff]   ;;  %v281_v42 = vld [vmem:[%s9710_s0 + $0x7c0] sm:$0xff] }
  0xd3   :  { %3495 = vmatprep.subr.bf16.mxu0 %v9719_v0  ;;  %v5483_v46 = vcombine.low %v273_v40, %v281_v42 }
  0xd6   :  { %3496 = vmatpush1.bf16.msra.mxu0 %v7139_v45  ;;  %v5484_v45 = vcombine.high %v273_v40, %v281_v42  ;;  %v252_v40 = vld [vmem:[%s9710_s0 + $0x6d8] sm:$0xff]  ;;  %v5441_v42 = vcombine.low %v228_v31, %v236_v32 }
  0xd7   :  { %3497 = vmatprep.subr.bf16.mxu0 %v9719_v0  ;;  %v5458_v43 = vcombine.high %v244_v39, %v252_v40 }
  0xd8   :  { %2937 = vmatprep.mubr.bf16.mxu1 %v5484_v45  ;;  %v106_v45 = vld [vmem:[%s9710_s0 + $0x248] sm:$0xff] }
  0xd9   :  { %3357 = vmatmul.mubr.bf16.gmra.mrb[4].mxu0 %v5265_v50  ;;  %v7179_v50 = vld [vmem:[%s9709_s1 + $0xd0] sm:$0xff]   ;;  %2938 = vmatmul.mubr.bf16.gmra.mrb[60].mxu1 %v5483_v46  ;;  %v5310_v46 = vcombine.high %v98_v44, %v106_v45 }
  0xda   :  { %3364 = vmatprep.mubr.bf16.mxu0 %v5282_v51  ;;  %3498 = vmatpush1.bf16.msra.mxu0 %v7142_v52  ;;  %v7180_v51 = vld [vmem:[%s9709_s1 + $0xd8] sm:$0xff]   ;;  %v289_v52 = vld [vmem:[%s9710_s0 + $0x800] sm:$0xff] }
  0xdb   :  { %3499 = vmatprep.subr.bf16.mxu0 %v9719_v0  ;;  %2983 = vmatpush1.bf16.msra.mxu1 %v7179_v50  ;;  %v5500_v57 = vcombine.high %v289_v52, %v297_v54  ;;  %v5499_v58 = vcombine.low %v289_v52, %v297_v54  ;;  %v5457_v50 = vcombine.low %v244_v39, %v252_v40  ;;  %v114_v52 = vld [vmem:[%s9710_s0 + $0x288] sm:$0xff]  ;;  %v7174_v39 = vld [vmem:[%s9709_s1 + $0x290] sm:$0xff]  }
  0xdc   :  { %2984 = vmatprep.subr.bf16.mxu1 %v9719_v0  ;;  %v210_v40 = vld [vmem:[%s9710_s0 + $0x588] sm:$0xff] }
  0xdd   :  { %2945 = vmatprep.mubr.bf16.mxu1 %v5500_v57 }
  0xde   :  { %3500 = vmatpush1.bf16.msra.mxu0 %v7145_v56  ;;  %v172_v56 = vld [vmem:[%s9710_s0 + $0x458] sm:$0xff] }
  0xdf   :  { %3501 = vmatprep.subr.bf16.mxu0 %v9719_v0  ;;  %2985 = vmatpush1.bf16.msra.mxu1 %v7180_v51  ;;  %v5378_v60 = vcombine.high %v164_v55, %v172_v56  ;;  %v5377_v8 = vcombine.low %v164_v55, %v172_v56  ;;  %v276_v55 = vld [vmem:[%s9710_s0 + $0x798] sm:$0xff] }
  0xe0   :  { %2986 = vmatprep.subr.bf16.mxu1 %v9719_v0  ;;  %v284_v56 = vld [vmem:[%s9710_s0 + $0x7d8] sm:$0xff] }
  0xe1   :  { %3365 = vmatmul.mubr.bf16.gmra.mrb[8].mxu0 %v5281_v62  ;;  %v7182_v62 = vld [vmem:[%s9709_s1 + $0xe0] sm:$0xff]   ;;  %2946 = vmatmul.mubr.bf16.gmra.mrb[64].mxu1 %v5499_v58 }
  0xe2   :  { %3372 = vmatprep.mubr.bf16.mxu0 %v5298_v63  ;;  %3502 = vmatpush1.bf16.msra.mxu0 %v7149_v1  ;;  %v7183_v63 = vld [vmem:[%s9709_s1 + $0xe8] sm:$0xff]   ;;  %v305_v1 = vld [vmem:[%s9710_s0 + $0x880] sm:$0xff] }
  0xe3   :  { %3503 = vmatprep.subr.bf16.mxu0 %v9719_v0  ;;  %2987 = vmatpush1.bf16.msra.mxu1 %v7182_v62 }
  0xe4   :  { %2988 = vmatprep.subr.bf16.mxu1 %v9719_v0 }
  0xe6   :  { %3504 = vmatpush1.bf16.msra.mxu0 %v7152_v3  ;;  %v313_v3 = vld [vmem:[%s9710_s0 + $0x8c0] sm:$0xff] }
  0xe7   :  { %3505 = vmatprep.subr.bf16.mxu0 %v9719_v0  ;;  %v5516_v6 = vcombine.high %v305_v1, %v313_v3  ;;  %v5515_v7 = vcombine.low %v305_v1, %v313_v3  ;;  %2989 = vmatpush1.bf16.msra.mxu1 %v7183_v63  ;;  %v292_v63 = vld [vmem:[%s9710_s0 + $0x818] sm:$0xff]  ;;  %v5489_v3 = vcombine.low %v276_v55, %v284_v56 }
  0xe8   :  { %2990 = vmatprep.subr.bf16.mxu1 %v9719_v0  ;;  %v300_v1 = vld [vmem:[%s9710_s0 + $0x858] sm:$0xff] }
  0xe9   :  { %3373 = vmatmul.mubr.bf16.gmra.mrb[12].mxu0 %v5297_v11  ;;  %2953 = vmatprep.mubr.bf16.mxu1 %v5516_v6  ;;  %v7186_v11 = vld [vmem:[%s9709_s1 + $0xf8] sm:$0xff]   ;;  %v5506_v4 = vcombine.high %v292_v63, %v300_v1  ;;  %v154_v6 = vld [vmem:[%s9710_s0 + $0x3c8] sm:$0xff] }
  0xea   :  { %3380 = vmatprep.mubr.bf16.mxu0 %v5314_v12  ;;  %3506 = vmatpush1.bf16.msra.mxu0 %v7155_v13  ;;  %v34_v12 = vld [vmem:[%s9710_s0 + $0x8] sm:$0xff] }
  0xeb   :  { %3507 = vmatprep.subr.bf16.mxu0 %v9719_v0  ;;  %2954 = vmatmul.mubr.bf16.gmra.mrb[68].mxu1 %v5515_v7  ;;  %v42_v13 = vld [vmem:[%s9710_s0 + $0x48] sm:$0xff]  ;;  %v5358_v7 = vcombine.high %v146_v5, %v154_v6 }
  0xec   :  { %2991 = vmatpush1.bf16.msra.mxu1 %v7185_v10  ;;  %v5246_v14 = vcombine.high %v34_v12, %v42_v13  ;;  %v5357_v10 = vcombine.low %v146_v5, %v154_v6  ;;  %v7189_v6 = vld [vmem:[%s9709_s1 + $0x2c0] sm:$0xff]  }
  0xed   :  { %2992 = vmatprep.subr.bf16.mxu1 %v9719_v0 }
  0xee   :  { %3508 = vmatpush1.bf16.msra.mxu0 %v7156_v17  ;;  %v5245_v17 = vcombine.low %v34_v12, %v42_v13  ;;  %2994 = vmatprep.mubr.bf16.mxu1 %v5246_v14  ;;  %v162_v13 = vld [vmem:[%s9710_s0 + $0x408] sm:$0xff] }
  0xef   :  { %3509 = vmatprep.subr.bf16.mxu0 %v9719_v0  ;;  %v170_v14 = vld [vmem:[%s9710_s0 + $0x448] sm:$0xff] }
  0xf0   :  { %2993 = vmatpush1.bf16.msra.mxu1 %v7186_v11  ;;  %v5505_v11 = vcombine.low %v292_v63, %v300_v1  ;;  %v5374_v15 = vcombine.high %v162_v13, %v170_v14  ;;  %v117_v1 = vld [vmem:[%s9710_s0 + $0x2a0] sm:$0xff] }
  0xf1   :  { %3381 = vmatmul.mubr.bf16.gmra.mrb[16].mxu0 %v5313_v23  ;;  %6627 = vmatprep.subr.bf16.mxu1 %v9719_v0  ;;  %v212_v23 = vld [vmem:[%s9710_s0 + $0x598] sm:$0xff] }
  0xf2   :  { %3388 = vmatprep.mubr.bf16.mxu0 %v5330_v24  ;;  %3510 = vmatpush1.bf16.msra.mxu0 %v7157_v25  ;;  %v220_v24 = vld [vmem:[%s9710_s0 + $0x5d8] sm:$0xff]  ;;  %v5261_v25 = vcombine.low %v50_v20, %v58_v21  ;;  %v178_v21 = vld [vmem:[%s9710_s0 + $0x488] sm:$0xff] }
  0xf3   :  { %3511 = vmatprep.subr.bf16.mxu0 %v9719_v0  ;;  %2995 = vmatmul.mubr.bf16.vlgmr.msra.gmra.mrb[0].mxu1 %v5245_v17  ;;  %v5426_v27 = vcombine.high %v212_v23, %v220_v24  ;;  %v5425_v34 = vcombine.low %v212_v23, %v220_v24  ;;  %v45_v17 = vld [vmem:[%s9710_s0 + $0x60] sm:$0xff] }
  0xf4   :  { %3002 = vmatprep.mubr.bf16.mxu1 %v5262_v22  ;;  %v5252_v20 = vcombine.high %v37_v16, %v45_v17  ;;  %v186_v22 = vld [vmem:[%s9710_s0 + $0x4c8] sm:$0xff]  ;;  %v53_v24 = vld [vmem:[%s9710_s0 + $0xa0] sm:$0xff] }
  0xf5   :  { %v5390_v23 = vcombine.high %v178_v21, %v186_v22 }
  0xf6   :  { %3512 = vmatpush1.bf16.msra.mxu0 %v7158_v29  ;;  %v74_v29 = vld [vmem:[%s9710_s0 + $0x148] sm:$0xff] }
  0xf7   :  { %3513 = vmatprep.subr.bf16.mxu0 %v9719_v0  ;;  %v5278_v30 = vcombine.high %v66_v28, %v74_v29  ;;  %v5277_v33 = vcombine.low %v66_v28, %v74_v29  ;;  %v7168_v28 = vld [vmem:[%s9709_s1 + $0x280] sm:$0xff]  }
  0xf9   :  { %3389 = vmatmul.mubr.bf16.gmra.mrb[20].mxu0 %v5329_v35  ;;  %v5442_v35 = vcombine.high %v228_v31, %v236_v32  ;;  %v202_v31 = vld [vmem:[%s9710_s0 + $0x548] sm:$0xff] }
  0xfa   :  { %3396 = vmatprep.mubr.bf16.mxu0 %v5346_v36  ;;  %3514 = vmatpush1.bf16.msra.mxu0 %v7159_v37  ;;  %v82_v36 = vld [vmem:[%s9710_s0 + $0x188] sm:$0xff] }
  0xfb   :  { %3515 = vmatprep.subr.bf16.mxu0 %v9719_v0  ;;  %3003 = vmatmul.mubr.bf16.gmra.mrb[4].mxu1 %v5261_v25  ;;  %v90_v37 = vld [vmem:[%s9710_s0 + $0x1c8] sm:$0xff]  ;;  %v61_v25 = vld [vmem:[%s9710_s0 + $0xe0] sm:$0xff] }
  0xfc   :  { %3010 = vmatprep.mubr.bf16.mxu1 %v5278_v30  ;;  %v5294_v38 = vcombine.high %v82_v36, %v90_v37  ;;  %v5268_v29 = vcombine.high %v53_v24, %v61_v25  ;;  %v194_v30 = vld [vmem:[%s9710_s0 + $0x508] sm:$0xff] }
  0xfd   :  { %v7171_v32 = vld [vmem:[%s9709_s1 + $0x288] sm:$0xff]  }
  0xfe   :  { %3516 = vmatpush1.bf16.msra.mxu0 %v7160_v41  ;;  %v5293_v41 = vcombine.low %v82_v36, %v90_v37  ;;  %v5405_v36 = vcombine.low %v194_v30, %v202_v31  ;;  %v5267_v37 = vcombine.low %v53_v24, %v61_v25 }
  0xff   :  { %3517 = vmatprep.subr.bf16.mxu0 %v9719_v0 }
 0x101   :  { %3397 = vmatmul.mubr.bf16.gmra.mrb[24].mxu0 %v5345_v47  ;;  %v260_v47 = vld [vmem:[%s9710_s0 + $0x718] sm:$0xff] }
 0x102   :  { %3404 = vmatprep.mubr.bf16.mxu0 %v5362_v48  ;;  %3518 = vmatpush1.bf16.msra.mxu0 %v7161_v49  ;;  %v268_v48 = vld [vmem:[%s9710_s0 + $0x758] sm:$0xff]  ;;  %v5309_v49 = vcombine.low %v98_v44, %v106_v45  ;;  %v85_v44 = vld [vmem:[%s9710_s0 + $0x1a0] sm:$0xff] }
 0x103   :  { %3519 = vmatprep.subr.bf16.mxu0 %v9719_v0  ;;  %3011 = vmatmul.mubr.bf16.gmra.mrb[8].mxu1 %v5277_v33  ;;  %v5474_v51 = vcombine.high %v260_v47, %v268_v48  ;;  %v5473_v58 = vcombine.low %v260_v47, %v268_v48  ;;  %v5406_v33 = vcombine.high %v194_v30, %v202_v31  ;;  %v93_v45 = vld [vmem:[%s9710_s0 + $0x1e0] sm:$0xff] }
 0x104   :  { %3018 = vmatprep.mubr.bf16.mxu1 %v5294_v38  ;;  %v5300_v48 = vcombine.high %v85_v44, %v93_v45  ;;  %v165_v31 = vld [vmem:[%s9710_s0 + $0x420] sm:$0xff] }
 0x106   :  { %3520 = vmatpush1.bf16.msra.mxu0 %v7162_v53  ;;  %v122_v53 = vld [vmem:[%s9710_s0 + $0x2c8] sm:$0xff] }
 0x107   :  { %3521 = vmatprep.subr.bf16.mxu0 %v9719_v0  ;;  %v5326_v54 = vcombine.high %v114_v52, %v122_v53  ;;  %v5325_v57 = vcombine.low %v114_v52, %v122_v53  ;;  %v234_v52 = vld [vmem:[%s9710_s0 + $0x648] sm:$0xff]  ;;  %v101_v53 = vld [vmem:[%s9710_s0 + $0x220] sm:$0xff] }
 0x109   :  { %3405 = vmatmul.mubr.bf16.gmra.mrb[28].mxu0 %v5361_v59  ;;  %v5490_v59 = vcombine.high %v276_v55, %v284_v56 }
 0x10a   :  { %3412 = vmatprep.mubr.bf16.mxu0 %v5378_v60  ;;  %3522 = vmatpush1.bf16.msra.mxu0 %v7163_v61  ;;  %v130_v60 = vld [vmem:[%s9710_s0 + $0x308] sm:$0xff] }
 0x10b   :  { %3523 = vmatprep.subr.bf16.mxu0 %v9719_v0  ;;  %3019 = vmatmul.mubr.bf16.gmra.mrb[12].mxu1 %v5293_v41  ;;  %v138_v61 = vld [vmem:[%s9710_s0 + $0x348] sm:$0xff] }
 0x10c   :  { %3026 = vmatprep.mubr.bf16.mxu1 %v5310_v46  ;;  %v5342_v62 = vcombine.high %v130_v60, %v138_v61  ;;  %v218_v41 = vld [vmem:[%s9710_s0 + $0x5c8] sm:$0xff] }
 0x10d   :  { %v5421_v46 = vcombine.low %v210_v40, %v218_v41 }
 0x10e   :  { %3524 = vmatpush1.bf16.msra.mxu0 %v7164_v2  ;;  %v5341_v2 = vcombine.low %v130_v60, %v138_v61  ;;  %v242_v60 = vld [vmem:[%s9710_s0 + $0x688] sm:$0xff] }
 0x10f   :  { %3670 = vmatprep.subr.bf16.mxu0 %v9719_v0  ;;  %v250_v61 = vld [vmem:[%s9710_s0 + $0x6c8] sm:$0xff] }
 0x110   :  { %v5454_v63 = vcombine.high %v242_v60, %v250_v61 }
 0x111   :  { %3413 = vmatmul.mubr.bf16.gmra.mrb[32].mxu0 %v5377_v8  ;;  %v308_v8 = vld [vmem:[%s9710_s0 + $0x898] sm:$0xff] }
 0x112   :  { %3420 = vmatprep.mubr.bf16.mxu0 %v5394_v9  ;;  %v316_v9 = vld [vmem:[%s9710_s0 + $0x8d8] sm:$0xff] }
 0x113   :  { %3027 = vmatmul.mubr.bf16.gmra.mrb[16].mxu1 %v5309_v49  ;;  %v5522_v12 = vcombine.high %v308_v8, %v316_v9  ;;  %v7181_v49 = vld [vmem:[%s9709_s1 + $0x2a0] sm:$0xff]  }
 0x114   :  { %3034 = vmatprep.mubr.bf16.mxu1 %v5326_v54  ;;  %v109_v54 = vld [vmem:[%s9710_s0 + $0x260] sm:$0xff] }
 0x119   :  { %3421 = vmatmul.mubr.bf16.gmra.mrb[36].mxu0 %v5393_v18  ;;  %v5373_v18 = vcombine.low %v162_v13, %v170_v14 }
 0x11a   :  { %3428 = vmatprep.mubr.bf16.mxu0 %v5410_v19  ;;  %v5521_v19 = vcombine.low %v308_v8, %v316_v9  ;;  %v266_v8 = vld [vmem:[%s9710_s0 + $0x748] sm:$0xff] }
 0x11b   :  { %3035 = vmatmul.mubr.bf16.gmra.mrb[20].mxu1 %v5325_v57  ;;  %v5299_v57 = vcombine.low %v85_v44, %v93_v45  ;;  %v7190_v9 = vld [vmem:[%s9709_s1 + $0x2c8] sm:$0xff]  }
 0x11c   :  { %3042 = vmatprep.mubr.bf16.mxu1 %v5342_v62  ;;  %v7188_v62 = vld [vmem:[%s9709_s1 + $0x2b8] sm:$0xff]  }
 0x121   :  { %3429 = vmatmul.mubr.bf16.gmra.mrb[40].mxu0 %v5409_v26  ;;  %v5389_v26 = vcombine.low %v178_v21, %v186_v22  ;;  %v149_v21 = vld [vmem:[%s9710_s0 + $0x3a0] sm:$0xff] }
 0x122   :  { %3436 = vmatprep.mubr.bf16.mxu0 %v5426_v27  ;;  %v5251_v27 = vcombine.low %v37_v16, %v45_v17  ;;  %v7191_v16 = vld [vmem:[%s9709_s1 + $0x2d0] sm:$0xff]   ;;  %v274_v17 = vld [vmem:[%s9710_s0 + $0x788] sm:$0xff]  ;;  %v157_v22 = vld [vmem:[%s9710_s0 + $0x3e0] sm:$0xff] }
 0x123   :  { %3043 = vmatmul.mubr.bf16.gmra.mrb[24].mxu1 %v5341_v2  ;;  %v125_v2 = vld [vmem:[%s9710_s0 + $0x2e0] sm:$0xff]  ;;  %v5364_v25 = vcombine.high %v149_v21, %v157_v22 }
 0x124   :  { %3050 = vmatprep.mubr.bf16.mxu1 %v5358_v7  ;;  %v5332_v5 = vcombine.high %v117_v1, %v125_v2  ;;  %v258_v7 = vld [vmem:[%s9710_s0 + $0x708] sm:$0xff]  ;;  %v5331_v14 = vcombine.low %v117_v1, %v125_v2  ;;  %v8209_v2 = vld [vmem:[%s9709_s1 + $0x398] sm:$0xff]  }
 0x125   :  { %v5469_v13 = vcombine.low %v258_v7, %v266_v8 }
 0x129   :  { %3437 = vmatmul.mubr.bf16.gmra.mrb[44].mxu0 %v5425_v34  ;;  %v69_v34 = vld [vmem:[%s9710_s0 + $0x120] sm:$0xff] }
 0x12a   :  { %3444 = vmatprep.mubr.bf16.mxu0 %v5442_v35  ;;  %v77_v35 = vld [vmem:[%s9710_s0 + $0x160] sm:$0xff] }
 0x12b   :  { %3051 = vmatmul.mubr.bf16.gmra.mrb[28].mxu1 %v5357_v10  ;;  %v5284_v38 = vcombine.high %v69_v34, %v77_v35  ;;  %v5283_v47 = vcombine.low %v69_v34, %v77_v35  ;;  %v5470_v10 = vcombine.high %v258_v7, %v266_v8  ;;  %v5363_v34 = vcombine.low %v149_v21, %v157_v22  ;;  %v8222_v7 = vld [vmem:[%s9709_s1 + $0x3a0] sm:$0xff]   ;;  %v8254_v21 = vld [vmem:[%s9709_s1 + $0x3b0] sm:$0xff]   ;;  %v38_v22 = vld [vmem:[%s9710_s0 + $0x28] sm:$0xff] }
 0x12c   :  { %3058 = vmatprep.mubr.bf16.mxu1 %v5374_v15  ;;  %v277_v8 = vld [vmem:[%s9710_s0 + $0x7a0] sm:$0xff] }
 0x131   :  { %3445 = vmatmul.mubr.bf16.gmra.mrb[48].mxu0 %v5441_v42  ;;  %v7177_v42 = vld [vmem:[%s9709_s1 + $0x298] sm:$0xff]  }
 0x132   :  { %3452 = vmatprep.mubr.bf16.mxu0 %v5458_v43  ;;  %v5422_v43 = vcombine.high %v210_v40, %v218_v41  ;;  %v181_v41 = vld [vmem:[%s9710_s0 + $0x4a0] sm:$0xff] }
 0x133   :  { %3059 = vmatmul.mubr.bf16.gmra.mrb[32].mxu1 %v5373_v18  ;;  %v282_v18 = vld [vmem:[%s9710_s0 + $0x7c8] sm:$0xff] }
 0x134   :  { %3066 = vmatprep.mubr.bf16.mxu1 %v5390_v23  ;;  %v5485_v23 = vcombine.low %v274_v17, %v282_v18 }
 0x139   :  { %3453 = vmatmul.mubr.bf16.gmra.mrb[52].mxu0 %v5457_v50  ;;  %v7184_v50 = vld [vmem:[%s9709_s1 + $0x2a8] sm:$0xff]  }
 0x13a   :  { %3460 = vmatprep.mubr.bf16.mxu0 %v5474_v51  ;;  %v226_v51 = vld [vmem:[%s9710_s0 + $0x608] sm:$0xff] }
 0x13b   :  { %3067 = vmatmul.mubr.bf16.gmra.mrb[36].mxu1 %v5389_v26  ;;  %v5438_v55 = vcombine.high %v226_v51, %v234_v52  ;;  %v5437_v56 = vcombine.low %v226_v51, %v234_v52  ;;  %v7193_v26 = vld [vmem:[%s9709_s1 + $0x2e0] sm:$0xff]  }
 0x13c   :  { %3074 = vmatprep.mubr.bf16.mxu1 %v5406_v33  ;;  %v213_v51 = vld [vmem:[%s9710_s0 + $0x5a0] sm:$0xff] }
 0x13d   :  { %v221_v52 = vld [vmem:[%s9710_s0 + $0x5e0] sm:$0xff] }
 0x141   :  { %3461 = vmatmul.mubr.bf16.gmra.mrb[56].mxu0 %v5473_v58  ;;  %v5316_v58 = vcombine.high %v101_v53, %v109_v54 }
 0x142   :  { %3468 = vmatprep.mubr.bf16.mxu0 %v5490_v59  ;;  %v7187_v59 = vld [vmem:[%s9709_s1 + $0x2b0] sm:$0xff]  }
 0x143   :  { %3075 = vmatmul.mubr.bf16.gmra.mrb[40].mxu1 %v5405_v36  ;;  %v7195_v36 = vld [vmem:[%s9709_s1 + $0x2f0] sm:$0xff]  }
 0x144   :  { %3082 = vmatprep.mubr.bf16.mxu1 %v5422_v43 }
 0x149   :  { %3469 = vmatmul.mubr.bf16.gmra.mrb[60].mxu0 %v5489_v3  ;;  %v5453_v3 = vcombine.low %v242_v60, %v250_v61  ;;  %v8196_v60 = vld [vmem:[%s9709_s1 + $0x390] sm:$0xff]   ;;  %v245_v61 = vld [vmem:[%s9710_s0 + $0x6a0] sm:$0xff] }
 0x14a   :  { %3476 = vmatprep.mubr.bf16.mxu0 %v5506_v4  ;;  %v5315_v4 = vcombine.low %v101_v53, %v109_v54  ;;  %v5428_v54 = vcombine.high %v213_v51, %v221_v52 }
 0x14b   :  { %3083 = vmatmul.mubr.bf16.gmra.mrb[44].mxu1 %v5421_v46  ;;  %v197_v46 = vld [vmem:[%s9710_s0 + $0x520] sm:$0xff] }
 0x14c   :  { %3090 = vmatprep.mubr.bf16.mxu1 %v5438_v55  ;;  %v8183_v55 = vld [vmem:[%s9709_s1 + $0x388] sm:$0xff]  }
 0x151   :  { %3477 = vmatmul.mubr.bf16.gmra.mrb[64].mxu0 %v5505_v11  ;;  %v133_v11 = vld [vmem:[%s9710_s0 + $0x320] sm:$0xff] }
 0x152   :  { %3484 = vmatprep.mubr.bf16.mxu0 %v5522_v12  ;;  %v141_v12 = vld [vmem:[%s9710_s0 + $0x360] sm:$0xff] }
 0x153   :  { %3091 = vmatmul.mubr.bf16.gmra.mrb[48].mxu1 %v5437_v56  ;;  %v5348_v15 = vcombine.high %v133_v11, %v141_v12  ;;  %v5347_v24 = vcombine.low %v133_v11, %v141_v12  ;;  %v229_v56 = vld [vmem:[%s9710_s0 + $0x620] sm:$0xff] }
 0x154   :  { %3098 = vmatprep.mubr.bf16.mxu1 %v5454_v63  ;;  %v293_v12 = vld [vmem:[%s9710_s0 + $0x820] sm:$0xff] }
 0x159   :  { %3485 = vmatmul.mubr.bf16.gmra.mrb[68].mxu0 %v5521_v19  ;;  %v7192_v19 = vld [vmem:[%s9709_s1 + $0x2d8] sm:$0xff]  }
 0x15a   :  { %3525 = vmatprep.mubr.bf16.mxu0 %v5252_v20  ;;  %v5486_v20 = vcombine.high %v274_v17, %v282_v18  ;;  %v309_v17 = vld [vmem:[%s9710_s0 + $0x8a0] sm:$0xff] }
 0x15b   :  { %3099 = vmatmul.mubr.bf16.gmra.mrb[52].mxu1 %v5453_v3  ;;  %v261_v3 = vld [vmem:[%s9710_s0 + $0x720] sm:$0xff] }
 0x15c   :  { %3106 = vmatprep.mubr.bf16.mxu1 %v5470_v10  ;;  %v317_v18 = vld [vmem:[%s9710_s0 + $0x8e0] sm:$0xff] }
 0x161   :  { %3526 = vmatmul.mubr.bf16.vlgmr.msra.gmra.mrb[0].mxu0 %v5251_v27  ;;  %v290_v27 = vld [vmem:[%s9710_s0 + $0x808] sm:$0xff] }
 0x162   :  { %3671 = vmatpush1.bf16.msra.mxu0 %v7168_v28  ;;  %3533 = vmatprep.mubr.bf16.mxu0 %v5268_v29  ;;  %v298_v28 = vld [vmem:[%s9710_s0 + $0x848] sm:$0xff] }
 0x163   :  { %3672 = vmatprep.subr.bf16.mxu0 %v9719_v0  ;;  %3107 = vmatmul.mubr.bf16.gmra.mrb[56].mxu1 %v5469_v13  ;;  %v7194_v29 = vld [vmem:[%s9709_s1 + $0x2e8] sm:$0xff]   ;;  %v5502_v30 = vcombine.high %v290_v27, %v298_v28  ;;  %v5501_v33 = vcombine.low %v290_v27, %v298_v28  ;;  %v301_v13 = vld [vmem:[%s9710_s0 + $0x860] sm:$0xff] }
 0x164   :  { %3114 = vmatprep.mubr.bf16.mxu1 %v5486_v20  ;;  %v5524_v20 = vcombine.high %v309_v17, %v317_v18  ;;  %v54_v27 = vld [vmem:[%s9710_s0 + $0xa8] sm:$0xff] }
 0x165   :  { %v62_v28 = vld [vmem:[%s9710_s0 + $0xe8] sm:$0xff] }
 0x166   :  { %3673 = vmatpush1.bf16.msra.mxu0 %v7171_v32  ;;  %v173_v32 = vld [vmem:[%s9710_s0 + $0x460] sm:$0xff] }
 0x167   :  { %3674 = vmatprep.subr.bf16.mxu0 %v9719_v0  ;;  %v5380_v35 = vcombine.high %v165_v31, %v173_v32  ;;  %v5379_v44 = vcombine.low %v165_v31, %v173_v32 }
 0x169   :  { %3534 = vmatmul.mubr.bf16.gmra.mrb[4].mxu0 %v5267_v37  ;;  %v306_v37 = vld [vmem:[%s9710_s0 + $0x888] sm:$0xff] }
 0x16a   :  { %3541 = vmatprep.mubr.bf16.mxu0 %v5284_v38  ;;  %3675 = vmatpush1.bf16.msra.mxu0 %v7174_v39  ;;  %v314_v38 = vld [vmem:[%s9710_s0 + $0x8c8] sm:$0xff]  ;;  %v7196_v39 = vld [vmem:[%s9709_s1 + $0x2f8] sm:$0xff]  }
 0x16b   :  { %3676 = vmatprep.subr.bf16.mxu0 %v9719_v0  ;;  %3115 = vmatmul.mubr.bf16.gmra.mrb[60].mxu1 %v5485_v23  ;;  %v5518_v40 = vcombine.high %v306_v37, %v314_v38  ;;  %v5517_v43 = vcombine.low %v306_v37, %v314_v38  ;;  %v46_v23 = vld [vmem:[%s9710_s0 + $0x68] sm:$0xff] }
 0x16c   :  { %3122 = vmatprep.mubr.bf16.mxu1 %v5502_v30  ;;  %v5253_v31 = vcombine.low %v38_v22, %v46_v23  ;;  %v7198_v37 = vld [vmem:[%s9709_s1 + $0x308] sm:$0xff]  }
 0x16d   :  { %v70_v38 = vld [vmem:[%s9710_s0 + $0x128] sm:$0xff] }
 0x16e   :  { %3677 = vmatpush1.bf16.msra.mxu0 %v7177_v42  ;;  %v189_v42 = vld [vmem:[%s9710_s0 + $0x4e0] sm:$0xff] }
 0x16f   :  { %3678 = vmatprep.subr.bf16.mxu0 %v9719_v0  ;;  %v5396_v45 = vcombine.high %v181_v41, %v189_v42 }
 0x171   :  { %3542 = vmatmul.mubr.bf16.gmra.mrb[8].mxu0 %v5283_v47  ;;  %v205_v47 = vld [vmem:[%s9710_s0 + $0x560] sm:$0xff] }
 0x172   :  { %3549 = vmatprep.mubr.bf16.mxu0 %v5300_v48  ;;  %3679 = vmatpush1.bf16.msra.mxu0 %v7181_v49  ;;  %v5395_v48 = vcombine.low %v181_v41, %v189_v42  ;;  %v5412_v49 = vcombine.high %v197_v46, %v205_v47  ;;  %v5411_v53 = vcombine.low %v197_v46, %v205_v47  ;;  %v8312_v47 = vld [vmem:[%s9709_s1 + $0x3c8] sm:$0xff]  }
 0x173   :  { %3680 = vmatprep.subr.bf16.mxu0 %v9719_v0  ;;  %3123 = vmatmul.mubr.bf16.gmra.mrb[64].mxu1 %v5501_v33  ;;  %v7197_v33 = vld [vmem:[%s9709_s1 + $0x300] sm:$0xff]   ;;  %v5269_v42 = vcombine.low %v54_v27, %v62_v28 }
 0x174   :  { %3130 = vmatprep.mubr.bf16.mxu1 %v5518_v40 }
 0x176   :  { %3681 = vmatpush1.bf16.msra.mxu0 %v7184_v50  ;;  %v8170_v50 = vld [vmem:[%s9709_s1 + $0x380] sm:$0xff]  }
 0x177   :  { %3682 = vmatprep.subr.bf16.mxu0 %v9719_v0  ;;  %6643 = vmatpush1.bf16.msra.mxu1 %v8170_v50 }
 0x178   :  { %6628 = vmatprep.subr.bf16.mxu1 %v9719_v0 }
 0x179   :  { %3550 = vmatmul.mubr.bf16.gmra.mrb[12].mxu0 %v5299_v57  ;;  %v237_v57 = vld [vmem:[%s9710_s0 + $0x660] sm:$0xff] }
 0x17a   :  { %3557 = vmatprep.mubr.bf16.mxu0 %v5316_v58  ;;  %3683 = vmatpush1.bf16.msra.mxu0 %v7187_v59  ;;  %v5427_v58 = vcombine.low %v213_v51, %v221_v52  ;;  %v5444_v59 = vcombine.high %v229_v56, %v237_v57  ;;  %v5443_v63 = vcombine.low %v229_v56, %v237_v57  ;;  %v94_v51 = vld [vmem:[%s9710_s0 + $0x1e8] sm:$0xff] }
 0x17b   :  { %3684 = vmatprep.subr.bf16.mxu0 %v9719_v0  ;;  %3131 = vmatmul.mubr.bf16.gmra.mrb[68].mxu1 %v5517_v43 }
 0x17c   :  { %6644 = vmatpush1.bf16.msra.mxu1 %v8183_v55 }
 0x17d   :  { %6629 = vmatprep.subr.bf16.mxu1 %v9719_v0 }
 0x17e   :  { %3685 = vmatpush1.bf16.msra.mxu0 %v7188_v62  ;;  %v253_v62 = vld [vmem:[%s9710_s0 + $0x6e0] sm:$0xff] }
 0x17f   :  { %3686 = vmatprep.subr.bf16.mxu0 %v9719_v0  ;;  %v5460_v1 = vcombine.high %v245_v61, %v253_v62 }
 0x180   :  { %6645 = vmatpush1.bf16.msra.mxu1 %v8196_v60 }
 0x181   :  { %3558 = vmatmul.mubr.bf16.gmra.mrb[16].mxu0 %v5315_v4  ;;  %6630 = vmatprep.subr.bf16.mxu1 %v9719_v0  ;;  %v269_v4 = vld [vmem:[%s9710_s0 + $0x760] sm:$0xff] }
 0x182   :  { %3565 = vmatprep.mubr.bf16.mxu0 %v5332_v5  ;;  %3687 = vmatpush1.bf16.msra.mxu0 %v7189_v6  ;;  %v5459_v5 = vcombine.low %v245_v61, %v253_v62  ;;  %v5476_v6 = vcombine.high %v261_v3, %v269_v4  ;;  %v5475_v10 = vcombine.low %v261_v3, %v269_v4  ;;  %v7202_v61 = vld [vmem:[%s9709_s1 + $0x328] sm:$0xff]   ;;  %v8340_v62 = vld [vmem:[%s9709_s1 + $0x3d0] sm:$0xff]  }
 0x183   :  { %3688 = vmatprep.subr.bf16.mxu0 %v9719_v0 }
 0x184   :  { %6646 = vmatpush1.bf16.msra.mxu1 %v8209_v2 }
 0x185   :  { %6631 = vmatprep.subr.bf16.mxu1 %v9719_v0 }
 0x186   :  { %3689 = vmatpush1.bf16.msra.mxu0 %v7190_v9  ;;  %v285_v9 = vld [vmem:[%s9710_s0 + $0x7e0] sm:$0xff] }
 0x187   :  { %3690 = vmatprep.subr.bf16.mxu0 %v9719_v0  ;;  %v5492_v11 = vcombine.high %v277_v8, %v285_v9 }
 0x188   :  { %6647 = vmatpush1.bf16.msra.mxu1 %v8222_v7 }
 0x189   :  { %3566 = vmatmul.mubr.bf16.gmra.mrb[20].mxu0 %v5331_v14  ;;  %6632 = vmatprep.subr.bf16.mxu1 %v9719_v0  ;;  %v5491_v14 = vcombine.low %v277_v8, %v285_v9 }
 0x18a   :  { %3573 = vmatprep.mubr.bf16.mxu0 %v5348_v15  ;;  %3691 = vmatpush1.bf16.msra.mxu0 %v7191_v16  ;;  %v5508_v15 = vcombine.high %v293_v12, %v301_v13  ;;  %v8241_v16 = vld [vmem:[%s9709_s1 + $0x3a8] sm:$0xff]  }
 0x18b   :  { %3692 = vmatprep.subr.bf16.mxu0 %v9719_v0 }
 0x18c   :  { %6648 = vmatpush1.bf16.msra.mxu1 %v8241_v16 }
 0x18d   :  { %6633 = vmatprep.subr.bf16.mxu1 %v9719_v0 }
 0x18e   :  { %3693 = vmatpush1.bf16.msra.mxu0 %v7192_v19  ;;  %v5507_v19 = vcombine.low %v293_v12, %v301_v13  ;;  %v8369_v12 = vld [vmem:[%s9709_s1 + $0x3e0] sm:$0xff]   ;;  %v7205_v13 = vld [vmem:[%s9709_s1 + $0x338] sm:$0xff]  }
 0x18f   :  { %3694 = vmatprep.subr.bf16.mxu0 %v9719_v0 }
 0x190   :  { %6649 = vmatpush1.bf16.msra.mxu1 %v8254_v21 }
 0x191   :  { %3574 = vmatmul.mubr.bf16.gmra.mrb[24].mxu0 %v5347_v24  ;;  %6634 = vmatprep.subr.bf16.mxu1 %v9719_v0  ;;  %v5523_v24 = vcombine.low %v309_v17, %v317_v18 }
 0x192   :  { %3581 = vmatprep.mubr.bf16.mxu0 %v5364_v25  ;;  %3695 = vmatpush1.bf16.msra.mxu0 %v7193_v26  ;;  %v5254_v25 = vcombine.high %v38_v22, %v46_v23  ;;  %v8267_v26 = vld [vmem:[%s9709_s1 + $0x3b8] sm:$0xff]  }
 0x193   :  { %3696 = vmatprep.subr.bf16.mxu0 %v9719_v0 }
 0x194   :  { %6650 = vmatpush1.bf16.msra.mxu1 %v8267_v26 }
 0x195   :  { %6635 = vmatprep.subr.bf16.mxu1 %v9719_v0 }
 0x196   :  { %3697 = vmatpush1.bf16.msra.mxu0 %v7194_v29 }
 0x197   :  { %3698 = vmatprep.subr.bf16.mxu0 %v9719_v0 }
 0x199   :  { %3582 = vmatmul.mubr.bf16.gmra.mrb[28].mxu0 %v5363_v34  ;;  %v5270_v34 = vcombine.high %v54_v27, %v62_v28  ;;  %v8401_v27 = vld [vmem:[%s9709_s1 + $0x3f0] sm:$0xff]   ;;  %v7209_v28 = vld [vmem:[%s9709_s1 + $0x348] sm:$0xff]  }
 0x19a   :  { %3589 = vmatprep.mubr.bf16.mxu0 %v5380_v35  ;;  %3699 = vmatpush1.bf16.msra.mxu0 %v7195_v36  ;;  %v8287_v36 = vld [vmem:[%s9709_s1 + $0x3c0] sm:$0xff]  }
 0x19b   :  { %3700 = vmatprep.subr.bf16.mxu0 %v9719_v0  ;;  %6651 = vmatpush1.bf16.msra.mxu1 %v8287_v36 }
 0x19c   :  { %6636 = vmatprep.subr.bf16.mxu1 %v9719_v0 }
 0x19e   :  { %3701 = vmatpush1.bf16.msra.mxu0 %v7196_v39  ;;  %v78_v39 = vld [vmem:[%s9710_s0 + $0x168] sm:$0xff] }
 0x19f   :  { %3847 = vmatprep.subr.bf16.mxu0 %v9719_v0  ;;  %6652 = vmatpush1.bf16.msra.mxu1 %v8312_v47 }
 0x1a0   :  { %6637 = vmatprep.subr.bf16.mxu1 %v9719_v0 }
 0x1a1   :  { %3590 = vmatmul.mubr.bf16.gmra.mrb[32].mxu0 %v5379_v44  ;;  %v5286_v44 = vcombine.high %v70_v38, %v78_v39 }
 0x1a2   :  { %3597 = vmatprep.mubr.bf16.mxu0 %v5396_v45  ;;  %v7199_v45 = vld [vmem:[%s9709_s1 + $0x310] sm:$0xff]  }
 0x1a3   :  { %6653 = vmatpush1.bf16.msra.mxu1 %v8340_v62 }
 0x1a4   :  { %6638 = vmatprep.subr.bf16.mxu1 %v9719_v0 }
 0x1a9   :  { %3598 = vmatmul.mubr.bf16.gmra.mrb[36].mxu0 %v5395_v48  ;;  %v7200_v48 = vld [vmem:[%s9709_s1 + $0x318] sm:$0xff]  }
 0x1aa   :  { %3605 = vmatprep.mubr.bf16.mxu0 %v5412_v49  ;;  %v86_v49 = vld [vmem:[%s9710_s0 + $0x1a8] sm:$0xff] }
 0x1ab   :  { %v5302_v57 = vcombine.high %v86_v49, %v94_v51 }
 0x1b1   :  { %3606 = vmatmul.mubr.bf16.gmra.mrb[40].mxu0 %v5411_v53 }
 0x1b2   :  { %3613 = vmatprep.mubr.bf16.mxu0 %v5428_v54  ;;  %v5285_v54 = vcombine.low %v70_v38, %v78_v39 }
 0x1b9   :  { %3614 = vmatmul.mubr.bf16.gmra.mrb[44].mxu0 %v5427_v58  ;;  %v7201_v58 = vld [vmem:[%s9709_s1 + $0x320] sm:$0xff]  }
 0x1ba   :  { %3621 = vmatprep.mubr.bf16.mxu0 %v5444_v59 }
 0x1c1   :  { %3622 = vmatmul.mubr.bf16.gmra.mrb[48].mxu0 %v5443_v63  ;;  %v102_v63 = vld [vmem:[%s9710_s0 + $0x228] sm:$0xff] }
 0x1c2   :  { %3629 = vmatprep.mubr.bf16.mxu0 %v5460_v1  ;;  %v110_v1 = vld [vmem:[%s9710_s0 + $0x268] sm:$0xff] }
 0x1c3   :  { %v5318_v9 = vcombine.high %v102_v63, %v110_v1 }
 0x1c6   :  { %v8276_v29 = vpop.f32.mrb[0].mxu1 }
 0x1c7   :  { %9723 = vst [vmem:[#allocation2_spill] sm:$0xff] %v8276_v29  ;;  %v2998_v30 = vpop.f32.mrb[1].mxu1 }
 0x1c8   :  { %v8279_v32 = vpop.f32.mrb[2].mxu1  ;;  %v134_v30 = vld [vmem:[%s9710_s0 + $0x328] sm:$0xff] }
 0x1c9   :  { %3630 = vmatmul.mubr.bf16.gmra.mrb[52].mxu0 %v5459_v5  ;;  %9724 = vst [vmem:[#allocation3_spill] sm:$0xff] %v8279_v32  ;;  %v3001_v35 = vpop.f32.mrb[3].mxu1  ;;  %v8355_v5 = vld [vmem:[%s9709_s1 + $0x3d8] sm:$0xff]  }
 0x1ca   :  { %3637 = vmatprep.mubr.bf16.mxu0 %v5476_v6  ;;  %v5301_v6 = vcombine.low %v86_v49, %v94_v51  ;;  %6654 = vmatpush1.bf16.msra.mxu1 %v8355_v5  ;;  %v8419_v35 = vld [vmem:[%s9709_s1 + $0x3f8] sm:$0xff]   ;;  %v150_v51 = vld [vmem:[%s9710_s0 + $0x3a8] sm:$0xff] }
 0x1cb   :  { %6639 = vmatprep.subr.bf16.mxu1 %v9719_v0  ;;  %v7213_v49 = vld [vmem:[%s9709_s1 + $0x358] sm:$0xff]  }
 0x1ce   :  { %v8299_v40 = vpop.f32.mrb[4].mxu1  ;;  %6655 = vmatpush1.bf16.msra.mxu1 %v8369_v12 }
 0x1cf   :  { %9725 = vst [vmem:[#allocation4_spill] sm:$0xff] %v8299_v40  ;;  %v3006_v41 = vpop.f32.mrb[5].mxu1  ;;  %6640 = vmatprep.subr.bf16.mxu1 %v9719_v0 }
 0x1d0   :  { %v8303_v43 = vpop.f32.mrb[6].mxu1  ;;  %v7211_v41 = vld [vmem:[%s9709_s1 + $0x350] sm:$0xff]  }
 0x1d1   :  { %3638 = vmatmul.mubr.bf16.gmra.mrb[56].mxu0 %v5475_v10  ;;  %9726 = vst [vmem:[#allocation5_spill] sm:$0xff] %v8303_v43  ;;  %v3009_v46 = vpop.f32.mrb[7].mxu1  ;;  %v7203_v10 = vld [vmem:[%s9709_s1 + $0x330] sm:$0xff]  }
 0x1d2   :  { %3645 = vmatprep.mubr.bf16.mxu0 %v5492_v11  ;;  %v5670_v43 = vld [vmem:[%s9711_s3 + $0xd0] sm:$0xff] }
 0x1d6   :  { %v8324_v52 = vpop.f32.mrb[8].mxu1 }
 0x1d7   :  { %9727 = vst [vmem:[#allocation6_spill] sm:$0xff] %v8324_v52  ;;  %v3014_v53 = vpop.f32.mrb[9].mxu1 }
 0x1d8   :  { %v8328_v56 = vpop.f32.mrb[10].mxu1  ;;  %v158_v53 = vld [vmem:[%s9710_s0 + $0x3e8] sm:$0xff] }
 0x1d9   :  { %3646 = vmatmul.mubr.bf16.gmra.mrb[60].mxu0 %v5491_v14  ;;  %9728 = vst [vmem:[#allocation7_spill] sm:$0xff] %v8328_v56  ;;  %v3017_v59 = vpop.f32.mrb[11].mxu1  ;;  %v118_v14 = vld [vmem:[%s9710_s0 + $0x2a8] sm:$0xff] }
 0x1da   :  { %3653 = vmatprep.mubr.bf16.mxu0 %v5508_v15  ;;  %v126_v15 = vld [vmem:[%s9710_s0 + $0x2e8] sm:$0xff] }
 0x1db   :  { %v5334_v23 = vcombine.high %v118_v14, %v126_v15 }
 0x1de   :  { %v8349_v3 = vpop.f32.mrb[12].mxu1 }
 0x1df   :  { %v3022_v4 = vpop.f32.mrb[13].mxu1 }
 0x1e0   :  { %v8357_v8 = vpop.f32.mrb[14].mxu1  ;;  %v104_v4 = vld [vmem:[%s9710_s0 + $0x238] sm:$0xff] }
 0x1e1   :  { %3654 = vmatmul.mubr.bf16.gmra.mrb[64].mxu0 %v5507_v19  ;;  %v3025_v11 = vpop.f32.mrb[15].mxu1  ;;  %v8387_v19 = vld [vmem:[%s9709_s1 + $0x3e8] sm:$0xff]  }
 0x1e2   :  { %3661 = vmatprep.mubr.bf16.mxu0 %v5524_v20  ;;  %v5317_v20 = vcombine.low %v102_v63, %v110_v1  ;;  %6656 = vmatpush1.bf16.msra.mxu1 %v8387_v19  ;;  %v7215_v63 = vld [vmem:[%s9709_s1 + $0x360] sm:$0xff]   ;;  %v7217_v11 = vld [vmem:[%s9709_s1 + $0x368] sm:$0xff]  }
 0x1e3   :  { %6641 = vmatprep.subr.bf16.mxu1 %v9719_v0 }
 0x1e6   :  { %v8381_v17 = vpop.f32.mrb[16].mxu1  ;;  %6657 = vmatpush1.bf16.msra.mxu1 %v8401_v27 }
 0x1e7   :  { %v3030_v18 = vpop.f32.mrb[17].mxu1  ;;  %6642 = vmatprep.subr.bf16.mxu1 %v9719_v0 }
 0x1e8   :  { %v8389_v22 = vpop.f32.mrb[18].mxu1 }
 0x1e9   :  { %3662 = vmatmul.mubr.bf16.gmra.mrb[68].mxu0 %v5523_v24  ;;  %v7207_v24 = vld [vmem:[%s9709_s1 + $0x340] sm:$0xff]  }
 0x1ea   :  { %3702 = vmatprep.mubr.bf16.mxu0 %v5254_v25  ;;  %v3033_v25 = vpop.f32.mrb[19].mxu1  ;;  %6658 = vmatpush1.bf16.msra.mxu1 %v8419_v35 }
 0x1eb   :  { %v7219_v25 = vld [vmem:[%s9709_s1 + $0x370] sm:$0xff]  }
 0x1f1   :  { %3703 = vmatmul.mubr.bf16.vlgmr.msra.gmra.mrb[0].mxu0 %v5253_v31  ;;  %v142_v31 = vld [vmem:[%s9710_s0 + $0x368] sm:$0xff] }
 0x1f2   :  { %3848 = vmatpush1.bf16.msra.mxu0 %v7197_v33  ;;  %3710 = vmatprep.mubr.bf16.mxu0 %v5270_v34  ;;  %v8413_v33 = vpop.f32.mrb[20].mxu1  ;;  %v5350_v39 = vcombine.high %v134_v30, %v142_v31 }
 0x1f3   :  { %3849 = vmatprep.subr.bf16.mxu0 %v9719_v0  ;;  %v3038_v34 = vpop.f32.mrb[21].mxu1 }
 0x1f4   :  { %v8421_v38 = vpop.f32.mrb[22].mxu1 }
 0x1f6   :  { %3850 = vmatpush1.bf16.msra.mxu0 %v7198_v37  ;;  %v5333_v37 = vcombine.low %v118_v14, %v126_v15  ;;  %v174_v14 = vld [vmem:[%s9710_s0 + $0x468] sm:$0xff] }
 0x1f7   :  { %3851 = vmatprep.subr.bf16.mxu0 %v9719_v0 }
 0x1f9   :  { %3711 = vmatmul.mubr.bf16.gmra.mrb[4].mxu0 %v5269_v42  ;;  %v3041_v42 = vpop.f32.mrb[23].mxu1 }
 0x1fa   :  { %3718 = vmatprep.mubr.bf16.mxu0 %v5286_v44  ;;  %3852 = vmatpush1.bf16.msra.mxu0 %v7199_v45  ;;  %v88_v44 = vld [vmem:[%s9710_s0 + $0x1b8] sm:$0xff]  ;;  %v190_v42 = vld [vmem:[%s9710_s0 + $0x4e8] sm:$0xff] }
 0x1fb   :  { %3853 = vmatprep.subr.bf16.mxu0 %v9719_v0  ;;  %v96_v45 = vld [vmem:[%s9710_s0 + $0x1f8] sm:$0xff] }
 0x1fc   :  { %v5306_v46 = vcombine.high %v88_v44, %v96_v45 }
 0x1fe   :  { %3854 = vmatpush1.bf16.msra.mxu0 %v7200_v48  ;;  %v5305_v48 = vcombine.low %v88_v44, %v96_v45  ;;  %4080 = vmatprep.mubr.bf16.mxu1 %v5306_v46 }
 0x1ff   :  { %3855 = vmatprep.subr.bf16.mxu0 %v9719_v0 }
 0x200   :  { %4081 = vmatmul.mubr.bf16.vlgmr.msra.gmra.mrb[72].mxu1 %v5305_v48 }
 0x201   :  { %3719 = vmatmul.mubr.bf16.gmra.mrb[8].mxu0 %v5285_v54  ;;  %v8445_v54 = vpop.f32.mrb[24].mxu1 }
 0x202   :  { %3726 = vmatprep.mubr.bf16.mxu0 %v5302_v57  ;;  %3856 = vmatpush1.bf16.msra.mxu0 %v7201_v58  ;;  %v3046_v57 = vpop.f32.mrb[25].mxu1  ;;  %v5349_v58 = vcombine.low %v134_v30, %v142_v31  ;;  %v120_v30 = vld [vmem:[%s9710_s0 + $0x2b8] sm:$0xff] }
 0x203   :  { %3857 = vmatprep.subr.bf16.mxu0 %v9719_v0  ;;  %v8447_v59 = vpop.f32.mrb[26].mxu1  ;;  %v128_v31 = vld [vmem:[%s9710_s0 + $0x2f8] sm:$0xff] }
 0x204   :  { %v3049_v1 = vpop.f32.mrb[27].mxu1  ;;  %v5338_v34 = vcombine.high %v120_v30, %v128_v31  ;;  %v144_v57 = vld [vmem:[%s9710_s0 + $0x378] sm:$0xff] }
 0x205   :  { %v8469_v15 = vpop.f32.mrb[28].mxu1  ;;  %v206_v1 = vld [vmem:[%s9710_s0 + $0x568] sm:$0xff] }
 0x206   :  { %3858 = vmatpush1.bf16.msra.mxu0 %v7202_v61  ;;  %v5366_v61 = vcombine.high %v150_v51, %v158_v53  ;;  %v3054_v18 = vpop.f32.mrb[29].mxu1 }
 0x207   :  { %3859 = vmatprep.subr.bf16.mxu0 %v9719_v0  ;;  %v160_v18 = vld [vmem:[%s9710_s0 + $0x3f8] sm:$0xff] }
 0x209   :  { %3727 = vmatmul.mubr.bf16.gmra.mrb[12].mxu0 %v5301_v6  ;;  %v112_v6 = vld [vmem:[%s9710_s0 + $0x278] sm:$0xff] }
 0x20a   :  { %3734 = vmatprep.mubr.bf16.mxu0 %v5318_v9  ;;  %3860 = vmatpush1.bf16.msra.mxu0 %v7203_v10  ;;  %v5322_v9 = vcombine.high %v104_v4, %v112_v6  ;;  %v5321_v10 = vcombine.low %v104_v4, %v112_v6 }
 0x20b   :  { %3861 = vmatprep.subr.bf16.mxu0 %v9719_v0 }
 0x20c   :  { %4088 = vmatprep.mubr.bf16.mxu1 %v5322_v9 }
 0x20d   :  { %4089 = vmatmul.mubr.bf16.gmra.mrb[76].mxu1 %v5321_v10 }
 0x20e   :  { %3862 = vmatpush1.bf16.msra.mxu0 %v7205_v13  ;;  %v166_v13 = vld [vmem:[%s9710_s0 + $0x428] sm:$0xff]  ;;  %4096 = vmatprep.mubr.bf16.mxu1 %v5338_v34 }
 0x20f   :  { %3863 = vmatprep.subr.bf16.mxu0 %v9719_v0  ;;  %v5381_v46 = vcombine.low %v166_v13, %v174_v14 }
 0x211   :  { %3735 = vmatmul.mubr.bf16.gmra.mrb[16].mxu0 %v5317_v20  ;;  %v5365_v20 = vcombine.low %v150_v51, %v158_v53  ;;  %v136_v53 = vld [vmem:[%s9710_s0 + $0x338] sm:$0xff] }
 0x212   :  { %3742 = vmatprep.mubr.bf16.mxu0 %v5334_v23  ;;  %3864 = vmatpush1.bf16.msra.mxu0 %v7207_v24  ;;  %v8471_v23 = vpop.f32.mrb[30].mxu1  ;;  %v5382_v24 = vcombine.high %v166_v13, %v174_v14  ;;  %v152_v14 = vld [vmem:[%s9710_s0 + $0x3b8] sm:$0xff] }
 0x213   :  { %3865 = vmatprep.subr.bf16.mxu0 %v9719_v0 }
 0x216   :  { %3866 = vmatpush1.bf16.msra.mxu0 %v7209_v28  ;;  %v3057_v28 = vpop.f32.mrb[31].mxu1 }
 0x217   :  { %3867 = vmatprep.subr.bf16.mxu0 %v9719_v0  ;;  %v8493_v44 = vpop.f32.mrb[32].mxu1  ;;  %v222_v28 = vld [vmem:[%s9710_s0 + $0x5e8] sm:$0xff] }
 0x218   :  { %v3062_v45 = vpop.f32.mrb[33].mxu1 }
 0x219   :  { %3743 = vmatmul.mubr.bf16.gmra.mrb[20].mxu0 %v5333_v37  ;;  %v5337_v37 = vcombine.low %v120_v30, %v128_v31  ;;  %v8495_v48 = vpop.f32.mrb[34].mxu1  ;;  %v176_v45 = vld [vmem:[%s9710_s0 + $0x478] sm:$0xff] }
 0x21a   :  { %3750 = vmatprep.mubr.bf16.mxu0 %v5350_v39  ;;  %3868 = vmatpush1.bf16.msra.mxu0 %v7211_v41  ;;  %v7221_v39 = vld [vmem:[%s9709_s1 + $0x378] sm:$0xff]   ;;  %v182_v41 = vld [vmem:[%s9710_s0 + $0x4a8] sm:$0xff]  ;;  %v3065_v51 = vpop.f32.mrb[35].mxu1 }
 0x21b   :  { %3869 = vmatprep.subr.bf16.mxu0 %v9719_v0  ;;  %4097 = vmatmul.mubr.bf16.gmra.mrb[80].mxu1 %v5337_v37  ;;  %v8510_v4 = vpop.f32.mrb[36].mxu1  ;;  %v5397_v9 = vcombine.low %v182_v41, %v190_v42  ;;  %v230_v51 = vld [vmem:[%s9710_s0 + $0x628] sm:$0xff] }
 0x21c   :  { %v3070_v6 = vpop.f32.mrb[37].mxu1 }
 0x21d   :  { %v8512_v10 = vpop.f32.mrb[38].mxu1 }
 0x21e   :  { %3870 = vmatpush1.bf16.msra.mxu0 %v7213_v49  ;;  %v5398_v49 = vcombine.high %v182_v41, %v190_v42  ;;  %v3073_v13 = vpop.f32.mrb[39].mxu1  ;;  %v168_v42 = vld [vmem:[%s9710_s0 + $0x438] sm:$0xff] }
 0x21f   :  { %3871 = vmatprep.subr.bf16.mxu0 %v9719_v0  ;;  %v8526_v30 = vpop.f32.mrb[40].mxu1 }
 0x220   :  { %v3078_v31 = vpop.f32.mrb[41].mxu1 }
 0x221   :  { %3751 = vmatmul.mubr.bf16.gmra.mrb[24].mxu0 %v5349_v58  ;;  %v5354_v58 = vcombine.high %v136_v53, %v144_v57  ;;  %v8528_v37 = vpop.f32.mrb[42].mxu1 }
 0x222   :  { %3758 = vmatprep.mubr.bf16.mxu0 %v5366_v61  ;;  %3872 = vmatpush1.bf16.msra.mxu0 %v7215_v63  ;;  %v5353_v61 = vcombine.low %v136_v53, %v144_v57  ;;  %v198_v63 = vld [vmem:[%s9710_s0 + $0x528] sm:$0xff]  ;;  %v3081_v41 = vpop.f32.mrb[43].mxu1 }
 0x223   :  { %3873 = vmatprep.subr.bf16.mxu0 %v9719_v0  ;;  %4104 = vmatprep.mubr.bf16.mxu1 %v5354_v58  ;;  %v5413_v34 = vcombine.low %v198_v63, %v206_v1  ;;  %v238_v53 = vld [vmem:[%s9710_s0 + $0x668] sm:$0xff]  ;;  %v8542_v57 = vpop.f32.mrb[44].mxu1  ;;  %v200_v41 = vld [vmem:[%s9710_s0 + $0x538] sm:$0xff] }
 0x224   :  { %4105 = vmatmul.mubr.bf16.gmra.mrb[84].mxu1 %v5353_v61  ;;  %v3086_v58 = vpop.f32.mrb[45].mxu1 }
 0x226   :  { %3874 = vmatpush1.bf16.msra.mxu0 %v7217_v11  ;;  %v5414_v11 = vcombine.high %v198_v63, %v206_v1  ;;  %v8544_v63 = vpop.f32.mrb[46].mxu1  ;;  %v5446_v1 = vcombine.high %v230_v51, %v238_v53 }
 0x227   :  { %3875 = vmatprep.subr.bf16.mxu0 %v9719_v0  ;;  %v3089_v6 = vpop.f32.mrb[47].mxu1 }
 0x229   :  { %3759 = vmatmul.mubr.bf16.gmra.mrb[28].mxu0 %v5365_v20  ;;  %v5370_v20 = vcombine.high %v152_v14, %v160_v18 }
 0x22a   :  { %3766 = vmatprep.mubr.bf16.mxu0 %v5382_v24  ;;  %3876 = vmatpush1.bf16.msra.mxu0 %v7219_v25  ;;  %v5369_v24 = vcombine.low %v152_v14, %v160_v18  ;;  %v214_v25 = vld [vmem:[%s9710_s0 + $0x5a8] sm:$0xff] }
 0x22b   :  { %3877 = vmatprep.subr.bf16.mxu0 %v9719_v0  ;;  %4112 = vmatprep.mubr.bf16.mxu1 %v5370_v20  ;;  %v5429_v61 = vcombine.low %v214_v25, %v222_v28  ;;  %v246_v18 = vld [vmem:[%s9710_s0 + $0x6a8] sm:$0xff] }
 0x22c   :  { %4113 = vmatmul.mubr.bf16.gmra.mrb[88].mxu1 %v5369_v24  ;;  %v254_v20 = vld [vmem:[%s9710_s0 + $0x6e8] sm:$0xff]  ;;  %v8558_v24 = vpop.f32.mrb[48].mxu1 }
 0x22e   :  { %3878 = vmatpush1.bf16.msra.mxu0 %v7221_v39  ;;  %v5430_v39 = vcombine.high %v214_v25, %v222_v28  ;;  %v3094_v25 = vpop.f32.mrb[49].mxu1  ;;  %v5445_v28 = vcombine.low %v230_v51, %v238_v53  ;;  %v270_v51 = vld [vmem:[%s9710_s0 + $0x768] sm:$0xff] }
 0x22f   :  { %4024 = vmatprep.subr.bf16.mxu0 %v9719_v0  ;;  %v8560_v31 = vpop.f32.mrb[50].mxu1 }
 0x231   :  { %3767 = vmatmul.mubr.bf16.gmra.mrb[32].mxu0 %v5381_v46  ;;  %v5386_v46 = vcombine.high %v168_v42, %v176_v45 }
 0x232   :  { %3774 = vmatprep.mubr.bf16.mxu0 %v5398_v49  ;;  %v5385_v49 = vcombine.low %v168_v42, %v176_v45  ;;  %v208_v42 = vld [vmem:[%s9710_s0 + $0x578] sm:$0xff] }
 0x233   :  { %4120 = vmatprep.mubr.bf16.mxu1 %v5386_v46  ;;  %v5418_v45 = vcombine.high %v200_v41, %v208_v42  ;;  %v5417_v46 = vcombine.low %v200_v41, %v208_v42 }
 0x234   :  { %4121 = vmatmul.mubr.bf16.gmra.mrb[92].mxu1 %v5385_v49  ;;  %v262_v49 = vld [vmem:[%s9710_s0 + $0x728] sm:$0xff] }
 0x235   :  { %v5478_v6 = vcombine.high %v262_v49, %v270_v51 }
 0x239   :  { %3775 = vmatmul.mubr.bf16.gmra.mrb[36].mxu0 %v5397_v9  ;;  %v184_v9 = vld [vmem:[%s9710_s0 + $0x4b8] sm:$0xff] }
 0x23a   :  { %3782 = vmatprep.mubr.bf16.mxu0 %v5414_v11  ;;  %v192_v11 = vld [vmem:[%s9710_s0 + $0x4f8] sm:$0xff] }
 0x23b   :  { %v5402_v13 = vcombine.high %v184_v9, %v192_v11  ;;  %v5401_v14 = vcombine.low %v184_v9, %v192_v11  ;;  %v216_v11 = vld [vmem:[%s9710_s0 + $0x5b8] sm:$0xff] }
 0x23d   :  { %4128 = vmatprep.mubr.bf16.mxu1 %v5402_v13  ;;  %v224_v13 = vld [vmem:[%s9710_s0 + $0x5f8] sm:$0xff] }
 0x23e   :  { %4129 = vmatmul.mubr.bf16.gmra.mrb[96].mxu1 %v5401_v14  ;;  %v5434_v14 = vcombine.high %v216_v11, %v224_v13  ;;  %v5433_v25 = vcombine.low %v216_v11, %v224_v13 }
 0x23f   :  { %4136 = vmatprep.mubr.bf16.mxu1 %v5418_v45 }
 0x241   :  { %3783 = vmatmul.mubr.bf16.gmra.mrb[40].mxu0 %v5413_v34  ;;  %v5462_v34 = vcombine.high %v246_v18, %v254_v20 }
 0x242   :  { %3790 = vmatprep.mubr.bf16.mxu0 %v5430_v39  ;;  %v3097_v39 = vpop.f32.mrb[51].mxu1 }
 0x243   :  { %v8574_v53 = vpop.f32.mrb[52].mxu1  ;;  %v5477_v39 = vcombine.low %v262_v49, %v270_v51  ;;  %v294_v49 = vld [vmem:[%s9710_s0 + $0x828] sm:$0xff] }
 0x244   :  { %v3102_v58 = vpop.f32.mrb[53].mxu1  ;;  %v302_v51 = vld [vmem:[%s9710_s0 + $0x868] sm:$0xff] }
 0x245   :  { %v240_v58 = vld [vmem:[%s9710_s0 + $0x678] sm:$0xff] }
 0x246   :  { %4137 = vmatmul.mubr.bf16.gmra.mrb[100].mxu1 %v5417_v46  ;;  %v232_v46 = vld [vmem:[%s9710_s0 + $0x638] sm:$0xff] }
 0x247   :  { %4144 = vmatprep.mubr.bf16.mxu1 %v5434_v14 }
 0x249   :  { %3791 = vmatmul.mubr.bf16.gmra.mrb[44].mxu0 %v5429_v61  ;;  %v5461_v61 = vcombine.low %v246_v18, %v254_v20  ;;  %v278_v18 = vld [vmem:[%s9710_s0 + $0x7a8] sm:$0xff] }
 0x24a   :  { %3798 = vmatprep.mubr.bf16.mxu0 %v5446_v1  ;;  %v8576_v1 = vpop.f32.mrb[54].mxu1  ;;  %v286_v20 = vld [vmem:[%s9710_s0 + $0x7e8] sm:$0xff] }
 0x24b   :  { %v3105_v9 = vpop.f32.mrb[55].mxu1  ;;  %v5494_v42 = vcombine.high %v278_v18, %v286_v20  ;;  %v5493_v13 = vcombine.low %v278_v18, %v286_v20  ;;  %v310_v18 = vld [vmem:[%s9710_s0 + $0x8a8] sm:$0xff] }
 0x24c   :  { %v318_v20 = vld [vmem:[%s9710_s0 + $0x8e8] sm:$0xff] }
 0x24e   :  { %4145 = vmatmul.mubr.bf16.gmra.mrb[104].mxu1 %v5433_v25  ;;  %v5510_v25 = vcombine.high %v294_v49, %v302_v51 }
 0x251   :  { %3799 = vmatmul.mubr.bf16.gmra.mrb[48].mxu0 %v5445_v28  ;;  %v8590_v28 = vpop.f32.mrb[56].mxu1 }
 0x252   :  { %3806 = vmatprep.mubr.bf16.mxu0 %v5462_v34  ;;  %v3110_v34 = vpop.f32.mrb[57].mxu1 }
 0x253   :  { %v8592_v41 = vpop.f32.mrb[58].mxu1 }
 0x254   :  { %v3113_v45 = vpop.f32.mrb[59].mxu1 }
 0x255   :  { %v8606_v9 = vpop.f32.mrb[60].mxu1 }
 0x256   :  { %v3118_v11 = vpop.f32.mrb[61].mxu1 }
 0x257   :  { %v8608_v14 = vpop.f32.mrb[62].mxu1 }
 0x258   :  { %v3121_v34 = vpop.f32.mrb[63].mxu1 }
 0x259   :  { %3807 = vmatmul.mubr.bf16.gmra.mrb[52].mxu0 %v5461_v61  ;;  %v5450_v61 = vcombine.high %v232_v46, %v240_v58  ;;  %v5526_v34 = vcombine.high %v310_v18, %v318_v20 }
 0x25a   :  { %3814 = vmatprep.mubr.bf16.mxu0 %v5478_v6  ;;  %v5449_v6 = vcombine.low %v232_v46, %v240_v58  ;;  %v8622_v58 = vpop.f32.mrb[64].mxu1 }
 0x25b   :  { %4152 = vmatprep.mubr.bf16.mxu1 %v5450_v61  ;;  %9729 = vst [vmem:[#allocation8_spill] sm:$0xff] %v8622_v58  ;;  %v3126_v61 = vpop.f32.mrb[65].mxu1 }
 0x25c   :  { %4153 = vmatmul.mubr.bf16.gmra.mrb[108].mxu1 %v5449_v6  ;;  %v5509_v6 = vcombine.low %v294_v49, %v302_v51  ;;  %v8624_v11 = vpop.f32.mrb[66].mxu1  ;;  %v39_v49 = vld [vmem:[%s9710_s0 + $0x30] sm:$0xff] }
 0x25d   :  { %9730 = vst [vmem:[#allocation9_spill] sm:$0xff] %v8624_v11  ;;  %v47_v51 = vld [vmem:[%s9710_s0 + $0x70] sm:$0xff] }
 0x25e   :  { %v5256_v56 = vcombine.high %v39_v49, %v47_v51 }
 0x261   :  { %3815 = vmatmul.mubr.bf16.gmra.mrb[56].mxu0 %v5477_v39  ;;  %v248_v39 = vld [vmem:[%s9710_s0 + $0x6b8] sm:$0xff] }
 0x262   :  { %3822 = vmatprep.mubr.bf16.mxu0 %v5494_v42  ;;  %v256_v42 = vld [vmem:[%s9710_s0 + $0x6f8] sm:$0xff] }
 0x263   :  { %v5466_v45 = vcombine.high %v248_v39, %v256_v42  ;;  %v5465_v46 = vcombine.low %v248_v39, %v256_v42  ;;  %v272_v39 = vld [vmem:[%s9710_s0 + $0x778] sm:$0xff] }
 0x265   :  { %4160 = vmatprep.mubr.bf16.mxu1 %v5466_v45 }
 0x266   :  { %4161 = vmatmul.mubr.bf16.gmra.mrb[112].mxu1 %v5465_v46 }
 0x269   :  { %3823 = vmatmul.mubr.bf16.gmra.mrb[60].mxu0 %v5493_v13  ;;  %v3129_v13 = vpop.f32.mrb[67].mxu1 }
 0x26a   :  { %3830 = vmatprep.mubr.bf16.mxu0 %v5510_v25  ;;  %v264_v25 = vld [vmem:[%s9710_s0 + $0x738] sm:$0xff]  ;;  %v8638_v46 = vpop.f32.mrb[68].mxu1  ;;  %v5525_v13 = vcombine.low %v310_v18, %v318_v20  ;;  %v55_v18 = vld [vmem:[%s9710_s0 + $0xb0] sm:$0xff] }
 0x26b   :  { %v5482_v42 = vcombine.high %v264_v25, %v272_v39  ;;  %v5481_v45 = vcombine.low %v264_v25, %v272_v39  ;;  %9731 = vst [vmem:[#allocation10_spill] sm:$0xff] %v8638_v46  ;;  %v3134_v61 = vpop.f32.mrb[69].mxu1  ;;  %v288_v25 = vld [vmem:[%s9710_s0 + $0x7f8] sm:$0xff]  ;;  %v63_v20 = vld [vmem:[%s9710_s0 + $0xf0] sm:$0xff] }
 0x26c   :  { %v8640_v0 = vpop.f32.mrb[70].mxu1  ;;  %v5272_v61 = vcombine.high %v55_v18, %v63_v20 }
 0x26d   :  { %4168 = vmatprep.mubr.bf16.mxu1 %v5482_v42  ;;  %9732 = vst [vmem:[#allocation11_spill] sm:$0xff] %v8640_v0  ;;  %v5672_v0 = vld [vmem:[%s9711_s3 + $0xe0] sm:$0xff] }
 0x26e   :  { %4169 = vmatmul.mubr.bf16.gmra.mrb[116].mxu1 %v5481_v45  ;;  %v5255_v45 = vcombine.low %v39_v49, %v47_v51  ;;  %v71_v49 = vld [vmem:[%s9710_s0 + $0x130] sm:$0xff] }
 0x26f   :  { %v79_v51 = vld [vmem:[%s9710_s0 + $0x170] sm:$0xff] }
 0x271   :  { %3831 = vmatmul.mubr.bf16.gmra.mrb[64].mxu0 %v5509_v6  ;;  %v3137_v6 = vpop.f32.mrb[71].mxu1 }
 0x272   :  { %3838 = vmatprep.mubr.bf16.mxu0 %v5526_v34  ;;  %v280_v34 = vld [vmem:[%s9710_s0 + $0x7b8] sm:$0xff] }
 0x273   :  { %v5498_v39 = vcombine.high %v280_v34, %v288_v25  ;;  %v5497_v42 = vcombine.low %v280_v34, %v288_v25  ;;  %v296_v6 = vld [vmem:[%s9710_s0 + $0x838] sm:$0xff]  ;;  %v9733_v25 = vmov 0  }
 0x275   :  { %4176 = vmatprep.mubr.bf16.mxu1 %v5498_v39  ;;  %v5271_v39 = vcombine.low %v55_v18, %v63_v20  ;;  %v95_v18 = vld [vmem:[%s9710_s0 + $0x1f0] sm:$0xff]  ;;  %v5287_v20 = vcombine.low %v71_v49, %v79_v51 }
 0x276   :  { %4177 = vmatmul.mubr.bf16.gmra.mrb[120].mxu1 %v5497_v42  ;;  %v5288_v42 = vcombine.high %v71_v49, %v79_v51 }
 0x279   :  { %3839 = vmatmul.mubr.bf16.gmra.mrb[68].mxu0 %v5525_v13 }
 0x27a   :  { %3879 = vmatprep.mubr.bf16.mxu0 %v5256_v56  ;;  %v304_v56 = vld [vmem:[%s9710_s0 + $0x878] sm:$0xff] }
 0x27b   :  { %v5514_v13 = vcombine.high %v296_v6, %v304_v56  ;;  %v5513_v34 = vcombine.low %v296_v6, %v304_v56 }
 0x27d   :  { %4184 = vmatprep.mubr.bf16.mxu1 %v5514_v13  ;;  %v111_v13 = vld [vmem:[%s9710_s0 + $0x270] sm:$0xff] }
 0x27e   :  { %4185 = vmatmul.mubr.bf16.gmra.mrb[124].mxu1 %v5513_v34 }
 0x281   :  { %3880 = vmatmul.mubr.bf16.vlgmr.msra.gmra.mrb[0].mxu0 %v5255_v45  ;;  %v320_v45 = vld [vmem:[%s9710_s0 + $0x8f8] sm:$0xff] }
 0x282   :  { %4025 = vmatpush1.bf16.msra.mxu0 %v8170_v50  ;;  %3887 = vmatprep.mubr.bf16.mxu0 %v5272_v61  ;;  %v312_v50 = vld [vmem:[%s9710_s0 + $0x8b8] sm:$0xff] }
 0x283   :  { %4026 = vmatprep.subr.bf16.mxu0 %v9733_v25  ;;  %v5530_v61 = vcombine.high %v312_v50, %v320_v45  ;;  %v5529_v6 = vcombine.low %v312_v50, %v320_v45 }
 0x285   :  { %4192 = vmatprep.mubr.bf16.mxu1 %v5530_v61 }
 0x286   :  { %4027 = vmatpush1.bf16.msra.mxu0 %v8183_v55  ;;  %v87_v55 = vld [vmem:[%s9710_s0 + $0x1b0] sm:$0xff]  ;;  %4193 = vmatmul.mubr.bf16.gmra.mrb[128].mxu1 %v5529_v6 }
 0x287   :  { %4028 = vmatprep.subr.bf16.mxu0 %v9733_v25  ;;  %v5304_v56 = vcombine.high %v87_v55, %v95_v18  ;;  %v5303_v34 = vcombine.low %v87_v55, %v95_v18 }
 0x289   :  { %3888 = vmatmul.mubr.bf16.gmra.mrb[4].mxu0 %v5271_v39 }
 0x28a   :  { %3895 = vmatprep.mubr.bf16.mxu0 %v5288_v42  ;;  %4029 = vmatpush1.bf16.msra.mxu0 %v8196_v60  ;;  %v103_v60 = vld [vmem:[%s9710_s0 + $0x230] sm:$0xff] }
 0x28b   :  { %4030 = vmatprep.subr.bf16.mxu0 %v9733_v25  ;;  %v5320_v49 = vcombine.high %v103_v60, %v111_v13  ;;  %v5319_v51 = vcombine.low %v103_v60, %v111_v13 }
 0x28e   :  { %4031 = vmatpush1.bf16.msra.mxu0 %v8209_v2  ;;  %v119_v2 = vld [vmem:[%s9710_s0 + $0x2b0] sm:$0xff] }
 0x28f   :  { %4032 = vmatprep.subr.bf16.mxu0 %v9733_v25 }
 0x291   :  { %3896 = vmatmul.mubr.bf16.gmra.mrb[8].mxu0 %v5287_v20 }
 0x292   :  { %3903 = vmatprep.mubr.bf16.mxu0 %v5304_v56  ;;  %4033 = vmatpush1.bf16.msra.mxu0 %v8222_v7  ;;  %v127_v7 = vld [vmem:[%s9710_s0 + $0x2f0] sm:$0xff] }
 0x293   :  { %4034 = vmatprep.subr.bf16.mxu0 %v9733_v25  ;;  %v5336_v39 = vcombine.high %v119_v2, %v127_v7  ;;  %v5335_v42 = vcombine.low %v119_v2, %v127_v7  ;;  %v239_v2 = vld [vmem:[%s9710_s0 + $0x670] sm:$0xff] }
 0x296   :  { %4035 = vmatpush1.bf16.msra.mxu0 %v8241_v16  ;;  %v135_v16 = vld [vmem:[%s9710_s0 + $0x330] sm:$0xff] }
 0x297   :  { %4036 = vmatprep.subr.bf16.mxu0 %v9733_v25 }
 0x299   :  { %3904 = vmatmul.mubr.bf16.gmra.mrb[12].mxu0 %v5303_v34 }
 0x29a   :  { %3911 = vmatprep.mubr.bf16.mxu0 %v5320_v49  ;;  %4037 = vmatpush1.bf16.msra.mxu0 %v8254_v21  ;;  %v143_v21 = vld [vmem:[%s9710_s0 + $0x370] sm:$0xff] }
 0x29b   :  { %4038 = vmatprep.subr.bf16.mxu0 %v9733_v25  ;;  %v5352_v50 = vcombine.high %v135_v16, %v143_v21  ;;  %v5351_v45 = vcombine.low %v135_v16, %v143_v21  ;;  %v231_v49 = vld [vmem:[%s9710_s0 + $0x630] sm:$0xff] }
 0x29c   :  { %v255_v16 = vld [vmem:[%s9710_s0 + $0x6f0] sm:$0xff]  ;;  %v5447_v21 = vcombine.low %v231_v49, %v239_v2 }
 0x29e   :  { %4039 = vmatpush1.bf16.msra.mxu0 %v8267_v26  ;;  %v151_v26 = vld [vmem:[%s9710_s0 + $0x3b0] sm:$0xff] }
 0x29f   :  { %4040 = vmatprep.subr.bf16.mxu0 %v9733_v25 }
 0x2a1   :  { %3912 = vmatmul.mubr.bf16.gmra.mrb[16].mxu0 %v5319_v51  ;;  %v5448_v51 = vcombine.high %v231_v49, %v239_v2  ;;  %v5661_v49 = vld [vmem:[%s9711_s3 + $0x88] sm:$0xff] }
 0x2a2   :  { %3919 = vmatprep.mubr.bf16.mxu0 %v5336_v39  ;;  %4041 = vmatpush1.bf16.msra.mxu0 %v8287_v36  ;;  %v159_v36 = vld [vmem:[%s9710_s0 + $0x3f0] sm:$0xff] }
 0x2a3   :  { %4042 = vmatprep.subr.bf16.mxu0 %v9733_v25  ;;  %v5368_v61 = vcombine.high %v151_v26, %v159_v36  ;;  %v5367_v6 = vcombine.low %v151_v26, %v159_v36  ;;  %v247_v39 = vld [vmem:[%s9710_s0 + $0x6b0] sm:$0xff] }
 0x2a4   :  { %v271_v26 = vld [vmem:[%s9710_s0 + $0x770] sm:$0xff]  ;;  %v5463_v36 = vcombine.low %v247_v39, %v255_v16 }
 0x2a6   :  { %4043 = vmatpush1.bf16.msra.mxu0 %v8312_v47  ;;  %v167_v47 = vld [vmem:[%s9710_s0 + $0x430] sm:$0xff] }
 0x2a7   :  { %4044 = vmatprep.subr.bf16.mxu0 %v9733_v25 }
 0x2a9   :  { %3920 = vmatmul.mubr.bf16.gmra.mrb[20].mxu0 %v5335_v42  ;;  %v5464_v42 = vcombine.high %v247_v39, %v255_v16 }
 0x2aa   :  { %3927 = vmatprep.mubr.bf16.mxu0 %v5352_v50  ;;  %4045 = vmatpush1.bf16.msra.mxu0 %v8340_v62  ;;  %v175_v62 = vld [vmem:[%s9710_s0 + $0x470] sm:$0xff] }
 0x2ab   :  { %4046 = vmatprep.subr.bf16.mxu0 %v9733_v25  ;;  %v5384_v55 = vcombine.high %v167_v47, %v175_v62  ;;  %v5383_v18 = vcombine.low %v167_v47, %v175_v62  ;;  %v263_v50 = vld [vmem:[%s9710_s0 + $0x730] sm:$0xff] }
 0x2ac   :  { %v287_v47 = vld [vmem:[%s9710_s0 + $0x7f0] sm:$0xff]  ;;  %v5479_v62 = vcombine.low %v263_v50, %v271_v26 }
 0x2ae   :  { %4047 = vmatpush1.bf16.msra.mxu0 %v8355_v5  ;;  %v183_v5 = vld [vmem:[%s9710_s0 + $0x4b0] sm:$0xff] }
 0x2af   :  { %4048 = vmatprep.subr.bf16.mxu0 %v9733_v25 }
 0x2b1   :  { %3928 = vmatmul.mubr.bf16.gmra.mrb[24].mxu0 %v5351_v45  ;;  %v5480_v45 = vcombine.high %v263_v50, %v271_v26 }
 0x2b2   :  { %3935 = vmatprep.mubr.bf16.mxu0 %v5368_v61  ;;  %4049 = vmatpush1.bf16.msra.mxu0 %v8369_v12  ;;  %v191_v12 = vld [vmem:[%s9710_s0 + $0x4f0] sm:$0xff] }
 0x2b3   :  { %4050 = vmatprep.subr.bf16.mxu0 %v9733_v25  ;;  %v5400_v20 = vcombine.high %v183_v5, %v191_v12  ;;  %v5399_v56 = vcombine.low %v183_v5, %v191_v12  ;;  %v279_v61 = vld [vmem:[%s9710_s0 + $0x7b0] sm:$0xff] }
 0x2b6   :  { %4051 = vmatpush1.bf16.msra.mxu0 %v8387_v19  ;;  %v199_v19 = vld [vmem:[%s9710_s0 + $0x530] sm:$0xff] }
 0x2b7   :  { %4052 = vmatprep.subr.bf16.mxu0 %v9733_v25 }
 0x2b9   :  { %3936 = vmatmul.mubr.bf16.gmra.mrb[28].mxu0 %v5367_v6  ;;  %v5496_v6 = vcombine.high %v279_v61, %v287_v47 }
 0x2ba   :  { %3943 = vmatprep.mubr.bf16.mxu0 %v5384_v55  ;;  %4053 = vmatpush1.bf16.msra.mxu0 %v8401_v27  ;;  %v207_v27 = vld [vmem:[%s9710_s0 + $0x570] sm:$0xff] }
 0x2bb   :  { %4054 = vmatprep.subr.bf16.mxu0 %v9733_v25  ;;  %v5416_v60 = vcombine.high %v199_v19, %v207_v27  ;;  %v215_v25 = vld [vmem:[%s9710_s0 + $0x5b0] sm:$0xff]  ;;  %v5415_v13 = vcombine.low %v199_v19, %v207_v27  ;;  %v5495_v27 = vcombine.low %v279_v61, %v287_v47  ;;  %v48_v61 = vld [vmem:[%s9710_s0 + $0x78] sm:$0xff] }
 0x2bc   :  { %v303_v19 = vld [vmem:[%s9710_s0 + $0x870] sm:$0xff] }
 0x2be   :  { %4055 = vmatpush1.bf16.msra.mxu0 %v8419_v35  ;;  %v223_v35 = vld [vmem:[%s9710_s0 + $0x5f0] sm:$0xff] }
 0x2bf   :  { %v5432_v34 = vcombine.high %v215_v25, %v223_v35  ;;  %v5431_v7 = vcombine.low %v215_v25, %v223_v35 }
 0x2c1   :  { %3944 = vmatmul.mubr.bf16.gmra.mrb[32].mxu0 %v5383_v18 }
 0x2c2   :  { %3951 = vmatprep.mubr.bf16.mxu0 %v5400_v20  ;;  %v295_v20 = vld [vmem:[%s9710_s0 + $0x830] sm:$0xff] }
 0x2c3   :  { %v5511_v16 = vcombine.low %v295_v20, %v303_v19 }
 0x2c9   :  { %3952 = vmatmul.mubr.bf16.gmra.mrb[36].mxu0 %v5399_v56  ;;  %v5512_v56 = vcombine.high %v295_v20, %v303_v19  ;;  %v5662_v20 = vld [vmem:[%s9711_s3 + $0x90] sm:$0xff]  ;;  %v5663_v19 = vld [vmem:[%s9711_s3 + $0x98] sm:$0xff] }
 0x2ca   :  { %3959 = vmatprep.mubr.bf16.mxu0 %v5416_v60 }
 0x2d1   :  { %3960 = vmatmul.mubr.bf16.gmra.mrb[40].mxu0 %v5415_v13  ;;  %v9721_v13 = vmov 0.0|0.0  }
 0x2d2   :  { %3967 = vmatprep.mubr.bf16.mxu0 %v5432_v34  ;;  %6363 = vmatprep.subr.bf16.mxu1 %v9721_v13  ;;  %v5660_v34 = vld [vmem:[%s9711_s3 + $0x80] sm:$0xff] }
 0x2d3   :  { %v8781_v55 = vpop.f32.mrb[72].mxu1  ;;  %v6364_v39 = vpack.c.bf16 %v5661_v49, %v5660_v34  ;;  %v64_v34 = vld [vmem:[%s9710_s0 + $0xf8] sm:$0xff] }
 0x2d4   :  { %v4084_v5 = vpop.f32.mrb[73].mxu1 }
 0x2d5   :  { %v8783_v12 = vpop.f32.mrb[74].mxu1  ;;  %6365 = vmatpush3.bf16.msra.mxu1 %v6364_v39 }
 0x2d6   :  { %v4087_v18 = vpop.f32.mrb[75].mxu1  ;;  %6366 = vmatprep.subr.bf16.mxu1 %v9721_v13 }
 0x2d9   :  { %3968 = vmatmul.mubr.bf16.gmra.mrb[44].mxu0 %v5431_v7  ;;  %v311_v7 = vld [vmem:[%s9710_s0 + $0x8b0] sm:$0xff] }
 0x2da   :  { %3975 = vmatprep.mubr.bf16.mxu0 %v5448_v51  ;;  %v319_v51 = vld [vmem:[%s9710_s0 + $0x8f0] sm:$0xff] }
 0x2db   :  { %v5527_v47 = vcombine.low %v311_v7, %v319_v51 }
 0x2e0   :  { %v8791_v60 = vpop.f32.mrb[76].mxu1 }
 0x2e1   :  { %3976 = vmatmul.mubr.bf16.gmra.mrb[48].mxu0 %v5447_v21  ;;  %v4092_v25 = vpop.f32.mrb[77].mxu1  ;;  %v5528_v21 = vcombine.high %v311_v7, %v319_v51 }
 0x2e2   :  { %3983 = vmatprep.mubr.bf16.mxu0 %v5464_v42  ;;  %v8793_v35 = vpop.f32.mrb[78].mxu1  ;;  %v56_v25 = vld [vmem:[%s9710_s0 + $0xb8] sm:$0xff] }
 0x2e3   :  { %v4095_v2 = vpop.f32.mrb[79].mxu1 }
 0x2e4   :  { %v5274_v2 = vcombine.high %v56_v25, %v64_v34 }
 0x2e9   :  { %3984 = vmatmul.mubr.bf16.gmra.mrb[52].mxu0 %v5463_v36 }
 0x2ea   :  { %3991 = vmatprep.mubr.bf16.mxu0 %v5480_v45  ;;  %v40_v45 = vld [vmem:[%s9710_s0 + $0x38] sm:$0xff] }
 0x2eb   :  { %v5257_v49 = vcombine.low %v40_v45, %v48_v61 }
 0x2ee   :  { %v8809_v42 = vpop.f32.mrb[80].mxu1 }
 0x2ef   :  { %v4100_v50 = vpop.f32.mrb[81].mxu1 }
 0x2f0   :  { %v8811_v26 = vpop.f32.mrb[82].mxu1  ;;  %v80_v50 = vld [vmem:[%s9710_s0 + $0x178] sm:$0xff] }
 0x2f1   :  { %3992 = vmatmul.mubr.bf16.gmra.mrb[56].mxu0 %v5479_v62  ;;  %v4103_v36 = vpop.f32.mrb[83].mxu1  ;;  %v5258_v62 = vcombine.high %v40_v45, %v48_v61 }
 0x2f2   :  { %3999 = vmatprep.mubr.bf16.mxu0 %v5496_v6  ;;  %v5273_v36 = vcombine.low %v56_v25, %v64_v34 }
 0x2f7   :  { %v8819_v6 = vpop.f32.mrb[84].mxu1 }
 0x2f8   :  { %v4108_v5 = vpop.f32.mrb[85].mxu1 }
 0x2f9   :  { %4000 = vmatmul.mubr.bf16.gmra.mrb[60].mxu0 %v5495_v27  ;;  %v8821_v18 = vpop.f32.mrb[86].mxu1  ;;  %v6367_v27 = vpack.c.bf16 %v5663_v19, %v5662_v20  ;;  %v5664_v20 = vld [vmem:[%s9711_s3 + $0xa0] sm:$0xff]  ;;  %v5665_v19 = vld [vmem:[%s9711_s3 + $0xa8] sm:$0xff] }
 0x2fa   :  { %4007 = vmatprep.mubr.bf16.mxu0 %v5512_v56  ;;  %v4111_v56 = vpop.f32.mrb[87].mxu1 }
 0x2fb   :  { %6368 = vmatpush3.bf16.msra.mxu1 %v6367_v27  ;;  %v6370_v27 = vpack.c.bf16 %v5665_v19, %v5664_v20 }
 0x2fc   :  { %6369 = vmatprep.subr.bf16.mxu1 %v9721_v13 }
 0x2ff   :  { %v8836_v7 = vpop.f32.mrb[88].mxu1  ;;  %6371 = vmatpush3.bf16.msra.mxu1 %v6370_v27 }
 0x300   :  { %v4116_v51 = vpop.f32.mrb[89].mxu1  ;;  %6372 = vmatprep.subr.bf16.mxu1 %v9721_v13 }
 0x301   :  { %4008 = vmatmul.mubr.bf16.gmra.mrb[64].mxu0 %v5511_v16  ;;  %v8838_v39 = vpop.f32.mrb[90].mxu1 }
 0x302   :  { %4015 = vmatprep.mubr.bf16.mxu0 %v5528_v21  ;;  %v4119_v16 = vpop.f32.mrb[91].mxu1  ;;  %v72_v21 = vld [vmem:[%s9710_s0 + $0x138] sm:$0xff] }
 0x303   :  { %v5290_v45 = vcombine.high %v72_v21, %v80_v50  ;;  %v5289_v56 = vcombine.low %v72_v21, %v80_v50  ;;  %v5666_v16 = vld [vmem:[%s9711_s3 + $0xb0] sm:$0xff]  ;;  %v5667_v21 = vld [vmem:[%s9711_s3 + $0xb8] sm:$0xff] }
 0x307   :  { %v8846_v61 = vpop.f32.mrb[92].mxu1 }
 0x309   :  { %4016 = vmatmul.mubr.bf16.gmra.mrb[68].mxu0 %v5527_v47  ;;  %v4124_v47 = vpop.f32.mrb[93].mxu1 }
 0x30a   :  { %4056 = vmatprep.mubr.bf16.mxu0 %v5258_v62  ;;  %v8848_v62 = vpop.f32.mrb[94].mxu1 }
 0x30b   :  { %v4127_v5 = vpop.f32.mrb[95].mxu1 }
 0x311   :  { %4057 = vmatmul.mubr.bf16.vlgmr.msra.gmra.mrb[0].mxu0 %v5257_v49  ;;  %v8856_v25 = vpop.f32.mrb[96].mxu1 }
 0x312   :  { %4064 = vmatprep.mubr.bf16.mxu0 %v5274_v2  ;;  %v4132_v34 = vpop.f32.mrb[97].mxu1 }
 0x313   :  { %v8859_v49 = vpop.f32.mrb[98].mxu1  ;;  %v5668_v34 = vld [vmem:[%s9711_s3 + $0xc0] sm:$0xff] }
 0x314   :  { %v4135_v2 = vpop.f32.mrb[99].mxu1 }
 0x315   :  { %v5669_v2 = vld [vmem:[%s9711_s3 + $0xc8] sm:$0xff] }
 0x319   :  { %4065 = vmatmul.mubr.bf16.gmra.mrb[4].mxu0 %v5273_v36  ;;  %v8861_v51 = vpop.f32.mrb[100].mxu1  ;;  %v6373_v36 = vpack.c.bf16 %v5667_v21, %v5666_v16  ;;  %v6376_v16 = vpack.c.bf16 %v5669_v2, %v5668_v34  ;;  %v5671_v34 = vld [vmem:[%s9711_s3 + $0xd8] sm:$0xff] }
 0x31a   :  { %4072 = vmatprep.mubr.bf16.mxu0 %v5290_v45  ;;  %v4140_v50 = vpop.f32.mrb[101].mxu1  ;;  %v6379_v2 = vpack.c.bf16 %v5671_v34, %v5670_v43  ;;  %v5673_v43 = vld [vmem:[%s9711_s3 + $0xe8] sm:$0xff] }
 0x31b   :  { %v8869_v45 = vpop.f32.mrb[102].mxu1  ;;  %6374 = vmatpush3.bf16.msra.mxu1 %v6373_v36  ;;  %v6382_v34 = vpack.c.bf16 %v5673_v43, %v5672_v0  ;;  %v5675_v0 = vld [vmem:[%s9711_s3 + $0xf8] sm:$0xff] }
 0x31c   :  { %v4143_v47 = vpop.f32.mrb[103].mxu1  ;;  %6375 = vmatprep.subr.bf16.mxu1 %v9721_v13 }
 0x31f   :  { %6377 = vmatpush3.bf16.msra.mxu1 %v6376_v16 }
 0x320   :  { %6378 = vmatprep.subr.bf16.mxu1 %v9721_v13 }
 0x321   :  { %4073 = vmatmul.mubr.bf16.gmra.mrb[8].mxu0 %v5289_v56  ;;  %v8872_v5 = vpop.f32.mrb[104].mxu1 }
 0x322   :  { %v4148_v20 = vpop.f32.mrb[105].mxu1 }
 0x323   :  { %v8874_v19 = vpop.f32.mrb[106].mxu1  ;;  %6380 = vmatpush3.bf16.msra.mxu1 %v6379_v2 }
 0x324   :  { %v4151_v27 = vpop.f32.mrb[107].mxu1  ;;  %6381 = vmatprep.subr.bf16.mxu1 %v9721_v13 }
 0x327   :  { %6383 = vmatpush3.bf16.msra.mxu1 %v6382_v34 }
 0x328   :  { %6384 = vmatprep.subr.bf16.mxu1 %v9721_v13 }
 0x32f   :  { %v8876_v56 = vpop.f32.mrb[108].mxu1 }
 0x330   :  { %v4156_v21 = vpop.f32.mrb[109].mxu1 }
 0x331   :  { %v8884_v50 = vpop.f32.mrb[110].mxu1 }
 0x332   :  { %v4159_v36 = vpop.f32.mrb[111].mxu1 }
 0x339   :  { %v8887_v47 = vpop.f32.mrb[112].mxu1 }
 0x33a   :  { %v4164_v20 = vpop.f32.mrb[113].mxu1 }
 0x33b   :  { %v8889_v27 = vpop.f32.mrb[114].mxu1 }
 0x33c   :  { %v4167_v52 = vpop.f32.mrb[115].mxu1 }
 0x341   :  { %v8897_v21 = vpop.f32.mrb[116].mxu1 }
 0x342   :  { %v4172_v16 = vpop.f32.mrb[117].mxu1 }
 0x343   :  { %v8899_v36 = vpop.f32.mrb[118].mxu1 }
 0x344   :  { %v4175_v20 = vpop.f32.mrb[119].mxu1 }
 0x349   :  { %v8902_v40 = vpop.f32.mrb[120].mxu1 }
 0x34a   :  { %v4180_v52 = vpop.f32.mrb[121].mxu1 }
 0x34b   :  { %v8904_v32 = vpop.f32.mrb[122].mxu1 }
 0x34c   :  { %9734 = vst [vmem:[#allocation12_spill] sm:$0xff] %v8904_v32  ;;  %v4183_v29 = vpop.f32.mrb[123].mxu1  ;;  %v5674_v32 = vld [vmem:[%s9711_s3 + $0xf0] sm:$0xff] }
 0x34d   :  { %v6385_v43 = vpack.c.bf16 %v5675_v0, %v5674_v32 }
 0x34f   :  { %6386 = vmatpush3.bf16.msra.mxu1 %v6385_v43 }
 0x350   :  { %6387 = vmatprep.subr.bf16.mxu1 %v9721_v13 }
 0x351   :  { %v8912_v2 = vpop.f32.mrb[124].mxu1 }
 0x352   :  { %v4188_v16 = vpop.f32.mrb[125].mxu1 }
 0x353   :  { %v8914_v20 = vpop.f32.mrb[126].mxu1 }
 0x354   :  { %9735 = vst [vmem:[#allocation13_spill] sm:$0xff] %v8914_v20  ;;  %v4191_v52 = vpop.f32.mrb[127].mxu1  ;;  %v7232_v20 = vmov 0.0  }
 0x355   :  { %6010 = vmatprep.mubr.msk.f32.mxu1 %vm7231_vm0, %v7232_v20 }
 0x359   :  { %v8917_v46 = vpop.f32.mrb[128].mxu1 }
 0x35a   :  { %9736 = vst [vmem:[#allocation14_spill] sm:$0xff] %v8917_v46  ;;  %v4196_v29 = vpop.f32.mrb[129].mxu1 }
 0x35b   :  { %v8919_v11 = vpop.f32.mrb[130].mxu1 }
 0x35c   :  { %9737 = vst [vmem:[#allocation15_spill] sm:$0xff] %v8919_v11  ;;  %v4199_v58 = vpop.f32.mrb[131].mxu1 }
 0x36c   :  { %v3905_v34 = vpop.f32.mrb[12].mxu0 }
 0x36d   :  { %v6665_v16 = vadd.f32 %v3905_v34, %v8349_v3  ;;  %v3907_v52 = vpop.f32.mrb[13].mxu0 }
 0x36e   :  { %v3908_v29 = vpop.f32.mrb[14].mxu0 }
 0x36f   :  { %v6667_v11 = vadd.f32 %v3908_v29, %v8357_v8  ;;  %v8931_v58 = vadd.f32 %v6665_v16, %v8781_v55  ;;  %v3910_v46 = vpop.f32.mrb[15].mxu0 }
 0x371   :  { %v8936_v32 = vadd.f32 %v6667_v11, %v8783_v12 }
 0x374   :  { %v3913_v0 = vpop.f32.mrb[16].mxu0 }
 0x375   :  { %v6669_v3 = vadd.f32 %v3913_v0, %v8381_v17  ;;  %v3915_v43 = vpop.f32.mrb[17].mxu0 }
 0x376   :  { %v3916_v34 = vpop.f32.mrb[18].mxu0 }
 0x377   :  { %v6671_v52 = vadd.f32 %v3916_v34, %v8389_v22  ;;  %v8941_v8 = vadd.f32 %v6669_v3, %v8791_v60  ;;  %v3918_v55 = vpop.f32.mrb[19].mxu0 }
 0x379   :  { %v8944_v46 = vadd.f32 %v6671_v52, %v8793_v35 }
 0x37c   :  { %v3921_v16 = vpop.f32.mrb[20].mxu0 }
 0x37d   :  { %v6673_v29 = vadd.f32 %v3921_v16, %v8413_v33  ;;  %v3923_v13 = vpop.f32.mrb[21].mxu0 }
 0x37e   :  { %v3924_v11 = vpop.f32.mrb[22].mxu0 }
 0x37f   :  { %v6675_v12 = vadd.f32 %v3924_v11, %v8421_v38  ;;  %v8949_v17 = vadd.f32 %v6673_v29, %v8809_v42  ;;  %v3926_v0 = vpop.f32.mrb[23].mxu0 }
 0x381   :  { %v8952_v22 = vadd.f32 %v6675_v12, %v8811_v26 }
 0x384   :  { %v3929_v60 = vpop.f32.mrb[24].mxu0 }
 0x385   :  { %v6677_v3 = vadd.f32 %v3929_v60, %v8445_v54  ;;  %v3931_v43 = vpop.f32.mrb[25].mxu0 }
 0x386   :  { %v3932_v35 = vpop.f32.mrb[26].mxu0 }
 0x387   :  { %v6679_v34 = vadd.f32 %v3932_v35, %v8447_v59  ;;  %v8957_v33 = vadd.f32 %v6677_v3, %v8819_v6  ;;  %v3934_v13 = vpop.f32.mrb[27].mxu0 }
 0x389   :  { %v8960_v38 = vadd.f32 %v6679_v34, %v8821_v18 }
 0x38c   :  { %v3937_v42 = vpop.f32.mrb[28].mxu0 }
 0x38d   :  { %v6681_v52 = vadd.f32 %v3937_v42, %v8469_v15  ;;  %v3939_v55 = vpop.f32.mrb[29].mxu0 }
 0x38e   :  { %v3940_v26 = vpop.f32.mrb[30].mxu0 }
 0x38f   :  { %v6683_v16 = vadd.f32 %v3940_v26, %v8471_v23  ;;  %v8965_v54 = vadd.f32 %v6681_v52, %v8836_v7  ;;  %v3942_v29 = vpop.f32.mrb[31].mxu0 }
 0x391   :  { %v8968_v59 = vadd.f32 %v6683_v16, %v8838_v39 }
 0x393   :  { %v4207_v6 = vmax.f32 %v8931_v58, %v8968_v59 }
 0x394   :  { %v3945_v11 = vpop.f32.mrb[32].mxu0 }
 0x395   :  { %v6685_v18 = vadd.f32 %v3945_v11, %v8493_v44  ;;  %v3947_v12 = vpop.f32.mrb[33].mxu0 }
 0x396   :  { %v3948_v0 = vpop.f32.mrb[34].mxu0 }
 0x397   :  { %v6687_v15 = vadd.f32 %v3948_v0, %v8495_v48  ;;  %v8975_v60 = vadd.f32 %v6685_v18, %v8846_v61  ;;  %v3950_v23 = vpop.f32.mrb[35].mxu0 }
 0x399   :  { %v4208_v7 = vmax.f32 %v8936_v32, %v8975_v60  ;;  %v8980_v39 = vadd.f32 %v6687_v15, %v8848_v62  ;;  %v9747_v32 = vld [vmem:[#allocation3_spill] sm:$0xff] }
 0x39b   :  { %v4209_v3 = vmax.f32 %v8941_v8, %v8980_v39  ;;  %v4253_v8 = vld [vmem:[%s9711_s3] sm:$0xff]  ;;  %v4254_v39 = vld [vmem:[%s9711_s3 + $0x8] sm:$0xff] }
 0x39c   :  { %v3953_v43 = vpop.f32.mrb[36].mxu0 }
 0x39d   :  { %v6689_v44 = vadd.f32 %v3953_v43, %v8510_v4  ;;  %v3955_v35 = vpop.f32.mrb[37].mxu0 }
 0x39e   :  { %v3956_v34 = vpop.f32.mrb[38].mxu0 }
 0x39f   :  { %v6691_v48 = vadd.f32 %v3956_v34, %v8512_v10  ;;  %v8987_v61 = vadd.f32 %v6689_v44, %v8856_v25  ;;  %v3958_v13 = vpop.f32.mrb[39].mxu0 }
 0x3a1   :  { %v8990_v42 = vadd.f32 %v6691_v48, %v8859_v49 }
 0x3a4   :  { %v3961_v52 = vpop.f32.mrb[40].mxu0 }
 0x3a5   :  { %v6693_v62 = vadd.f32 %v3961_v52, %v8526_v30  ;;  %v3963_v55 = vpop.f32.mrb[41].mxu0 }
 0x3a6   :  { %v3964_v26 = vpop.f32.mrb[42].mxu0 }
 0x3a7   :  { %v6695_v16 = vadd.f32 %v3964_v26, %v8528_v37  ;;  %v8995_v4 = vadd.f32 %v6693_v62, %v8861_v51  ;;  %v3966_v29 = vpop.f32.mrb[43].mxu0 }
 0x3a9   :  { %v8998_v10 = vadd.f32 %v6695_v16, %v8869_v45 }
 0x3ac   :  { %v3969_v25 = vpop.f32.mrb[44].mxu0 }
 0x3ad   :  { %v6697_v11 = vadd.f32 %v3969_v25, %v8542_v57  ;;  %v3971_v18 = vpop.f32.mrb[45].mxu0 }
 0x3ae   :  { %v3972_v49 = vpop.f32.mrb[46].mxu0  ;;  %v9738_v18 = vld [vmem:[#allocation12_spill] sm:$0xff] }
 0x3af   :  { %v6699_v12 = vadd.f32 %v3972_v49, %v8544_v63  ;;  %v9003_v30 = vadd.f32 %v6697_v11, %v8872_v5  ;;  %v3974_v0 = vpop.f32.mrb[47].mxu0 }
 0x3b0   :  { %v9739_v0 = vld [vmem:[#allocation8_spill] sm:$0xff] }
 0x3b1   :  { %v9006_v37 = vadd.f32 %v6699_v12, %v8874_v19 }
 0x3b4   :  { %v3977_v51 = vpop.f32.mrb[48].mxu0 }
 0x3b5   :  { %v6701_v15 = vadd.f32 %v3977_v51, %v8558_v24  ;;  %v3979_v23 = vpop.f32.mrb[49].mxu0 }
 0x3b6   :  { %v3980_v45 = vpop.f32.mrb[50].mxu0  ;;  %v9740_v23 = vld [vmem:[#allocation9_spill] sm:$0xff] }
 0x3b7   :  { %v6703_v43 = vadd.f32 %v3980_v45, %v8560_v31  ;;  %v6702_v57 = vadd.f32 %v6701_v15, %v8876_v56  ;;  %v3982_v44 = vpop.f32.mrb[51].mxu0 }
 0x3b9   :  { %v6704_v35 = vadd.f32 %v6703_v43, %v8884_v50  ;;  %v9741_v43 = vld [vmem:[#allocation13_spill] sm:$0xff] }
 0x3bc   :  { %v3985_v63 = vpop.f32.mrb[52].mxu0 }
 0x3bd   :  { %v6705_v5 = vadd.f32 %v3985_v63, %v8574_v53  ;;  %v3987_v34 = vpop.f32.mrb[53].mxu0 }
 0x3be   :  { %v3988_v48 = vpop.f32.mrb[54].mxu0 }
 0x3bf   :  { %v6707_v19 = vadd.f32 %v3988_v48, %v8576_v1  ;;  %v6706_v13 = vadd.f32 %v6705_v5, %v8887_v47  ;;  %v3990_v52 = vpop.f32.mrb[55].mxu0  ;;  %v9049_v5 = vld [vmem:[%s9712_s2] ss:$0 sm:$0xff] }
 0x3c1   :  { %v6708_v24 = vadd.f32 %v6707_v19, %v8889_v27  ;;  %v9742_v19 = vld [vmem:[#allocation10_spill] sm:$0xff] }
 0x3c3   :  { %v4210_v62 = vmax.f32 %v8987_v61, %v6708_v24 }
 0x3c4   :  { %v3993_v31 = vpop.f32.mrb[56].mxu0 }
 0x3c5   :  { %v6709_v56 = vadd.f32 %v3993_v31, %v8590_v28  ;;  %v3995_v55 = vpop.f32.mrb[57].mxu0 }
 0x3c6   :  { %v3996_v26 = vpop.f32.mrb[58].mxu0 }
 0x3c7   :  { %v6711_v50 = vadd.f32 %v3996_v26, %v8592_v41  ;;  %v6710_v53 = vadd.f32 %v6709_v56, %v8897_v21  ;;  %v3998_v16 = vpop.f32.mrb[59].mxu0  ;;  %v9743_v56 = vld [vmem:[#allocation11_spill] sm:$0xff] }
 0x3c8   :  { %v9745_v16 = vld [vmem:[#allocation15_spill] sm:$0xff] }
 0x3c9   :  { %v4211_v29 = vmax.f32 %v8990_v42, %v6710_v53  ;;  %v9022_v1 = vadd.f32 %v6711_v50, %v8899_v36 }
 0x3cb   :  { %v4212_v47 = vmax.f32 %v8995_v4, %v9022_v1 }
 0x3cc   :  { %v4001_v27 = vpop.f32.mrb[60].mxu0 }
 0x3cd   :  { %v6713_v61 = vadd.f32 %v4001_v27, %v8606_v9  ;;  %v4003_v25 = vpop.f32.mrb[61].mxu0 }
 0x3ce   :  { %v4004_v28 = vpop.f32.mrb[62].mxu0 }
 0x3cf   :  { %v6715_v11 = vadd.f32 %v4004_v28, %v8608_v14  ;;  %v9029_v41 = vadd.f32 %v6713_v61, %v8902_v40  ;;  %v4006_v21 = vpop.f32.mrb[63].mxu0  ;;  %v9746_v28 = vld [vmem:[#allocation2_spill] sm:$0xff] }
 0x3d1   :  { %v4213_v42 = vmax.f32 %v8998_v10, %v9029_v41  ;;  %v9034_v36 = vadd.f32 %v6715_v11, %v9738_v18 }
 0x3d3   :  { %v4214_v49 = vmax.f32 %v9003_v30, %v9034_v36  ;;  %v4262_v30 = vld [vmem:[%s9711_s3 + $0x48] sm:$0xff] }
 0x3d4   :  { %v4009_v12 = vpop.f32.mrb[64].mxu0 }
 0x3d5   :  { %v6717_v9 = vadd.f32 %v4009_v12, %v9739_v0  ;;  %v4011_v51 = vpop.f32.mrb[65].mxu0 }
 0x3d6   :  { %v4012_v15 = vpop.f32.mrb[66].mxu0 }
 0x3d7   :  { %v6719_v14 = vadd.f32 %v4012_v15, %v9740_v23  ;;  %v9041_v40 = vadd.f32 %v6717_v9, %v8912_v2  ;;  %v4014_v45 = vpop.f32.mrb[67].mxu0 }
 0x3d9   :  { %v4215_v10 = vmax.f32 %v9006_v37, %v9041_v40  ;;  %v6720_v44 = vadd.f32 %v6719_v14, %v9741_v43  ;;  %v4263_v37 = vld [vmem:[%s9711_s3 + $0x50] sm:$0xff] }
 0x3db   :  { %v4216_v63 = vmax.f32 %v6702_v57, %v6720_v44  ;;  %v9744_v57 = vld [vmem:[#allocation14_spill] sm:$0xff]  ;;  %v4255_v44 = vld [vmem:[%s9711_s3 + $0x10] sm:$0xff] }
 0x3dc   :  { %v4017_v34 = vpop.f32.mrb[68].mxu0 }
 0x3dd   :  { %v4225_v48 = vmax.f32 %v4207_v6, %v4216_v63  ;;  %v6721_v2 = vadd.f32 %v4017_v34, %v9742_v19  ;;  %v4019_v52 = vpop.f32.mrb[69].mxu0  ;;  %v4256_v63 = vld [vmem:[%s9711_s3 + $0x18] sm:$0xff] }
 0x3de   :  { %v4020_v24 = vpop.f32.mrb[70].mxu0  ;;  %v9750_v52 = vmov 0.0|0.0  }
 0x3df   :  { %v9056_v31 = vadd.f32 %v9049_v5, %v4225_v48  ;;  %v6723_v55 = vadd.f32 %v4020_v24, %v9743_v56  ;;  %v6722_v26 = vadd.f32 %v6721_v2, %v9744_v57  ;;  %v4022_v50 = vpop.f32.mrb[71].mxu0  ;;  %v4257_v24 = vld [vmem:[%s9711_s3 + $0x20] sm:$0xff] }
 0x3e0   :  { %v9752_v50 = vld [vmem:[#allocation7_spill] sm:$0xff] }
 0x3e1   :  { %v4217_v53 = vmax.f32 %v6704_v35, %v6722_v26  ;;  %v6724_v27 = vadd.f32 %v6723_v55, %v9745_v16 }
 0x3e3   :  { %v4226_v58 = vmax.f32 %v4208_v7, %v4217_v53  ;;  %v4218_v59 = vmax.f32 %v6706_v13, %v6724_v27  ;;  %v4259_v27 = vld [vmem:[%s9711_s3 + $0x30] sm:$0xff] }
 0x3e4   :  { %v4058_v6 = vpop.f32.mrb[0].mxu0 }
 0x3e5   :  { %v9065_v61 = vadd.f32 %v9049_v5, %v4226_v58  ;;  %v4227_v25 = vmax.f32 %v4209_v3, %v4218_v59  ;;  %v6659_v11 = vadd.f32 %v4058_v6, %v9746_v28  ;;  %v4060_v41 = vpop.f32.mrb[1].mxu0  ;;  %v4260_v58 = vld [vmem:[%s9711_s3 + $0x38] sm:$0xff] }
 0x3e6   :  { %v4061_v21 = vpop.f32.mrb[2].mxu0  ;;  %v4266_v41 = vld [vmem:[%s9711_s3 + $0x68] sm:$0xff] }
 0x3e7   :  { %v9072_v35 = vadd.f32 %v9049_v5, %v4227_v25  ;;  %v4201_v18 = vmax.f32 %v6659_v11, %v8944_v46  ;;  %v6660_v60 = vadd.f32 %v4061_v21, %v9747_v32  ;;  %v4063_v7 = vpop.f32.mrb[3].mxu0  ;;  %v9748_v46 = vld [vmem:[#allocation4_spill] sm:$0xff]  ;;  %v4261_v11 = vld [vmem:[%s9711_s3 + $0x40] sm:$0xff]  ;;  %v4268_v32 = vld [vmem:[%s9711_s3 + $0x78] sm:$0xff] }
 0x3e8   :  { %v6400_v36 = vpack.c.bf16 %v4262_v30, %v4261_v11  ;;  %v5704_v30 = vld [vmem:[%s9711_s3 + $0x1e0] sm:$0xff] }
 0x3e9   :  { %v9076_v13 = vmax.f32 %v4201_v18, %v4210_v62  ;;  %v4202_v12 = vmax.f32 %v6660_v60, %v8949_v17  ;;  %v6388_v62 = vpack.c.bf16 %v4254_v39, %v4253_v8  ;;  %v4267_v18 = vld [vmem:[%s9711_s3 + $0x70] sm:$0xff] }
 0x3ea   :  { %v6409_v60 = vpack.c.bf16 %v4268_v32, %v4267_v18 }
 0x3eb   :  { %v4220_v0 = vmax.f32 %v4202_v12, %v4211_v29  ;;  %v9749_v29 = vld [vmem:[#allocation5_spill] sm:$0xff]  ;;  %v4235_v7 = vadd.f32 %v9049_v5, %v9076_v13  ;;  %v5676_v12 = vld [vmem:[%s9711_s3 + $0x100] sm:$0xff] }
 0x3ec   :  { %v4066_v3 = vpop.f32.mrb[4].mxu0 }
 0x3ed   :  { %v4236_v9 = vadd.f32 %v9049_v5, %v4220_v0  ;;  %v6661_v51 = vadd.f32 %v4066_v3, %v9748_v46  ;;  %v4068_v15 = vpop.f32.mrb[5].mxu0  ;;  %v5677_v0 = vld [vmem:[%s9711_s3 + $0x108] sm:$0xff]  ;;  %v4244_v39 = vmax.f32 %v4235_v7, 0.0  ;;  %v5678_v3 = vld [vmem:[%s9711_s3 + $0x110] sm:$0xff]  ;;  %v5711_v7 = vld [vmem:[%s9711_s3 + $0x218] sm:$0xff] }
 0x3ee   :  { %v4069_v23 = vpop.f32.mrb[6].mxu0  ;;  %v6412_v8 = vpack.c.bf16 %v5677_v0, %v5676_v12  ;;  %v5681_v46 = vld [vmem:[%s9711_s3 + $0x128] sm:$0xff]  ;;  %v5682_v15 = vld [vmem:[%s9711_s3 + $0x130] sm:$0xff] }
 0x3ef   :  { %v4245_v14 = vmax.f32 %v4236_v9, 0.0  ;;  %v4203_v17 = vmax.f32 %v6661_v51, %v8952_v22  ;;  %v6662_v45 = vadd.f32 %v4069_v23, %v9749_v29  ;;  %v4071_v43 = vpop.f32.mrb[7].mxu0  ;;  %v6391_v22 = vpack.c.bf16 %v4256_v63, %v4255_v44  ;;  %v5680_v9 = vld [vmem:[%s9711_s3 + $0x120] sm:$0xff]  ;;  %v5683_v23 = vld [vmem:[%s9711_s3 + $0x138] sm:$0xff]  ;;  %v5713_v0 = vld [vmem:[%s9711_s3 + $0x228] sm:$0xff] }
 0x3f0   :  { %v6418_v51 = vpack.c.bf16 %v5681_v46, %v5680_v9  ;;  %v5687_v43 = vld [vmem:[%s9711_s3 + $0x158] sm:$0xff]  ;;  %v5688_v63 = vld [vmem:[%s9711_s3 + $0x160] sm:$0xff]  ;;  %v5717_v9 = vld [vmem:[%s9711_s3 + $0x248] sm:$0xff] }
 0x3f1   :  { %v4221_v34 = vmax.f32 %v4203_v17, %v4212_v47  ;;  %v4204_v48 = vmax.f32 %v6662_v45, %v8957_v33  ;;  %6011 = vmatmul.mubr.f32.vlgmr.msra.gmra.mrb[132].mxu1 %v4245_v14  ;;  %v4258_v33 = vld [vmem:[%s9711_s3 + $0x28] sm:$0xff]  ;;  %v9751_v47 = vld [vmem:[#allocation6_spill] sm:$0xff]  ;;  %v5686_v45 = vld [vmem:[%s9711_s3 + $0x150] sm:$0xff] }
 0x3f2   :  { %6389 = vmatpush3.bf16.msra.mxu1 %v6388_v62  ;;  %6045 = vmatprep.mubr.msk.f32.mxu1 %vm7231_vm0, %v7232_v20  ;;  %v6421_v62 = vpack.c.bf16 %v5683_v23, %v5682_v15  ;;  %v5684_v14 = vld [vmem:[%s9711_s3 + $0x140] sm:$0xff]  ;;  %v5685_v17 = vld [vmem:[%s9711_s3 + $0x148] sm:$0xff]  ;;  %v6427_v44 = vpack.c.bf16 %v5687_v43, %v5686_v45  ;;  %v5719_v15 = vld [vmem:[%s9711_s3 + $0x258] sm:$0xff] }
 0x3f3   :  { %v9102_v19 = vadd.f32 %v9049_v5, %v4221_v34  ;;  %v4222_v2 = vmax.f32 %v4204_v48, %v4213_v42  ;;  %6390 = vmatprep.subr.bf16.mxu1 %v9750_v52  ;;  %v6394_v42 = vpack.c.bf16 %v4258_v33, %v4257_v24  ;;  %v6424_v29 = vpack.c.bf16 %v5685_v17, %v5684_v14  ;;  %v5689_v34 = vld [vmem:[%s9711_s3 + $0x168] sm:$0xff]  ;;  %v5692_v33 = vld [vmem:[%s9711_s3 + $0x180] sm:$0xff]  ;;  %v5723_v45 = vld [vmem:[%s9711_s3 + $0x278] sm:$0xff] }
 0x3f4   :  { %v4074_v4 = vpop.f32.mrb[8].mxu0  ;;  %v6430_v48 = vpack.c.bf16 %v5689_v34, %v5688_v63  ;;  %v5721_v14 = vld [vmem:[%s9711_s3 + $0x268] sm:$0xff] }
 0x3f5   :  { %v9112_v1 = vadd.f32 %v9049_v5, %v4222_v2  ;;  %v6663_v56 = vadd.f32 %v4074_v4, %v9751_v47  ;;  %v4076_v55 = vpop.f32.mrb[9].mxu0  ;;  %v5691_v2 = vld [vmem:[%s9711_s3 + $0x178] sm:$0xff]  ;;  %v5693_v4 = vld [vmem:[%s9711_s3 + $0x188] sm:$0xff] }
 0x3f6   :  { %6392 = vmatpush3.bf16.msra.mxu1 %v6391_v22  ;;  %v4077_v57 = vpop.f32.mrb[10].mxu0  ;;  %v5690_v22 = vld [vmem:[%s9711_s3 + $0x170] sm:$0xff]  ;;  %v6436_v47 = vpack.c.bf16 %v5693_v4, %v5692_v33  ;;  %v5725_v63 = vld [vmem:[%s9711_s3 + $0x288] sm:$0xff] }
 0x3f7   :  { %v4205_v26 = vmax.f32 %v6663_v56, %v8960_v38  ;;  %v6664_v53 = vadd.f32 %v4077_v57, %v9752_v50  ;;  %v4079_v16 = vpop.f32.mrb[11].mxu0  ;;  %6393 = vmatprep.subr.bf16.mxu1 %v9750_v52  ;;  %v6397_v38 = vpack.c.bf16 %v4260_v58, %v4259_v27  ;;  %v6433_v24 = vpack.c.bf16 %v5691_v2, %v5690_v22  ;;  %v5694_v55 = vld [vmem:[%s9711_s3 + $0x190] sm:$0xff]  ;;  %v5695_v57 = vld [vmem:[%s9711_s3 + $0x198] sm:$0xff]  ;;  %v5700_v58 = vld [vmem:[%s9711_s3 + $0x1c0] sm:$0xff] }
 0x3f8   :  { %v4246_v56 = vmax.f32 %v9102_v19, 0.0  ;;  %v5696_v19 = vld [vmem:[%s9711_s3 + $0x1a0] sm:$0xff]  ;;  %v5699_v16 = vld [vmem:[%s9711_s3 + $0x1b8] sm:$0xff]  ;;  %v4247_v32 = vmax.f32 %v9112_v1, 0.0  ;;  %v5726_v22 = vld [vmem:[%s9711_s3 + $0x290] sm:$0xff] }
 0x3f9   :  { %v4223_v59 = vmax.f32 %v4205_v26, %v4214_v49  ;;  %v4206_v6 = vmax.f32 %v6664_v53, %v8965_v54  ;;  %v4264_v49 = vld [vmem:[%s9711_s3 + $0x58] sm:$0xff]  ;;  %v5697_v26 = vld [vmem:[%s9711_s3 + $0x1a8] sm:$0xff]  ;;  %v5698_v53 = vld [vmem:[%s9711_s3 + $0x1b0] sm:$0xff] }
 0x3fa   :  { %6395 = vmatpush3.bf16.msra.mxu1 %v6394_v42  ;;  %v6403_v40 = vpack.c.bf16 %v4264_v49, %v4263_v37  ;;  %v6439_v42 = vpack.c.bf16 %v5695_v57, %v5694_v55  ;;  %v6442_v50 = vpack.c.bf16 %v5697_v26, %v5696_v19  ;;  %v6445_v27 = vpack.c.bf16 %v5699_v16, %v5698_v53  ;;  %v5706_v49 = vld [vmem:[%s9711_s3 + $0x1f0] sm:$0xff]  ;;  %v5712_v1 = vld [vmem:[%s9711_s3 + $0x220] sm:$0xff]  ;;  %v5727_v2 = vld [vmem:[%s9711_s3 + $0x298] sm:$0xff] }
 0x3fb   :  { %v9129_v25 = vadd.f32 %v9049_v5, %v4223_v59  ;;  %v4224_v28 = vmax.f32 %v4206_v6, %v4215_v10  ;;  %6396 = vmatprep.subr.bf16.mxu1 %v9750_v52  ;;  %v4265_v10 = vld [vmem:[%s9711_s3 + $0x60] sm:$0xff]  ;;  %v5701_v59 = vld [vmem:[%s9711_s3 + $0x1c8] sm:$0xff]  ;;  %v5734_v26 = vld [vmem:[%s9711_s3 + $0x2d0] sm:$0xff] }
 0x3fc   :  { %v6406_v21 = vpack.c.bf16 %v4266_v41, %v4265_v10  ;;  %v6448_v6 = vpack.c.bf16 %v5701_v59, %v5700_v58  ;;  %v5708_v41 = vld [vmem:[%s9711_s3 + $0x200] sm:$0xff]  ;;  %v5729_v33 = vld [vmem:[%s9711_s3 + $0x2a8] sm:$0xff]  ;;  %v5738_v59 = vld [vmem:[%s9711_s3 + $0x2f0] sm:$0xff] }
 0x3fd   :  { %v9142_v54 = vadd.f32 %v9049_v5, %v4224_v28  ;;  %v5679_v5 = vld [vmem:[%s9711_s3 + $0x118] sm:$0xff]  ;;  %v5732_v57 = vld [vmem:[%s9711_s3 + $0x2c0] sm:$0xff] }
 0x3fe   :  { %6398 = vmatpush3.bf16.msra.mxu1 %v6397_v38  ;;  %v6415_v13 = vpack.c.bf16 %v5679_v5, %v5678_v3  ;;  %v5702_v38 = vld [vmem:[%s9711_s3 + $0x1d0] sm:$0xff]  ;;  %v5703_v28 = vld [vmem:[%s9711_s3 + $0x1d8] sm:$0xff]  ;;  %v5736_v16 = vld [vmem:[%s9711_s3 + $0x2e0] sm:$0xff] }
 0x3ff   :  { %6399 = vmatprep.subr.bf16.mxu1 %v9750_v52  ;;  %v6451_v11 = vpack.c.bf16 %v5703_v28, %v5702_v38  ;;  %v5715_v3 = vld [vmem:[%s9711_s3 + $0x238] sm:$0xff]  ;;  %v5740_v28 = vld [vmem:[%s9711_s3 + $0x300] sm:$0xff] }
 0x402   :  { %6401 = vmatpush3.bf16.msra.mxu1 %v6400_v36  ;;  %v5705_v36 = vld [vmem:[%s9711_s3 + $0x1e8] sm:$0xff] }
 0x403   :  { %6402 = vmatprep.subr.bf16.mxu1 %v9750_v52  ;;  %v6454_v37 = vpack.c.bf16 %v5705_v36, %v5704_v30  ;;  %v4249_v36 = vmax.f32 %v9142_v54, 0.0  ;;  %v5744_v54 = vld [vmem:[%s9711_s3 + $0x320] sm:$0xff] }
 0x406   :  { %6404 = vmatpush3.bf16.msra.mxu1 %v6403_v40  ;;  %v5707_v40 = vld [vmem:[%s9711_s3 + $0x1f8] sm:$0xff] }
 0x407   :  { %6405 = vmatprep.subr.bf16.mxu1 %v9750_v52  ;;  %v6457_v10 = vpack.c.bf16 %v5707_v40, %v5706_v49  ;;  %v5743_v49 = vld [vmem:[%s9711_s3 + $0x318] sm:$0xff] }
 0x40a   :  { %6407 = vmatpush3.bf16.msra.mxu1 %v6406_v21  ;;  %v5709_v21 = vld [vmem:[%s9711_s3 + $0x208] sm:$0xff] }
 0x40b   :  { %6408 = vmatprep.subr.bf16.mxu1 %v9750_v52  ;;  %v6460_v18 = vpack.c.bf16 %v5709_v21, %v5708_v41  ;;  %v5746_v21 = vld [vmem:[%s9711_s3 + $0x330] sm:$0xff] }
 0x40e   :  { %6410 = vmatpush3.bf16.msra.mxu1 %v6409_v60  ;;  %v5710_v60 = vld [vmem:[%s9711_s3 + $0x210] sm:$0xff] }
 0x40f   :  { %6411 = vmatprep.subr.bf16.mxu1 %v9750_v52  ;;  %v6463_v12 = vpack.c.bf16 %v5711_v7, %v5710_v60  ;;  %v5748_v60 = vld [vmem:[%s9711_s3 + $0x340] sm:$0xff]  ;;  %v5749_v7 = vld [vmem:[%s9711_s3 + $0x348] sm:$0xff] }
 0x411   :  { %6046 = vmatmul.mubr.f32.vlgmr.msra.gmra.mrb[134].mxu1 %v4244_v39  ;;  %v5714_v39 = vld [vmem:[%s9711_s3 + $0x230] sm:$0xff] }
 0x412   :  { %6413 = vmatpush3.bf16.msra.mxu1 %v6412_v8  ;;  %6080 = vmatprep.mubr.msk.f32.mxu1 %vm7231_vm0, %v7232_v20  ;;  %v6466_v8 = vpack.c.bf16 %v5713_v0, %v5712_v1  ;;  %v6469_v5 = vpack.c.bf16 %v5715_v3, %v5714_v39  ;;  %v5750_v1 = vld [vmem:[%s9711_s3 + $0x350] sm:$0xff]  ;;  %v5751_v0 = vld [vmem:[%s9711_s3 + $0x358] sm:$0xff]  ;;  %v5752_v39 = vld [vmem:[%s9711_s3 + $0x360] sm:$0xff] }
 0x413   :  { %6414 = vmatprep.subr.bf16.mxu1 %v9750_v52  ;;  %v5753_v3 = vld [vmem:[%s9711_s3 + $0x368] sm:$0xff] }
 0x416   :  { %6416 = vmatpush3.bf16.msra.mxu1 %v6415_v13  ;;  %v5716_v13 = vld [vmem:[%s9711_s3 + $0x240] sm:$0xff] }
 0x417   :  { %6417 = vmatprep.subr.bf16.mxu1 %v9750_v52  ;;  %v6472_v46 = vpack.c.bf16 %v5717_v9, %v5716_v13  ;;  %v5754_v13 = vld [vmem:[%s9711_s3 + $0x370] sm:$0xff]  ;;  %v5755_v9 = vld [vmem:[%s9711_s3 + $0x378] sm:$0xff] }
 0x41a   :  { %6419 = vmatpush3.bf16.msra.mxu1 %v6418_v51  ;;  %v5718_v51 = vld [vmem:[%s9711_s3 + $0x250] sm:$0xff] }
 0x41b   :  { %6420 = vmatprep.subr.bf16.mxu1 %v9750_v52  ;;  %v6475_v23 = vpack.c.bf16 %v5719_v15, %v5718_v51  ;;  %v5756_v51 = vld [vmem:[%s9711_s3 + $0x380] sm:$0xff]  ;;  %v5757_v15 = vld [vmem:[%s9711_s3 + $0x388] sm:$0xff] }
 0x41e   :  { %6422 = vmatpush3.bf16.msra.mxu1 %v6421_v62  ;;  %v5720_v62 = vld [vmem:[%s9711_s3 + $0x260] sm:$0xff] }
 0x41f   :  { %6423 = vmatprep.subr.bf16.mxu1 %v9750_v52  ;;  %v6478_v17 = vpack.c.bf16 %v5721_v14, %v5720_v62  ;;  %v4250_v62 = vmax.f32 %v9056_v31, 0.0  ;;  %v5758_v14 = vld [vmem:[%s9711_s3 + $0x390] sm:$0xff]  ;;  %v5760_v31 = vld [vmem:[%s9711_s3 + $0x3a0] sm:$0xff] }
 0x422   :  { %6425 = vmatpush3.bf16.msra.mxu1 %v6424_v29  ;;  %v5722_v29 = vld [vmem:[%s9711_s3 + $0x270] sm:$0xff] }
 0x423   :  { %6426 = vmatprep.subr.bf16.mxu1 %v9750_v52  ;;  %v6481_v43 = vpack.c.bf16 %v5723_v45, %v5722_v29  ;;  %v5761_v45 = vld [vmem:[%s9711_s3 + $0x3a8] sm:$0xff] }
 0x426   :  { %6428 = vmatpush3.bf16.msra.mxu1 %v6427_v44  ;;  %v5724_v44 = vld [vmem:[%s9711_s3 + $0x280] sm:$0xff] }
 0x427   :  { %6429 = vmatprep.subr.bf16.mxu1 %v9750_v52  ;;  %v6484_v34 = vpack.c.bf16 %v5725_v63, %v5724_v44  ;;  %v5762_v44 = vld [vmem:[%s9711_s3 + $0x3b0] sm:$0xff]  ;;  %v5763_v63 = vld [vmem:[%s9711_s3 + $0x3b8] sm:$0xff] }
 0x42a   :  { %6431 = vmatpush3.bf16.msra.mxu1 %v6430_v48  ;;  %v4248_v48 = vmax.f32 %v9129_v25, 0.0  ;;  %v5728_v25 = vld [vmem:[%s9711_s3 + $0x2a0] sm:$0xff] }
 0x42b   :  { %6432 = vmatprep.subr.bf16.mxu1 %v9750_v52  ;;  %v6490_v4 = vpack.c.bf16 %v5729_v33, %v5728_v25  ;;  %v5767_v25 = vld [vmem:[%s9711_s3 + $0x3d8] sm:$0xff] }
 0x42e   :  { %6434 = vmatpush3.bf16.msra.mxu1 %v6433_v24  ;;  %v6487_v24 = vpack.c.bf16 %v5727_v2, %v5726_v22  ;;  %v5765_v22 = vld [vmem:[%s9711_s3 + $0x3c8] sm:$0xff] }
 0x42f   :  { %6435 = vmatprep.subr.bf16.mxu1 %v9750_v52 }
 0x431   :  { %6081 = vmatmul.mubr.f32.vlgmr.msra.gmra.mrb[136].mxu1 %v4246_v56  ;;  %v5731_v56 = vld [vmem:[%s9711_s3 + $0x2b8] sm:$0xff] }
 0x432   :  { %6437 = vmatpush3.bf16.msra.mxu1 %v6436_v47  ;;  %6115 = vmatprep.mubr.msk.f32.mxu1 %vm7231_vm0, %v7232_v20  ;;  %v5730_v47 = vld [vmem:[%s9711_s3 + $0x2b0] sm:$0xff] }
 0x433   :  { %6438 = vmatprep.subr.bf16.mxu1 %v9750_v52  ;;  %v6493_v55 = vpack.c.bf16 %v5731_v56, %v5730_v47  ;;  %v5769_v47 = vld [vmem:[%s9711_s3 + $0x3e8] sm:$0xff] }
 0x436   :  { %6440 = vmatpush3.bf16.msra.mxu1 %v6439_v42  ;;  %v5733_v42 = vld [vmem:[%s9711_s3 + $0x2c8] sm:$0xff] }
 0x437   :  { %6441 = vmatprep.subr.bf16.mxu1 %v9750_v52  ;;  %v6496_v19 = vpack.c.bf16 %v5733_v42, %v5732_v57  ;;  %v5770_v42 = vld [vmem:[%s9711_s3 + $0x3f0] sm:$0xff] }
 0x43a   :  { %6443 = vmatpush3.bf16.msra.mxu1 %v6442_v50  ;;  %v5735_v50 = vld [vmem:[%s9711_s3 + $0x2d8] sm:$0xff] }
 0x43b   :  { %6444 = vmatprep.subr.bf16.mxu1 %v9750_v52  ;;  %v6499_v53 = vpack.c.bf16 %v5735_v50, %v5734_v26  ;;  %v5772_v50 = vld [vmem:[%s9711_s3 + $0x400] sm:$0xff] }
 0x43e   :  { %6446 = vmatpush3.bf16.msra.mxu1 %v6445_v27  ;;  %v5737_v27 = vld [vmem:[%s9711_s3 + $0x2e8] sm:$0xff] }
 0x43f   :  { %6447 = vmatprep.subr.bf16.mxu1 %v9750_v52  ;;  %v6502_v58 = vpack.c.bf16 %v5737_v27, %v5736_v16  ;;  %v4251_v27 = vmax.f32 %v9065_v61, 0.0  ;;  %v5776_v61 = vld [vmem:[%s9711_s3 + $0x420] sm:$0xff] }
 0x442   :  { %6449 = vmatpush3.bf16.msra.mxu1 %v6448_v6  ;;  %v5739_v6 = vld [vmem:[%s9711_s3 + $0x2f8] sm:$0xff] }
 0x443   :  { %6450 = vmatprep.subr.bf16.mxu1 %v9750_v52  ;;  %v6505_v38 = vpack.c.bf16 %v5739_v6, %v5738_v59  ;;  %v5775_v59 = vld [vmem:[%s9711_s3 + $0x418] sm:$0xff] }
 0x446   :  { %6452 = vmatpush3.bf16.msra.mxu1 %v6451_v11  ;;  %v5741_v11 = vld [vmem:[%s9711_s3 + $0x308] sm:$0xff] }
 0x447   :  { %6453 = vmatprep.subr.bf16.mxu1 %v9750_v52  ;;  %v6508_v30 = vpack.c.bf16 %v5741_v11, %v5740_v28  ;;  %v5778_v11 = vld [vmem:[%s9711_s3 + $0x430] sm:$0xff] }
 0x44a   :  { %6455 = vmatpush3.bf16.msra.mxu1 %v6454_v37  ;;  %v5742_v37 = vld [vmem:[%s9711_s3 + $0x310] sm:$0xff] }
 0x44b   :  { %6456 = vmatprep.subr.bf16.mxu1 %v9750_v52  ;;  %v6511_v40 = vpack.c.bf16 %v5743_v49, %v5742_v37  ;;  %v5780_v37 = vld [vmem:[%s9711_s3 + $0x440] sm:$0xff]  ;;  %v5781_v49 = vld [vmem:[%s9711_s3 + $0x448] sm:$0xff] }
 0x44e   :  { %6458 = vmatpush3.bf16.msra.mxu1 %v6457_v10  ;;  %v5745_v10 = vld [vmem:[%s9711_s3 + $0x328] sm:$0xff] }
 0x44f   :  { %6459 = vmatprep.subr.bf16.mxu1 %v9750_v52  ;;  %v6514_v41 = vpack.c.bf16 %v5745_v10, %v5744_v54  ;;  %v5782_v54 = vld [vmem:[%s9711_s3 + $0x450] sm:$0xff]  ;;  %v5783_v10 = vld [vmem:[%s9711_s3 + $0x458] sm:$0xff] }
 0x451   :  { %6116 = vmatmul.mubr.f32.vlgmr.msra.gmra.mrb[138].mxu1 %v4247_v32 }
 0x452   :  { %6461 = vmatpush3.bf16.msra.mxu1 %v6460_v18  ;;  %6150 = vmatprep.mubr.msk.f32.mxu1 %vm7231_vm0, %v7232_v20  ;;  %v5747_v18 = vld [vmem:[%s9711_s3 + $0x338] sm:$0xff] }
 0x453   :  { %6462 = vmatprep.subr.bf16.mxu1 %v9750_v52  ;;  %v6517_v32 = vpack.c.bf16 %v5747_v18, %v5746_v21  ;;  %v5784_v21 = vld [vmem:[%s9711_s3 + $0x460] sm:$0xff]  ;;  %v5785_v18 = vld [vmem:[%s9711_s3 + $0x468] sm:$0xff] }
 0x456   :  { %6464 = vmatpush3.bf16.msra.mxu1 %v6463_v12  ;;  %v6520_v12 = vpack.c.bf16 %v5749_v7, %v5748_v60 }
 0x457   :  { %6465 = vmatprep.subr.bf16.mxu1 %v9750_v52 }
 0x45a   :  { %6467 = vmatpush3.bf16.msra.mxu1 %v6466_v8  ;;  %v6523_v8 = vpack.c.bf16 %v5751_v0, %v5750_v1  ;;  %v5786_v1 = vld [vmem:[%s9711_s3 + $0x470] sm:$0xff]  ;;  %v5787_v0 = vld [vmem:[%s9711_s3 + $0x478] sm:$0xff] }
 0x45b   :  { %6468 = vmatprep.subr.bf16.mxu1 %v9750_v52 }
 0x45e   :  { %6470 = vmatpush3.bf16.msra.mxu1 %v6469_v5  ;;  %v6526_v5 = vpack.c.bf16 %v5753_v3, %v5752_v39  ;;  %v4252_v39 = vmax.f32 %v9072_v35, 0.0  ;;  %v5052_v35 = vld [vmem:[%s9713_s5 + $0x8] sm:$0xff] }
 0x45f   :  { %6471 = vmatprep.subr.bf16.mxu1 %v9750_v52 }
 0x462   :  { %6473 = vmatpush3.bf16.msra.mxu1 %v6472_v46  ;;  %v6529_v46 = vpack.c.bf16 %v5755_v9, %v5754_v13 }
 0x463   :  { %6474 = vmatprep.subr.bf16.mxu1 %v9750_v52 }
 0x466   :  { %6476 = vmatpush3.bf16.msra.mxu1 %v6475_v23  ;;  %v6532_v23 = vpack.c.bf16 %v5757_v15, %v5756_v51  ;;  %v5051_v15 = vld [vmem:[%s9713_s5] sm:$0xff] }
 0x467   :  { %6477 = vmatprep.subr.bf16.mxu1 %v9750_v52 }
 0x46a   :  { %6479 = vmatpush3.bf16.msra.mxu1 %v6478_v17  ;;  %v5759_v17 = vld [vmem:[%s9711_s3 + $0x398] sm:$0xff] }
 0x46b   :  { %6480 = vmatprep.subr.bf16.mxu1 %v9750_v52  ;;  %v6535_v29 = vpack.c.bf16 %v5759_v17, %v5758_v14  ;;  %v5054_v14 = vld [vmem:[%s9713_s5 + $0x18] sm:$0xff] }
 0x46e   :  { %6482 = vmatpush3.bf16.msra.mxu1 %v6481_v43  ;;  %v6538_v43 = vpack.c.bf16 %v5761_v45, %v5760_v31  ;;  %v5056_v31 = vld [vmem:[%s9713_s5 + $0x28] sm:$0xff] }
 0x46f   :  { %6483 = vmatprep.subr.bf16.mxu1 %v9750_v52 }
 0x471   :  { %6151 = vmatmul.mubr.f32.vlgmr.msra.gmra.mrb[140].mxu1 %v4248_v48  ;;  %v5764_v48 = vld [vmem:[%s9711_s3 + $0x3c0] sm:$0xff] }
 0x472   :  { %6485 = vmatpush3.bf16.msra.mxu1 %v6484_v34  ;;  %6185 = vmatprep.mubr.msk.f32.mxu1 %vm7231_vm0, %v7232_v20  ;;  %v6541_v34 = vpack.c.bf16 %v5763_v63, %v5762_v44  ;;  %v6544_v2 = vpack.c.bf16 %v5765_v22, %v5764_v48  ;;  %v5058_v44 = vld [vmem:[%s9713_s5 + $0x38] sm:$0xff]  ;;  %v5060_v48 = vld [vmem:[%s9713_s5 + $0x48] sm:$0xff] }
 0x473   :  { %6486 = vmatprep.subr.bf16.mxu1 %v9750_v52 }
 0x476   :  { %6488 = vmatpush3.bf16.msra.mxu1 %v6487_v24  ;;  %v5766_v24 = vld [vmem:[%s9711_s3 + $0x3d0] sm:$0xff] }
 0x477   :  { %6489 = vmatprep.subr.bf16.mxu1 %v9750_v52  ;;  %v6547_v33 = vpack.c.bf16 %v5767_v25, %v5766_v24  ;;  %v5062_v24 = vld [vmem:[%s9713_s5 + $0x58] sm:$0xff] }
 0x47a   :  { %6491 = vmatpush3.bf16.msra.mxu1 %v6490_v4  ;;  %v5768_v4 = vld [vmem:[%s9711_s3 + $0x3e0] sm:$0xff] }
 0x47b   :  { %6492 = vmatprep.subr.bf16.mxu1 %v9750_v52  ;;  %v6550_v57 = vpack.c.bf16 %v5769_v47, %v5768_v4  ;;  %v5064_v4 = vld [vmem:[%s9713_s5 + $0x68] sm:$0xff] }
 0x47e   :  { %6494 = vmatpush3.bf16.msra.mxu1 %v6493_v55 }
 0x47f   :  { %6495 = vmatprep.subr.bf16.mxu1 %v9750_v52 }
 0x482   :  { %6497 = vmatpush3.bf16.msra.mxu1 %v6496_v19  ;;  %v5771_v19 = vld [vmem:[%s9711_s3 + $0x3f8] sm:$0xff] }
 0x483   :  { %6498 = vmatprep.subr.bf16.mxu1 %v9750_v52  ;;  %v6553_v26 = vpack.c.bf16 %v5771_v19, %v5770_v42  ;;  %v5065_v42 = vld [vmem:[%s9713_s5 + $0x70] sm:$0xff]  ;;  %v5066_v19 = vld [vmem:[%s9713_s5 + $0x78] sm:$0xff] }
 0x486   :  { %6500 = vmatpush3.bf16.msra.mxu1 %v6499_v53  ;;  %v5773_v53 = vld [vmem:[%s9711_s3 + $0x408] sm:$0xff] }
 0x487   :  { %6501 = vmatprep.subr.bf16.mxu1 %v9750_v52  ;;  %v6556_v16 = vpack.c.bf16 %v5773_v53, %v5772_v50 }
 0x48a   :  { %6503 = vmatpush3.bf16.msra.mxu1 %v6502_v58  ;;  %v5774_v58 = vld [vmem:[%s9711_s3 + $0x410] sm:$0xff] }
 0x48b   :  { %6504 = vmatprep.subr.bf16.mxu1 %v9750_v52  ;;  %v6559_v6 = vpack.c.bf16 %v5775_v59, %v5774_v58 }
 0x48e   :  { %6506 = vmatpush3.bf16.msra.mxu1 %v6505_v38  ;;  %v5777_v38 = vld [vmem:[%s9711_s3 + $0x428] sm:$0xff] }
 0x48f   :  { %6507 = vmatprep.subr.bf16.mxu1 %v9750_v52  ;;  %v6562_v28 = vpack.c.bf16 %v5777_v38, %v5776_v61 }
 0x491   :  { %6186 = vmatmul.mubr.f32.vlgmr.msra.gmra.mrb[142].mxu1 %v4249_v36 }
 0x492   :  { %6509 = vmatpush3.bf16.msra.mxu1 %v6508_v30  ;;  %6220 = vmatprep.mubr.msk.f32.mxu1 %vm7231_vm0, %v7232_v20  ;;  %v5779_v30 = vld [vmem:[%s9711_s3 + $0x438] sm:$0xff] }
 0x493   :  { %6510 = vmatprep.subr.bf16.mxu1 %v9750_v52  ;;  %v6565_v36 = vpack.c.bf16 %v5779_v30, %v5778_v11  ;;  %v5788_v11 = vld [vmem:[%s9714_s4] ss:$0 sm:$0xff] }
 0x496   :  { %6512 = vmatpush3.bf16.msra.mxu1 %v6511_v40  ;;  %v6568_v40 = vpack.c.bf16 %v5781_v49, %v5780_v37  ;;  %v5145_v37 = vld [vmem:[%s9715_s7] sm:$0xff]  ;;  %v5146_v49 = vld [vmem:[%s9715_s7 + $0x8] sm:$0xff] }
 0x497   :  { %6513 = vmatprep.subr.bf16.mxu1 %v9750_v52 }
 0x49a   :  { %6515 = vmatpush3.bf16.msra.mxu1 %v6514_v41  ;;  %v6571_v41 = vpack.c.bf16 %v5783_v10, %v5782_v54  ;;  %v6604_v54 = vpack.c.bf16 %v5146_v49, %v5145_v37 }
 0x49b   :  { %6516 = vmatprep.subr.bf16.mxu1 %v9750_v52 }
 0x49e   :  { %6518 = vmatpush3.bf16.msra.mxu1 %v6517_v32 }
 0x49f   :  { %6519 = vmatprep.subr.bf16.mxu1 %v9750_v52 }
 0x4a2   :  { %6521 = vmatpush3.bf16.msra.mxu1 %v6520_v12  ;;  %v6574_v12 = vpack.c.bf16 %v5785_v18, %v5784_v21  ;;  %v5148_v21 = vld [vmem:[%s9715_s7 + $0x18] sm:$0xff] }
 0x4a3   :  { %6522 = vmatprep.subr.bf16.mxu1 %v9750_v52 }
 0x4a6   :  { %6524 = vmatpush3.bf16.msra.mxu1 %v6523_v8  ;;  %v6577_v8 = vpack.c.bf16 %v5787_v0, %v5786_v1  ;;  %v5153_v0 = vld [vmem:[%s9715_s7 + $0x40] sm:$0xff] }
 0x4a7   :  { %6525 = vmatprep.subr.bf16.mxu1 %v9750_v52 }
 0x4aa   :  { %6527 = vmatpush3.bf16.msra.mxu1 %v6526_v5 }
 0x4ab   :  { %6528 = vmatprep.subr.bf16.mxu1 %v9750_v52 }
 0x4ae   :  { %6530 = vmatpush3.bf16.msra.mxu1 %v6529_v46 }
 0x4af   :  { %6531 = vmatprep.subr.bf16.mxu1 %v9750_v52 }
 0x4b1   :  { %6221 = vmatmul.mubr.f32.vlgmr.msra.gmra.mrb[144].mxu1 %v4250_v62  ;;  %v6580_v62 = vpack.c.bf16 %v5052_v35, %v5051_v15  ;;  %v5159_v15 = vld [vmem:[%s9715_s7 + $0x70] sm:$0xff]  ;;  %v5160_v35 = vld [vmem:[%s9715_s7 + $0x78] sm:$0xff] }
 0x4b2   :  { %6533 = vmatpush3.bf16.msra.mxu1 %v6532_v23  ;;  %6255 = vmatprep.mubr.msk.f32.mxu1 %vm7231_vm0, %v7232_v20  ;;  %v5053_v23 = vld [vmem:[%s9713_s5 + $0x10] sm:$0xff] }
 0x4b3   :  { %6534 = vmatprep.subr.bf16.mxu1 %v9750_v52  ;;  %v6583_v17 = vpack.c.bf16 %v5054_v14, %v5053_v23  ;;  %v6625_v23 = vpack.c.bf16 %v5160_v35, %v5159_v15 }
 0x4b6   :  { %6536 = vmatpush3.bf16.msra.mxu1 %v6535_v29  ;;  %v5055_v29 = vld [vmem:[%s9713_s5 + $0x20] sm:$0xff] }
 0x4b7   :  { %6537 = vmatprep.subr.bf16.mxu1 %v9750_v52  ;;  %v6586_v45 = vpack.c.bf16 %v5056_v31, %v5055_v29 }
 0x4ba   :  { %6539 = vmatpush3.bf16.msra.mxu1 %v6538_v43  ;;  %v5057_v43 = vld [vmem:[%s9713_s5 + $0x30] sm:$0xff] }
 0x4bb   :  { %6540 = vmatprep.subr.bf16.mxu1 %v9750_v52  ;;  %v6589_v63 = vpack.c.bf16 %v5058_v44, %v5057_v43 }
 0x4be   :  { %6542 = vmatpush3.bf16.msra.mxu1 %v6541_v34  ;;  %v5059_v34 = vld [vmem:[%s9713_s5 + $0x40] sm:$0xff] }
 0x4bf   :  { %6543 = vmatprep.subr.bf16.mxu1 %v9750_v52  ;;  %v6592_v22 = vpack.c.bf16 %v5060_v48, %v5059_v34 }
 0x4c2   :  { %6545 = vmatpush3.bf16.msra.mxu1 %v6544_v2  ;;  %v5061_v2 = vld [vmem:[%s9713_s5 + $0x50] sm:$0xff] }
 0x4c3   :  { %6546 = vmatprep.subr.bf16.mxu1 %v9750_v52  ;;  %v6595_v25 = vpack.c.bf16 %v5062_v24, %v5061_v2 }
 0x4c4   :  { %v4352_v56 = vpop.f32.mrb[132].mxu1 }
 0x4c5   :  { %v6012_v55 = vpop.f32.mrb[133].mxu1 }
 0x4c6   :  { %6548 = vmatpush3.bf16.msra.mxu1 %v6547_v33  ;;  %v5063_v33 = vld [vmem:[%s9713_s5 + $0x60] sm:$0xff] }
 0x4c7   :  { %6549 = vmatprep.subr.bf16.mxu1 %v9750_v52  ;;  %v6598_v47 = vpack.c.bf16 %v5064_v4, %v5063_v33 }
 0x4ca   :  { %6551 = vmatpush3.bf16.msra.mxu1 %v6550_v57 }
 0x4cb   :  { %6552 = vmatprep.subr.bf16.mxu1 %v9750_v52 }
 0x4ce   :  { %6554 = vmatpush3.bf16.msra.mxu1 %v6553_v26  ;;  %v6601_v26 = vpack.c.bf16 %v5066_v19, %v5065_v42 }
 0x4cf   :  { %6555 = vmatprep.subr.bf16.mxu1 %v9750_v52 }
 0x4d1   :  { %6256 = vmatmul.mubr.f32.vlgmr.msra.gmra.mrb[146].mxu1 %v4251_v27 }
 0x4d2   :  { %6557 = vmatpush3.bf16.msra.mxu1 %v6556_v16  ;;  %6290 = vmatprep.mubr.msk.f32.mxu1 %vm7231_vm0, %v7232_v20 }
 0x4d3   :  { %6558 = vmatprep.subr.bf16.mxu1 %v9750_v52 }
 0x4d6   :  { %6560 = vmatpush3.bf16.msra.mxu1 %v6559_v6 }
 0x4d7   :  { %6561 = vmatprep.subr.bf16.mxu1 %v9750_v52 }
 0x4da   :  { %6563 = vmatpush3.bf16.msra.mxu1 %v6562_v28 }
 0x4db   :  { %6564 = vmatprep.subr.bf16.mxu1 %v9750_v52 }
 0x4de   :  { %6566 = vmatpush3.bf16.msra.mxu1 %v6565_v36 }
 0x4df   :  { %6567 = vmatprep.subr.bf16.mxu1 %v9750_v52 }
 0x4e2   :  { %6569 = vmatpush3.bf16.msra.mxu1 %v6568_v40 }
 0x4e3   :  { %6570 = vmatprep.subr.bf16.mxu1 %v9750_v52 }
 0x4e4   :  { %v4422_v32 = vpop.f32.mrb[134].mxu1 }
 0x4e5   :  { %v4423_v60 = vadd.f32 %v4422_v32, %v4352_v56  ;;  %v6047_v7 = vpop.f32.mrb[135].mxu1  ;;  %v5149_v32 = vld [vmem:[%s9715_s7 + $0x20] sm:$0xff] }
 0x4e6   :  { %6572 = vmatpush3.bf16.msra.mxu1 %v6571_v41  ;;  %v5147_v41 = vld [vmem:[%s9715_s7 + $0x10] sm:$0xff] }
 0x4e7   :  { %6573 = vmatprep.subr.bf16.mxu1 %v9750_v52  ;;  %v6607_v18 = vpack.c.bf16 %v5148_v21, %v5147_v41 }
 0x4ea   :  { %6575 = vmatpush3.bf16.msra.mxu1 %v6574_v12  ;;  %v5151_v12 = vld [vmem:[%s9715_s7 + $0x30] sm:$0xff] }
 0x4eb   :  { %6576 = vmatprep.subr.bf16.mxu1 %v9750_v52 }
 0x4ee   :  { %6578 = vmatpush3.bf16.msra.mxu1 %v6577_v8  ;;  %v5154_v8 = vld [vmem:[%s9715_s7 + $0x48] sm:$0xff] }
 0x4ef   :  { %6579 = vmatprep.subr.bf16.mxu1 %v9750_v52 }
 0x4f1   :  { %6291 = vmatmul.mubr.f32.vlgmr.msra.gmra.mrb[148].mxu1 %v4252_v39  ;;  %v6616_v39 = vpack.c.bf16 %v5154_v8, %v5153_v0 }
 0x4f2   :  { %6325 = vmatprep.mubr.msk.f32.mxu1 %vm7231_vm0, %v7232_v20  ;;  %6581 = vmatpush3.bf16.msra.mxu1 %v6580_v62  ;;  %v5789_v62 = vld [vmem:[%s9716_s6] ss:$0 sm:$0xff] }
 0x4f3   :  { %6582 = vmatprep.subr.bf16.mxu1 %v9750_v52 }
 0x4f6   :  { %6584 = vmatpush3.bf16.msra.mxu1 %v6583_v17 }
 0x4f7   :  { %6585 = vmatprep.subr.bf16.mxu1 %v9750_v52 }
 0x4fa   :  { %6587 = vmatpush3.bf16.msra.mxu1 %v6586_v45 }
 0x4fb   :  { %6588 = vmatprep.subr.bf16.mxu1 %v9750_v52 }
 0x4fe   :  { %6590 = vmatpush3.bf16.msra.mxu1 %v6589_v63 }
 0x4ff   :  { %6591 = vmatprep.subr.bf16.mxu1 %v9750_v52 }
 0x502   :  { %6593 = vmatpush3.bf16.msra.mxu1 %v6592_v22 }
 0x503   :  { %6594 = vmatprep.subr.bf16.mxu1 %v9750_v52 }
 0x504   :  { %v4509_v3 = vpop.f32.mrb[136].mxu1 }
 0x505   :  { %v4513_v5 = vadd.f32 %v4509_v3, %v4423_v60  ;;  %v6082_v13 = vpop.f32.mrb[137].mxu1  ;;  %v5150_v60 = vld [vmem:[%s9715_s7 + $0x28] sm:$0xff]  ;;  %v5155_v3 = vld [vmem:[%s9715_s7 + $0x50] sm:$0xff] }
 0x506   :  { %6596 = vmatpush3.bf16.msra.mxu1 %v6595_v25  ;;  %v6610_v7 = vpack.c.bf16 %v5150_v60, %v5149_v32 }
 0x507   :  { %6597 = vmatprep.subr.bf16.mxu1 %v9750_v52 }
 0x50a   :  { %6599 = vmatpush3.bf16.msra.mxu1 %v6598_v47 }
 0x50b   :  { %6600 = vmatprep.subr.bf16.mxu1 %v9750_v52 }
 0x50e   :  { %6602 = vmatpush3.bf16.msra.mxu1 %v6601_v26 }
 0x50f   :  { %6603 = vmatprep.subr.bf16.mxu1 %v9750_v52 }
 0x524   :  { %v4597_v9 = vpop.f32.mrb[138].mxu1 }
 0x525   :  { %v4601_v46 = vadd.f32 %v4597_v9, %v4513_v5  ;;  %v6117_v51 = vpop.f32.mrb[139].mxu1  ;;  %v5156_v5 = vld [vmem:[%s9715_s7 + $0x58] sm:$0xff]  ;;  %v5157_v9 = vld [vmem:[%s9715_s7 + $0x60] sm:$0xff] }
 0x526   :  { %v6619_v13 = vpack.c.bf16 %v5156_v5, %v5155_v3 }
 0x544   :  { %v4685_v56 = vpop.f32.mrb[140].mxu1 }
 0x545   :  { %v4689_v55 = vadd.f32 %v4685_v56, %v4601_v46  ;;  %v6152_v57 = vpop.f32.mrb[141].mxu1  ;;  %v5158_v46 = vld [vmem:[%s9715_s7 + $0x68] sm:$0xff] }
 0x546   :  { %v6622_v51 = vpack.c.bf16 %v5158_v46, %v5157_v9 }
 0x564   :  { %v4773_v50 = vpop.f32.mrb[142].mxu1 }
 0x565   :  { %v4777_v53 = vadd.f32 %v4773_v50, %v4689_v55  ;;  %v6187_v16 = vpop.f32.mrb[143].mxu1 }
 0x584   :  { %v4861_v27 = vpop.f32.mrb[144].mxu1 }
 0x585   :  { %v4865_v58 = vadd.f32 %v4861_v27, %v4777_v53  ;;  %v6222_v59 = vpop.f32.mrb[145].mxu1 }
 0x5a4   :  { %v4949_v6 = vpop.f32.mrb[146].mxu1 }
 0x5a5   :  { %v4953_v61 = vadd.f32 %v4949_v6, %v4865_v58  ;;  %v6257_v38 = vpop.f32.mrb[147].mxu1 }
 0x5c4   :  { %v5037_v28 = vpop.f32.mrb[148].mxu1 }
 0x5c5   :  { %v5041_v30 = vadd.f32 %v5037_v28, %v4953_v61  ;;  %v6292_v36 = vpop.f32.mrb[149].mxu1 }
 0x5c7   :  { %v5049_v40 = vadd.f32 %v5788_v11, %v5041_v30 }
 0x5c9   :  { %v5050_v10 = vmax.f32 %v5049_v40, 0.0 }
 0x5cb   :  { %6326 = vmatmul.mubr.f32.vlgmr.msra.gmra.mrb[150].mxu1 %v5050_v10 }
 0x5cc   :  { %6605 = vmatpush3.bf16.msra.mxu1 %v6604_v54  ;;  %6360 = vmatprep.mubr.msk.f32.mxu1 %vm7231_vm0, %v7232_v20  ;;  %v5152_v20 = vld [vmem:[%s9715_s7 + $0x38] sm:$0xff] }
 0x5cd   :  { %6606 = vmatprep.subr.bf16.mxu1 %v9750_v52  ;;  %v6613_v1 = vpack.c.bf16 %v5152_v20, %v5151_v12 }
 0x5d0   :  { %6608 = vmatpush3.bf16.msra.mxu1 %v6607_v18 }
 0x5d1   :  { %6609 = vmatprep.subr.bf16.mxu1 %v9750_v52 }
 0x5d4   :  { %6611 = vmatpush3.bf16.msra.mxu1 %v6610_v7 }
 0x5d5   :  { %6612 = vmatprep.subr.bf16.mxu1 %v9750_v52 }
 0x5d8   :  { %6614 = vmatpush3.bf16.msra.mxu1 %v6613_v1 }
 0x5d9   :  { %6615 = vmatprep.subr.bf16.mxu1 %v9750_v52 }
 0x5dc   :  { %6617 = vmatpush3.bf16.msra.mxu1 %v6616_v39 }
 0x5dd   :  { %6618 = vmatprep.subr.bf16.mxu1 %v9750_v52 }
 0x5e0   :  { %6620 = vmatpush3.bf16.msra.mxu1 %v6619_v13 }
 0x5e1   :  { %6621 = vmatprep.subr.bf16.mxu1 %v9750_v52 }
 0x5e4   :  { %6623 = vmatpush3.bf16.msra.mxu1 %v6622_v51 }
 0x5e5   :  { %6624 = vmatprep.subr.bf16.mxu1 %v9750_v52  ;;  %v5790_v52 = vld [vmem:[%s9717_s8] ss:$0 sm:$0xff] }
 0x5e8   :  { %6626 = vmatpush3.bf16.msra.mxu1 %v6625_v23 }
 0x69e   :  { %v5140_v14 = vpop.f32.mrb[150].mxu1 }
 0x69f   :  { %v5141_v17 = vadd.f32 %v5789_v62, %v5140_v14  ;;  %v6327_v29 = vpop.f32.mrb[151].mxu1 }
 0x6a1   :  { %v5144_v31 = vmax.f32 %v5141_v17, 0.0 }
 0x6a3   :  { %6361 = vmatmul.mubr.f32.vlgmr.msra.gmra.mrb[152].mxu1 %v5144_v31 }
 0x776   :  { %v5234_v45 = vpop.f32.mrb[152].mxu1 }
 0x777   :  { %v5235_v43 = vadd.f32 %v5790_v52, %v5234_v45  ;;  %v6362_v44 = vpop.f32.mrb[153].mxu1 }
 0x779   :  { %5238 = vst [vmem:[%s9718_s9] sm:$0xff] %v5235_v43 }

</bundles_post_ra>
